<compile_context>
chip_gen: v7x
topology: tpu7x:2x2x1
jax: 0.10.0
libtpu: 0.0.40
codegen_flags: <defaults>
</compile_context>

<pallas_src>
import math
import functools

import jax
import jax.numpy as jnp
from jax import lax
from jax.experimental import pallas as pl
from jax.experimental.pallas import tpu as pltpu


def _round_up(x, m):
    return (x + m - 1) // m * m


def _gru_kernel(x_ref, lens_ref, wih_ref, whh_ref, bias_ref, bhn_ref,
                out_ref, hlast_ref, *, ts, hp):
    """One grid step == TS timesteps of the GRU for all (padded) batch rows.

    x_ref    : [TS, Bp, Ep]  bf16 embedded inputs for this time chunk
    lens_ref : [Bp, 1]       int32 valid sequence length per batch row
    wih_ref  : [Ep, 3*Hp]    bf16 fused input-hidden weights (r|z|n)
    whh_ref  : [Hp, 3*Hp]    bf16 fused hidden-hidden weights (r|z|n)
    bias_ref : [1, 3*Hp]     f32 fused bias (b_ir+b_hr | b_iz+b_hz | b_in)
    bhn_ref  : [1, Hp]       f32 b_hn (stays inside the r*(.) term)
    out_ref  : [TS, Bp, Hp]  f32 GRU outputs (zero past seq_len)
    hlast_ref: [Bp, Hp]      f32 carried hidden state; constant out_spec index
                             keeps it grid-resident, so it doubles as the
                             final hidden-state output.
    """
    c = pl.program_id(0)

    @pl.when(c == 0)
    def _():
        hlast_ref[...] = jnp.zeros(hlast_ref.shape, hlast_ref.dtype)

    _, bp, ep = x_ref.shape

    # Hoisted input projection for the whole chunk: one large MXU matmul
    # [TS*Bp, Ep] x [Ep, 3Hp] (bf16 operands, f32 accumulation), fused bias
    # folded in. gx stays in values (no explicit VMEM round trip).
    x2d = x_ref[...].reshape(ts * bp, ep)
    gx = jnp.dot(x2d, wih_ref[...], preferred_element_type=jnp.float32)
    gx = (gx + bias_ref[...]).reshape(ts, bp, 3 * hp)

    # Loop invariants hoisted off the serial recurrence.
    whh = whh_ref[...]
    bhn = bhn_ref[...]                                     # [1, Hp]
    lens = lens_ref[...]                                   # [Bp, 1]
    t0 = c * ts
    step_ids = t0 + lax.broadcasted_iota(jnp.int32, (bp, ts), 1)
    valid_all = step_ids < lens                            # [Bp, TS] bool

    h = hlast_ref[...]
    for s in range(ts):                                    # static unroll
        # Serial path: a single fused hidden matmul [Bp, Hp] x [Hp, 3Hp].
        gh = jnp.dot(h.astype(whh.dtype), whh,
                     preferred_element_type=jnp.float32)
        gxs = gx[s]                                        # static slice
        # PyTorch GRU gate order: r (reset), z (update), n (new).
        r = jax.nn.sigmoid(gxs[:, 0 * hp:1 * hp] + gh[:, 0 * hp:1 * hp])
        z = jax.nn.sigmoid(gxs[:, 1 * hp:2 * hp] + gh[:, 1 * hp:2 * hp])
        n = jnp.tanh(gxs[:, 2 * hp:3 * hp] + r * (gh[:, 2 * hp:3 * hp] + bhn))
        h_new = (1.0 - z) * n + z * h
        # Packed-sequence semantics: rows with length <= t keep their hidden
        # state and emit zero-padded output (matches pad_packed_sequence).
        valid = valid_all[:, s:s + 1]                      # [Bp, 1] bool
        h = jnp.where(valid, h_new, h)
        out_ref[s] = jnp.where(valid, h, 0.0)

    hlast_ref[...] = h


def init_params(key, vocab_size, embedding_size, hidden_size):
    """PyTorch-layout parameters (gate order r, z, n stacked along dim 0)."""
    k_emb, k_wih, k_whh, k_bih, k_bhh = jax.random.split(key, 5)
    bound = 1.0 / math.sqrt(hidden_size)
    return {
        "embedding": jax.random.normal(
            k_emb, (vocab_size, embedding_size), jnp.float32),
        "w_ih": jax.random.uniform(
            k_wih, (3 * hidden_size, embedding_size), jnp.float32, -bound, bound),
        "w_hh": jax.random.uniform(
            k_whh, (3 * hidden_size, hidden_size), jnp.float32, -bound, bound),
        "b_ih": jax.random.uniform(
            k_bih, (3 * hidden_size,), jnp.float32, -bound, bound),
        "b_hh": jax.random.uniform(
            k_bhh, (3 * hidden_size,), jnp.float32, -bound, bound),
    }


def prepare_params(params, hidden_size):
    """Convert PyTorch-layout params to the fused / lane-padded kernel layout."""
    emb = params["embedding"]
    _, e = emb.shape
    h = hidden_size
    ep = _round_up(e, 128)
    hp = _round_up(h, 128)

    emb_p = jnp.zeros((emb.shape[0], ep), jnp.bfloat16)
    emb_p = emb_p.at[:, :e].set(emb.astype(jnp.bfloat16))

    def fuse_w(w, in_dim, in_dim_p):
        # w: [3H, in_dim] (r, z, n) -> [in_dim_p, 3*Hp] bf16, zero padding.
        out = jnp.zeros((in_dim_p, 3 * hp), jnp.float32)
        for g in range(3):
            out = out.at[:in_dim, g * hp:g * hp + h].set(
                w[g * h:(g + 1) * h, :].T)
        return out.astype(jnp.bfloat16)

    b_ih, b_hh = params["b_ih"], params["b_hh"]
    # b_hr / b_hz commute with the pre-activation adds, so fold them into the
    # chunk-level (off-serial-path) fused bias; b_hn must stay inside r*(...).
    bias = jnp.zeros((1, 3 * hp), jnp.float32)
    bias = bias.at[0, 0 * hp:0 * hp + h].set(b_ih[0 * h:1 * h] + b_hh[0 * h:1 * h])
    bias = bias.at[0, 1 * hp:1 * hp + h].set(b_ih[1 * h:2 * h] + b_hh[1 * h:2 * h])
    bias = bias.at[0, 2 * hp:2 * hp + h].set(b_ih[2 * h:3 * h])
    b_hn = jnp.zeros((1, hp), jnp.float32).at[0, :h].set(b_hh[2 * h:3 * h])

    return {
        "embedding": emb_p,
        "w_ih": fuse_w(params["w_ih"], e, ep),
        "w_hh": fuse_w(params["w_hh"], h, hp),
        "bias": bias,
        "b_hn": b_hn,
        "H": h, "Hp": hp, "E": e, "Ep": ep,
    }


def _gru_pallas_call(ts, Tp, Bp, Ep, Hp, single_buffer_constants):
    # Constant-index blocks never change across the grid: single-buffer them
    # to halve their VMEM footprint (the fused weights dominate at real H).
    const_kw = (dict(pipeline_mode=pl.Buffered(1))
                if single_buffer_constants else {})
    kernel = functools.partial(_gru_kernel, ts=ts, hp=Hp)
    return pl.pallas_call(
        kernel,
        out_shape=(
            jax.ShapeDtypeStruct((Tp, Bp, Hp), jnp.float32),
            jax.ShapeDtypeStruct((Bp, Hp), jnp.float32),
        ),
        grid_spec=pltpu.PrefetchScalarGridSpec(
            num_scalar_prefetch=0,
            grid=(Tp // ts,),
            in_specs=[
                pl.BlockSpec((ts, Bp, Ep), lambda c: (c, 0, 0)),           # x chunk
                pl.BlockSpec((Bp, 1), lambda c: (0, 0), **const_kw),       # lengths
                pl.BlockSpec((Ep, 3 * Hp), lambda c: (0, 0), **const_kw),  # W_ih fused
                pl.BlockSpec((Hp, 3 * Hp), lambda c: (0, 0), **const_kw),  # W_hh fused
                pl.BlockSpec((1, 3 * Hp), lambda c: (0, 0), **const_kw),   # fused bias
                pl.BlockSpec((1, Hp), lambda c: (0, 0), **const_kw),       # b_hn
            ],
            out_specs=[
                pl.BlockSpec((ts, Bp, Hp), lambda c: (c, 0, 0)),   # outputs
                pl.BlockSpec((Bp, Hp), lambda c: (0, 0)),          # last hidden
            ],
        ),
        compiler_params=pltpu.CompilerParams(
            dimension_semantics=("arbitrary",),        # time recurrence: serial
            vmem_limit_bytes=32 * 1024 * 1024,         # valid on v5e/v6e/v7x
        ),
    )


def encoder_rnn_forward(input_wv, seq_len, kparams, ts=16,
                        single_buffer_constants=True):
    """input_wv: [B, T] int32 token ids; seq_len: [B] int32 (descending).

    ts=16 fills the v5e MXU M dim (TS*Bp=128 at Bp=8); use ts=32 on v6e/v7x
    to fill their 256-wide MXU when T is large enough.
    """
    B, T = input_wv.shape
    H, Hp, Ep = kparams["H"], kparams["Hp"], kparams["Ep"]
    Bp = _round_up(B, 8)          # fill sublanes
    Tp = _round_up(T, ts)         # whole chunks

    # Time-major embedding gather: transpose the cheap int32 id matrix, not
    # the f32 activation tensor. Dropout(p=0) in eval mode is the identity.
    x = kparams["embedding"][input_wv.T]                     # [T, B, Ep] bf16
    x = jnp.pad(x, ((0, Tp - T), (0, Bp - B), (0, 0)))
    lens = jnp.pad(seq_len.astype(jnp.int32), (0, Bp - B)).reshape(Bp, 1)

    call = _gru_pallas_call(ts, Tp, Bp, Ep, Hp, single_buffer_constants)
    out_tm, h_last = call(x, lens, kparams["w_ih"], kparams["w_hh"],
                          kparams["bias"], kparams["b_hn"])

    # Kernel stores stay time-major / lane-dense; the batch-first transpose is
    # wrapper-side only (for spec parity with batch_first=True).
    encoding_output = jnp.transpose(out_tm[:T, :B, :H], (1, 0, 2))  # [B, T, H]
    last_hidden = h_last[None, :B, :H]                              # [1, B, H]
    return encoding_output, last_hidden


if __name__ == "__main__":
    vocab_size, embedding_size, hidden_size = 50, 32, 32
    B, T = 2, 8

    key = jax.random.PRNGKey(0)
    k_params, k_ids = jax.random.split(key)
    params = init_params(k_params, vocab_size, embedding_size, hidden_size)
    kparams = prepare_params(params, hidden_size)

    input_wv = jax.random.randint(k_ids, (B, T), 0, vocab_size, dtype=jnp.int32)
    # pack_padded_sequence requires descending lengths; max length == T.
    seq_len = jnp.array([T, 5], dtype=jnp.int32)

    try:
        encoding_output, last_hidden = encoder_rnn_forward(
            input_wv, seq_len, kparams, single_buffer_constants=True)
        jax.block_until_ready((encoding_output, last_hidden))
    except Exception:
        # pipeline_mode=pl.Buffered(1) unsupported on this jax build: fall
        # back to default double-buffered constant blocks.
        encoding_output, last_hidden = encoder_rnn_forward(
            input_wv, seq_len, kparams, single_buffer_constants=False)
        jax.block_until_ready((encoding_output, last_hidden))

    assert encoding_output.shape == (B, T, hidden_size)
    assert last_hidden.shape == (1, B, hidden_size)

    # Packed-sequence consistency checks (exact by construction): outputs past
    # each row's length are zero and last_hidden equals out[:, seq_len-1].
    assert float(jnp.abs(encoding_output[1, 5:, :]).max()) == 0.0
    assert float(jnp.abs(last_hidden[0, 1] - encoding_output[1, 4]).max()) == 0.0
    assert float(jnp.abs(last_hidden[0, 0] - encoding_output[0, 7]).max()) == 0.0

    print("KERNEL_OK")
</pallas_src>

<mosaic_0001>
module attributes {stable_mosaic.version = 11 : i64} {
  func.func @_gru_kernel(%arg0: i32, %arg1: memref<16x8x128xbf16, #tpu.memory_space<vmem>>, %arg2: memref<8x1xi32, #tpu.memory_space<vmem>>, %arg3: memref<128x384xbf16, #tpu.memory_space<vmem>>, %arg4: memref<128x384xbf16, #tpu.memory_space<vmem>>, %arg5: memref<1x384xf32, #tpu.memory_space<vmem>>, %arg6: memref<1x128xf32, #tpu.memory_space<vmem>>, %arg7: memref<16x8x128xf32, #tpu.memory_space<vmem>>, %arg8: memref<8x128xf32, #tpu.memory_space<vmem>>) attributes {dimension_semantics = [#tpu.dimension_semantics<arbitrary>], iteration_bounds = array<i64: 1>, scalar_prefetch = 0 : i64, scratch_operands = 0 : i64, tpu.core_type = #tpu.core_type<tc>, window_params = [{transform_indices = @transform_0, window_bounds = array<i64: 16, 8, 128>}, {pipeline_mode = #tpu.pipeline_mode<synchronous>, transform_indices = @transform_1, window_bounds = array<i64: 8, 1>}, {pipeline_mode = #tpu.pipeline_mode<synchronous>, transform_indices = @transform_2, window_bounds = array<i64: 128, 384>}, {pipeline_mode = #tpu.pipeline_mode<synchronous>, transform_indices = @transform_3, window_bounds = array<i64: 128, 384>}, {pipeline_mode = #tpu.pipeline_mode<synchronous>, transform_indices = @transform_4, window_bounds = array<i64: 1, 384>}, {pipeline_mode = #tpu.pipeline_mode<synchronous>, transform_indices = @transform_5, window_bounds = array<i64: 1, 128>}, {transform_indices = @transform_6, window_bounds = array<i64: 16, 8, 128>}, {pipeline_mode = #tpu.pipeline_mode<synchronous>, transform_indices = @transform_7, window_bounds = array<i64: 8, 128>}]} {
    %c0_i32 = arith.constant 0 : i32
    %0 = arith.cmpi eq, %arg0, %c0_i32 : i32
    %1 = arith.extui %0 : i1 to i32
    %c0_i32_0 = arith.constant 0 : i32
    %2 = arith.cmpi ne, %1, %c0_i32_0 : i32
    scf.if %2 {
      %cst_130 = arith.constant 0.000000e+00 : f32
      %710 = vector.broadcast %cst_130 : f32 to vector<8x128xf32>
      %c0_131 = arith.constant 0 : index
      %c0_132 = arith.constant 0 : index
      %711 = vector.load %arg8[%c0_131, %c0_132] : memref<8x128xf32, #tpu.memory_space<vmem>>, vector<8x128xf32>
      tpu.vector_store %arg8[%c0_131, %c0_132], %710 {strides = array<i32>} : memref<8x128xf32, #tpu.memory_space<vmem>>, vector<8x128xf32>,
    } else {
    }
    %c0 = arith.constant 0 : index
    %c0_1 = arith.constant 0 : index
    %c0_2 = arith.constant 0 : index
    %3 = vector.load %arg1[%c0, %c0_1, %c0_2] : memref<16x8x128xbf16, #tpu.memory_space<vmem>>, vector<16x8x128xbf16>
    %4 = vector.shape_cast %3 : vector<16x8x128xbf16> to vector<128x128xbf16>
    %c0_3 = arith.constant 0 : index
    %c0_4 = arith.constant 0 : index
    %5 = vector.load %arg3[%c0_3, %c0_4] : memref<128x384xbf16, #tpu.memory_space<vmem>>, vector<128x384xbf16>
    %cst = arith.constant dense<0.000000e+00> : vector<128x384xf32>
    %6 = tpu.matmul %4, %5, %cst {dimension_numbers = #tpu.dot_dimension_numbers<[1], [0], [0], [1], [0, 0, 1, 1], [], []>} : vector<128x128xbf16>, vector<128x384xbf16>, vector<128x384xf32> -> vector<128x384xf32>
    %c0_5 = arith.constant 0 : index
    %c0_6 = arith.constant 0 : index
    %7 = vector.load %arg5[%c0_5, %c0_6] : memref<1x384xf32, #tpu.memory_space<vmem>>, vector<1x384xf32>
    %8 = vector.broadcast %7 : vector<1x384xf32> to vector<128x384xf32>
    %9 = arith.addf %6, %8 : vector<128x384xf32>
    %10 = vector.shape_cast %9 : vector<128x384xf32> to vector<16x8x384xf32>
    %c0_7 = arith.constant 0 : index
    %c0_8 = arith.constant 0 : index
    %11 = vector.load %arg4[%c0_7, %c0_8] : memref<128x384xbf16, #tpu.memory_space<vmem>>, vector<128x384xbf16>
    %c0_9 = arith.constant 0 : index
    %c0_10 = arith.constant 0 : index
    %12 = vector.load %arg6[%c0_9, %c0_10] : memref<1x128xf32, #tpu.memory_space<vmem>>, vector<1x128xf32>
    %c0_11 = arith.constant 0 : index
    %c0_12 = arith.constant 0 : index
    %13 = vector.load %arg2[%c0_11, %c0_12] : memref<8x1xi32, #tpu.memory_space<vmem>>, vector<8x1xi32>
    %c16_i32 = arith.constant 16 : i32
    %14 = arith.muli %arg0, %c16_i32 : i32
    %15 = tpu.iota {dimensions = array<i32: 1>} : vector<8x16xi32>
    %16 = vector.broadcast %14 : i32 to vector<8x16xi32>
    %17 = arith.addi %16, %15 : vector<8x16xi32>
    %18 = vector.broadcast %13 : vector<8x1xi32> to vector<8x16xi32>
    %19 = arith.cmpi slt, %17, %18 : vector<8x16xi32>
    %c0_13 = arith.constant 0 : index
    %c0_14 = arith.constant 0 : index
    %20 = vector.load %arg8[%c0_13, %c0_14] : memref<8x128xf32, #tpu.memory_space<vmem>>, vector<8x128xf32>
    %21 = arith.truncf %20 : vector<8x128xf32> to vector<8x128xbf16>
    %cst_15 = arith.constant dense<0.000000e+00> : vector<8x384xf32>
    %22 = tpu.matmul %21, %11, %cst_15 {dimension_numbers = #tpu.dot_dimension_numbers<[1], [0], [0], [1], [0, 0, 1, 1], [], []>} : vector<8x128xbf16>, vector<128x384xbf16>, vector<8x384xf32> -> vector<8x384xf32>
    %23 = vector.extract_strided_slice %10 {offsets = [0, 0, 0], sizes = [1, 8, 384], strides = [1, 1, 1]} : vector<16x8x384xf32> to vector<1x8x384xf32>
    %24 = vector.shape_cast %23 : vector<1x8x384xf32> to vector<8x384xf32>
    %25 = vector.extract_strided_slice %24 {offsets = [0, 0], sizes = [8, 128], strides = [1, 1]} : vector<8x384xf32> to vector<8x128xf32>
    %26 = vector.extract_strided_slice %22 {offsets = [0, 0], sizes = [8, 128], strides = [1, 1]} : vector<8x384xf32> to vector<8x128xf32>
    %27 = arith.addf %25, %26 : vector<8x128xf32>
    %28 = arith.negf %27 : vector<8x128xf32>
    %29 = math.exp %28 : vector<8x128xf32>
    %cst_16 = arith.constant 1.000000e+00 : f32
    %30 = vector.broadcast %cst_16 : f32 to vector<8x128xf32>
    %31 = arith.addf %30, %29 : vector<8x128xf32>
    %32 = arith.divf %30, %31 : vector<8x128xf32>
    %33 = vector.extract_strided_slice %24 {offsets = [0, 128], sizes = [8, 128], strides = [1, 1]} : vector<8x384xf32> to vector<8x128xf32>
    %34 = vector.extract_strided_slice %22 {offsets = [0, 128], sizes = [8, 128], strides = [1, 1]} : vector<8x384xf32> to vector<8x128xf32>
    %35 = arith.addf %33, %34 : vector<8x128xf32>
    %36 = arith.negf %35 : vector<8x128xf32>
    %37 = math.exp %36 : vector<8x128xf32>
    %cst_17 = arith.constant 1.000000e+00 : f32
    %38 = vector.broadcast %cst_17 : f32 to vector<8x128xf32>
    %39 = arith.addf %38, %37 : vector<8x128xf32>
    %40 = arith.divf %38, %39 : vector<8x128xf32>
    %41 = vector.extract_strided_slice %24 {offsets = [0, 256], sizes = [8, 128], strides = [1, 1]} : vector<8x384xf32> to vector<8x128xf32>
    %42 = vector.extract_strided_slice %22 {offsets = [0, 256], sizes = [8, 128], strides = [1, 1]} : vector<8x384xf32> to vector<8x128xf32>
    %43 = vector.broadcast %12 : vector<1x128xf32> to vector<8x128xf32>
    %44 = arith.addf %42, %43 : vector<8x128xf32>
    %45 = arith.mulf %32, %44 : vector<8x128xf32>
    %46 = arith.addf %41, %45 : vector<8x128xf32>
    %47 = math.tanh %46 : vector<8x128xf32>
    %cst_18 = arith.constant 1.000000e+00 : f32
    %48 = vector.broadcast %cst_18 : f32 to vector<8x128xf32>
    %49 = arith.subf %48, %40 : vector<8x128xf32>
    %50 = arith.mulf %49, %47 : vector<8x128xf32>
    %51 = arith.mulf %40, %20 : vector<8x128xf32>
    %52 = arith.addf %50, %51 : vector<8x128xf32>
    %53 = vector.extract_strided_slice %19 {offsets = [0, 0], sizes = [8, 1], strides = [1, 1]} : vector<8x16xi1> to vector<8x1xi1>
    %54 = vector.shape_cast %53 : vector<8x1xi1> to vector<8x1xi1>
    %55 = vector.broadcast %54 : vector<8x1xi1> to vector<8x128xi1>
    %56 = arith.select %55, %52, %20 : vector<8x128xi1>, vector<8x128xf32>
    %cst_19 = arith.constant 0.000000e+00 : f32
    %57 = vector.shape_cast %53 : vector<8x1xi1> to vector<8x1xi1>
    %58 = vector.broadcast %57 : vector<8x1xi1> to vector<8x128xi1>
    %59 = vector.broadcast %cst_19 : f32 to vector<8x128xf32>
    %60 = arith.select %58, %56, %59 : vector<8x128xi1>, vector<8x128xf32>
    %c0_20 = arith.constant 0 : index
    %c0_21 = arith.constant 0 : index
    %c0_22 = arith.constant 0 : index
    %61 = vector.load %arg7[%c0_20, %c0_21, %c0_22] : memref<16x8x128xf32, #tpu.memory_space<vmem>>, vector<1x8x128xf32>
    %62 = vector.shape_cast %61 : vector<1x8x128xf32> to vector<8x128xf32>
    %63 = vector.shape_cast %60 : vector<8x128xf32> to vector<1x8x128xf32>
    tpu.vector_store %arg7[%c0_20, %c0_21, %c0_22], %63 {strides = array<i32>} : memref<16x8x128xf32, #tpu.memory_space<vmem>>, vector<1x8x128xf32>,
    %64 = arith.truncf %56 : vector<8x128xf32> to vector<8x128xbf16>
    %cst_23 = arith.constant dense<0.000000e+00> : vector<8x384xf32>
    %65 = tpu.matmul %64, %11, %cst_23 {dimension_numbers = #tpu.dot_dimension_numbers<[1], [0], [0], [1], [0, 0, 1, 1], [], []>} : vector<8x128xbf16>, vector<128x384xbf16>, vector<8x384xf32> -> vector<8x384xf32>
    %66 = vector.extract_strided_slice %10 {offsets = [1, 0, 0], sizes = [1, 8, 384], strides = [1, 1, 1]} : vector<16x8x384xf32> to vector<1x8x384xf32>
    %67 = vector.shape_cast %66 : vector<1x8x384xf32> to vector<8x384xf32>
    %68 = vector.extract_strided_slice %67 {offsets = [0, 0], sizes = [8, 128], strides = [1, 1]} : vector<8x384xf32> to vector<8x128xf32>
    %69 = vector.extract_strided_slice %65 {offsets = [0, 0], sizes = [8, 128], strides = [1, 1]} : vector<8x384xf32> to vector<8x128xf32>
    %70 = arith.addf %68, %69 : vector<8x128xf32>
    %71 = arith.negf %70 : vector<8x128xf32>
    %72 = math.exp %71 : vector<8x128xf32>
    %cst_24 = arith.constant 1.000000e+00 : f32
    %73 = vector.broadcast %cst_24 : f32 to vector<8x128xf32>
    %74 = arith.addf %73, %72 : vector<8x128xf32>
    %75 = arith.divf %73, %74 : vector<8x128xf32>
    %76 = vector.extract_strided_slice %67 {offsets = [0, 128], sizes = [8, 128], strides = [1, 1]} : vector<8x384xf32> to vector<8x128xf32>
    %77 = vector.extract_strided_slice %65 {offsets = [0, 128], sizes = [8, 128], strides = [1, 1]} : vector<8x384xf32> to vector<8x128xf32>
    %78 = arith.addf %76, %77 : vector<8x128xf32>
    %79 = arith.negf %78 : vector<8x128xf32>
    %80 = math.exp %79 : vector<8x128xf32>
    %cst_25 = arith.constant 1.000000e+00 : f32
    %81 = vector.broadcast %cst_25 : f32 to vector<8x128xf32>
    %82 = arith.addf %81, %80 : vector<8x128xf32>
    %83 = arith.divf %81, %82 : vector<8x128xf32>
    %84 = vector.extract_strided_slice %67 {offsets = [0, 256], sizes = [8, 128], strides = [1, 1]} : vector<8x384xf32> to vector<8x128xf32>
    %85 = vector.extract_strided_slice %65 {offsets = [0, 256], sizes = [8, 128], strides = [1, 1]} : vector<8x384xf32> to vector<8x128xf32>
    %86 = vector.broadcast %12 : vector<1x128xf32> to vector<8x128xf32>
    %87 = arith.addf %85, %86 : vector<8x128xf32>
    %88 = arith.mulf %75, %87 : vector<8x128xf32>
    %89 = arith.addf %84, %88 : vector<8x128xf32>
    %90 = math.tanh %89 : vector<8x128xf32>
    %cst_26 = arith.constant 1.000000e+00 : f32
    %91 = vector.broadcast %cst_26 : f32 to vector<8x128xf32>
    %92 = arith.subf %91, %83 : vector<8x128xf32>
    %93 = arith.mulf %92, %90 : vector<8x128xf32>
    %94 = arith.mulf %83, %56 : vector<8x128xf32>
    %95 = arith.addf %93, %94 : vector<8x128xf32>
    %96 = vector.extract_strided_slice %19 {offsets = [0, 1], sizes = [8, 1], strides = [1, 1]} : vector<8x16xi1> to vector<8x1xi1>
    %97 = vector.shape_cast %96 : vector<8x1xi1> to vector<8x1xi1>
    %98 = vector.broadcast %97 : vector<8x1xi1> to vector<8x128xi1>
    %99 = arith.select %98, %95, %56 : vector<8x128xi1>, vector<8x128xf32>
    %cst_27 = arith.constant 0.000000e+00 : f32
    %100 = vector.shape_cast %96 : vector<8x1xi1> to vector<8x1xi1>
    %101 = vector.broadcast %100 : vector<8x1xi1> to vector<8x128xi1>
    %102 = vector.broadcast %cst_27 : f32 to vector<8x128xf32>
    %103 = arith.select %101, %99, %102 : vector<8x128xi1>, vector<8x128xf32>
    %c1 = arith.constant 1 : index
    %c0_28 = arith.constant 0 : index
    %c0_29 = arith.constant 0 : index
    %104 = vector.load %arg7[%c1, %c0_28, %c0_29] : memref<16x8x128xf32, #tpu.memory_space<vmem>>, vector<1x8x128xf32>
    %105 = vector.shape_cast %104 : vector<1x8x128xf32> to vector<8x128xf32>
    %106 = vector.shape_cast %103 : vector<8x128xf32> to vector<1x8x128xf32>
    tpu.vector_store %arg7[%c1, %c0_28, %c0_29], %106 {strides = array<i32>} : memref<16x8x128xf32, #tpu.memory_space<vmem>>, vector<1x8x128xf32>,
    %107 = arith.truncf %99 : vector<8x128xf32> to vector<8x128xbf16>
    %cst_30 = arith.constant dense<0.000000e+00> : vector<8x384xf32>
    %108 = tpu.matmul %107, %11, %cst_30 {dimension_numbers = #tpu.dot_dimension_numbers<[1], [0], [0], [1], [0, 0, 1, 1], [], []>} : vector<8x128xbf16>, vector<128x384xbf16>, vector<8x384xf32> -> vector<8x384xf32>
    %109 = vector.extract_strided_slice %10 {offsets = [2, 0, 0], sizes = [1, 8, 384], strides = [1, 1, 1]} : vector<16x8x384xf32> to vector<1x8x384xf32>
    %110 = vector.shape_cast %109 : vector<1x8x384xf32> to vector<8x384xf32>
    %111 = vector.extract_strided_slice %110 {offsets = [0, 0], sizes = [8, 128], strides = [1, 1]} : vector<8x384xf32> to vector<8x128xf32>
    %112 = vector.extract_strided_slice %108 {offsets = [0, 0], sizes = [8, 128], strides = [1, 1]} : vector<8x384xf32> to vector<8x128xf32>
    %113 = arith.addf %111, %112 : vector<8x128xf32>
    %114 = arith.negf %113 : vector<8x128xf32>
    %115 = math.exp %114 : vector<8x128xf32>
    %cst_31 = arith.constant 1.000000e+00 : f32
    %116 = vector.broadcast %cst_31 : f32 to vector<8x128xf32>
    %117 = arith.addf %116, %115 : vector<8x128xf32>
    %118 = arith.divf %116, %117 : vector<8x128xf32>
    %119 = vector.extract_strided_slice %110 {offsets = [0, 128], sizes = [8, 128], strides = [1, 1]} : vector<8x384xf32> to vector<8x128xf32>
    %120 = vector.extract_strided_slice %108 {offsets = [0, 128], sizes = [8, 128], strides = [1, 1]} : vector<8x384xf32> to vector<8x128xf32>
    %121 = arith.addf %119, %120 : vector<8x128xf32>
    %122 = arith.negf %121 : vector<8x128xf32>
    %123 = math.exp %122 : vector<8x128xf32>
    %cst_32 = arith.constant 1.000000e+00 : f32
    %124 = vector.broadcast %cst_32 : f32 to vector<8x128xf32>
    %125 = arith.addf %124, %123 : vector<8x128xf32>
    %126 = arith.divf %124, %125 : vector<8x128xf32>
    %127 = vector.extract_strided_slice %110 {offsets = [0, 256], sizes = [8, 128], strides = [1, 1]} : vector<8x384xf32> to vector<8x128xf32>
    %128 = vector.extract_strided_slice %108 {offsets = [0, 256], sizes = [8, 128], strides = [1, 1]} : vector<8x384xf32> to vector<8x128xf32>
    %129 = vector.broadcast %12 : vector<1x128xf32> to vector<8x128xf32>
    %130 = arith.addf %128, %129 : vector<8x128xf32>
    %131 = arith.mulf %118, %130 : vector<8x128xf32>
    %132 = arith.addf %127, %131 : vector<8x128xf32>
    %133 = math.tanh %132 : vector<8x128xf32>
    %cst_33 = arith.constant 1.000000e+00 : f32
    %134 = vector.broadcast %cst_33 : f32 to vector<8x128xf32>
    %135 = arith.subf %134, %126 : vector<8x128xf32>
    %136 = arith.mulf %135, %133 : vector<8x128xf32>
    %137 = arith.mulf %126, %99 : vector<8x128xf32>
    %138 = arith.addf %136, %137 : vector<8x128xf32>
    %139 = vector.extract_strided_slice %19 {offsets = [0, 2], sizes = [8, 1], strides = [1, 1]} : vector<8x16xi1> to vector<8x1xi1>
    %140 = vector.shape_cast %139 : vector<8x1xi1> to vector<8x1xi1>
    %141 = vector.broadcast %140 : vector<8x1xi1> to vector<8x128xi1>
    %142 = arith.select %141, %138, %99 : vector<8x128xi1>, vector<8x128xf32>
    %cst_34 = arith.constant 0.000000e+00 : f32
    %143 = vector.shape_cast %139 : vector<8x1xi1> to vector<8x1xi1>
    %144 = vector.broadcast %143 : vector<8x1xi1> to vector<8x128xi1>
    %145 = vector.broadcast %cst_34 : f32 to vector<8x128xf32>
    %146 = arith.select %144, %142, %145 : vector<8x128xi1>, vector<8x128xf32>
    %c2 = arith.constant 2 : index
    %c0_35 = arith.constant 0 : index
    %c0_36 = arith.constant 0 : index
    %147 = vector.load %arg7[%c2, %c0_35, %c0_36] : memref<16x8x128xf32, #tpu.memory_space<vmem>>, vector<1x8x128xf32>
    %148 = vector.shape_cast %147 : vector<1x8x128xf32> to vector<8x128xf32>
    %149 = vector.shape_cast %146 : vector<8x128xf32> to vector<1x8x128xf32>
    tpu.vector_store %arg7[%c2, %c0_35, %c0_36], %149 {strides = array<i32>} : memref<16x8x128xf32, #tpu.memory_space<vmem>>, vector<1x8x128xf32>,
    %150 = arith.truncf %142 : vector<8x128xf32> to vector<8x128xbf16>
    %cst_37 = arith.constant dense<0.000000e+00> : vector<8x384xf32>
    %151 = tpu.matmul %150, %11, %cst_37 {dimension_numbers = #tpu.dot_dimension_numbers<[1], [0], [0], [1], [0, 0, 1, 1], [], []>} : vector<8x128xbf16>, vector<128x384xbf16>, vector<8x384xf32> -> vector<8x384xf32>
    %152 = vector.extract_strided_slice %10 {offsets = [3, 0, 0], sizes = [1, 8, 384], strides = [1, 1, 1]} : vector<16x8x384xf32> to vector<1x8x384xf32>
    %153 = vector.shape_cast %152 : vector<1x8x384xf32> to vector<8x384xf32>
    %154 = vector.extract_strided_slice %153 {offsets = [0, 0], sizes = [8, 128], strides = [1, 1]} : vector<8x384xf32> to vector<8x128xf32>
    %155 = vector.extract_strided_slice %151 {offsets = [0, 0], sizes = [8, 128], strides = [1, 1]} : vector<8x384xf32> to vector<8x128xf32>
    %156 = arith.addf %154, %155 : vector<8x128xf32>
    %157 = arith.negf %156 : vector<8x128xf32>
    %158 = math.exp %157 : vector<8x128xf32>
    %cst_38 = arith.constant 1.000000e+00 : f32
    %159 = vector.broadcast %cst_38 : f32 to vector<8x128xf32>
    %160 = arith.addf %159, %158 : vector<8x128xf32>
    %161 = arith.divf %159, %160 : vector<8x128xf32>
    %162 = vector.extract_strided_slice %153 {offsets = [0, 128], sizes = [8, 128], strides = [1, 1]} : vector<8x384xf32> to vector<8x128xf32>
    %163 = vector.extract_strided_slice %151 {offsets = [0, 128], sizes = [8, 128], strides = [1, 1]} : vector<8x384xf32> to vector<8x128xf32>
    %164 = arith.addf %162, %163 : vector<8x128xf32>
    %165 = arith.negf %164 : vector<8x128xf32>
    %166 = math.exp %165 : vector<8x128xf32>
    %cst_39 = arith.constant 1.000000e+00 : f32
    %167 = vector.broadcast %cst_39 : f32 to vector<8x128xf32>
    %168 = arith.addf %167, %166 : vector<8x128xf32>
    %169 = arith.divf %167, %168 : vector<8x128xf32>
    %170 = vector.extract_strided_slice %153 {offsets = [0, 256], sizes = [8, 128], strides = [1, 1]} : vector<8x384xf32> to vector<8x128xf32>
    %171 = vector.extract_strided_slice %151 {offsets = [0, 256], sizes = [8, 128], strides = [1, 1]} : vector<8x384xf32> to vector<8x128xf32>
    %172 = vector.broadcast %12 : vector<1x128xf32> to vector<8x128xf32>
    %173 = arith.addf %171, %172 : vector<8x128xf32>
    %174 = arith.mulf %161, %173 : vector<8x128xf32>
    %175 = arith.addf %170, %174 : vector<8x128xf32>
    %176 = math.tanh %175 : vector<8x128xf32>
    %cst_40 = arith.constant 1.000000e+00 : f32
    %177 = vector.broadcast %cst_40 : f32 to vector<8x128xf32>
    %178 = arith.subf %177, %169 : vector<8x128xf32>
    %179 = arith.mulf %178, %176 : vector<8x128xf32>
    %180 = arith.mulf %169, %142 : vector<8x128xf32>
    %181 = arith.addf %179, %180 : vector<8x128xf32>
    %182 = vector.extract_strided_slice %19 {offsets = [0, 3], sizes = [8, 1], strides = [1, 1]} : vector<8x16xi1> to vector<8x1xi1>
    %183 = vector.shape_cast %182 : vector<8x1xi1> to vector<8x1xi1>
    %184 = vector.broadcast %183 : vector<8x1xi1> to vector<8x128xi1>
    %185 = arith.select %184, %181, %142 : vector<8x128xi1>, vector<8x128xf32>
    %cst_41 = arith.constant 0.000000e+00 : f32
    %186 = vector.shape_cast %182 : vector<8x1xi1> to vector<8x1xi1>
    %187 = vector.broadcast %186 : vector<8x1xi1> to vector<8x128xi1>
    %188 = vector.broadcast %cst_41 : f32 to vector<8x128xf32>
    %189 = arith.select %187, %185, %188 : vector<8x128xi1>, vector<8x128xf32>
    %c3 = arith.constant 3 : index
    %c0_42 = arith.constant 0 : index
    %c0_43 = arith.constant 0 : index
    %190 = vector.load %arg7[%c3, %c0_42, %c0_43] : memref<16x8x128xf32, #tpu.memory_space<vmem>>, vector<1x8x128xf32>
    %191 = vector.shape_cast %190 : vector<1x8x128xf32> to vector<8x128xf32>
    %192 = vector.shape_cast %189 : vector<8x128xf32> to vector<1x8x128xf32>
    tpu.vector_store %arg7[%c3, %c0_42, %c0_43], %192 {strides = array<i32>} : memref<16x8x128xf32, #tpu.memory_space<vmem>>, vector<1x8x128xf32>,
    %193 = arith.truncf %185 : vector<8x128xf32> to vector<8x128xbf16>
    %cst_44 = arith.constant dense<0.000000e+00> : vector<8x384xf32>
    %194 = tpu.matmul %193, %11, %cst_44 {dimension_numbers = #tpu.dot_dimension_numbers<[1], [0], [0], [1], [0, 0, 1, 1], [], []>} : vector<8x128xbf16>, vector<128x384xbf16>, vector<8x384xf32> -> vector<8x384xf32>
    %195 = vector.extract_strided_slice %10 {offsets = [4, 0, 0], sizes = [1, 8, 384], strides = [1, 1, 1]} : vector<16x8x384xf32> to vector<1x8x384xf32>
    %196 = vector.shape_cast %195 : vector<1x8x384xf32> to vector<8x384xf32>
    %197 = vector.extract_strided_slice %196 {offsets = [0, 0], sizes = [8, 128], strides = [1, 1]} : vector<8x384xf32> to vector<8x128xf32>
    %198 = vector.extract_strided_slice %194 {offsets = [0, 0], sizes = [8, 128], strides = [1, 1]} : vector<8x384xf32> to vector<8x128xf32>
    %199 = arith.addf %197, %198 : vector<8x128xf32>
    %200 = arith.negf %199 : vector<8x128xf32>
    %201 = math.exp %200 : vector<8x128xf32>
    %cst_45 = arith.constant 1.000000e+00 : f32
    %202 = vector.broadcast %cst_45 : f32 to vector<8x128xf32>
    %203 = arith.addf %202, %201 : vector<8x128xf32>
    %204 = arith.divf %202, %203 : vector<8x128xf32>
    %205 = vector.extract_strided_slice %196 {offsets = [0, 128], sizes = [8, 128], strides = [1, 1]} : vector<8x384xf32> to vector<8x128xf32>
    %206 = vector.extract_strided_slice %194 {offsets = [0, 128], sizes = [8, 128], strides = [1, 1]} : vector<8x384xf32> to vector<8x128xf32>
    %207 = arith.addf %205, %206 : vector<8x128xf32>
    %208 = arith.negf %207 : vector<8x128xf32>
    %209 = math.exp %208 : vector<8x128xf32>
    %cst_46 = arith.constant 1.000000e+00 : f32
    %210 = vector.broadcast %cst_46 : f32 to vector<8x128xf32>
    %211 = arith.addf %210, %209 : vector<8x128xf32>
    %212 = arith.divf %210, %211 : vector<8x128xf32>
    %213 = vector.extract_strided_slice %196 {offsets = [0, 256], sizes = [8, 128], strides = [1, 1]} : vector<8x384xf32> to vector<8x128xf32>
    %214 = vector.extract_strided_slice %194 {offsets = [0, 256], sizes = [8, 128], strides = [1, 1]} : vector<8x384xf32> to vector<8x128xf32>
    %215 = vector.broadcast %12 : vector<1x128xf32> to vector<8x128xf32>
    %216 = arith.addf %214, %215 : vector<8x128xf32>
    %217 = arith.mulf %204, %216 : vector<8x128xf32>
    %218 = arith.addf %213, %217 : vector<8x128xf32>
    %219 = math.tanh %218 : vector<8x128xf32>
    %cst_47 = arith.constant 1.000000e+00 : f32
    %220 = vector.broadcast %cst_47 : f32 to vector<8x128xf32>
    %221 = arith.subf %220, %212 : vector<8x128xf32>
    %222 = arith.mulf %221, %219 : vector<8x128xf32>
    %223 = arith.mulf %212, %185 : vector<8x128xf32>
    %224 = arith.addf %222, %223 : vector<8x128xf32>
    %225 = vector.extract_strided_slice %19 {offsets = [0, 4], sizes = [8, 1], strides = [1, 1]} : vector<8x16xi1> to vector<8x1xi1>
    %226 = vector.shape_cast %225 : vector<8x1xi1> to vector<8x1xi1>
    %227 = vector.broadcast %226 : vector<8x1xi1> to vector<8x128xi1>
    %228 = arith.select %227, %224, %185 : vector<8x128xi1>, vector<8x128xf32>
    %cst_48 = arith.constant 0.000000e+00 : f32
    %229 = vector.shape_cast %225 : vector<8x1xi1> to vector<8x1xi1>
    %230 = vector.broadcast %229 : vector<8x1xi1> to vector<8x128xi1>
    %231 = vector.broadcast %cst_48 : f32 to vector<8x128xf32>
    %232 = arith.select %230, %228, %231 : vector<8x128xi1>, vector<8x128xf32>
    %c4 = arith.constant 4 : index
    %c0_49 = arith.constant 0 : index
    %c0_50 = arith.constant 0 : index
    %233 = vector.load %arg7[%c4, %c0_49, %c0_50] : memref<16x8x128xf32, #tpu.memory_space<vmem>>, vector<1x8x128xf32>
    %234 = vector.shape_cast %233 : vector<1x8x128xf32> to vector<8x128xf32>
    %235 = vector.shape_cast %232 : vector<8x128xf32> to vector<1x8x128xf32>
    tpu.vector_store %arg7[%c4, %c0_49, %c0_50], %235 {strides = array<i32>} : memref<16x8x128xf32, #tpu.memory_space<vmem>>, vector<1x8x128xf32>,
    %236 = arith.truncf %228 : vector<8x128xf32> to vector<8x128xbf16>
    %cst_51 = arith.constant dense<0.000000e+00> : vector<8x384xf32>
    %237 = tpu.matmul %236, %11, %cst_51 {dimension_numbers = #tpu.dot_dimension_numbers<[1], [0], [0], [1], [0, 0, 1, 1], [], []>} : vector<8x128xbf16>, vector<128x384xbf16>, vector<8x384xf32> -> vector<8x384xf32>
    %238 = vector.extract_strided_slice %10 {offsets = [5, 0, 0], sizes = [1, 8, 384], strides = [1, 1, 1]} : vector<16x8x384xf32> to vector<1x8x384xf32>
    %239 = vector.shape_cast %238 : vector<1x8x384xf32> to vector<8x384xf32>
    %240 = vector.extract_strided_slice %239 {offsets = [0, 0], sizes = [8, 128], strides = [1, 1]} : vector<8x384xf32> to vector<8x128xf32>
    %241 = vector.extract_strided_slice %237 {offsets = [0, 0], sizes = [8, 128], strides = [1, 1]} : vector<8x384xf32> to vector<8x128xf32>
    %242 = arith.addf %240, %241 : vector<8x128xf32>
    %243 = arith.negf %242 : vector<8x128xf32>
    %244 = math.exp %243 : vector<8x128xf32>
    %cst_52 = arith.constant 1.000000e+00 : f32
    %245 = vector.broadcast %cst_52 : f32 to vector<8x128xf32>
    %246 = arith.addf %245, %244 : vector<8x128xf32>
    %247 = arith.divf %245, %246 : vector<8x128xf32>
    %248 = vector.extract_strided_slice %239 {offsets = [0, 128], sizes = [8, 128], strides = [1, 1]} : vector<8x384xf32> to vector<8x128xf32>
    %249 = vector.extract_strided_slice %237 {offsets = [0, 128], sizes = [8, 128], strides = [1, 1]} : vector<8x384xf32> to vector<8x128xf32>
    %250 = arith.addf %248, %249 : vector<8x128xf32>
    %251 = arith.negf %250 : vector<8x128xf32>
    %252 = math.exp %251 : vector<8x128xf32>
    %cst_53 = arith.constant 1.000000e+00 : f32
    %253 = vector.broadcast %cst_53 : f32 to vector<8x128xf32>
    %254 = arith.addf %253, %252 : vector<8x128xf32>
    %255 = arith.divf %253, %254 : vector<8x128xf32>
    %256 = vector.extract_strided_slice %239 {offsets = [0, 256], sizes = [8, 128], strides = [1, 1]} : vector<8x384xf32> to vector<8x128xf32>
    %257 = vector.extract_strided_slice %237 {offsets = [0, 256], sizes = [8, 128], strides = [1, 1]} : vector<8x384xf32> to vector<8x128xf32>
    %258 = vector.broadcast %12 : vector<1x128xf32> to vector<8x128xf32>
    %259 = arith.addf %257, %258 : vector<8x128xf32>
    %260 = arith.mulf %247, %259 : vector<8x128xf32>
    %261 = arith.addf %256, %260 : vector<8x128xf32>
    %262 = math.tanh %261 : vector<8x128xf32>
    %cst_54 = arith.constant 1.000000e+00 : f32
    %263 = vector.broadcast %cst_54 : f32 to vector<8x128xf32>
    %264 = arith.subf %263, %255 : vector<8x128xf32>
    %265 = arith.mulf %264, %262 : vector<8x128xf32>
    %266 = arith.mulf %255, %228 : vector<8x128xf32>
    %267 = arith.addf %265, %266 : vector<8x128xf32>
    %268 = vector.extract_strided_slice %19 {offsets = [0, 5], sizes = [8, 1], strides = [1, 1]} : vector<8x16xi1> to vector<8x1xi1>
    %269 = vector.shape_cast %268 : vector<8x1xi1> to vector<8x1xi1>
    %270 = vector.broadcast %269 : vector<8x1xi1> to vector<8x128xi1>
    %271 = arith.select %270, %267, %228 : vector<8x128xi1>, vector<8x128xf32>
    %cst_55 = arith.constant 0.000000e+00 : f32
    %272 = vector.shape_cast %268 : vector<8x1xi1> to vector<8x1xi1>
    %273 = vector.broadcast %272 : vector<8x1xi1> to vector<8x128xi1>
    %274 = vector.broadcast %cst_55 : f32 to vector<8x128xf32>
    %275 = arith.select %273, %271, %274 : vector<8x128xi1>, vector<8x128xf32>
    %c5 = arith.constant 5 : index
    %c0_56 = arith.constant 0 : index
    %c0_57 = arith.constant 0 : index
    %276 = vector.load %arg7[%c5, %c0_56, %c0_57] : memref<16x8x128xf32, #tpu.memory_space<vmem>>, vector<1x8x128xf32>
    %277 = vector.shape_cast %276 : vector<1x8x128xf32> to vector<8x128xf32>
    %278 = vector.shape_cast %275 : vector<8x128xf32> to vector<1x8x128xf32>
    tpu.vector_store %arg7[%c5, %c0_56, %c0_57], %278 {strides = array<i32>} : memref<16x8x128xf32, #tpu.memory_space<vmem>>, vector<1x8x128xf32>,
    %279 = arith.truncf %271 : vector<8x128xf32> to vector<8x128xbf16>
    %cst_58 = arith.constant dense<0.000000e+00> : vector<8x384xf32>
    %280 = tpu.matmul %279, %11, %cst_58 {dimension_numbers = #tpu.dot_dimension_numbers<[1], [0], [0], [1], [0, 0, 1, 1], [], []>} : vector<8x128xbf16>, vector<128x384xbf16>, vector<8x384xf32> -> vector<8x384xf32>
    %281 = vector.extract_strided_slice %10 {offsets = [6, 0, 0], sizes = [1, 8, 384], strides = [1, 1, 1]} : vector<16x8x384xf32> to vector<1x8x384xf32>
    %282 = vector.shape_cast %281 : vector<1x8x384xf32> to vector<8x384xf32>
    %283 = vector.extract_strided_slice %282 {offsets = [0, 0], sizes = [8, 128], strides = [1, 1]} : vector<8x384xf32> to vector<8x128xf32>
    %284 = vector.extract_strided_slice %280 {offsets = [0, 0], sizes = [8, 128], strides = [1, 1]} : vector<8x384xf32> to vector<8x128xf32>
    %285 = arith.addf %283, %284 : vector<8x128xf32>
    %286 = arith.negf %285 : vector<8x128xf32>
    %287 = math.exp %286 : vector<8x128xf32>
    %cst_59 = arith.constant 1.000000e+00 : f32
    %288 = vector.broadcast %cst_59 : f32 to vector<8x128xf32>
    %289 = arith.addf %288, %287 : vector<8x128xf32>
    %290 = arith.divf %288, %289 : vector<8x128xf32>
    %291 = vector.extract_strided_slice %282 {offsets = [0, 128], sizes = [8, 128], strides = [1, 1]} : vector<8x384xf32> to vector<8x128xf32>
    %292 = vector.extract_strided_slice %280 {offsets = [0, 128], sizes = [8, 128], strides = [1, 1]} : vector<8x384xf32> to vector<8x128xf32>
    %293 = arith.addf %291, %292 : vector<8x128xf32>
    %294 = arith.negf %293 : vector<8x128xf32>
    %295 = math.exp %294 : vector<8x128xf32>
    %cst_60 = arith.constant 1.000000e+00 : f32
    %296 = vector.broadcast %cst_60 : f32 to vector<8x128xf32>
    %297 = arith.addf %296, %295 : vector<8x128xf32>
    %298 = arith.divf %296, %297 : vector<8x128xf32>
    %299 = vector.extract_strided_slice %282 {offsets = [0, 256], sizes = [8, 128], strides = [1, 1]} : vector<8x384xf32> to vector<8x128xf32>
    %300 = vector.extract_strided_slice %280 {offsets = [0, 256], sizes = [8, 128], strides = [1, 1]} : vector<8x384xf32> to vector<8x128xf32>
    %301 = vector.broadcast %12 : vector<1x128xf32> to vector<8x128xf32>
    %302 = arith.addf %300, %301 : vector<8x128xf32>
    %303 = arith.mulf %290, %302 : vector<8x128xf32>
    %304 = arith.addf %299, %303 : vector<8x128xf32>
    %305 = math.tanh %304 : vector<8x128xf32>
    %cst_61 = arith.constant 1.000000e+00 : f32
    %306 = vector.broadcast %cst_61 : f32 to vector<8x128xf32>
    %307 = arith.subf %306, %298 : vector<8x128xf32>
    %308 = arith.mulf %307, %305 : vector<8x128xf32>
    %309 = arith.mulf %298, %271 : vector<8x128xf32>
    %310 = arith.addf %308, %309 : vector<8x128xf32>
    %311 = vector.extract_strided_slice %19 {offsets = [0, 6], sizes = [8, 1], strides = [1, 1]} : vector<8x16xi1> to vector<8x1xi1>
    %312 = vector.shape_cast %311 : vector<8x1xi1> to vector<8x1xi1>
    %313 = vector.broadcast %312 : vector<8x1xi1> to vector<8x128xi1>
    %314 = arith.select %313, %310, %271 : vector<8x128xi1>, vector<8x128xf32>
    %cst_62 = arith.constant 0.000000e+00 : f32
    %315 = vector.shape_cast %311 : vector<8x1xi1> to vector<8x1xi1>
    %316 = vector.broadcast %315 : vector<8x1xi1> to vector<8x128xi1>
    %317 = vector.broadcast %cst_62 : f32 to vector<8x128xf32>
    %318 = arith.select %316, %314, %317 : vector<8x128xi1>, vector<8x128xf32>
    %c6 = arith.constant 6 : index
    %c0_63 = arith.constant 0 : index
    %c0_64 = arith.constant 0 : index
    %319 = vector.load %arg7[%c6, %c0_63, %c0_64] : memref<16x8x128xf32, #tpu.memory_space<vmem>>, vector<1x8x128xf32>
    %320 = vector.shape_cast %319 : vector<1x8x128xf32> to vector<8x128xf32>
    %321 = vector.shape_cast %318 : vector<8x128xf32> to vector<1x8x128xf32>
    tpu.vector_store %arg7[%c6, %c0_63, %c0_64], %321 {strides = array<i32>} : memref<16x8x128xf32, #tpu.memory_space<vmem>>, vector<1x8x128xf32>,
    %322 = arith.truncf %314 : vector<8x128xf32> to vector<8x128xbf16>
    %cst_65 = arith.constant dense<0.000000e+00> : vector<8x384xf32>
    %323 = tpu.matmul %322, %11, %cst_65 {dimension_numbers = #tpu.dot_dimension_numbers<[1], [0], [0], [1], [0, 0, 1, 1], [], []>} : vector<8x128xbf16>, vector<128x384xbf16>, vector<8x384xf32> -> vector<8x384xf32>
    %324 = vector.extract_strided_slice %10 {offsets = [7, 0, 0], sizes = [1, 8, 384], strides = [1, 1, 1]} : vector<16x8x384xf32> to vector<1x8x384xf32>
    %325 = vector.shape_cast %324 : vector<1x8x384xf32> to vector<8x384xf32>
    %326 = vector.extract_strided_slice %325 {offsets = [0, 0], sizes = [8, 128], strides = [1, 1]} : vector<8x384xf32> to vector<8x128xf32>
    %327 = vector.extract_strided_slice %323 {offsets = [0, 0], sizes = [8, 128], strides = [1, 1]} : vector<8x384xf32> to vector<8x128xf32>
    %328 = arith.addf %326, %327 : vector<8x128xf32>
    %329 = arith.negf %328 : vector<8x128xf32>
    %330 = math.exp %329 : vector<8x128xf32>
    %cst_66 = arith.constant 1.000000e+00 : f32
    %331 = vector.broadcast %cst_66 : f32 to vector<8x128xf32>
    %332 = arith.addf %331, %330 : vector<8x128xf32>
    %333 = arith.divf %331, %332 : vector<8x128xf32>
    %334 = vector.extract_strided_slice %325 {offsets = [0, 128], sizes = [8, 128], strides = [1, 1]} : vector<8x384xf32> to vector<8x128xf32>
    %335 = vector.extract_strided_slice %323 {offsets = [0, 128], sizes = [8, 128], strides = [1, 1]} : vector<8x384xf32> to vector<8x128xf32>
    %336 = arith.addf %334, %335 : vector<8x128xf32>
    %337 = arith.negf %336 : vector<8x128xf32>
    %338 = math.exp %337 : vector<8x128xf32>
    %cst_67 = arith.constant 1.000000e+00 : f32
    %339 = vector.broadcast %cst_67 : f32 to vector<8x128xf32>
    %340 = arith.addf %339, %338 : vector<8x128xf32>
    %341 = arith.divf %339, %340 : vector<8x128xf32>
    %342 = vector.extract_strided_slice %325 {offsets = [0, 256], sizes = [8, 128], strides = [1, 1]} : vector<8x384xf32> to vector<8x128xf32>
    %343 = vector.extract_strided_slice %323 {offsets = [0, 256], sizes = [8, 128], strides = [1, 1]} : vector<8x384xf32> to vector<8x128xf32>
    %344 = vector.broadcast %12 : vector<1x128xf32> to vector<8x128xf32>
    %345 = arith.addf %343, %344 : vector<8x128xf32>
    %346 = arith.mulf %333, %345 : vector<8x128xf32>
    %347 = arith.addf %342, %346 : vector<8x128xf32>
    %348 = math.tanh %347 : vector<8x128xf32>
    %cst_68 = arith.constant 1.000000e+00 : f32
    %349 = vector.broadcast %cst_68 : f32 to vector<8x128xf32>
    %350 = arith.subf %349, %341 : vector<8x128xf32>
    %351 = arith.mulf %350, %348 : vector<8x128xf32>
    %352 = arith.mulf %341, %314 : vector<8x128xf32>
    %353 = arith.addf %351, %352 : vector<8x128xf32>
    %354 = vector.extract_strided_slice %19 {offsets = [0, 7], sizes = [8, 1], strides = [1, 1]} : vector<8x16xi1> to vector<8x1xi1>
    %355 = vector.shape_cast %354 : vector<8x1xi1> to vector<8x1xi1>
    %356 = vector.broadcast %355 : vector<8x1xi1> to vector<8x128xi1>
    %357 = arith.select %356, %353, %314 : vector<8x128xi1>, vector<8x128xf32>
    %cst_69 = arith.constant 0.000000e+00 : f32
    %358 = vector.shape_cast %354 : vector<8x1xi1> to vector<8x1xi1>
    %359 = vector.broadcast %358 : vector<8x1xi1> to vector<8x128xi1>
    %360 = vector.broadcast %cst_69 : f32 to vector<8x128xf32>
    %361 = arith.select %359, %357, %360 : vector<8x128xi1>, vector<8x128xf32>
    %c7 = arith.constant 7 : index
    %c0_70 = arith.constant 0 : index
    %c0_71 = arith.constant 0 : index
    %362 = vector.load %arg7[%c7, %c0_70, %c0_71] : memref<16x8x128xf32, #tpu.memory_space<vmem>>, vector<1x8x128xf32>
    %363 = vector.shape_cast %362 : vector<1x8x128xf32> to vector<8x128xf32>
    %364 = vector.shape_cast %361 : vector<8x128xf32> to vector<1x8x128xf32>
    tpu.vector_store %arg7[%c7, %c0_70, %c0_71], %364 {strides = array<i32>} : memref<16x8x128xf32, #tpu.memory_space<vmem>>, vector<1x8x128xf32>,
    %365 = arith.truncf %357 : vector<8x128xf32> to vector<8x128xbf16>
    %cst_72 = arith.constant dense<0.000000e+00> : vector<8x384xf32>
    %366 = tpu.matmul %365, %11, %cst_72 {dimension_numbers = #tpu.dot_dimension_numbers<[1], [0], [0], [1], [0, 0, 1, 1], [], []>} : vector<8x128xbf16>, vector<128x384xbf16>, vector<8x384xf32> -> vector<8x384xf32>
    %367 = vector.extract_strided_slice %10 {offsets = [8, 0, 0], sizes = [1, 8, 384], strides = [1, 1, 1]} : vector<16x8x384xf32> to vector<1x8x384xf32>
    %368 = vector.shape_cast %367 : vector<1x8x384xf32> to vector<8x384xf32>
    %369 = vector.extract_strided_slice %368 {offsets = [0, 0], sizes = [8, 128], strides = [1, 1]} : vector<8x384xf32> to vector<8x128xf32>
    %370 = vector.extract_strided_slice %366 {offsets = [0, 0], sizes = [8, 128], strides = [1, 1]} : vector<8x384xf32> to vector<8x128xf32>
    %371 = arith.addf %369, %370 : vector<8x128xf32>
    %372 = arith.negf %371 : vector<8x128xf32>
    %373 = math.exp %372 : vector<8x128xf32>
    %cst_73 = arith.constant 1.000000e+00 : f32
    %374 = vector.broadcast %cst_73 : f32 to vector<8x128xf32>
    %375 = arith.addf %374, %373 : vector<8x128xf32>
    %376 = arith.divf %374, %375 : vector<8x128xf32>
    %377 = vector.extract_strided_slice %368 {offsets = [0, 128], sizes = [8, 128], strides = [1, 1]} : vector<8x384xf32> to vector<8x128xf32>
    %378 = vector.extract_strided_slice %366 {offsets = [0, 128], sizes = [8, 128], strides = [1, 1]} : vector<8x384xf32> to vector<8x128xf32>
    %379 = arith.addf %377, %378 : vector<8x128xf32>
    %380 = arith.negf %379 : vector<8x128xf32>
    %381 = math.exp %380 : vector<8x128xf32>
    %cst_74 = arith.constant 1.000000e+00 : f32
    %382 = vector.broadcast %cst_74 : f32 to vector<8x128xf32>
    %383 = arith.addf %382, %381 : vector<8x128xf32>
    %384 = arith.divf %382, %383 : vector<8x128xf32>
    %385 = vector.extract_strided_slice %368 {offsets = [0, 256], sizes = [8, 128], strides = [1, 1]} : vector<8x384xf32> to vector<8x128xf32>
    %386 = vector.extract_strided_slice %366 {offsets = [0, 256], sizes = [8, 128], strides = [1, 1]} : vector<8x384xf32> to vector<8x128xf32>
    %387 = vector.broadcast %12 : vector<1x128xf32> to vector<8x128xf32>
    %388 = arith.addf %386, %387 : vector<8x128xf32>
    %389 = arith.mulf %376, %388 : vector<8x128xf32>
    %390 = arith.addf %385, %389 : vector<8x128xf32>
    %391 = math.tanh %390 : vector<8x128xf32>
    %cst_75 = arith.constant 1.000000e+00 : f32
    %392 = vector.broadcast %cst_75 : f32 to vector<8x128xf32>
    %393 = arith.subf %392, %384 : vector<8x128xf32>
    %394 = arith.mulf %393, %391 : vector<8x128xf32>
    %395 = arith.mulf %384, %357 : vector<8x128xf32>
    %396 = arith.addf %394, %395 : vector<8x128xf32>
    %397 = vector.extract_strided_slice %19 {offsets = [0, 8], sizes = [8, 1], strides = [1, 1]} : vector<8x16xi1> to vector<8x1xi1>
    %398 = vector.shape_cast %397 : vector<8x1xi1> to vector<8x1xi1>
    %399 = vector.broadcast %398 : vector<8x1xi1> to vector<8x128xi1>
    %400 = arith.select %399, %396, %357 : vector<8x128xi1>, vector<8x128xf32>
    %cst_76 = arith.constant 0.000000e+00 : f32
    %401 = vector.shape_cast %397 : vector<8x1xi1> to vector<8x1xi1>
    %402 = vector.broadcast %401 : vector<8x1xi1> to vector<8x128xi1>
    %403 = vector.broadcast %cst_76 : f32 to vector<8x128xf32>
    %404 = arith.select %402, %400, %403 : vector<8x128xi1>, vector<8x128xf32>
    %c8 = arith.constant 8 : index
    %c0_77 = arith.constant 0 : index
    %c0_78 = arith.constant 0 : index
    %405 = vector.load %arg7[%c8, %c0_77, %c0_78] : memref<16x8x128xf32, #tpu.memory_space<vmem>>, vector<1x8x128xf32>
    %406 = vector.shape_cast %405 : vector<1x8x128xf32> to vector<8x128xf32>
    %407 = vector.shape_cast %404 : vector<8x128xf32> to vector<1x8x128xf32>
    tpu.vector_store %arg7[%c8, %c0_77, %c0_78], %407 {strides = array<i32>} : memref<16x8x128xf32, #tpu.memory_space<vmem>>, vector<1x8x128xf32>,
    %408 = arith.truncf %400 : vector<8x128xf32> to vector<8x128xbf16>
    %cst_79 = arith.constant dense<0.000000e+00> : vector<8x384xf32>
    %409 = tpu.matmul %408, %11, %cst_79 {dimension_numbers = #tpu.dot_dimension_numbers<[1], [0], [0], [1], [0, 0, 1, 1], [], []>} : vector<8x128xbf16>, vector<128x384xbf16>, vector<8x384xf32> -> vector<8x384xf32>
    %410 = vector.extract_strided_slice %10 {offsets = [9, 0, 0], sizes = [1, 8, 384], strides = [1, 1, 1]} : vector<16x8x384xf32> to vector<1x8x384xf32>
    %411 = vector.shape_cast %410 : vector<1x8x384xf32> to vector<8x384xf32>
    %412 = vector.extract_strided_slice %411 {offsets = [0, 0], sizes = [8, 128], strides = [1, 1]} : vector<8x384xf32> to vector<8x128xf32>
    %413 = vector.extract_strided_slice %409 {offsets = [0, 0], sizes = [8, 128], strides = [1, 1]} : vector<8x384xf32> to vector<8x128xf32>
    %414 = arith.addf %412, %413 : vector<8x128xf32>
    %415 = arith.negf %414 : vector<8x128xf32>
    %416 = math.exp %415 : vector<8x128xf32>
    %cst_80 = arith.constant 1.000000e+00 : f32
    %417 = vector.broadcast %cst_80 : f32 to vector<8x128xf32>
    %418 = arith.addf %417, %416 : vector<8x128xf32>
    %419 = arith.divf %417, %418 : vector<8x128xf32>
    %420 = vector.extract_strided_slice %411 {offsets = [0, 128], sizes = [8, 128], strides = [1, 1]} : vector<8x384xf32> to vector<8x128xf32>
    %421 = vector.extract_strided_slice %409 {offsets = [0, 128], sizes = [8, 128], strides = [1, 1]} : vector<8x384xf32> to vector<8x128xf32>
    %422 = arith.addf %420, %421 : vector<8x128xf32>
    %423 = arith.negf %422 : vector<8x128xf32>
    %424 = math.exp %423 : vector<8x128xf32>
    %cst_81 = arith.constant 1.000000e+00 : f32
    %425 = vector.broadcast %cst_81 : f32 to vector<8x128xf32>
    %426 = arith.addf %425, %424 : vector<8x128xf32>
    %427 = arith.divf %425, %426 : vector<8x128xf32>
    %428 = vector.extract_strided_slice %411 {offsets = [0, 256], sizes = [8, 128], strides = [1, 1]} : vector<8x384xf32> to vector<8x128xf32>
    %429 = vector.extract_strided_slice %409 {offsets = [0, 256], sizes = [8, 128], strides = [1, 1]} : vector<8x384xf32> to vector<8x128xf32>
    %430 = vector.broadcast %12 : vector<1x128xf32> to vector<8x128xf32>
    %431 = arith.addf %429, %430 : vector<8x128xf32>
    %432 = arith.mulf %419, %431 : vector<8x128xf32>
    %433 = arith.addf %428, %432 : vector<8x128xf32>
    %434 = math.tanh %433 : vector<8x128xf32>
    %cst_82 = arith.constant 1.000000e+00 : f32
    %435 = vector.broadcast %cst_82 : f32 to vector<8x128xf32>
    %436 = arith.subf %435, %427 : vector<8x128xf32>
    %437 = arith.mulf %436, %434 : vector<8x128xf32>
    %438 = arith.mulf %427, %400 : vector<8x128xf32>
    %439 = arith.addf %437, %438 : vector<8x128xf32>
    %440 = vector.extract_strided_slice %19 {offsets = [0, 9], sizes = [8, 1], strides = [1, 1]} : vector<8x16xi1> to vector<8x1xi1>
    %441 = vector.shape_cast %440 : vector<8x1xi1> to vector<8x1xi1>
    %442 = vector.broadcast %441 : vector<8x1xi1> to vector<8x128xi1>
    %443 = arith.select %442, %439, %400 : vector<8x128xi1>, vector<8x128xf32>
    %cst_83 = arith.constant 0.000000e+00 : f32
    %444 = vector.shape_cast %440 : vector<8x1xi1> to vector<8x1xi1>
    %445 = vector.broadcast %444 : vector<8x1xi1> to vector<8x128xi1>
    %446 = vector.broadcast %cst_83 : f32 to vector<8x128xf32>
    %447 = arith.select %445, %443, %446 : vector<8x128xi1>, vector<8x128xf32>
    %c9 = arith.constant 9 : index
    %c0_84 = arith.constant 0 : index
    %c0_85 = arith.constant 0 : index
    %448 = vector.load %arg7[%c9, %c0_84, %c0_85] : memref<16x8x128xf32, #tpu.memory_space<vmem>>, vector<1x8x128xf32>
    %449 = vector.shape_cast %448 : vector<1x8x128xf32> to vector<8x128xf32>
    %450 = vector.shape_cast %447 : vector<8x128xf32> to vector<1x8x128xf32>
    tpu.vector_store %arg7[%c9, %c0_84, %c0_85], %450 {strides = array<i32>} : memref<16x8x128xf32, #tpu.memory_space<vmem>>, vector<1x8x128xf32>,
    %451 = arith.truncf %443 : vector<8x128xf32> to vector<8x128xbf16>
    %cst_86 = arith.constant dense<0.000000e+00> : vector<8x384xf32>
    %452 = tpu.matmul %451, %11, %cst_86 {dimension_numbers = #tpu.dot_dimension_numbers<[1], [0], [0], [1], [0, 0, 1, 1], [], []>} : vector<8x128xbf16>, vector<128x384xbf16>, vector<8x384xf32> -> vector<8x384xf32>
    %453 = vector.extract_strided_slice %10 {offsets = [10, 0, 0], sizes = [1, 8, 384], strides = [1, 1, 1]} : vector<16x8x384xf32> to vector<1x8x384xf32>
    %454 = vector.shape_cast %453 : vector<1x8x384xf32> to vector<8x384xf32>
    %455 = vector.extract_strided_slice %454 {offsets = [0, 0], sizes = [8, 128], strides = [1, 1]} : vector<8x384xf32> to vector<8x128xf32>
    %456 = vector.extract_strided_slice %452 {offsets = [0, 0], sizes = [8, 128], strides = [1, 1]} : vector<8x384xf32> to vector<8x128xf32>
    %457 = arith.addf %455, %456 : vector<8x128xf32>
    %458 = arith.negf %457 : vector<8x128xf32>
    %459 = math.exp %458 : vector<8x128xf32>
    %cst_87 = arith.constant 1.000000e+00 : f32
    %460 = vector.broadcast %cst_87 : f32 to vector<8x128xf32>
    %461 = arith.addf %460, %459 : vector<8x128xf32>
    %462 = arith.divf %460, %461 : vector<8x128xf32>
    %463 = vector.extract_strided_slice %454 {offsets = [0, 128], sizes = [8, 128], strides = [1, 1]} : vector<8x384xf32> to vector<8x128xf32>
    %464 = vector.extract_strided_slice %452 {offsets = [0, 128], sizes = [8, 128], strides = [1, 1]} : vector<8x384xf32> to vector<8x128xf32>
    %465 = arith.addf %463, %464 : vector<8x128xf32>
    %466 = arith.negf %465 : vector<8x128xf32>
    %467 = math.exp %466 : vector<8x128xf32>
    %cst_88 = arith.constant 1.000000e+00 : f32
    %468 = vector.broadcast %cst_88 : f32 to vector<8x128xf32>
    %469 = arith.addf %468, %467 : vector<8x128xf32>
    %470 = arith.divf %468, %469 : vector<8x128xf32>
    %471 = vector.extract_strided_slice %454 {offsets = [0, 256], sizes = [8, 128], strides = [1, 1]} : vector<8x384xf32> to vector<8x128xf32>
    %472 = vector.extract_strided_slice %452 {offsets = [0, 256], sizes = [8, 128], strides = [1, 1]} : vector<8x384xf32> to vector<8x128xf32>
    %473 = vector.broadcast %12 : vector<1x128xf32> to vector<8x128xf32>
    %474 = arith.addf %472, %473 : vector<8x128xf32>
    %475 = arith.mulf %462, %474 : vector<8x128xf32>
    %476 = arith.addf %471, %475 : vector<8x128xf32>
    %477 = math.tanh %476 : vector<8x128xf32>
    %cst_89 = arith.constant 1.000000e+00 : f32
    %478 = vector.broadcast %cst_89 : f32 to vector<8x128xf32>
    %479 = arith.subf %478, %470 : vector<8x128xf32>
    %480 = arith.mulf %479, %477 : vector<8x128xf32>
    %481 = arith.mulf %470, %443 : vector<8x128xf32>
    %482 = arith.addf %480, %481 : vector<8x128xf32>
    %483 = vector.extract_strided_slice %19 {offsets = [0, 10], sizes = [8, 1], strides = [1, 1]} : vector<8x16xi1> to vector<8x1xi1>
    %484 = vector.shape_cast %483 : vector<8x1xi1> to vector<8x1xi1>
    %485 = vector.broadcast %484 : vector<8x1xi1> to vector<8x128xi1>
    %486 = arith.select %485, %482, %443 : vector<8x128xi1>, vector<8x128xf32>
    %cst_90 = arith.constant 0.000000e+00 : f32
    %487 = vector.shape_cast %483 : vector<8x1xi1> to vector<8x1xi1>
    %488 = vector.broadcast %487 : vector<8x1xi1> to vector<8x128xi1>
    %489 = vector.broadcast %cst_90 : f32 to vector<8x128xf32>
    %490 = arith.select %488, %486, %489 : vector<8x128xi1>, vector<8x128xf32>
    %c10 = arith.constant 10 : index
    %c0_91 = arith.constant 0 : index
    %c0_92 = arith.constant 0 : index
    %491 = vector.load %arg7[%c10, %c0_91, %c0_92] : memref<16x8x128xf32, #tpu.memory_space<vmem>>, vector<1x8x128xf32>
    %492 = vector.shape_cast %491 : vector<1x8x128xf32> to vector<8x128xf32>
    %493 = vector.shape_cast %490 : vector<8x128xf32> to vector<1x8x128xf32>
    tpu.vector_store %arg7[%c10, %c0_91, %c0_92], %493 {strides = array<i32>} : memref<16x8x128xf32, #tpu.memory_space<vmem>>, vector<1x8x128xf32>,
    %494 = arith.truncf %486 : vector<8x128xf32> to vector<8x128xbf16>
    %cst_93 = arith.constant dense<0.000000e+00> : vector<8x384xf32>
    %495 = tpu.matmul %494, %11, %cst_93 {dimension_numbers = #tpu.dot_dimension_numbers<[1], [0], [0], [1], [0, 0, 1, 1], [], []>} : vector<8x128xbf16>, vector<128x384xbf16>, vector<8x384xf32> -> vector<8x384xf32>
    %496 = vector.extract_strided_slice %10 {offsets = [11, 0, 0], sizes = [1, 8, 384], strides = [1, 1, 1]} : vector<16x8x384xf32> to vector<1x8x384xf32>
    %497 = vector.shape_cast %496 : vector<1x8x384xf32> to vector<8x384xf32>
    %498 = vector.extract_strided_slice %497 {offsets = [0, 0], sizes = [8, 128], strides = [1, 1]} : vector<8x384xf32> to vector<8x128xf32>
    %499 = vector.extract_strided_slice %495 {offsets = [0, 0], sizes = [8, 128], strides = [1, 1]} : vector<8x384xf32> to vector<8x128xf32>
    %500 = arith.addf %498, %499 : vector<8x128xf32>
    %501 = arith.negf %500 : vector<8x128xf32>
    %502 = math.exp %501 : vector<8x128xf32>
    %cst_94 = arith.constant 1.000000e+00 : f32
    %503 = vector.broadcast %cst_94 : f32 to vector<8x128xf32>
    %504 = arith.addf %503, %502 : vector<8x128xf32>
    %505 = arith.divf %503, %504 : vector<8x128xf32>
    %506 = vector.extract_strided_slice %497 {offsets = [0, 128], sizes = [8, 128], strides = [1, 1]} : vector<8x384xf32> to vector<8x128xf32>
    %507 = vector.extract_strided_slice %495 {offsets = [0, 128], sizes = [8, 128], strides = [1, 1]} : vector<8x384xf32> to vector<8x128xf32>
    %508 = arith.addf %506, %507 : vector<8x128xf32>
    %509 = arith.negf %508 : vector<8x128xf32>
    %510 = math.exp %509 : vector<8x128xf32>
    %cst_95 = arith.constant 1.000000e+00 : f32
    %511 = vector.broadcast %cst_95 : f32 to vector<8x128xf32>
    %512 = arith.addf %511, %510 : vector<8x128xf32>
    %513 = arith.divf %511, %512 : vector<8x128xf32>
    %514 = vector.extract_strided_slice %497 {offsets = [0, 256], sizes = [8, 128], strides = [1, 1]} : vector<8x384xf32> to vector<8x128xf32>
    %515 = vector.extract_strided_slice %495 {offsets = [0, 256], sizes = [8, 128], strides = [1, 1]} : vector<8x384xf32> to vector<8x128xf32>
    %516 = vector.broadcast %12 : vector<1x128xf32> to vector<8x128xf32>
    %517 = arith.addf %515, %516 : vector<8x128xf32>
    %518 = arith.mulf %505, %517 : vector<8x128xf32>
    %519 = arith.addf %514, %518 : vector<8x128xf32>
    %520 = math.tanh %519 : vector<8x128xf32>
    %cst_96 = arith.constant 1.000000e+00 : f32
    %521 = vector.broadcast %cst_96 : f32 to vector<8x128xf32>
    %522 = arith.subf %521, %513 : vector<8x128xf32>
    %523 = arith.mulf %522, %520 : vector<8x128xf32>
    %524 = arith.mulf %513, %486 : vector<8x128xf32>
    %525 = arith.addf %523, %524 : vector<8x128xf32>
    %526 = vector.extract_strided_slice %19 {offsets = [0, 11], sizes = [8, 1], strides = [1, 1]} : vector<8x16xi1> to vector<8x1xi1>
    %527 = vector.shape_cast %526 : vector<8x1xi1> to vector<8x1xi1>
    %528 = vector.broadcast %527 : vector<8x1xi1> to vector<8x128xi1>
    %529 = arith.select %528, %525, %486 : vector<8x128xi1>, vector<8x128xf32>
    %cst_97 = arith.constant 0.000000e+00 : f32
    %530 = vector.shape_cast %526 : vector<8x1xi1> to vector<8x1xi1>
    %531 = vector.broadcast %530 : vector<8x1xi1> to vector<8x128xi1>
    %532 = vector.broadcast %cst_97 : f32 to vector<8x128xf32>
    %533 = arith.select %531, %529, %532 : vector<8x128xi1>, vector<8x128xf32>
    %c11 = arith.constant 11 : index
    %c0_98 = arith.constant 0 : index
    %c0_99 = arith.constant 0 : index
    %534 = vector.load %arg7[%c11, %c0_98, %c0_99] : memref<16x8x128xf32, #tpu.memory_space<vmem>>, vector<1x8x128xf32>
    %535 = vector.shape_cast %534 : vector<1x8x128xf32> to vector<8x128xf32>
    %536 = vector.shape_cast %533 : vector<8x128xf32> to vector<1x8x128xf32>
    tpu.vector_store %arg7[%c11, %c0_98, %c0_99], %536 {strides = array<i32>} : memref<16x8x128xf32, #tpu.memory_space<vmem>>, vector<1x8x128xf32>,
    %537 = arith.truncf %529 : vector<8x128xf32> to vector<8x128xbf16>
    %cst_100 = arith.constant dense<0.000000e+00> : vector<8x384xf32>
    %538 = tpu.matmul %537, %11, %cst_100 {dimension_numbers = #tpu.dot_dimension_numbers<[1], [0], [0], [1], [0, 0, 1, 1], [], []>} : vector<8x128xbf16>, vector<128x384xbf16>, vector<8x384xf32> -> vector<8x384xf32>
    %539 = vector.extract_strided_slice %10 {offsets = [12, 0, 0], sizes = [1, 8, 384], strides = [1, 1, 1]} : vector<16x8x384xf32> to vector<1x8x384xf32>
    %540 = vector.shape_cast %539 : vector<1x8x384xf32> to vector<8x384xf32>
    %541 = vector.extract_strided_slice %540 {offsets = [0, 0], sizes = [8, 128], strides = [1, 1]} : vector<8x384xf32> to vector<8x128xf32>
    %542 = vector.extract_strided_slice %538 {offsets = [0, 0], sizes = [8, 128], strides = [1, 1]} : vector<8x384xf32> to vector<8x128xf32>
    %543 = arith.addf %541, %542 : vector<8x128xf32>
    %544 = arith.negf %543 : vector<8x128xf32>
    %545 = math.exp %544 : vector<8x128xf32>
    %cst_101 = arith.constant 1.000000e+00 : f32
    %546 = vector.broadcast %cst_101 : f32 to vector<8x128xf32>
    %547 = arith.addf %546, %545 : vector<8x128xf32>
    %548 = arith.divf %546, %547 : vector<8x128xf32>
    %549 = vector.extract_strided_slice %540 {offsets = [0, 128], sizes = [8, 128], strides = [1, 1]} : vector<8x384xf32> to vector<8x128xf32>
    %550 = vector.extract_strided_slice %538 {offsets = [0, 128], sizes = [8, 128], strides = [1, 1]} : vector<8x384xf32> to vector<8x128xf32>
    %551 = arith.addf %549, %550 : vector<8x128xf32>
    %552 = arith.negf %551 : vector<8x128xf32>
    %553 = math.exp %552 : vector<8x128xf32>
    %cst_102 = arith.constant 1.000000e+00 : f32
    %554 = vector.broadcast %cst_102 : f32 to vector<8x128xf32>
    %555 = arith.addf %554, %553 : vector<8x128xf32>
    %556 = arith.divf %554, %555 : vector<8x128xf32>
    %557 = vector.extract_strided_slice %540 {offsets = [0, 256], sizes = [8, 128], strides = [1, 1]} : vector<8x384xf32> to vector<8x128xf32>
    %558 = vector.extract_strided_slice %538 {offsets = [0, 256], sizes = [8, 128], strides = [1, 1]} : vector<8x384xf32> to vector<8x128xf32>
    %559 = vector.broadcast %12 : vector<1x128xf32> to vector<8x128xf32>
    %560 = arith.addf %558, %559 : vector<8x128xf32>
    %561 = arith.mulf %548, %560 : vector<8x128xf32>
    %562 = arith.addf %557, %561 : vector<8x128xf32>
    %563 = math.tanh %562 : vector<8x128xf32>
    %cst_103 = arith.constant 1.000000e+00 : f32
    %564 = vector.broadcast %cst_103 : f32 to vector<8x128xf32>
    %565 = arith.subf %564, %556 : vector<8x128xf32>
    %566 = arith.mulf %565, %563 : vector<8x128xf32>
    %567 = arith.mulf %556, %529 : vector<8x128xf32>
    %568 = arith.addf %566, %567 : vector<8x128xf32>
    %569 = vector.extract_strided_slice %19 {offsets = [0, 12], sizes = [8, 1], strides = [1, 1]} : vector<8x16xi1> to vector<8x1xi1>
    %570 = vector.shape_cast %569 : vector<8x1xi1> to vector<8x1xi1>
    %571 = vector.broadcast %570 : vector<8x1xi1> to vector<8x128xi1>
    %572 = arith.select %571, %568, %529 : vector<8x128xi1>, vector<8x128xf32>
    %cst_104 = arith.constant 0.000000e+00 : f32
    %573 = vector.shape_cast %569 : vector<8x1xi1> to vector<8x1xi1>
    %574 = vector.broadcast %573 : vector<8x1xi1> to vector<8x128xi1>
    %575 = vector.broadcast %cst_104 : f32 to vector<8x128xf32>
    %576 = arith.select %574, %572, %575 : vector<8x128xi1>, vector<8x128xf32>
    %c12 = arith.constant 12 : index
    %c0_105 = arith.constant 0 : index
    %c0_106 = arith.constant 0 : index
    %577 = vector.load %arg7[%c12, %c0_105, %c0_106] : memref<16x8x128xf32, #tpu.memory_space<vmem>>, vector<1x8x128xf32>
    %578 = vector.shape_cast %577 : vector<1x8x128xf32> to vector<8x128xf32>
    %579 = vector.shape_cast %576 : vector<8x128xf32> to vector<1x8x128xf32>
    tpu.vector_store %arg7[%c12, %c0_105, %c0_106], %579 {strides = array<i32>} : memref<16x8x128xf32, #tpu.memory_space<vmem>>, vector<1x8x128xf32>,
    %580 = arith.truncf %572 : vector<8x128xf32> to vector<8x128xbf16>
    %cst_107 = arith.constant dense<0.000000e+00> : vector<8x384xf32>
    %581 = tpu.matmul %580, %11, %cst_107 {dimension_numbers = #tpu.dot_dimension_numbers<[1], [0], [0], [1], [0, 0, 1, 1], [], []>} : vector<8x128xbf16>, vector<128x384xbf16>, vector<8x384xf32> -> vector<8x384xf32>
    %582 = vector.extract_strided_slice %10 {offsets = [13, 0, 0], sizes = [1, 8, 384], strides = [1, 1, 1]} : vector<16x8x384xf32> to vector<1x8x384xf32>
    %583 = vector.shape_cast %582 : vector<1x8x384xf32> to vector<8x384xf32>
    %584 = vector.extract_strided_slice %583 {offsets = [0, 0], sizes = [8, 128], strides = [1, 1]} : vector<8x384xf32> to vector<8x128xf32>
    %585 = vector.extract_strided_slice %581 {offsets = [0, 0], sizes = [8, 128], strides = [1, 1]} : vector<8x384xf32> to vector<8x128xf32>
    %586 = arith.addf %584, %585 : vector<8x128xf32>
    %587 = arith.negf %586 : vector<8x128xf32>
    %588 = math.exp %587 : vector<8x128xf32>
    %cst_108 = arith.constant 1.000000e+00 : f32
    %589 = vector.broadcast %cst_108 : f32 to vector<8x128xf32>
    %590 = arith.addf %589, %588 : vector<8x128xf32>
    %591 = arith.divf %589, %590 : vector<8x128xf32>
    %592 = vector.extract_strided_slice %583 {offsets = [0, 128], sizes = [8, 128], strides = [1, 1]} : vector<8x384xf32> to vector<8x128xf32>
    %593 = vector.extract_strided_slice %581 {offsets = [0, 128], sizes = [8, 128], strides = [1, 1]} : vector<8x384xf32> to vector<8x128xf32>
    %594 = arith.addf %592, %593 : vector<8x128xf32>
    %595 = arith.negf %594 : vector<8x128xf32>
    %596 = math.exp %595 : vector<8x128xf32>
    %cst_109 = arith.constant 1.000000e+00 : f32
    %597 = vector.broadcast %cst_109 : f32 to vector<8x128xf32>
    %598 = arith.addf %597, %596 : vector<8x128xf32>
    %599 = arith.divf %597, %598 : vector<8x128xf32>
    %600 = vector.extract_strided_slice %583 {offsets = [0, 256], sizes = [8, 128], strides = [1, 1]} : vector<8x384xf32> to vector<8x128xf32>
    %601 = vector.extract_strided_slice %581 {offsets = [0, 256], sizes = [8, 128], strides = [1, 1]} : vector<8x384xf32> to vector<8x128xf32>
    %602 = vector.broadcast %12 : vector<1x128xf32> to vector<8x128xf32>
    %603 = arith.addf %601, %602 : vector<8x128xf32>
    %604 = arith.mulf %591, %603 : vector<8x128xf32>
    %605 = arith.addf %600, %604 : vector<8x128xf32>
    %606 = math.tanh %605 : vector<8x128xf32>
    %cst_110 = arith.constant 1.000000e+00 : f32
    %607 = vector.broadcast %cst_110 : f32 to vector<8x128xf32>
    %608 = arith.subf %607, %599 : vector<8x128xf32>
    %609 = arith.mulf %608, %606 : vector<8x128xf32>
    %610 = arith.mulf %599, %572 : vector<8x128xf32>
    %611 = arith.addf %609, %610 : vector<8x128xf32>
    %612 = vector.extract_strided_slice %19 {offsets = [0, 13], sizes = [8, 1], strides = [1, 1]} : vector<8x16xi1> to vector<8x1xi1>
    %613 = vector.shape_cast %612 : vector<8x1xi1> to vector<8x1xi1>
    %614 = vector.broadcast %613 : vector<8x1xi1> to vector<8x128xi1>
    %615 = arith.select %614, %611, %572 : vector<8x128xi1>, vector<8x128xf32>
    %cst_111 = arith.constant 0.000000e+00 : f32
    %616 = vector.shape_cast %612 : vector<8x1xi1> to vector<8x1xi1>
    %617 = vector.broadcast %616 : vector<8x1xi1> to vector<8x128xi1>
    %618 = vector.broadcast %cst_111 : f32 to vector<8x128xf32>
    %619 = arith.select %617, %615, %618 : vector<8x128xi1>, vector<8x128xf32>
    %c13 = arith.constant 13 : index
    %c0_112 = arith.constant 0 : index
    %c0_113 = arith.constant 0 : index
    %620 = vector.load %arg7[%c13, %c0_112, %c0_113] : memref<16x8x128xf32, #tpu.memory_space<vmem>>, vector<1x8x128xf32>
    %621 = vector.shape_cast %620 : vector<1x8x128xf32> to vector<8x128xf32>
    %622 = vector.shape_cast %619 : vector<8x128xf32> to vector<1x8x128xf32>
    tpu.vector_store %arg7[%c13, %c0_112, %c0_113], %622 {strides = array<i32>} : memref<16x8x128xf32, #tpu.memory_space<vmem>>, vector<1x8x128xf32>,
    %623 = arith.truncf %615 : vector<8x128xf32> to vector<8x128xbf16>
    %cst_114 = arith.constant dense<0.000000e+00> : vector<8x384xf32>
    %624 = tpu.matmul %623, %11, %cst_114 {dimension_numbers = #tpu.dot_dimension_numbers<[1], [0], [0], [1], [0, 0, 1, 1], [], []>} : vector<8x128xbf16>, vector<128x384xbf16>, vector<8x384xf32> -> vector<8x384xf32>
    %625 = vector.extract_strided_slice %10 {offsets = [14, 0, 0], sizes = [1, 8, 384], strides = [1, 1, 1]} : vector<16x8x384xf32> to vector<1x8x384xf32>
    %626 = vector.shape_cast %625 : vector<1x8x384xf32> to vector<8x384xf32>
    %627 = vector.extract_strided_slice %626 {offsets = [0, 0], sizes = [8, 128], strides = [1, 1]} : vector<8x384xf32> to vector<8x128xf32>
    %628 = vector.extract_strided_slice %624 {offsets = [0, 0], sizes = [8, 128], strides = [1, 1]} : vector<8x384xf32> to vector<8x128xf32>
    %629 = arith.addf %627, %628 : vector<8x128xf32>
    %630 = arith.negf %629 : vector<8x128xf32>
    %631 = math.exp %630 : vector<8x128xf32>
    %cst_115 = arith.constant 1.000000e+00 : f32
    %632 = vector.broadcast %cst_115 : f32 to vector<8x128xf32>
    %633 = arith.addf %632, %631 : vector<8x128xf32>
    %634 = arith.divf %632, %633 : vector<8x128xf32>
    %635 = vector.extract_strided_slice %626 {offsets = [0, 128], sizes = [8, 128], strides = [1, 1]} : vector<8x384xf32> to vector<8x128xf32>
    %636 = vector.extract_strided_slice %624 {offsets = [0, 128], sizes = [8, 128], strides = [1, 1]} : vector<8x384xf32> to vector<8x128xf32>
    %637 = arith.addf %635, %636 : vector<8x128xf32>
    %638 = arith.negf %637 : vector<8x128xf32>
    %639 = math.exp %638 : vector<8x128xf32>
    %cst_116 = arith.constant 1.000000e+00 : f32
    %640 = vector.broadcast %cst_116 : f32 to vector<8x128xf32>
    %641 = arith.addf %640, %639 : vector<8x128xf32>
    %642 = arith.divf %640, %641 : vector<8x128xf32>
    %643 = vector.extract_strided_slice %626 {offsets = [0, 256], sizes = [8, 128], strides = [1, 1]} : vector<8x384xf32> to vector<8x128xf32>
    %644 = vector.extract_strided_slice %624 {offsets = [0, 256], sizes = [8, 128], strides = [1, 1]} : vector<8x384xf32> to vector<8x128xf32>
    %645 = vector.broadcast %12 : vector<1x128xf32> to vector<8x128xf32>
    %646 = arith.addf %644, %645 : vector<8x128xf32>
    %647 = arith.mulf %634, %646 : vector<8x128xf32>
    %648 = arith.addf %643, %647 : vector<8x128xf32>
    %649 = math.tanh %648 : vector<8x128xf32>
    %cst_117 = arith.constant 1.000000e+00 : f32
    %650 = vector.broadcast %cst_117 : f32 to vector<8x128xf32>
    %651 = arith.subf %650, %642 : vector<8x128xf32>
    %652 = arith.mulf %651, %649 : vector<8x128xf32>
    %653 = arith.mulf %642, %615 : vector<8x128xf32>
    %654 = arith.addf %652, %653 : vector<8x128xf32>
    %655 = vector.extract_strided_slice %19 {offsets = [0, 14], sizes = [8, 1], strides = [1, 1]} : vector<8x16xi1> to vector<8x1xi1>
    %656 = vector.shape_cast %655 : vector<8x1xi1> to vector<8x1xi1>
    %657 = vector.broadcast %656 : vector<8x1xi1> to vector<8x128xi1>
    %658 = arith.select %657, %654, %615 : vector<8x128xi1>, vector<8x128xf32>
    %cst_118 = arith.constant 0.000000e+00 : f32
    %659 = vector.shape_cast %655 : vector<8x1xi1> to vector<8x1xi1>
    %660 = vector.broadcast %659 : vector<8x1xi1> to vector<8x128xi1>
    %661 = vector.broadcast %cst_118 : f32 to vector<8x128xf32>
    %662 = arith.select %660, %658, %661 : vector<8x128xi1>, vector<8x128xf32>
    %c14 = arith.constant 14 : index
    %c0_119 = arith.constant 0 : index
    %c0_120 = arith.constant 0 : index
    %663 = vector.load %arg7[%c14, %c0_119, %c0_120] : memref<16x8x128xf32, #tpu.memory_space<vmem>>, vector<1x8x128xf32>
    %664 = vector.shape_cast %663 : vector<1x8x128xf32> to vector<8x128xf32>
    %665 = vector.shape_cast %662 : vector<8x128xf32> to vector<1x8x128xf32>
    tpu.vector_store %arg7[%c14, %c0_119, %c0_120], %665 {strides = array<i32>} : memref<16x8x128xf32, #tpu.memory_space<vmem>>, vector<1x8x128xf32>,
    %666 = arith.truncf %658 : vector<8x128xf32> to vector<8x128xbf16>
    %cst_121 = arith.constant dense<0.000000e+00> : vector<8x384xf32>
    %667 = tpu.matmul %666, %11, %cst_121 {dimension_numbers = #tpu.dot_dimension_numbers<[1], [0], [0], [1], [0, 0, 1, 1], [], []>} : vector<8x128xbf16>, vector<128x384xbf16>, vector<8x384xf32> -> vector<8x384xf32>
    %668 = vector.extract_strided_slice %10 {offsets = [15, 0, 0], sizes = [1, 8, 384], strides = [1, 1, 1]} : vector<16x8x384xf32> to vector<1x8x384xf32>
    %669 = vector.shape_cast %668 : vector<1x8x384xf32> to vector<8x384xf32>
    %670 = vector.extract_strided_slice %669 {offsets = [0, 0], sizes = [8, 128], strides = [1, 1]} : vector<8x384xf32> to vector<8x128xf32>
    %671 = vector.extract_strided_slice %667 {offsets = [0, 0], sizes = [8, 128], strides = [1, 1]} : vector<8x384xf32> to vector<8x128xf32>
    %672 = arith.addf %670, %671 : vector<8x128xf32>
    %673 = arith.negf %672 : vector<8x128xf32>
    %674 = math.exp %673 : vector<8x128xf32>
    %cst_122 = arith.constant 1.000000e+00 : f32
    %675 = vector.broadcast %cst_122 : f32 to vector<8x128xf32>
    %676 = arith.addf %675, %674 : vector<8x128xf32>
    %677 = arith.divf %675, %676 : vector<8x128xf32>
    %678 = vector.extract_strided_slice %669 {offsets = [0, 128], sizes = [8, 128], strides = [1, 1]} : vector<8x384xf32> to vector<8x128xf32>
    %679 = vector.extract_strided_slice %667 {offsets = [0, 128], sizes = [8, 128], strides = [1, 1]} : vector<8x384xf32> to vector<8x128xf32>
    %680 = arith.addf %678, %679 : vector<8x128xf32>
    %681 = arith.negf %680 : vector<8x128xf32>
    %682 = math.exp %681 : vector<8x128xf32>
    %cst_123 = arith.constant 1.000000e+00 : f32
    %683 = vector.broadcast %cst_123 : f32 to vector<8x128xf32>
    %684 = arith.addf %683, %682 : vector<8x128xf32>
    %685 = arith.divf %683, %684 : vector<8x128xf32>
    %686 = vector.extract_strided_slice %669 {offsets = [0, 256], sizes = [8, 128], strides = [1, 1]} : vector<8x384xf32> to vector<8x128xf32>
    %687 = vector.extract_strided_slice %667 {offsets = [0, 256], sizes = [8, 128], strides = [1, 1]} : vector<8x384xf32> to vector<8x128xf32>
    %688 = vector.broadcast %12 : vector<1x128xf32> to vector<8x128xf32>
    %689 = arith.addf %687, %688 : vector<8x128xf32>
    %690 = arith.mulf %677, %689 : vector<8x128xf32>
    %691 = arith.addf %686, %690 : vector<8x128xf32>
    %692 = math.tanh %691 : vector<8x128xf32>
    %cst_124 = arith.constant 1.000000e+00 : f32
    %693 = vector.broadcast %cst_124 : f32 to vector<8x128xf32>
    %694 = arith.subf %693, %685 : vector<8x128xf32>
    %695 = arith.mulf %694, %692 : vector<8x128xf32>
    %696 = arith.mulf %685, %658 : vector<8x128xf32>
    %697 = arith.addf %695, %696 : vector<8x128xf32>
    %698 = vector.extract_strided_slice %19 {offsets = [0, 15], sizes = [8, 1], strides = [1, 1]} : vector<8x16xi1> to vector<8x1xi1>
    %699 = vector.shape_cast %698 : vector<8x1xi1> to vector<8x1xi1>
    %700 = vector.broadcast %699 : vector<8x1xi1> to vector<8x128xi1>
    %701 = arith.select %700, %697, %658 : vector<8x128xi1>, vector<8x128xf32>
    %cst_125 = arith.constant 0.000000e+00 : f32
    %702 = vector.shape_cast %698 : vector<8x1xi1> to vector<8x1xi1>
    %703 = vector.broadcast %702 : vector<8x1xi1> to vector<8x128xi1>
    %704 = vector.broadcast %cst_125 : f32 to vector<8x128xf32>
    %705 = arith.select %703, %701, %704 : vector<8x128xi1>, vector<8x128xf32>
    %c15 = arith.constant 15 : index
    %c0_126 = arith.constant 0 : index
    %c0_127 = arith.constant 0 : index
    %706 = vector.load %arg7[%c15, %c0_126, %c0_127] : memref<16x8x128xf32, #tpu.memory_space<vmem>>, vector<1x8x128xf32>
    %707 = vector.shape_cast %706 : vector<1x8x128xf32> to vector<8x128xf32>
    %708 = vector.shape_cast %705 : vector<8x128xf32> to vector<1x8x128xf32>
    tpu.vector_store %arg7[%c15, %c0_126, %c0_127], %708 {strides = array<i32>} : memref<16x8x128xf32, #tpu.memory_space<vmem>>, vector<1x8x128xf32>,
    %c0_128 = arith.constant 0 : index
    %c0_129 = arith.constant 0 : index
    %709 = vector.load %arg8[%c0_128, %c0_129] : memref<8x128xf32, #tpu.memory_space<vmem>>, vector<8x128xf32>
    tpu.vector_store %arg8[%c0_128, %c0_129], %701 {strides = array<i32>} : memref<8x128xf32, #tpu.memory_space<vmem>>, vector<8x128xf32>,
    return
  }
  func.func @transform_0(%arg0: i32) -> (i32, i32, i32) {
    %c0_i32 = arith.constant 0 : i32
    %c0_i32_0 = arith.constant 0 : i32
    %c0_i32_1 = arith.constant 0 : i32
    return %arg0, %c0_i32, %c0_i32_0 : i32, i32, i32
  }
  func.func @transform_1(%arg0: i32) -> (i32, i32) {
    %c0_i32 = arith.constant 0 : i32
    %c0_i32_0 = arith.constant 0 : i32
    %c0_i32_1 = arith.constant 0 : i32
    return %c0_i32, %c0_i32_0 : i32, i32
  }
  func.func @transform_2(%arg0: i32) -> (i32, i32) {
    %c0_i32 = arith.constant 0 : i32
    %c0_i32_0 = arith.constant 0 : i32
    %c0_i32_1 = arith.constant 0 : i32
    return %c0_i32, %c0_i32_0 : i32, i32
  }
  func.func @transform_3(%arg0: i32) -> (i32, i32) {
    %c0_i32 = arith.constant 0 : i32
    %c0_i32_0 = arith.constant 0 : i32
    %c0_i32_1 = arith.constant 0 : i32
    return %c0_i32, %c0_i32_0 : i32, i32
  }
  func.func @transform_4(%arg0: i32) -> (i32, i32) {
    %c0_i32 = arith.constant 0 : i32
    %c0_i32_0 = arith.constant 0 : i32
    %c0_i32_1 = arith.constant 0 : i32
    return %c0_i32, %c0_i32_0 : i32, i32
  }
  func.func @transform_5(%arg0: i32) -> (i32, i32) {
    %c0_i32 = arith.constant 0 : i32
    %c0_i32_0 = arith.constant 0 : i32
    %c0_i32_1 = arith.constant 0 : i32
    return %c0_i32, %c0_i32_0 : i32, i32
  }
  func.func @transform_6(%arg0: i32) -> (i32, i32, i32) {
    %c0_i32 = arith.constant 0 : i32
    %c0_i32_0 = arith.constant 0 : i32
    %c0_i32_1 = arith.constant 0 : i32
    return %arg0, %c0_i32, %c0_i32_0 : i32, i32, i32
  }
  func.func @transform_7(%arg0: i32) -> (i32, i32) {
    %c0_i32 = arith.constant 0 : i32
    %c0_i32_0 = arith.constant 0 : i32
    %c0_i32_1 = arith.constant 0 : i32
    return %c0_i32, %c0_i32_0 : i32, i32
  }
}

module attributes {stable_mosaic.version = 11 : i64} {
  func.func @_gru_kernel(%arg0: i32, %arg1: memref<16x8x128xbf16, #tpu.memory_space<vmem>>, %arg2: memref<8x1xi32, #tpu.memory_space<vmem>>, %arg3: memref<128x384xbf16, #tpu.memory_space<vmem>>, %arg4: memref<128x384xbf16, #tpu.memory_space<vmem>>, %arg5: memref<1x384xf32, #tpu.memory_space<vmem>>, %arg6: memref<1x128xf32, #tpu.memory_space<vmem>>, %arg7: memref<16x8x128xf32, #tpu.memory_space<vmem>>, %arg8: memref<8x128xf32, #tpu.memory_space<vmem>>) attributes {dimension_semantics = [#tpu.dimension_semantics<arbitrary>], iteration_bounds = array<i64: 1>, scalar_prefetch = 0 : i64, scratch_operands = 0 : i64, tpu.core_type = #tpu.core_type<tc>, window_params = [{transform_indices = @transform_0, window_bounds = array<i64: 16, 8, 128>}, {pipeline_mode = #tpu.pipeline_mode<synchronous>, transform_indices = @transform_1, window_bounds = array<i64: 8, 1>}, {pipeline_mode = #tpu.pipeline_mode<synchronous>, transform_indices = @transform_2, window_bounds = array<i64: 128, 384>}, {pipeline_mode = #tpu.pipeline_mode<synchronous>, transform_indices = @transform_3, window_bounds = array<i64: 128, 384>}, {pipeline_mode = #tpu.pipeline_mode<synchronous>, transform_indices = @transform_4, window_bounds = array<i64: 1, 384>}, {pipeline_mode = #tpu.pipeline_mode<synchronous>, transform_indices = @transform_5, window_bounds = array<i64: 1, 128>}, {transform_indices = @transform_6, window_bounds = array<i64: 16, 8, 128>}, {pipeline_mode = #tpu.pipeline_mode<synchronous>, transform_indices = @transform_7, window_bounds = array<i64: 8, 128>}]} {
    %c0_i32 = arith.constant 0 : i32
    %0 = arith.cmpi eq, %arg0, %c0_i32 : i32
    %1 = arith.extui %0 : i1 to i32
    %c0_i32_0 = arith.constant 0 : i32
    %2 = arith.cmpi ne, %1, %c0_i32_0 : i32
    scf.if %2 {
      %cst_130 = arith.constant 0.000000e+00 : f32
      %710 = vector.broadcast %cst_130 : f32 to vector<8x128xf32>
      %c0_131 = arith.constant 0 : index
      %c0_132 = arith.constant 0 : index
      %711 = vector.load %arg8[%c0_131, %c0_132] : memref<8x128xf32, #tpu.memory_space<vmem>>, vector<8x128xf32>
      tpu.vector_store %arg8[%c0_131, %c0_132], %710 {strides = array<i32>} : memref<8x128xf32, #tpu.memory_space<vmem>>, vector<8x128xf32>,
    } else {
    }
    %c0 = arith.constant 0 : index
    %c0_1 = arith.constant 0 : index
    %c0_2 = arith.constant 0 : index
    %3 = vector.load %arg1[%c0, %c0_1, %c0_2] : memref<16x8x128xbf16, #tpu.memory_space<vmem>>, vector<16x8x128xbf16>
    %4 = vector.shape_cast %3 : vector<16x8x128xbf16> to vector<128x128xbf16>
    %c0_3 = arith.constant 0 : index
    %c0_4 = arith.constant 0 : index
    %5 = vector.load %arg3[%c0_3, %c0_4] : memref<128x384xbf16, #tpu.memory_space<vmem>>, vector<128x384xbf16>
    %cst = arith.constant dense<0.000000e+00> : vector<128x384xf32>
    %6 = tpu.matmul %4, %5, %cst {dimension_numbers = #tpu.dot_dimension_numbers<[1], [0], [0], [1], [0, 0, 1, 1], [], []>} : vector<128x128xbf16>, vector<128x384xbf16>, vector<128x384xf32> -> vector<128x384xf32>
    %c0_5 = arith.constant 0 : index
    %c0_6 = arith.constant 0 : index
    %7 = vector.load %arg5[%c0_5, %c0_6] : memref<1x384xf32, #tpu.memory_space<vmem>>, vector<1x384xf32>
    %8 = vector.broadcast %7 : vector<1x384xf32> to vector<128x384xf32>
    %9 = arith.addf %6, %8 : vector<128x384xf32>
    %10 = vector.shape_cast %9 : vector<128x384xf32> to vector<16x8x384xf32>
    %c0_7 = arith.constant 0 : index
    %c0_8 = arith.constant 0 : index
    %11 = vector.load %arg4[%c0_7, %c0_8] : memref<128x384xbf16, #tpu.memory_space<vmem>>, vector<128x384xbf16>
    %c0_9 = arith.constant 0 : index
    %c0_10 = arith.constant 0 : index
    %12 = vector.load %arg6[%c0_9, %c0_10] : memref<1x128xf32, #tpu.memory_space<vmem>>, vector<1x128xf32>
    %c0_11 = arith.constant 0 : index
    %c0_12 = arith.constant 0 : index
    %13 = vector.load %arg2[%c0_11, %c0_12] : memref<8x1xi32, #tpu.memory_space<vmem>>, vector<8x1xi32>
    %c16_i32 = arith.constant 16 : i32
    %14 = arith.muli %arg0, %c16_i32 : i32
    %15 = tpu.iota {dimensions = array<i32: 1>} : vector<8x16xi32>
    %16 = vector.broadcast %14 : i32 to vector<8x16xi32>
    %17 = arith.addi %16, %15 : vector<8x16xi32>
    %18 = vector.broadcast %13 : vector<8x1xi32> to vector<8x16xi32>
    %19 = arith.cmpi slt, %17, %18 : vector<8x16xi32>
    %c0_13 = arith.constant 0 : index
    %c0_14 = arith.constant 0 : index
    %20 = vector.load %arg8[%c0_13, %c0_14] : memref<8x128xf32, #tpu.memory_space<vmem>>, vector<8x128xf32>
    %21 = arith.truncf %20 : vector<8x128xf32> to vector<8x128xbf16>
    %cst_15 = arith.constant dense<0.000000e+00> : vector<8x384xf32>
    %22 = tpu.matmul %21, %11, %cst_15 {dimension_numbers = #tpu.dot_dimension_numbers<[1], [0], [0], [1], [0, 0, 1, 1], [], []>} : vector<8x128xbf16>, vector<128x384xbf16>, vector<8x384xf32> -> vector<8x384xf32>
    %23 = vector.extract_strided_slice %10 {offsets = [0, 0, 0], sizes = [1, 8, 384], strides = [1, 1, 1]} : vector<16x8x384xf32> to vector<1x8x384xf32>
    %24 = vector.shape_cast %23 : vector<1x8x384xf32> to vector<8x384xf32>
    %25 = vector.extract_strided_slice %24 {offsets = [0, 0], sizes = [8, 128], strides = [1, 1]} : vector<8x384xf32> to vector<8x128xf32>
    %26 = vector.extract_strided_slice %22 {offsets = [0, 0], sizes = [8, 128], strides = [1, 1]} : vector<8x384xf32> to vector<8x128xf32>
    %27 = arith.addf %25, %26 : vector<8x128xf32>
    %28 = arith.negf %27 : vector<8x128xf32>
    %29 = math.exp %28 : vector<8x128xf32>
    %cst_16 = arith.constant 1.000000e+00 : f32
    %30 = vector.broadcast %cst_16 : f32 to vector<8x128xf32>
    %31 = arith.addf %30, %29 : vector<8x128xf32>
    %32 = arith.divf %30, %31 : vector<8x128xf32>
    %33 = vector.extract_strided_slice %24 {offsets = [0, 128], sizes = [8, 128], strides = [1, 1]} : vector<8x384xf32> to vector<8x128xf32>
    %34 = vector.extract_strided_slice %22 {offsets = [0, 128], sizes = [8, 128], strides = [1, 1]} : vector<8x384xf32> to vector<8x128xf32>
    %35 = arith.addf %33, %34 : vector<8x128xf32>
    %36 = arith.negf %35 : vector<8x128xf32>
    %37 = math.exp %36 : vector<8x128xf32>
    %cst_17 = arith.constant 1.000000e+00 : f32
    %38 = vector.broadcast %cst_17 : f32 to vector<8x128xf32>
    %39 = arith.addf %38, %37 : vector<8x128xf32>
    %40 = arith.divf %38, %39 : vector<8x128xf32>
    %41 = vector.extract_strided_slice %24 {offsets = [0, 256], sizes = [8, 128], strides = [1, 1]} : vector<8x384xf32> to vector<8x128xf32>
    %42 = vector.extract_strided_slice %22 {offsets = [0, 256], sizes = [8, 128], strides = [1, 1]} : vector<8x384xf32> to vector<8x128xf32>
    %43 = vector.broadcast %12 : vector<1x128xf32> to vector<8x128xf32>
    %44 = arith.addf %42, %43 : vector<8x128xf32>
    %45 = arith.mulf %32, %44 : vector<8x128xf32>
    %46 = arith.addf %41, %45 : vector<8x128xf32>
    %47 = math.tanh %46 : vector<8x128xf32>
    %cst_18 = arith.constant 1.000000e+00 : f32
    %48 = vector.broadcast %cst_18 : f32 to vector<8x128xf32>
    %49 = arith.subf %48, %40 : vector<8x128xf32>
    %50 = arith.mulf %49, %47 : vector<8x128xf32>
    %51 = arith.mulf %40, %20 : vector<8x128xf32>
    %52 = arith.addf %50, %51 : vector<8x128xf32>
    %53 = vector.extract_strided_slice %19 {offsets = [0, 0], sizes = [8, 1], strides = [1, 1]} : vector<8x16xi1> to vector<8x1xi1>
    %54 = vector.shape_cast %53 : vector<8x1xi1> to vector<8x1xi1>
    %55 = vector.broadcast %54 : vector<8x1xi1> to vector<8x128xi1>
    %56 = arith.select %55, %52, %20 : vector<8x128xi1>, vector<8x128xf32>
    %cst_19 = arith.constant 0.000000e+00 : f32
    %57 = vector.shape_cast %53 : vector<8x1xi1> to vector<8x1xi1>
    %58 = vector.broadcast %57 : vector<8x1xi1> to vector<8x128xi1>
    %59 = vector.broadcast %cst_19 : f32 to vector<8x128xf32>
    %60 = arith.select %58, %56, %59 : vector<8x128xi1>, vector<8x128xf32>
    %c0_20 = arith.constant 0 : index
    %c0_21 = arith.constant 0 : index
    %c0_22 = arith.constant 0 : index
    %61 = vector.load %arg7[%c0_20, %c0_21, %c0_22] : memref<16x8x128xf32, #tpu.memory_space<vmem>>, vector<1x8x128xf32>
    %62 = vector.shape_cast %61 : vector<1x8x128xf32> to vector<8x128xf32>
    %63 = vector.shape_cast %60 : vector<8x128xf32> to vector<1x8x128xf32>
    tpu.vector_store %arg7[%c0_20, %c0_21, %c0_22], %63 {strides = array<i32>} : memref<16x8x128xf32, #tpu.memory_space<vmem>>, vector<1x8x128xf32>,
    %64 = arith.truncf %56 : vector<8x128xf32> to vector<8x128xbf16>
    %cst_23 = arith.constant dense<0.000000e+00> : vector<8x384xf32>
    %65 = tpu.matmul %64, %11, %cst_23 {dimension_numbers = #tpu.dot_dimension_numbers<[1], [0], [0], [1], [0, 0, 1, 1], [], []>} : vector<8x128xbf16>, vector<128x384xbf16>, vector<8x384xf32> -> vector<8x384xf32>
    %66 = vector.extract_strided_slice %10 {offsets = [1, 0, 0], sizes = [1, 8, 384], strides = [1, 1, 1]} : vector<16x8x384xf32> to vector<1x8x384xf32>
    %67 = vector.shape_cast %66 : vector<1x8x384xf32> to vector<8x384xf32>
    %68 = vector.extract_strided_slice %67 {offsets = [0, 0], sizes = [8, 128], strides = [1, 1]} : vector<8x384xf32> to vector<8x128xf32>
    %69 = vector.extract_strided_slice %65 {offsets = [0, 0], sizes = [8, 128], strides = [1, 1]} : vector<8x384xf32> to vector<8x128xf32>
    %70 = arith.addf %68, %69 : vector<8x128xf32>
    %71 = arith.negf %70 : vector<8x128xf32>
    %72 = math.exp %71 : vector<8x128xf32>
    %cst_24 = arith.constant 1.000000e+00 : f32
    %73 = vector.broadcast %cst_24 : f32 to vector<8x128xf32>
    %74 = arith.addf %73, %72 : vector<8x128xf32>
    %75 = arith.divf %73, %74 : vector<8x128xf32>
    %76 = vector.extract_strided_slice %67 {offsets = [0, 128], sizes = [8, 128], strides = [1, 1]} : vector<8x384xf32> to vector<8x128xf32>
    %77 = vector.extract_strided_slice %65 {offsets = [0, 128], sizes = [8, 128], strides = [1, 1]} : vector<8x384xf32> to vector<8x128xf32>
    %78 = arith.addf %76, %77 : vector<8x128xf32>
    %79 = arith.negf %78 : vector<8x128xf32>
    %80 = math.exp %79 : vector<8x128xf32>
    %cst_25 = arith.constant 1.000000e+00 : f32
    %81 = vector.broadcast %cst_25 : f32 to vector<8x128xf32>
    %82 = arith.addf %81, %80 : vector<8x128xf32>
    %83 = arith.divf %81, %82 : vector<8x128xf32>
    %84 = vector.extract_strided_slice %67 {offsets = [0, 256], sizes = [8, 128], strides = [1, 1]} : vector<8x384xf32> to vector<8x128xf32>
    %85 = vector.extract_strided_slice %65 {offsets = [0, 256], sizes = [8, 128], strides = [1, 1]} : vector<8x384xf32> to vector<8x128xf32>
    %86 = vector.broadcast %12 : vector<1x128xf32> to vector<8x128xf32>
    %87 = arith.addf %85, %86 : vector<8x128xf32>
    %88 = arith.mulf %75, %87 : vector<8x128xf32>
    %89 = arith.addf %84, %88 : vector<8x128xf32>
    %90 = math.tanh %89 : vector<8x128xf32>
    %cst_26 = arith.constant 1.000000e+00 : f32
    %91 = vector.broadcast %cst_26 : f32 to vector<8x128xf32>
    %92 = arith.subf %91, %83 : vector<8x128xf32>
    %93 = arith.mulf %92, %90 : vector<8x128xf32>
    %94 = arith.mulf %83, %56 : vector<8x128xf32>
    %95 = arith.addf %93, %94 : vector<8x128xf32>
    %96 = vector.extract_strided_slice %19 {offsets = [0, 1], sizes = [8, 1], strides = [1, 1]} : vector<8x16xi1> to vector<8x1xi1>
    %97 = vector.shape_cast %96 : vector<8x1xi1> to vector<8x1xi1>
    %98 = vector.broadcast %97 : vector<8x1xi1> to vector<8x128xi1>
    %99 = arith.select %98, %95, %56 : vector<8x128xi1>, vector<8x128xf32>
    %cst_27 = arith.constant 0.000000e+00 : f32
    %100 = vector.shape_cast %96 : vector<8x1xi1> to vector<8x1xi1>
    %101 = vector.broadcast %100 : vector<8x1xi1> to vector<8x128xi1>
    %102 = vector.broadcast %cst_27 : f32 to vector<8x128xf32>
    %103 = arith.select %101, %99, %102 : vector<8x128xi1>, vector<8x128xf32>
    %c1 = arith.constant 1 : index
    %c0_28 = arith.constant 0 : index
    %c0_29 = arith.constant 0 : index
    %104 = vector.load %arg7[%c1, %c0_28, %c0_29] : memref<16x8x128xf32, #tpu.memory_space<vmem>>, vector<1x8x128xf32>
    %105 = vector.shape_cast %104 : vector<1x8x128xf32> to vector<8x128xf32>
    %106 = vector.shape_cast %103 : vector<8x128xf32> to vector<1x8x128xf32>
    tpu.vector_store %arg7[%c1, %c0_28, %c0_29], %106 {strides = array<i32>} : memref<16x8x128xf32, #tpu.memory_space<vmem>>, vector<1x8x128xf32>,
    %107 = arith.truncf %99 : vector<8x128xf32> to vector<8x128xbf16>
    %cst_30 = arith.constant dense<0.000000e+00> : vector<8x384xf32>
    %108 = tpu.matmul %107, %11, %cst_30 {dimension_numbers = #tpu.dot_dimension_numbers<[1], [0], [0], [1], [0, 0, 1, 1], [], []>} : vector<8x128xbf16>, vector<128x384xbf16>, vector<8x384xf32> -> vector<8x384xf32>
    %109 = vector.extract_strided_slice %10 {offsets = [2, 0, 0], sizes = [1, 8, 384], strides = [1, 1, 1]} : vector<16x8x384xf32> to vector<1x8x384xf32>
    %110 = vector.shape_cast %109 : vector<1x8x384xf32> to vector<8x384xf32>
    %111 = vector.extract_strided_slice %110 {offsets = [0, 0], sizes = [8, 128], strides = [1, 1]} : vector<8x384xf32> to vector<8x128xf32>
    %112 = vector.extract_strided_slice %108 {offsets = [0, 0], sizes = [8, 128], strides = [1, 1]} : vector<8x384xf32> to vector<8x128xf32>
    %113 = arith.addf %111, %112 : vector<8x128xf32>
    %114 = arith.negf %113 : vector<8x128xf32>
    %115 = math.exp %114 : vector<8x128xf32>
    %cst_31 = arith.constant 1.000000e+00 : f32
    %116 = vector.broadcast %cst_31 : f32 to vector<8x128xf32>
    %117 = arith.addf %116, %115 : vector<8x128xf32>
    %118 = arith.divf %116, %117 : vector<8x128xf32>
    %119 = vector.extract_strided_slice %110 {offsets = [0, 128], sizes = [8, 128], strides = [1, 1]} : vector<8x384xf32> to vector<8x128xf32>
    %120 = vector.extract_strided_slice %108 {offsets = [0, 128], sizes = [8, 128], strides = [1, 1]} : vector<8x384xf32> to vector<8x128xf32>
    %121 = arith.addf %119, %120 : vector<8x128xf32>
    %122 = arith.negf %121 : vector<8x128xf32>
    %123 = math.exp %122 : vector<8x128xf32>
    %cst_32 = arith.constant 1.000000e+00 : f32
    %124 = vector.broadcast %cst_32 : f32 to vector<8x128xf32>
    %125 = arith.addf %124, %123 : vector<8x128xf32>
    %126 = arith.divf %124, %125 : vector<8x128xf32>
    %127 = vector.extract_strided_slice %110 {offsets = [0, 256], sizes = [8, 128], strides = [1, 1]} : vector<8x384xf32> to vector<8x128xf32>
    %128 = vector.extract_strided_slice %108 {offsets = [0, 256], sizes = [8, 128], strides = [1, 1]} : vector<8x384xf32> to vector<8x128xf32>
    %129 = vector.broadcast %12 : vector<1x128xf32> to vector<8x128xf32>
    %130 = arith.addf %128, %129 : vector<8x128xf32>
    %131 = arith.mulf %118, %130 : vector<8x128xf32>
    %132 = arith.addf %127, %131 : vector<8x128xf32>
    %133 = math.tanh %132 : vector<8x128xf32>
    %cst_33 = arith.constant 1.000000e+00 : f32
    %134 = vector.broadcast %cst_33 : f32 to vector<8x128xf32>
    %135 = arith.subf %134, %126 : vector<8x128xf32>
    %136 = arith.mulf %135, %133 : vector<8x128xf32>
    %137 = arith.mulf %126, %99 : vector<8x128xf32>
    %138 = arith.addf %136, %137 : vector<8x128xf32>
    %139 = vector.extract_strided_slice %19 {offsets = [0, 2], sizes = [8, 1], strides = [1, 1]} : vector<8x16xi1> to vector<8x1xi1>
    %140 = vector.shape_cast %139 : vector<8x1xi1> to vector<8x1xi1>
    %141 = vector.broadcast %140 : vector<8x1xi1> to vector<8x128xi1>
    %142 = arith.select %141, %138, %99 : vector<8x128xi1>, vector<8x128xf32>
    %cst_34 = arith.constant 0.000000e+00 : f32
    %143 = vector.shape_cast %139 : vector<8x1xi1> to vector<8x1xi1>
    %144 = vector.broadcast %143 : vector<8x1xi1> to vector<8x128xi1>
    %145 = vector.broadcast %cst_34 : f32 to vector<8x128xf32>
    %146 = arith.select %144, %142, %145 : vector<8x128xi1>, vector<8x128xf32>
    %c2 = arith.constant 2 : index
    %c0_35 = arith.constant 0 : index
    %c0_36 = arith.constant 0 : index
    %147 = vector.load %arg7[%c2, %c0_35, %c0_36] : memref<16x8x128xf32, #tpu.memory_space<vmem>>, vector<1x8x128xf32>
    %148 = vector.shape_cast %147 : vector<1x8x128xf32> to vector<8x128xf32>
    %149 = vector.shape_cast %146 : vector<8x128xf32> to vector<1x8x128xf32>
    tpu.vector_store %arg7[%c2, %c0_35, %c0_36], %149 {strides = array<i32>} : memref<16x8x128xf32, #tpu.memory_space<vmem>>, vector<1x8x128xf32>,
    %150 = arith.truncf %142 : vector<8x128xf32> to vector<8x128xbf16>
    %cst_37 = arith.constant dense<0.000000e+00> : vector<8x384xf32>
    %151 = tpu.matmul %150, %11, %cst_37 {dimension_numbers = #tpu.dot_dimension_numbers<[1], [0], [0], [1], [0, 0, 1, 1], [], []>} : vector<8x128xbf16>, vector<128x384xbf16>, vector<8x384xf32> -> vector<8x384xf32>
    %152 = vector.extract_strided_slice %10 {offsets = [3, 0, 0], sizes = [1, 8, 384], strides = [1, 1, 1]} : vector<16x8x384xf32> to vector<1x8x384xf32>
    %153 = vector.shape_cast %152 : vector<1x8x384xf32> to vector<8x384xf32>
    %154 = vector.extract_strided_slice %153 {offsets = [0, 0], sizes = [8, 128], strides = [1, 1]} : vector<8x384xf32> to vector<8x128xf32>
    %155 = vector.extract_strided_slice %151 {offsets = [0, 0], sizes = [8, 128], strides = [1, 1]} : vector<8x384xf32> to vector<8x128xf32>
    %156 = arith.addf %154, %155 : vector<8x128xf32>
    %157 = arith.negf %156 : vector<8x128xf32>
    %158 = math.exp %157 : vector<8x128xf32>
    %cst_38 = arith.constant 1.000000e+00 : f32
    %159 = vector.broadcast %cst_38 : f32 to vector<8x128xf32>
    %160 = arith.addf %159, %158 : vector<8x128xf32>
    %161 = arith.divf %159, %160 : vector<8x128xf32>
    %162 = vector.extract_strided_slice %153 {offsets = [0, 128], sizes = [8, 128], strides = [1, 1]} : vector<8x384xf32> to vector<8x128xf32>
    %163 = vector.extract_strided_slice %151 {offsets = [0, 128], sizes = [8, 128], strides = [1, 1]} : vector<8x384xf32> to vector<8x128xf32>
    %164 = arith.addf %162, %163 : vector<8x128xf32>
    %165 = arith.negf %164 : vector<8x128xf32>
    %166 = math.exp %165 : vector<8x128xf32>
    %cst_39 = arith.constant 1.000000e+00 : f32
    %167 = vector.broadcast %cst_39 : f32 to vector<8x128xf32>
    %168 = arith.addf %167, %166 : vector<8x128xf32>
    %169 = arith.divf %167, %168 : vector<8x128xf32>
    %170 = vector.extract_strided_slice %153 {offsets = [0, 256], sizes = [8, 128], strides = [1, 1]} : vector<8x384xf32> to vector<8x128xf32>
    %171 = vector.extract_strided_slice %151 {offsets = [0, 256], sizes = [8, 128], strides = [1, 1]} : vector<8x384xf32> to vector<8x128xf32>
    %172 = vector.broadcast %12 : vector<1x128xf32> to vector<8x128xf32>
    %173 = arith.addf %171, %172 : vector<8x128xf32>
    %174 = arith.mulf %161, %173 : vector<8x128xf32>
    %175 = arith.addf %170, %174 : vector<8x128xf32>
    %176 = math.tanh %175 : vector<8x128xf32>
    %cst_40 = arith.constant 1.000000e+00 : f32
    %177 = vector.broadcast %cst_40 : f32 to vector<8x128xf32>
    %178 = arith.subf %177, %169 : vector<8x128xf32>
    %179 = arith.mulf %178, %176 : vector<8x128xf32>
    %180 = arith.mulf %169, %142 : vector<8x128xf32>
    %181 = arith.addf %179, %180 : vector<8x128xf32>
    %182 = vector.extract_strided_slice %19 {offsets = [0, 3], sizes = [8, 1], strides = [1, 1]} : vector<8x16xi1> to vector<8x1xi1>
    %183 = vector.shape_cast %182 : vector<8x1xi1> to vector<8x1xi1>
    %184 = vector.broadcast %183 : vector<8x1xi1> to vector<8x128xi1>
    %185 = arith.select %184, %181, %142 : vector<8x128xi1>, vector<8x128xf32>
    %cst_41 = arith.constant 0.000000e+00 : f32
    %186 = vector.shape_cast %182 : vector<8x1xi1> to vector<8x1xi1>
    %187 = vector.broadcast %186 : vector<8x1xi1> to vector<8x128xi1>
    %188 = vector.broadcast %cst_41 : f32 to vector<8x128xf32>
    %189 = arith.select %187, %185, %188 : vector<8x128xi1>, vector<8x128xf32>
    %c3 = arith.constant 3 : index
    %c0_42 = arith.constant 0 : index
    %c0_43 = arith.constant 0 : index
    %190 = vector.load %arg7[%c3, %c0_42, %c0_43] : memref<16x8x128xf32, #tpu.memory_space<vmem>>, vector<1x8x128xf32>
    %191 = vector.shape_cast %190 : vector<1x8x128xf32> to vector<8x128xf32>
    %192 = vector.shape_cast %189 : vector<8x128xf32> to vector<1x8x128xf32>
    tpu.vector_store %arg7[%c3, %c0_42, %c0_43], %192 {strides = array<i32>} : memref<16x8x128xf32, #tpu.memory_space<vmem>>, vector<1x8x128xf32>,
    %193 = arith.truncf %185 : vector<8x128xf32> to vector<8x128xbf16>
    %cst_44 = arith.constant dense<0.000000e+00> : vector<8x384xf32>
    %194 = tpu.matmul %193, %11, %cst_44 {dimension_numbers = #tpu.dot_dimension_numbers<[1], [0], [0], [1], [0, 0, 1, 1], [], []>} : vector<8x128xbf16>, vector<128x384xbf16>, vector<8x384xf32> -> vector<8x384xf32>
    %195 = vector.extract_strided_slice %10 {offsets = [4, 0, 0], sizes = [1, 8, 384], strides = [1, 1, 1]} : vector<16x8x384xf32> to vector<1x8x384xf32>
    %196 = vector.shape_cast %195 : vector<1x8x384xf32> to vector<8x384xf32>
    %197 = vector.extract_strided_slice %196 {offsets = [0, 0], sizes = [8, 128], strides = [1, 1]} : vector<8x384xf32> to vector<8x128xf32>
    %198 = vector.extract_strided_slice %194 {offsets = [0, 0], sizes = [8, 128], strides = [1, 1]} : vector<8x384xf32> to vector<8x128xf32>
    %199 = arith.addf %197, %198 : vector<8x128xf32>
    %200 = arith.negf %199 : vector<8x128xf32>
    %201 = math.exp %200 : vector<8x128xf32>
    %cst_45 = arith.constant 1.000000e+00 : f32
    %202 = vector.broadcast %cst_45 : f32 to vector<8x128xf32>
    %203 = arith.addf %202, %201 : vector<8x128xf32>
    %204 = arith.divf %202, %203 : vector<8x128xf32>
    %205 = vector.extract_strided_slice %196 {offsets = [0, 128], sizes = [8, 128], strides = [1, 1]} : vector<8x384xf32> to vector<8x128xf32>
    %206 = vector.extract_strided_slice %194 {offsets = [0, 128], sizes = [8, 128], strides = [1, 1]} : vector<8x384xf32> to vector<8x128xf32>
    %207 = arith.addf %205, %206 : vector<8x128xf32>
    %208 = arith.negf %207 : vector<8x128xf32>
    %209 = math.exp %208 : vector<8x128xf32>
    %cst_46 = arith.constant 1.000000e+00 : f32
    %210 = vector.broadcast %cst_46 : f32 to vector<8x128xf32>
    %211 = arith.addf %210, %209 : vector<8x128xf32>
    %212 = arith.divf %210, %211 : vector<8x128xf32>
    %213 = vector.extract_strided_slice %196 {offsets = [0, 256], sizes = [8, 128], strides = [1, 1]} : vector<8x384xf32> to vector<8x128xf32>
    %214 = vector.extract_strided_slice %194 {offsets = [0, 256], sizes = [8, 128], strides = [1, 1]} : vector<8x384xf32> to vector<8x128xf32>
    %215 = vector.broadcast %12 : vector<1x128xf32> to vector<8x128xf32>
    %216 = arith.addf %214, %215 : vector<8x128xf32>
    %217 = arith.mulf %204, %216 : vector<8x128xf32>
    %218 = arith.addf %213, %217 : vector<8x128xf32>
    %219 = math.tanh %218 : vector<8x128xf32>
    %cst_47 = arith.constant 1.000000e+00 : f32
    %220 = vector.broadcast %cst_47 : f32 to vector<8x128xf32>
    %221 = arith.subf %220, %212 : vector<8x128xf32>
    %222 = arith.mulf %221, %219 : vector<8x128xf32>
    %223 = arith.mulf %212, %185 : vector<8x128xf32>
    %224 = arith.addf %222, %223 : vector<8x128xf32>
    %225 = vector.extract_strided_slice %19 {offsets = [0, 4], sizes = [8, 1], strides = [1, 1]} : vector<8x16xi1> to vector<8x1xi1>
    %226 = vector.shape_cast %225 : vector<8x1xi1> to vector<8x1xi1>
    %227 = vector.broadcast %226 : vector<8x1xi1> to vector<8x128xi1>
    %228 = arith.select %227, %224, %185 : vector<8x128xi1>, vector<8x128xf32>
    %cst_48 = arith.constant 0.000000e+00 : f32
    %229 = vector.shape_cast %225 : vector<8x1xi1> to vector<8x1xi1>
    %230 = vector.broadcast %229 : vector<8x1xi1> to vector<8x128xi1>
    %231 = vector.broadcast %cst_48 : f32 to vector<8x128xf32>
    %232 = arith.select %230, %228, %231 : vector<8x128xi1>, vector<8x128xf32>
    %c4 = arith.constant 4 : index
    %c0_49 = arith.constant 0 : index
    %c0_50 = arith.constant 0 : index
    %233 = vector.load %arg7[%c4, %c0_49, %c0_50] : memref<16x8x128xf32, #tpu.memory_space<vmem>>, vector<1x8x128xf32>
    %234 = vector.shape_cast %233 : vector<1x8x128xf32> to vector<8x128xf32>
    %235 = vector.shape_cast %232 : vector<8x128xf32> to vector<1x8x128xf32>
    tpu.vector_store %arg7[%c4, %c0_49, %c0_50], %235 {strides = array<i32>} : memref<16x8x128xf32, #tpu.memory_space<vmem>>, vector<1x8x128xf32>,
    %236 = arith.truncf %228 : vector<8x128xf32> to vector<8x128xbf16>
    %cst_51 = arith.constant dense<0.000000e+00> : vector<8x384xf32>
    %237 = tpu.matmul %236, %11, %cst_51 {dimension_numbers = #tpu.dot_dimension_numbers<[1], [0], [0], [1], [0, 0, 1, 1], [], []>} : vector<8x128xbf16>, vector<128x384xbf16>, vector<8x384xf32> -> vector<8x384xf32>
    %238 = vector.extract_strided_slice %10 {offsets = [5, 0, 0], sizes = [1, 8, 384], strides = [1, 1, 1]} : vector<16x8x384xf32> to vector<1x8x384xf32>
    %239 = vector.shape_cast %238 : vector<1x8x384xf32> to vector<8x384xf32>
    %240 = vector.extract_strided_slice %239 {offsets = [0, 0], sizes = [8, 128], strides = [1, 1]} : vector<8x384xf32> to vector<8x128xf32>
    %241 = vector.extract_strided_slice %237 {offsets = [0, 0], sizes = [8, 128], strides = [1, 1]} : vector<8x384xf32> to vector<8x128xf32>
    %242 = arith.addf %240, %241 : vector<8x128xf32>
    %243 = arith.negf %242 : vector<8x128xf32>
    %244 = math.exp %243 : vector<8x128xf32>
    %cst_52 = arith.constant 1.000000e+00 : f32
    %245 = vector.broadcast %cst_52 : f32 to vector<8x128xf32>
    %246 = arith.addf %245, %244 : vector<8x128xf32>
    %247 = arith.divf %245, %246 : vector<8x128xf32>
    %248 = vector.extract_strided_slice %239 {offsets = [0, 128], sizes = [8, 128], strides = [1, 1]} : vector<8x384xf32> to vector<8x128xf32>
    %249 = vector.extract_strided_slice %237 {offsets = [0, 128], sizes = [8, 128], strides = [1, 1]} : vector<8x384xf32> to vector<8x128xf32>
    %250 = arith.addf %248, %249 : vector<8x128xf32>
    %251 = arith.negf %250 : vector<8x128xf32>
    %252 = math.exp %251 : vector<8x128xf32>
    %cst_53 = arith.constant 1.000000e+00 : f32
    %253 = vector.broadcast %cst_53 : f32 to vector<8x128xf32>
    %254 = arith.addf %253, %252 : vector<8x128xf32>
    %255 = arith.divf %253, %254 : vector<8x128xf32>
    %256 = vector.extract_strided_slice %239 {offsets = [0, 256], sizes = [8, 128], strides = [1, 1]} : vector<8x384xf32> to vector<8x128xf32>
    %257 = vector.extract_strided_slice %237 {offsets = [0, 256], sizes = [8, 128], strides = [1, 1]} : vector<8x384xf32> to vector<8x128xf32>
    %258 = vector.broadcast %12 : vector<1x128xf32> to vector<8x128xf32>
    %259 = arith.addf %257, %258 : vector<8x128xf32>
    %260 = arith.mulf %247, %259 : vector<8x128xf32>
    %261 = arith.addf %256, %260 : vector<8x128xf32>
    %262 = math.tanh %261 : vector<8x128xf32>
    %cst_54 = arith.constant 1.000000e+00 : f32
    %263 = vector.broadcast %cst_54 : f32 to vector<8x128xf32>
    %264 = arith.subf %263, %255 : vector<8x128xf32>
    %265 = arith.mulf %264, %262 : vector<8x128xf32>
    %266 = arith.mulf %255, %228 : vector<8x128xf32>
    %267 = arith.addf %265, %266 : vector<8x128xf32>
    %268 = vector.extract_strided_slice %19 {offsets = [0, 5], sizes = [8, 1], strides = [1, 1]} : vector<8x16xi1> to vector<8x1xi1>
    %269 = vector.shape_cast %268 : vector<8x1xi1> to vector<8x1xi1>
    %270 = vector.broadcast %269 : vector<8x1xi1> to vector<8x128xi1>
    %271 = arith.select %270, %267, %228 : vector<8x128xi1>, vector<8x128xf32>
    %cst_55 = arith.constant 0.000000e+00 : f32
    %272 = vector.shape_cast %268 : vector<8x1xi1> to vector<8x1xi1>
    %273 = vector.broadcast %272 : vector<8x1xi1> to vector<8x128xi1>
    %274 = vector.broadcast %cst_55 : f32 to vector<8x128xf32>
    %275 = arith.select %273, %271, %274 : vector<8x128xi1>, vector<8x128xf32>
    %c5 = arith.constant 5 : index
    %c0_56 = arith.constant 0 : index
    %c0_57 = arith.constant 0 : index
    %276 = vector.load %arg7[%c5, %c0_56, %c0_57] : memref<16x8x128xf32, #tpu.memory_space<vmem>>, vector<1x8x128xf32>
    %277 = vector.shape_cast %276 : vector<1x8x128xf32> to vector<8x128xf32>
    %278 = vector.shape_cast %275 : vector<8x128xf32> to vector<1x8x128xf32>
    tpu.vector_store %arg7[%c5, %c0_56, %c0_57], %278 {strides = array<i32>} : memref<16x8x128xf32, #tpu.memory_space<vmem>>, vector<1x8x128xf32>,
    %279 = arith.truncf %271 : vector<8x128xf32> to vector<8x128xbf16>
    %cst_58 = arith.constant dense<0.000000e+00> : vector<8x384xf32>
    %280 = tpu.matmul %279, %11, %cst_58 {dimension_numbers = #tpu.dot_dimension_numbers<[1], [0], [0], [1], [0, 0, 1, 1], [], []>} : vector<8x128xbf16>, vector<128x384xbf16>, vector<8x384xf32> -> vector<8x384xf32>
    %281 = vector.extract_strided_slice %10 {offsets = [6, 0, 0], sizes = [1, 8, 384], strides = [1, 1, 1]} : vector<16x8x384xf32> to vector<1x8x384xf32>
    %282 = vector.shape_cast %281 : vector<1x8x384xf32> to vector<8x384xf32>
    %283 = vector.extract_strided_slice %282 {offsets = [0, 0], sizes = [8, 128], strides = [1, 1]} : vector<8x384xf32> to vector<8x128xf32>
    %284 = vector.extract_strided_slice %280 {offsets = [0, 0], sizes = [8, 128], strides = [1, 1]} : vector<8x384xf32> to vector<8x128xf32>
    %285 = arith.addf %283, %284 : vector<8x128xf32>
    %286 = arith.negf %285 : vector<8x128xf32>
    %287 = math.exp %286 : vector<8x128xf32>
    %cst_59 = arith.constant 1.000000e+00 : f32
    %288 = vector.broadcast %cst_59 : f32 to vector<8x128xf32>
    %289 = arith.addf %288, %287 : vector<8x128xf32>
    %290 = arith.divf %288, %289 : vector<8x128xf32>
    %291 = vector.extract_strided_slice %282 {offsets = [0, 128], sizes = [8, 128], strides = [1, 1]} : vector<8x384xf32> to vector<8x128xf32>
    %292 = vector.extract_strided_slice %280 {offsets = [0, 128], sizes = [8, 128], strides = [1, 1]} : vector<8x384xf32> to vector<8x128xf32>
    %293 = arith.addf %291, %292 : vector<8x128xf32>
    %294 = arith.negf %293 : vector<8x128xf32>
    %295 = math.exp %294 : vector<8x128xf32>
    %cst_60 = arith.constant 1.000000e+00 : f32
    %296 = vector.broadcast %cst_60 : f32 to vector<8x128xf32>
    %297 = arith.addf %296, %295 : vector<8x128xf32>
    %298 = arith.divf %296, %297 : vector<8x128xf32>
    %299 = vector.extract_strided_slice %282 {offsets = [0, 256], sizes = [8, 128], strides = [1, 1]} : vector<8x384xf32> to vector<8x128xf32>
    %300 = vector.extract_strided_slice %280 {offsets = [0, 256], sizes = [8, 128], strides = [1, 1]} : vector<8x384xf32> to vector<8x128xf32>
    %301 = vector.broadcast %12 : vector<1x128xf32> to vector<8x128xf32>
    %302 = arith.addf %300, %301 : vector<8x128xf32>
    %303 = arith.mulf %290, %302 : vector<8x128xf32>
    %304 = arith.addf %299, %303 : vector<8x128xf32>
    %305 = math.tanh %304 : vector<8x128xf32>
    %cst_61 = arith.constant 1.000000e+00 : f32
    %306 = vector.broadcast %cst_61 : f32 to vector<8x128xf32>
    %307 = arith.subf %306, %298 : vector<8x128xf32>
    %308 = arith.mulf %307, %305 : vector<8x128xf32>
    %309 = arith.mulf %298, %271 : vector<8x128xf32>
    %310 = arith.addf %308, %309 : vector<8x128xf32>
    %311 = vector.extract_strided_slice %19 {offsets = [0, 6], sizes = [8, 1], strides = [1, 1]} : vector<8x16xi1> to vector<8x1xi1>
    %312 = vector.shape_cast %311 : vector<8x1xi1> to vector<8x1xi1>
    %313 = vector.broadcast %312 : vector<8x1xi1> to vector<8x128xi1>
    %314 = arith.select %313, %310, %271 : vector<8x128xi1>, vector<8x128xf32>
    %cst_62 = arith.constant 0.000000e+00 : f32
    %315 = vector.shape_cast %311 : vector<8x1xi1> to vector<8x1xi1>
    %316 = vector.broadcast %315 : vector<8x1xi1> to vector<8x128xi1>
    %317 = vector.broadcast %cst_62 : f32 to vector<8x128xf32>
    %318 = arith.select %316, %314, %317 : vector<8x128xi1>, vector<8x128xf32>
    %c6 = arith.constant 6 : index
    %c0_63 = arith.constant 0 : index
    %c0_64 = arith.constant 0 : index
    %319 = vector.load %arg7[%c6, %c0_63, %c0_64] : memref<16x8x128xf32, #tpu.memory_space<vmem>>, vector<1x8x128xf32>
    %320 = vector.shape_cast %319 : vector<1x8x128xf32> to vector<8x128xf32>
    %321 = vector.shape_cast %318 : vector<8x128xf32> to vector<1x8x128xf32>
    tpu.vector_store %arg7[%c6, %c0_63, %c0_64], %321 {strides = array<i32>} : memref<16x8x128xf32, #tpu.memory_space<vmem>>, vector<1x8x128xf32>,
    %322 = arith.truncf %314 : vector<8x128xf32> to vector<8x128xbf16>
    %cst_65 = arith.constant dense<0.000000e+00> : vector<8x384xf32>
    %323 = tpu.matmul %322, %11, %cst_65 {dimension_numbers = #tpu.dot_dimension_numbers<[1], [0], [0], [1], [0, 0, 1, 1], [], []>} : vector<8x128xbf16>, vector<128x384xbf16>, vector<8x384xf32> -> vector<8x384xf32>
    %324 = vector.extract_strided_slice %10 {offsets = [7, 0, 0], sizes = [1, 8, 384], strides = [1, 1, 1]} : vector<16x8x384xf32> to vector<1x8x384xf32>
    %325 = vector.shape_cast %324 : vector<1x8x384xf32> to vector<8x384xf32>
    %326 = vector.extract_strided_slice %325 {offsets = [0, 0], sizes = [8, 128], strides = [1, 1]} : vector<8x384xf32> to vector<8x128xf32>
    %327 = vector.extract_strided_slice %323 {offsets = [0, 0], sizes = [8, 128], strides = [1, 1]} : vector<8x384xf32> to vector<8x128xf32>
    %328 = arith.addf %326, %327 : vector<8x128xf32>
    %329 = arith.negf %328 : vector<8x128xf32>
    %330 = math.exp %329 : vector<8x128xf32>
    %cst_66 = arith.constant 1.000000e+00 : f32
    %331 = vector.broadcast %cst_66 : f32 to vector<8x128xf32>
    %332 = arith.addf %331, %330 : vector<8x128xf32>
    %333 = arith.divf %331, %332 : vector<8x128xf32>
    %334 = vector.extract_strided_slice %325 {offsets = [0, 128], sizes = [8, 128], strides = [1, 1]} : vector<8x384xf32> to vector<8x128xf32>
    %335 = vector.extract_strided_slice %323 {offsets = [0, 128], sizes = [8, 128], strides = [1, 1]} : vector<8x384xf32> to vector<8x128xf32>
    %336 = arith.addf %334, %335 : vector<8x128xf32>
    %337 = arith.negf %336 : vector<8x128xf32>
    %338 = math.exp %337 : vector<8x128xf32>
    %cst_67 = arith.constant 1.000000e+00 : f32
    %339 = vector.broadcast %cst_67 : f32 to vector<8x128xf32>
    %340 = arith.addf %339, %338 : vector<8x128xf32>
    %341 = arith.divf %339, %340 : vector<8x128xf32>
    %342 = vector.extract_strided_slice %325 {offsets = [0, 256], sizes = [8, 128], strides = [1, 1]} : vector<8x384xf32> to vector<8x128xf32>
    %343 = vector.extract_strided_slice %323 {offsets = [0, 256], sizes = [8, 128], strides = [1, 1]} : vector<8x384xf32> to vector<8x128xf32>
    %344 = vector.broadcast %12 : vector<1x128xf32> to vector<8x128xf32>
    %345 = arith.addf %343, %344 : vector<8x128xf32>
    %346 = arith.mulf %333, %345 : vector<8x128xf32>
    %347 = arith.addf %342, %346 : vector<8x128xf32>
    %348 = math.tanh %347 : vector<8x128xf32>
    %cst_68 = arith.constant 1.000000e+00 : f32
    %349 = vector.broadcast %cst_68 : f32 to vector<8x128xf32>
    %350 = arith.subf %349, %341 : vector<8x128xf32>
    %351 = arith.mulf %350, %348 : vector<8x128xf32>
    %352 = arith.mulf %341, %314 : vector<8x128xf32>
    %353 = arith.addf %351, %352 : vector<8x128xf32>
    %354 = vector.extract_strided_slice %19 {offsets = [0, 7], sizes = [8, 1], strides = [1, 1]} : vector<8x16xi1> to vector<8x1xi1>
    %355 = vector.shape_cast %354 : vector<8x1xi1> to vector<8x1xi1>
    %356 = vector.broadcast %355 : vector<8x1xi1> to vector<8x128xi1>
    %357 = arith.select %356, %353, %314 : vector<8x128xi1>, vector<8x128xf32>
    %cst_69 = arith.constant 0.000000e+00 : f32
    %358 = vector.shape_cast %354 : vector<8x1xi1> to vector<8x1xi1>
    %359 = vector.broadcast %358 : vector<8x1xi1> to vector<8x128xi1>
    %360 = vector.broadcast %cst_69 : f32 to vector<8x128xf32>
    %361 = arith.select %359, %357, %360 : vector<8x128xi1>, vector<8x128xf32>
    %c7 = arith.constant 7 : index
    %c0_70 = arith.constant 0 : index
    %c0_71 = arith.constant 0 : index
    %362 = vector.load %arg7[%c7, %c0_70, %c0_71] : memref<16x8x128xf32, #tpu.memory_space<vmem>>, vector<1x8x128xf32>
    %363 = vector.shape_cast %362 : vector<1x8x128xf32> to vector<8x128xf32>
    %364 = vector.shape_cast %361 : vector<8x128xf32> to vector<1x8x128xf32>
    tpu.vector_store %arg7[%c7, %c0_70, %c0_71], %364 {strides = array<i32>} : memref<16x8x128xf32, #tpu.memory_space<vmem>>, vector<1x8x128xf32>,
    %365 = arith.truncf %357 : vector<8x128xf32> to vector<8x128xbf16>
    %cst_72 = arith.constant dense<0.000000e+00> : vector<8x384xf32>
    %366 = tpu.matmul %365, %11, %cst_72 {dimension_numbers = #tpu.dot_dimension_numbers<[1], [0], [0], [1], [0, 0, 1, 1], [], []>} : vector<8x128xbf16>, vector<128x384xbf16>, vector<8x384xf32> -> vector<8x384xf32>
    %367 = vector.extract_strided_slice %10 {offsets = [8, 0, 0], sizes = [1, 8, 384], strides = [1, 1, 1]} : vector<16x8x384xf32> to vector<1x8x384xf32>
    %368 = vector.shape_cast %367 : vector<1x8x384xf32> to vector<8x384xf32>
    %369 = vector.extract_strided_slice %368 {offsets = [0, 0], sizes = [8, 128], strides = [1, 1]} : vector<8x384xf32> to vector<8x128xf32>
    %370 = vector.extract_strided_slice %366 {offsets = [0, 0], sizes = [8, 128], strides = [1, 1]} : vector<8x384xf32> to vector<8x128xf32>
    %371 = arith.addf %369, %370 : vector<8x128xf32>
    %372 = arith.negf %371 : vector<8x128xf32>
    %373 = math.exp %372 : vector<8x128xf32>
    %cst_73 = arith.constant 1.000000e+00 : f32
    %374 = vector.broadcast %cst_73 : f32 to vector<8x128xf32>
    %375 = arith.addf %374, %373 : vector<8x128xf32>
    %376 = arith.divf %374, %375 : vector<8x128xf32>
    %377 = vector.extract_strided_slice %368 {offsets = [0, 128], sizes = [8, 128], strides = [1, 1]} : vector<8x384xf32> to vector<8x128xf32>
    %378 = vector.extract_strided_slice %366 {offsets = [0, 128], sizes = [8, 128], strides = [1, 1]} : vector<8x384xf32> to vector<8x128xf32>
    %379 = arith.addf %377, %378 : vector<8x128xf32>
    %380 = arith.negf %379 : vector<8x128xf32>
    %381 = math.exp %380 : vector<8x128xf32>
    %cst_74 = arith.constant 1.000000e+00 : f32
    %382 = vector.broadcast %cst_74 : f32 to vector<8x128xf32>
    %383 = arith.addf %382, %381 : vector<8x128xf32>
    %384 = arith.divf %382, %383 : vector<8x128xf32>
    %385 = vector.extract_strided_slice %368 {offsets = [0, 256], sizes = [8, 128], strides = [1, 1]} : vector<8x384xf32> to vector<8x128xf32>
    %386 = vector.extract_strided_slice %366 {offsets = [0, 256], sizes = [8, 128], strides = [1, 1]} : vector<8x384xf32> to vector<8x128xf32>
    %387 = vector.broadcast %12 : vector<1x128xf32> to vector<8x128xf32>
    %388 = arith.addf %386, %387 : vector<8x128xf32>
    %389 = arith.mulf %376, %388 : vector<8x128xf32>
    %390 = arith.addf %385, %389 : vector<8x128xf32>
    %391 = math.tanh %390 : vector<8x128xf32>
    %cst_75 = arith.constant 1.000000e+00 : f32
    %392 = vector.broadcast %cst_75 : f32 to vector<8x128xf32>
    %393 = arith.subf %392, %384 : vector<8x128xf32>
    %394 = arith.mulf %393, %391 : vector<8x128xf32>
    %395 = arith.mulf %384, %357 : vector<8x128xf32>
    %396 = arith.addf %394, %395 : vector<8x128xf32>
    %397 = vector.extract_strided_slice %19 {offsets = [0, 8], sizes = [8, 1], strides = [1, 1]} : vector<8x16xi1> to vector<8x1xi1>
    %398 = vector.shape_cast %397 : vector<8x1xi1> to vector<8x1xi1>
    %399 = vector.broadcast %398 : vector<8x1xi1> to vector<8x128xi1>
    %400 = arith.select %399, %396, %357 : vector<8x128xi1>, vector<8x128xf32>
    %cst_76 = arith.constant 0.000000e+00 : f32
    %401 = vector.shape_cast %397 : vector<8x1xi1> to vector<8x1xi1>
    %402 = vector.broadcast %401 : vector<8x1xi1> to vector<8x128xi1>
    %403 = vector.broadcast %cst_76 : f32 to vector<8x128xf32>
    %404 = arith.select %402, %400, %403 : vector<8x128xi1>, vector<8x128xf32>
    %c8 = arith.constant 8 : index
    %c0_77 = arith.constant 0 : index
    %c0_78 = arith.constant 0 : index
    %405 = vector.load %arg7[%c8, %c0_77, %c0_78] : memref<16x8x128xf32, #tpu.memory_space<vmem>>, vector<1x8x128xf32>
    %406 = vector.shape_cast %405 : vector<1x8x128xf32> to vector<8x128xf32>
    %407 = vector.shape_cast %404 : vector<8x128xf32> to vector<1x8x128xf32>
    tpu.vector_store %arg7[%c8, %c0_77, %c0_78], %407 {strides = array<i32>} : memref<16x8x128xf32, #tpu.memory_space<vmem>>, vector<1x8x128xf32>,
    %408 = arith.truncf %400 : vector<8x128xf32> to vector<8x128xbf16>
    %cst_79 = arith.constant dense<0.000000e+00> : vector<8x384xf32>
    %409 = tpu.matmul %408, %11, %cst_79 {dimension_numbers = #tpu.dot_dimension_numbers<[1], [0], [0], [1], [0, 0, 1, 1], [], []>} : vector<8x128xbf16>, vector<128x384xbf16>, vector<8x384xf32> -> vector<8x384xf32>
    %410 = vector.extract_strided_slice %10 {offsets = [9, 0, 0], sizes = [1, 8, 384], strides = [1, 1, 1]} : vector<16x8x384xf32> to vector<1x8x384xf32>
    %411 = vector.shape_cast %410 : vector<1x8x384xf32> to vector<8x384xf32>
    %412 = vector.extract_strided_slice %411 {offsets = [0, 0], sizes = [8, 128], strides = [1, 1]} : vector<8x384xf32> to vector<8x128xf32>
    %413 = vector.extract_strided_slice %409 {offsets = [0, 0], sizes = [8, 128], strides = [1, 1]} : vector<8x384xf32> to vector<8x128xf32>
    %414 = arith.addf %412, %413 : vector<8x128xf32>
    %415 = arith.negf %414 : vector<8x128xf32>
    %416 = math.exp %415 : vector<8x128xf32>
    %cst_80 = arith.constant 1.000000e+00 : f32
    %417 = vector.broadcast %cst_80 : f32 to vector<8x128xf32>
    %418 = arith.addf %417, %416 : vector<8x128xf32>
    %419 = arith.divf %417, %418 : vector<8x128xf32>
    %420 = vector.extract_strided_slice %411 {offsets = [0, 128], sizes = [8, 128], strides = [1, 1]} : vector<8x384xf32> to vector<8x128xf32>
    %421 = vector.extract_strided_slice %409 {offsets = [0, 128], sizes = [8, 128], strides = [1, 1]} : vector<8x384xf32> to vector<8x128xf32>
    %422 = arith.addf %420, %421 : vector<8x128xf32>
    %423 = arith.negf %422 : vector<8x128xf32>
    %424 = math.exp %423 : vector<8x128xf32>
    %cst_81 = arith.constant 1.000000e+00 : f32
    %425 = vector.broadcast %cst_81 : f32 to vector<8x128xf32>
    %426 = arith.addf %425, %424 : vector<8x128xf32>
    %427 = arith.divf %425, %426 : vector<8x128xf32>
    %428 = vector.extract_strided_slice %411 {offsets = [0, 256], sizes = [8, 128], strides = [1, 1]} : vector<8x384xf32> to vector<8x128xf32>
    %429 = vector.extract_strided_slice %409 {offsets = [0, 256], sizes = [8, 128], strides = [1, 1]} : vector<8x384xf32> to vector<8x128xf32>
    %430 = vector.broadcast %12 : vector<1x128xf32> to vector<8x128xf32>
    %431 = arith.addf %429, %430 : vector<8x128xf32>
    %432 = arith.mulf %419, %431 : vector<8x128xf32>
    %433 = arith.addf %428, %432 : vector<8x128xf32>
    %434 = math.tanh %433 : vector<8x128xf32>
    %cst_82 = arith.constant 1.000000e+00 : f32
    %435 = vector.broadcast %cst_82 : f32 to vector<8x128xf32>
    %436 = arith.subf %435, %427 : vector<8x128xf32>
    %437 = arith.mulf %436, %434 : vector<8x128xf32>
    %438 = arith.mulf %427, %400 : vector<8x128xf32>
    %439 = arith.addf %437, %438 : vector<8x128xf32>
    %440 = vector.extract_strided_slice %19 {offsets = [0, 9], sizes = [8, 1], strides = [1, 1]} : vector<8x16xi1> to vector<8x1xi1>
    %441 = vector.shape_cast %440 : vector<8x1xi1> to vector<8x1xi1>
    %442 = vector.broadcast %441 : vector<8x1xi1> to vector<8x128xi1>
    %443 = arith.select %442, %439, %400 : vector<8x128xi1>, vector<8x128xf32>
    %cst_83 = arith.constant 0.000000e+00 : f32
    %444 = vector.shape_cast %440 : vector<8x1xi1> to vector<8x1xi1>
    %445 = vector.broadcast %444 : vector<8x1xi1> to vector<8x128xi1>
    %446 = vector.broadcast %cst_83 : f32 to vector<8x128xf32>
    %447 = arith.select %445, %443, %446 : vector<8x128xi1>, vector<8x128xf32>
    %c9 = arith.constant 9 : index
    %c0_84 = arith.constant 0 : index
    %c0_85 = arith.constant 0 : index
    %448 = vector.load %arg7[%c9, %c0_84, %c0_85] : memref<16x8x128xf32, #tpu.memory_space<vmem>>, vector<1x8x128xf32>
    %449 = vector.shape_cast %448 : vector<1x8x128xf32> to vector<8x128xf32>
    %450 = vector.shape_cast %447 : vector<8x128xf32> to vector<1x8x128xf32>
    tpu.vector_store %arg7[%c9, %c0_84, %c0_85], %450 {strides = array<i32>} : memref<16x8x128xf32, #tpu.memory_space<vmem>>, vector<1x8x128xf32>,
    %451 = arith.truncf %443 : vector<8x128xf32> to vector<8x128xbf16>
    %cst_86 = arith.constant dense<0.000000e+00> : vector<8x384xf32>
    %452 = tpu.matmul %451, %11, %cst_86 {dimension_numbers = #tpu.dot_dimension_numbers<[1], [0], [0], [1], [0, 0, 1, 1], [], []>} : vector<8x128xbf16>, vector<128x384xbf16>, vector<8x384xf32> -> vector<8x384xf32>
    %453 = vector.extract_strided_slice %10 {offsets = [10, 0, 0], sizes = [1, 8, 384], strides = [1, 1, 1]} : vector<16x8x384xf32> to vector<1x8x384xf32>
    %454 = vector.shape_cast %453 : vector<1x8x384xf32> to vector<8x384xf32>
    %455 = vector.extract_strided_slice %454 {offsets = [0, 0], sizes = [8, 128], strides = [1, 1]} : vector<8x384xf32> to vector<8x128xf32>
    %456 = vector.extract_strided_slice %452 {offsets = [0, 0], sizes = [8, 128], strides = [1, 1]} : vector<8x384xf32> to vector<8x128xf32>
    %457 = arith.addf %455, %456 : vector<8x128xf32>
    %458 = arith.negf %457 : vector<8x128xf32>
    %459 = math.exp %458 : vector<8x128xf32>
    %cst_87 = arith.constant 1.000000e+00 : f32
    %460 = vector.broadcast %cst_87 : f32 to vector<8x128xf32>
    %461 = arith.addf %460, %459 : vector<8x128xf32>
    %462 = arith.divf %460, %461 : vector<8x128xf32>
    %463 = vector.extract_strided_slice %454 {offsets = [0, 128], sizes = [8, 128], strides = [1, 1]} : vector<8x384xf32> to vector<8x128xf32>
    %464 = vector.extract_strided_slice %452 {offsets = [0, 128], sizes = [8, 128], strides = [1, 1]} : vector<8x384xf32> to vector<8x128xf32>
    %465 = arith.addf %463, %464 : vector<8x128xf32>
    %466 = arith.negf %465 : vector<8x128xf32>
    %467 = math.exp %466 : vector<8x128xf32>
    %cst_88 = arith.constant 1.000000e+00 : f32
    %468 = vector.broadcast %cst_88 : f32 to vector<8x128xf32>
    %469 = arith.addf %468, %467 : vector<8x128xf32>
    %470 = arith.divf %468, %469 : vector<8x128xf32>
    %471 = vector.extract_strided_slice %454 {offsets = [0, 256], sizes = [8, 128], strides = [1, 1]} : vector<8x384xf32> to vector<8x128xf32>
    %472 = vector.extract_strided_slice %452 {offsets = [0, 256], sizes = [8, 128], strides = [1, 1]} : vector<8x384xf32> to vector<8x128xf32>
    %473 = vector.broadcast %12 : vector<1x128xf32> to vector<8x128xf32>
    %474 = arith.addf %472, %473 : vector<8x128xf32>
    %475 = arith.mulf %462, %474 : vector<8x128xf32>
    %476 = arith.addf %471, %475 : vector<8x128xf32>
    %477 = math.tanh %476 : vector<8x128xf32>
    %cst_89 = arith.constant 1.000000e+00 : f32
    %478 = vector.broadcast %cst_89 : f32 to vector<8x128xf32>
    %479 = arith.subf %478, %470 : vector<8x128xf32>
    %480 = arith.mulf %479, %477 : vector<8x128xf32>
    %481 = arith.mulf %470, %443 : vector<8x128xf32>
    %482 = arith.addf %480, %481 : vector<8x128xf32>
    %483 = vector.extract_strided_slice %19 {offsets = [0, 10], sizes = [8, 1], strides = [1, 1]} : vector<8x16xi1> to vector<8x1xi1>
    %484 = vector.shape_cast %483 : vector<8x1xi1> to vector<8x1xi1>
    %485 = vector.broadcast %484 : vector<8x1xi1> to vector<8x128xi1>
    %486 = arith.select %485, %482, %443 : vector<8x128xi1>, vector<8x128xf32>
    %cst_90 = arith.constant 0.000000e+00 : f32
    %487 = vector.shape_cast %483 : vector<8x1xi1> to vector<8x1xi1>
    %488 = vector.broadcast %487 : vector<8x1xi1> to vector<8x128xi1>
    %489 = vector.broadcast %cst_90 : f32 to vector<8x128xf32>
    %490 = arith.select %488, %486, %489 : vector<8x128xi1>, vector<8x128xf32>
    %c10 = arith.constant 10 : index
    %c0_91 = arith.constant 0 : index
    %c0_92 = arith.constant 0 : index
    %491 = vector.load %arg7[%c10, %c0_91, %c0_92] : memref<16x8x128xf32, #tpu.memory_space<vmem>>, vector<1x8x128xf32>
    %492 = vector.shape_cast %491 : vector<1x8x128xf32> to vector<8x128xf32>
    %493 = vector.shape_cast %490 : vector<8x128xf32> to vector<1x8x128xf32>
    tpu.vector_store %arg7[%c10, %c0_91, %c0_92], %493 {strides = array<i32>} : memref<16x8x128xf32, #tpu.memory_space<vmem>>, vector<1x8x128xf32>,
    %494 = arith.truncf %486 : vector<8x128xf32> to vector<8x128xbf16>
    %cst_93 = arith.constant dense<0.000000e+00> : vector<8x384xf32>
    %495 = tpu.matmul %494, %11, %cst_93 {dimension_numbers = #tpu.dot_dimension_numbers<[1], [0], [0], [1], [0, 0, 1, 1], [], []>} : vector<8x128xbf16>, vector<128x384xbf16>, vector<8x384xf32> -> vector<8x384xf32>
    %496 = vector.extract_strided_slice %10 {offsets = [11, 0, 0], sizes = [1, 8, 384], strides = [1, 1, 1]} : vector<16x8x384xf32> to vector<1x8x384xf32>
    %497 = vector.shape_cast %496 : vector<1x8x384xf32> to vector<8x384xf32>
    %498 = vector.extract_strided_slice %497 {offsets = [0, 0], sizes = [8, 128], strides = [1, 1]} : vector<8x384xf32> to vector<8x128xf32>
    %499 = vector.extract_strided_slice %495 {offsets = [0, 0], sizes = [8, 128], strides = [1, 1]} : vector<8x384xf32> to vector<8x128xf32>
    %500 = arith.addf %498, %499 : vector<8x128xf32>
    %501 = arith.negf %500 : vector<8x128xf32>
    %502 = math.exp %501 : vector<8x128xf32>
    %cst_94 = arith.constant 1.000000e+00 : f32
    %503 = vector.broadcast %cst_94 : f32 to vector<8x128xf32>
    %504 = arith.addf %503, %502 : vector<8x128xf32>
    %505 = arith.divf %503, %504 : vector<8x128xf32>
    %506 = vector.extract_strided_slice %497 {offsets = [0, 128], sizes = [8, 128], strides = [1, 1]} : vector<8x384xf32> to vector<8x128xf32>
    %507 = vector.extract_strided_slice %495 {offsets = [0, 128], sizes = [8, 128], strides = [1, 1]} : vector<8x384xf32> to vector<8x128xf32>
    %508 = arith.addf %506, %507 : vector<8x128xf32>
    %509 = arith.negf %508 : vector<8x128xf32>
    %510 = math.exp %509 : vector<8x128xf32>
    %cst_95 = arith.constant 1.000000e+00 : f32
    %511 = vector.broadcast %cst_95 : f32 to vector<8x128xf32>
    %512 = arith.addf %511, %510 : vector<8x128xf32>
    %513 = arith.divf %511, %512 : vector<8x128xf32>
    %514 = vector.extract_strided_slice %497 {offsets = [0, 256], sizes = [8, 128], strides = [1, 1]} : vector<8x384xf32> to vector<8x128xf32>
    %515 = vector.extract_strided_slice %495 {offsets = [0, 256], sizes = [8, 128], strides = [1, 1]} : vector<8x384xf32> to vector<8x128xf32>
    %516 = vector.broadcast %12 : vector<1x128xf32> to vector<8x128xf32>
    %517 = arith.addf %515, %516 : vector<8x128xf32>
    %518 = arith.mulf %505, %517 : vector<8x128xf32>
    %519 = arith.addf %514, %518 : vector<8x128xf32>
    %520 = math.tanh %519 : vector<8x128xf32>
    %cst_96 = arith.constant 1.000000e+00 : f32
    %521 = vector.broadcast %cst_96 : f32 to vector<8x128xf32>
    %522 = arith.subf %521, %513 : vector<8x128xf32>
    %523 = arith.mulf %522, %520 : vector<8x128xf32>
    %524 = arith.mulf %513, %486 : vector<8x128xf32>
    %525 = arith.addf %523, %524 : vector<8x128xf32>
    %526 = vector.extract_strided_slice %19 {offsets = [0, 11], sizes = [8, 1], strides = [1, 1]} : vector<8x16xi1> to vector<8x1xi1>
    %527 = vector.shape_cast %526 : vector<8x1xi1> to vector<8x1xi1>
    %528 = vector.broadcast %527 : vector<8x1xi1> to vector<8x128xi1>
    %529 = arith.select %528, %525, %486 : vector<8x128xi1>, vector<8x128xf32>
    %cst_97 = arith.constant 0.000000e+00 : f32
    %530 = vector.shape_cast %526 : vector<8x1xi1> to vector<8x1xi1>
    %531 = vector.broadcast %530 : vector<8x1xi1> to vector<8x128xi1>
    %532 = vector.broadcast %cst_97 : f32 to vector<8x128xf32>
    %533 = arith.select %531, %529, %532 : vector<8x128xi1>, vector<8x128xf32>
    %c11 = arith.constant 11 : index
    %c0_98 = arith.constant 0 : index
    %c0_99 = arith.constant 0 : index
    %534 = vector.load %arg7[%c11, %c0_98, %c0_99] : memref<16x8x128xf32, #tpu.memory_space<vmem>>, vector<1x8x128xf32>
    %535 = vector.shape_cast %534 : vector<1x8x128xf32> to vector<8x128xf32>
    %536 = vector.shape_cast %533 : vector<8x128xf32> to vector<1x8x128xf32>
    tpu.vector_store %arg7[%c11, %c0_98, %c0_99], %536 {strides = array<i32>} : memref<16x8x128xf32, #tpu.memory_space<vmem>>, vector<1x8x128xf32>,
    %537 = arith.truncf %529 : vector<8x128xf32> to vector<8x128xbf16>
    %cst_100 = arith.constant dense<0.000000e+00> : vector<8x384xf32>
    %538 = tpu.matmul %537, %11, %cst_100 {dimension_numbers = #tpu.dot_dimension_numbers<[1], [0], [0], [1], [0, 0, 1, 1], [], []>} : vector<8x128xbf16>, vector<128x384xbf16>, vector<8x384xf32> -> vector<8x384xf32>
    %539 = vector.extract_strided_slice %10 {offsets = [12, 0, 0], sizes = [1, 8, 384], strides = [1, 1, 1]} : vector<16x8x384xf32> to vector<1x8x384xf32>
    %540 = vector.shape_cast %539 : vector<1x8x384xf32> to vector<8x384xf32>
    %541 = vector.extract_strided_slice %540 {offsets = [0, 0], sizes = [8, 128], strides = [1, 1]} : vector<8x384xf32> to vector<8x128xf32>
    %542 = vector.extract_strided_slice %538 {offsets = [0, 0], sizes = [8, 128], strides = [1, 1]} : vector<8x384xf32> to vector<8x128xf32>
    %543 = arith.addf %541, %542 : vector<8x128xf32>
    %544 = arith.negf %543 : vector<8x128xf32>
    %545 = math.exp %544 : vector<8x128xf32>
    %cst_101 = arith.constant 1.000000e+00 : f32
    %546 = vector.broadcast %cst_101 : f32 to vector<8x128xf32>
    %547 = arith.addf %546, %545 : vector<8x128xf32>
    %548 = arith.divf %546, %547 : vector<8x128xf32>
    %549 = vector.extract_strided_slice %540 {offsets = [0, 128], sizes = [8, 128], strides = [1, 1]} : vector<8x384xf32> to vector<8x128xf32>
    %550 = vector.extract_strided_slice %538 {offsets = [0, 128], sizes = [8, 128], strides = [1, 1]} : vector<8x384xf32> to vector<8x128xf32>
    %551 = arith.addf %549, %550 : vector<8x128xf32>
    %552 = arith.negf %551 : vector<8x128xf32>
    %553 = math.exp %552 : vector<8x128xf32>
    %cst_102 = arith.constant 1.000000e+00 : f32
    %554 = vector.broadcast %cst_102 : f32 to vector<8x128xf32>
    %555 = arith.addf %554, %553 : vector<8x128xf32>
    %556 = arith.divf %554, %555 : vector<8x128xf32>
    %557 = vector.extract_strided_slice %540 {offsets = [0, 256], sizes = [8, 128], strides = [1, 1]} : vector<8x384xf32> to vector<8x128xf32>
    %558 = vector.extract_strided_slice %538 {offsets = [0, 256], sizes = [8, 128], strides = [1, 1]} : vector<8x384xf32> to vector<8x128xf32>
    %559 = vector.broadcast %12 : vector<1x128xf32> to vector<8x128xf32>
    %560 = arith.addf %558, %559 : vector<8x128xf32>
    %561 = arith.mulf %548, %560 : vector<8x128xf32>
    %562 = arith.addf %557, %561 : vector<8x128xf32>
    %563 = math.tanh %562 : vector<8x128xf32>
    %cst_103 = arith.constant 1.000000e+00 : f32
    %564 = vector.broadcast %cst_103 : f32 to vector<8x128xf32>
    %565 = arith.subf %564, %556 : vector<8x128xf32>
    %566 = arith.mulf %565, %563 : vector<8x128xf32>
    %567 = arith.mulf %556, %529 : vector<8x128xf32>
    %568 = arith.addf %566, %567 : vector<8x128xf32>
    %569 = vector.extract_strided_slice %19 {offsets = [0, 12], sizes = [8, 1], strides = [1, 1]} : vector<8x16xi1> to vector<8x1xi1>
    %570 = vector.shape_cast %569 : vector<8x1xi1> to vector<8x1xi1>
    %571 = vector.broadcast %570 : vector<8x1xi1> to vector<8x128xi1>
    %572 = arith.select %571, %568, %529 : vector<8x128xi1>, vector<8x128xf32>
    %cst_104 = arith.constant 0.000000e+00 : f32
    %573 = vector.shape_cast %569 : vector<8x1xi1> to vector<8x1xi1>
    %574 = vector.broadcast %573 : vector<8x1xi1> to vector<8x128xi1>
    %575 = vector.broadcast %cst_104 : f32 to vector<8x128xf32>
    %576 = arith.select %574, %572, %575 : vector<8x128xi1>, vector<8x128xf32>
    %c12 = arith.constant 12 : index
    %c0_105 = arith.constant 0 : index
    %c0_106 = arith.constant 0 : index
    %577 = vector.load %arg7[%c12, %c0_105, %c0_106] : memref<16x8x128xf32, #tpu.memory_space<vmem>>, vector<1x8x128xf32>
    %578 = vector.shape_cast %577 : vector<1x8x128xf32> to vector<8x128xf32>
    %579 = vector.shape_cast %576 : vector<8x128xf32> to vector<1x8x128xf32>
    tpu.vector_store %arg7[%c12, %c0_105, %c0_106], %579 {strides = array<i32>} : memref<16x8x128xf32, #tpu.memory_space<vmem>>, vector<1x8x128xf32>,
    %580 = arith.truncf %572 : vector<8x128xf32> to vector<8x128xbf16>
    %cst_107 = arith.constant dense<0.000000e+00> : vector<8x384xf32>
    %581 = tpu.matmul %580, %11, %cst_107 {dimension_numbers = #tpu.dot_dimension_numbers<[1], [0], [0], [1], [0, 0, 1, 1], [], []>} : vector<8x128xbf16>, vector<128x384xbf16>, vector<8x384xf32> -> vector<8x384xf32>
    %582 = vector.extract_strided_slice %10 {offsets = [13, 0, 0], sizes = [1, 8, 384], strides = [1, 1, 1]} : vector<16x8x384xf32> to vector<1x8x384xf32>
    %583 = vector.shape_cast %582 : vector<1x8x384xf32> to vector<8x384xf32>
    %584 = vector.extract_strided_slice %583 {offsets = [0, 0], sizes = [8, 128], strides = [1, 1]} : vector<8x384xf32> to vector<8x128xf32>
    %585 = vector.extract_strided_slice %581 {offsets = [0, 0], sizes = [8, 128], strides = [1, 1]} : vector<8x384xf32> to vector<8x128xf32>
    %586 = arith.addf %584, %585 : vector<8x128xf32>
    %587 = arith.negf %586 : vector<8x128xf32>
    %588 = math.exp %587 : vector<8x128xf32>
    %cst_108 = arith.constant 1.000000e+00 : f32
    %589 = vector.broadcast %cst_108 : f32 to vector<8x128xf32>
    %590 = arith.addf %589, %588 : vector<8x128xf32>
    %591 = arith.divf %589, %590 : vector<8x128xf32>
    %592 = vector.extract_strided_slice %583 {offsets = [0, 128], sizes = [8, 128], strides = [1, 1]} : vector<8x384xf32> to vector<8x128xf32>
    %593 = vector.extract_strided_slice %581 {offsets = [0, 128], sizes = [8, 128], strides = [1, 1]} : vector<8x384xf32> to vector<8x128xf32>
    %594 = arith.addf %592, %593 : vector<8x128xf32>
    %595 = arith.negf %594 : vector<8x128xf32>
    %596 = math.exp %595 : vector<8x128xf32>
    %cst_109 = arith.constant 1.000000e+00 : f32
    %597 = vector.broadcast %cst_109 : f32 to vector<8x128xf32>
    %598 = arith.addf %597, %596 : vector<8x128xf32>
    %599 = arith.divf %597, %598 : vector<8x128xf32>
    %600 = vector.extract_strided_slice %583 {offsets = [0, 256], sizes = [8, 128], strides = [1, 1]} : vector<8x384xf32> to vector<8x128xf32>
    %601 = vector.extract_strided_slice %581 {offsets = [0, 256], sizes = [8, 128], strides = [1, 1]} : vector<8x384xf32> to vector<8x128xf32>
    %602 = vector.broadcast %12 : vector<1x128xf32> to vector<8x128xf32>
    %603 = arith.addf %601, %602 : vector<8x128xf32>
    %604 = arith.mulf %591, %603 : vector<8x128xf32>
    %605 = arith.addf %600, %604 : vector<8x128xf32>
    %606 = math.tanh %605 : vector<8x128xf32>
    %cst_110 = arith.constant 1.000000e+00 : f32
    %607 = vector.broadcast %cst_110 : f32 to vector<8x128xf32>
    %608 = arith.subf %607, %599 : vector<8x128xf32>
    %609 = arith.mulf %608, %606 : vector<8x128xf32>
    %610 = arith.mulf %599, %572 : vector<8x128xf32>
    %611 = arith.addf %609, %610 : vector<8x128xf32>
    %612 = vector.extract_strided_slice %19 {offsets = [0, 13], sizes = [8, 1], strides = [1, 1]} : vector<8x16xi1> to vector<8x1xi1>
    %613 = vector.shape_cast %612 : vector<8x1xi1> to vector<8x1xi1>
    %614 = vector.broadcast %613 : vector<8x1xi1> to vector<8x128xi1>
    %615 = arith.select %614, %611, %572 : vector<8x128xi1>, vector<8x128xf32>
    %cst_111 = arith.constant 0.000000e+00 : f32
    %616 = vector.shape_cast %612 : vector<8x1xi1> to vector<8x1xi1>
    %617 = vector.broadcast %616 : vector<8x1xi1> to vector<8x128xi1>
    %618 = vector.broadcast %cst_111 : f32 to vector<8x128xf32>
    %619 = arith.select %617, %615, %618 : vector<8x128xi1>, vector<8x128xf32>
    %c13 = arith.constant 13 : index
    %c0_112 = arith.constant 0 : index
    %c0_113 = arith.constant 0 : index
    %620 = vector.load %arg7[%c13, %c0_112, %c0_113] : memref<16x8x128xf32, #tpu.memory_space<vmem>>, vector<1x8x128xf32>
    %621 = vector.shape_cast %620 : vector<1x8x128xf32> to vector<8x128xf32>
    %622 = vector.shape_cast %619 : vector<8x128xf32> to vector<1x8x128xf32>
    tpu.vector_store %arg7[%c13, %c0_112, %c0_113], %622 {strides = array<i32>} : memref<16x8x128xf32, #tpu.memory_space<vmem>>, vector<1x8x128xf32>,
    %623 = arith.truncf %615 : vector<8x128xf32> to vector<8x128xbf16>
    %cst_114 = arith.constant dense<0.000000e+00> : vector<8x384xf32>
    %624 = tpu.matmul %623, %11, %cst_114 {dimension_numbers = #tpu.dot_dimension_numbers<[1], [0], [0], [1], [0, 0, 1, 1], [], []>} : vector<8x128xbf16>, vector<128x384xbf16>, vector<8x384xf32> -> vector<8x384xf32>
    %625 = vector.extract_strided_slice %10 {offsets = [14, 0, 0], sizes = [1, 8, 384], strides = [1, 1, 1]} : vector<16x8x384xf32> to vector<1x8x384xf32>
    %626 = vector.shape_cast %625 : vector<1x8x384xf32> to vector<8x384xf32>
    %627 = vector.extract_strided_slice %626 {offsets = [0, 0], sizes = [8, 128], strides = [1, 1]} : vector<8x384xf32> to vector<8x128xf32>
    %628 = vector.extract_strided_slice %624 {offsets = [0, 0], sizes = [8, 128], strides = [1, 1]} : vector<8x384xf32> to vector<8x128xf32>
    %629 = arith.addf %627, %628 : vector<8x128xf32>
    %630 = arith.negf %629 : vector<8x128xf32>
    %631 = math.exp %630 : vector<8x128xf32>
    %cst_115 = arith.constant 1.000000e+00 : f32
    %632 = vector.broadcast %cst_115 : f32 to vector<8x128xf32>
    %633 = arith.addf %632, %631 : vector<8x128xf32>
    %634 = arith.divf %632, %633 : vector<8x128xf32>
    %635 = vector.extract_strided_slice %626 {offsets = [0, 128], sizes = [8, 128], strides = [1, 1]} : vector<8x384xf32> to vector<8x128xf32>
    %636 = vector.extract_strided_slice %624 {offsets = [0, 128], sizes = [8, 128], strides = [1, 1]} : vector<8x384xf32> to vector<8x128xf32>
    %637 = arith.addf %635, %636 : vector<8x128xf32>
    %638 = arith.negf %637 : vector<8x128xf32>
    %639 = math.exp %638 : vector<8x128xf32>
    %cst_116 = arith.constant 1.000000e+00 : f32
    %640 = vector.broadcast %cst_116 : f32 to vector<8x128xf32>
    %641 = arith.addf %640, %639 : vector<8x128xf32>
    %642 = arith.divf %640, %641 : vector<8x128xf32>
    %643 = vector.extract_strided_slice %626 {offsets = [0, 256], sizes = [8, 128], strides = [1, 1]} : vector<8x384xf32> to vector<8x128xf32>
    %644 = vector.extract_strided_slice %624 {offsets = [0, 256], sizes = [8, 128], strides = [1, 1]} : vector<8x384xf32> to vector<8x128xf32>
    %645 = vector.broadcast %12 : vector<1x128xf32> to vector<8x128xf32>
    %646 = arith.addf %644, %645 : vector<8x128xf32>
    %647 = arith.mulf %634, %646 : vector<8x128xf32>
    %648 = arith.addf %643, %647 : vector<8x128xf32>
    %649 = math.tanh %648 : vector<8x128xf32>
    %cst_117 = arith.constant 1.000000e+00 : f32
    %650 = vector.broadcast %cst_117 : f32 to vector<8x128xf32>
    %651 = arith.subf %650, %642 : vector<8x128xf32>
    %652 = arith.mulf %651, %649 : vector<8x128xf32>
    %653 = arith.mulf %642, %615 : vector<8x128xf32>
    %654 = arith.addf %652, %653 : vector<8x128xf32>
    %655 = vector.extract_strided_slice %19 {offsets = [0, 14], sizes = [8, 1], strides = [1, 1]} : vector<8x16xi1> to vector<8x1xi1>
    %656 = vector.shape_cast %655 : vector<8x1xi1> to vector<8x1xi1>
    %657 = vector.broadcast %656 : vector<8x1xi1> to vector<8x128xi1>
    %658 = arith.select %657, %654, %615 : vector<8x128xi1>, vector<8x128xf32>
    %cst_118 = arith.constant 0.000000e+00 : f32
    %659 = vector.shape_cast %655 : vector<8x1xi1> to vector<8x1xi1>
    %660 = vector.broadcast %659 : vector<8x1xi1> to vector<8x128xi1>
    %661 = vector.broadcast %cst_118 : f32 to vector<8x128xf32>
    %662 = arith.select %660, %658, %661 : vector<8x128xi1>, vector<8x128xf32>
    %c14 = arith.constant 14 : index
    %c0_119 = arith.constant 0 : index
    %c0_120 = arith.constant 0 : index
    %663 = vector.load %arg7[%c14, %c0_119, %c0_120] : memref<16x8x128xf32, #tpu.memory_space<vmem>>, vector<1x8x128xf32>
    %664 = vector.shape_cast %663 : vector<1x8x128xf32> to vector<8x128xf32>
    %665 = vector.shape_cast %662 : vector<8x128xf32> to vector<1x8x128xf32>
    tpu.vector_store %arg7[%c14, %c0_119, %c0_120], %665 {strides = array<i32>} : memref<16x8x128xf32, #tpu.memory_space<vmem>>, vector<1x8x128xf32>,
    %666 = arith.truncf %658 : vector<8x128xf32> to vector<8x128xbf16>
    %cst_121 = arith.constant dense<0.000000e+00> : vector<8x384xf32>
    %667 = tpu.matmul %666, %11, %cst_121 {dimension_numbers = #tpu.dot_dimension_numbers<[1], [0], [0], [1], [0, 0, 1, 1], [], []>} : vector<8x128xbf16>, vector<128x384xbf16>, vector<8x384xf32> -> vector<8x384xf32>
    %668 = vector.extract_strided_slice %10 {offsets = [15, 0, 0], sizes = [1, 8, 384], strides = [1, 1, 1]} : vector<16x8x384xf32> to vector<1x8x384xf32>
    %669 = vector.shape_cast %668 : vector<1x8x384xf32> to vector<8x384xf32>
    %670 = vector.extract_strided_slice %669 {offsets = [0, 0], sizes = [8, 128], strides = [1, 1]} : vector<8x384xf32> to vector<8x128xf32>
    %671 = vector.extract_strided_slice %667 {offsets = [0, 0], sizes = [8, 128], strides = [1, 1]} : vector<8x384xf32> to vector<8x128xf32>
    %672 = arith.addf %670, %671 : vector<8x128xf32>
    %673 = arith.negf %672 : vector<8x128xf32>
    %674 = math.exp %673 : vector<8x128xf32>
    %cst_122 = arith.constant 1.000000e+00 : f32
    %675 = vector.broadcast %cst_122 : f32 to vector<8x128xf32>
    %676 = arith.addf %675, %674 : vector<8x128xf32>
    %677 = arith.divf %675, %676 : vector<8x128xf32>
    %678 = vector.extract_strided_slice %669 {offsets = [0, 128], sizes = [8, 128], strides = [1, 1]} : vector<8x384xf32> to vector<8x128xf32>
    %679 = vector.extract_strided_slice %667 {offsets = [0, 128], sizes = [8, 128], strides = [1, 1]} : vector<8x384xf32> to vector<8x128xf32>
    %680 = arith.addf %678, %679 : vector<8x128xf32>
    %681 = arith.negf %680 : vector<8x128xf32>
    %682 = math.exp %681 : vector<8x128xf32>
    %cst_123 = arith.constant 1.000000e+00 : f32
    %683 = vector.broadcast %cst_123 : f32 to vector<8x128xf32>
    %684 = arith.addf %683, %682 : vector<8x128xf32>
    %685 = arith.divf %683, %684 : vector<8x128xf32>
    %686 = vector.extract_strided_slice %669 {offsets = [0, 256], sizes = [8, 128], strides = [1, 1]} : vector<8x384xf32> to vector<8x128xf32>
    %687 = vector.extract_strided_slice %667 {offsets = [0, 256], sizes = [8, 128], strides = [1, 1]} : vector<8x384xf32> to vector<8x128xf32>
    %688 = vector.broadcast %12 : vector<1x128xf32> to vector<8x128xf32>
    %689 = arith.addf %687, %688 : vector<8x128xf32>
    %690 = arith.mulf %677, %689 : vector<8x128xf32>
    %691 = arith.addf %686, %690 : vector<8x128xf32>
    %692 = math.tanh %691 : vector<8x128xf32>
    %cst_124 = arith.constant 1.000000e+00 : f32
    %693 = vector.broadcast %cst_124 : f32 to vector<8x128xf32>
    %694 = arith.subf %693, %685 : vector<8x128xf32>
    %695 = arith.mulf %694, %692 : vector<8x128xf32>
    %696 = arith.mulf %685, %658 : vector<8x128xf32>
    %697 = arith.addf %695, %696 : vector<8x128xf32>
    %698 = vector.extract_strided_slice %19 {offsets = [0, 15], sizes = [8, 1], strides = [1, 1]} : vector<8x16xi1> to vector<8x1xi1>
    %699 = vector.shape_cast %698 : vector<8x1xi1> to vector<8x1xi1>
    %700 = vector.broadcast %699 : vector<8x1xi1> to vector<8x128xi1>
    %701 = arith.select %700, %697, %658 : vector<8x128xi1>, vector<8x128xf32>
    %cst_125 = arith.constant 0.000000e+00 : f32
    %702 = vector.shape_cast %698 : vector<8x1xi1> to vector<8x1xi1>
    %703 = vector.broadcast %702 : vector<8x1xi1> to vector<8x128xi1>
    %704 = vector.broadcast %cst_125 : f32 to vector<8x128xf32>
    %705 = arith.select %703, %701, %704 : vector<8x128xi1>, vector<8x128xf32>
    %c15 = arith.constant 15 : index
    %c0_126 = arith.constant 0 : index
    %c0_127 = arith.constant 0 : index
    %706 = vector.load %arg7[%c15, %c0_126, %c0_127] : memref<16x8x128xf32, #tpu.memory_space<vmem>>, vector<1x8x128xf32>
    %707 = vector.shape_cast %706 : vector<1x8x128xf32> to vector<8x128xf32>
    %708 = vector.shape_cast %705 : vector<8x128xf32> to vector<1x8x128xf32>
    tpu.vector_store %arg7[%c15, %c0_126, %c0_127], %708 {strides = array<i32>} : memref<16x8x128xf32, #tpu.memory_space<vmem>>, vector<1x8x128xf32>,
    %c0_128 = arith.constant 0 : index
    %c0_129 = arith.constant 0 : index
    %709 = vector.load %arg8[%c0_128, %c0_129] : memref<8x128xf32, #tpu.memory_space<vmem>>, vector<8x128xf32>
    tpu.vector_store %arg8[%c0_128, %c0_129], %701 {strides = array<i32>} : memref<8x128xf32, #tpu.memory_space<vmem>>, vector<8x128xf32>,
    return
  }
  func.func @transform_0(%arg0: i32) -> (i32, i32, i32) {
    %c0_i32 = arith.constant 0 : i32
    %c0_i32_0 = arith.constant 0 : i32
    %c0_i32_1 = arith.constant 0 : i32
    return %arg0, %c0_i32, %c0_i32_0 : i32, i32, i32
  }
  func.func @transform_1(%arg0: i32) -> (i32, i32) {
    %c0_i32 = arith.constant 0 : i32
    %c0_i32_0 = arith.constant 0 : i32
    %c0_i32_1 = arith.constant 0 : i32
    return %c0_i32, %c0_i32_0 : i32, i32
  }
  func.func @transform_2(%arg0: i32) -> (i32, i32) {
    %c0_i32 = arith.constant 0 : i32
    %c0_i32_0 = arith.constant 0 : i32
    %c0_i32_1 = arith.constant 0 : i32
    return %c0_i32, %c0_i32_0 : i32, i32
  }
  func.func @transform_3(%arg0: i32) -> (i32, i32) {
    %c0_i32 = arith.constant 0 : i32
    %c0_i32_0 = arith.constant 0 : i32
    %c0_i32_1 = arith.constant 0 : i32
    return %c0_i32, %c0_i32_0 : i32, i32
  }
  func.func @transform_4(%arg0: i32) -> (i32, i32) {
    %c0_i32 = arith.constant 0 : i32
    %c0_i32_0 = arith.constant 0 : i32
    %c0_i32_1 = arith.constant 0 : i32
    return %c0_i32, %c0_i32_0 : i32, i32
  }
  func.func @transform_5(%arg0: i32) -> (i32, i32) {
    %c0_i32 = arith.constant 0 : i32
    %c0_i32_0 = arith.constant 0 : i32
    %c0_i32_1 = arith.constant 0 : i32
    return %c0_i32, %c0_i32_0 : i32, i32
  }
  func.func @transform_6(%arg0: i32) -> (i32, i32, i32) {
    %c0_i32 = arith.constant 0 : i32
    %c0_i32_0 = arith.constant 0 : i32
    %c0_i32_1 = arith.constant 0 : i32
    return %arg0, %c0_i32, %c0_i32_0 : i32, i32, i32
  }
  func.func @transform_7(%arg0: i32) -> (i32, i32) {
    %c0_i32 = arith.constant 0 : i32
    %c0_i32_0 = arith.constant 0 : i32
    %c0_i32_1 = arith.constant 0 : i32
    return %c0_i32, %c0_i32_0 : i32, i32
  }
}

</mosaic_0001>

<bundles_post_ra>
// kernel: tpu_custom_call.1
= control target key start
LH: loop header
LB: loop body
LE: loop exit
PB: predicated region body
PF: predicated region fallthrough
CT: control target
= control target key end

     0   :  { %13 = vsyncpa [#allocation3], 0  ;;  %s4752_s0 = inlined_call_operand.hbm [shape: bf16[16,8,128], index: 0, kind: input, shape index: {}]   ;;  %s4753_s1 = inlined_call_operand.vmem [shape: s32[8,1], index: 1, kind: input, shape index: {}]   ;;  %s4754_s2 = inlined_call_operand.hbm [shape: bf16[128,384], index: 2, kind: input, shape index: {}]   ;;  %s4755_s3 = inlined_call_operand.hbm [shape: bf16[128,384], index: 3, kind: input, shape index: {}]   ;;  %s4756_s4 = inlined_call_operand.vmem [shape: f32[1,384], index: 4, kind: input, shape index: {}]   ;;  %s4757_s5 = inlined_call_operand.vmem [shape: f32[1,128], index: 5, kind: input, shape index: {}]   ;;  %s4758_s6 = inlined_call_operand.hbm [shape: f32[16,8,128], index: 6, kind: output, shape index: {0}]   ;;  %s4759_s7 = inlined_call_operand.hbm [shape: f32[8,128], index: 7, kind: output, shape index: {1}]  }
   0x1   :  { %14 = vsyncpa [#allocation6], 0 }
   0x2   :  { %15 = vsyncpa [#allocation4], 0 }
   0x3   :  { %16 = vsyncpa [#allocation10], 0  ;;  %s3580_s24 = smov [#allocation5]   ;;  %s3462_s28 = scalar_lea.hbm %s4754_s2, 3072 }
   0x4   :  { %s36_s25 = sshll.u32 %s3580_s24, 4  ;;  %p3463_p0 = scmp.ne.s32.totalorder %s4754_s2, %s3462_s28  ;;  %s37_s25 = int_to_ptr.vmem [resolvable:$true] %s36_s25 }
   0x5   :  { %p3466_p1 = scmp.lt.u32.totalorder %s3462_s28, %s4754_s2 }
   0x7   :  { %p3468_p2 = pnand %p3466_p1, %p3463_p0 }
   0x9   :  { %3471 = shalt.err (!%p3468_p2)
}
   0xa   :  { %s3472_s10 = scalar_lea.vmem %s37_s25, 3072  ;;  %p3477_p4 = scmp.lt.s32.totalorder %s37_s25, %s37_s25 }
   0xb   :  { %p3473_p3 = scmp.ne.s32.totalorder %s37_s25, %s3472_s10  ;;  %p3478_p5 = scmp.lt.s32.totalorder %s3472_s10, %s3472_s10 }
   0xd   :  { %p3479_p6 = por %p3478_p5, %p3477_p4 }
   0xf   :  { %p3480_p7 = pnand %p3479_p6, %p3473_p3 }
  0x11   :  { %3483 = shalt.err (!%p3480_p7)
}
  0x12   :  { %s3581_s11 = smov 192   ;;  %s3582_s12 = smov 12  }
  0x13   :  { %42 = dma.hbm_to_vmem [thread:$0]  %s4754_s2, 3072, %s37_s25, [#allocation6], %s3581_s11, %s3581_s11, %s3582_s12  }
  0x14   :  { %s3583_s15 = smov [#allocation2]   ;;  %s3484_s19 = scalar_lea.hbm %s4752_s0, 1024 }
  0x15   :  { %s22_s16 = sshll.u32 %s3583_s15, 4  ;;  %p3485_p8 = scmp.ne.s32.totalorder %s4752_s0, %s3484_s19  ;;  %s23_s16 = int_to_ptr.vmem [resolvable:$true] %s22_s16 }
  0x16   :  { %p3488_p9 = scmp.lt.u32.totalorder %s3484_s19, %s4752_s0 }
  0x18   :  { %p3490_p10 = pnand %p3488_p9, %p3485_p8 }
  0x1a   :  { %3493 = shalt.err (!%p3490_p10)
}
  0x1b   :  { %s3494_s24 = scalar_lea.vmem %s23_s16, 1024  ;;  %p3499_p12 = scmp.lt.s32.totalorder %s23_s16, %s23_s16 }
  0x1c   :  { %p3495_p11 = scmp.ne.s32.totalorder %s23_s16, %s3494_s24  ;;  %p3500_p13 = scmp.lt.s32.totalorder %s3494_s24, %s3494_s24 }
  0x1e   :  { %p3501_p0 = por %p3500_p13, %p3499_p12 }
  0x20   :  { %p3502_p1 = pnand %p3501_p0, %p3495_p11 }
  0x22   :  { %3505 = shalt.err (!%p3502_p1)
}
  0x23   :  { %s3584_s2 = smov 64   ;;  %s3585_s25 = smov 4  }
  0x24   :  { %28 = dma.hbm_to_vmem [thread:$0]  %s4752_s0, 1024, %s23_s16, [#allocation3], %s3584_s2, %s3584_s2, %s3585_s25  }
  0x25   :  { %s3586_s28 = smov [#allocation7]   ;;  %s3506_s9 = scalar_lea.hbm %s4755_s3, 3072 }
  0x26   :  { %s48_s29 = sshll.u32 %s3586_s28, 4  ;;  %p3507_p2 = scmp.ne.s32.totalorder %s4755_s3, %s3506_s9  ;;  %s49_s29 = int_to_ptr.vmem [resolvable:$true] %s48_s29 }
  0x27   :  { %p3510_p3 = scmp.lt.u32.totalorder %s3506_s9, %s4755_s3 }
  0x29   :  { %p3512_p4 = pnand %p3510_p3, %p3507_p2 }
  0x2b   :  { %3515 = shalt.err (!%p3512_p4)
}
  0x2c   :  { %s3516_s17 = scalar_lea.vmem %s49_s29, 3072  ;;  %p3521_p6 = scmp.lt.s32.totalorder %s49_s29, %s49_s29 }
  0x2d   :  { %p3517_p5 = scmp.ne.s32.totalorder %s49_s29, %s3516_s17  ;;  %p3522_p7 = scmp.lt.s32.totalorder %s3516_s17, %s3516_s17 }
  0x2f   :  { %p3523_p8 = por %p3522_p7, %p3521_p6 }
  0x31   :  { %p3524_p9 = pnand %p3523_p8, %p3517_p5 }
  0x33   :  { %3527 = shalt.err (!%p3524_p9)
}
  0x34   :  { %54 = dma.hbm_to_vmem [thread:$0]  %s4755_s3, 3072, %s49_s29, [#allocation6], %s3581_s11, %s3581_s11, %s3582_s12  }
  0x35   :  { %3572 = dma.done.wait [#allocation3], 1024  }
  0x36   :  { %3573 = vsyncadd [#allocation3], 4294966272 }
  0x37   :  { %3574 = dma.done.wait [#allocation6], 6144  }
  0x38   :  { %3575 = vsyncadd [#allocation6], 4294961152  ;;  %v4760_v0 = vmov 0   ;;  %v558_v1 = vld [vmem:[%s4753_s1] sm:$0xff]  ;;  %v3176_v3 = vld [vmem:[#allocation5 + $0x8] ss:$12 sps:$4 sm:$0xff]   ;;  %v124_v61 = vlaneseq }
  0x39   :  { %3158 = vset.pattern.permute.xlu0 %v4760_v0  ;;  %347 = vmatprep.mubr.bf16.mxu0 %v4760_v0  ;;  %v3174_v2 = vld [vmem:[#allocation5 + $0x4] ss:$12 sps:$4 sm:$0xff]   ;;  %v3177_v4 = vld [vmem:[#allocation5] ss:$12 sps:$4 sm:$0xff]   ;;  %v3178_v5 = vld [vmem:[#allocation5 + $0x1c] ss:$12 sps:$4 sm:$0xff]  }
  0x3a   :  { %565 = vperm.xlu0 %3158, %v558_v1   ;;  %315 = vmatprep.subr.bf16.mxu0 %v3174_v2  ;;  %v3180_v6 = vld [vmem:[#allocation5 + $0x20] ss:$12 sps:$4 sm:$0xff]   ;;  %v3181_v7 = vld [vmem:[#allocation5 + $0x18] ss:$12 sps:$4 sm:$0xff]   ;;  %v3588_v10 = vmov 1   ;;  %v4762_v31 = vmov 0.0  }
  0x3b   :  { %2777 = vmatprep.subr.bf16.mxu1 %v3176_v3  ;;  %316 = vmatpush1.bf16.msra.mxu0 %v3177_v4  ;;  %v3182_v8 = vld [vmem:[#allocation5 + $0x34] ss:$12 sps:$4 sm:$0xff]   ;;  %v3184_v9 = vld [vmem:[#allocation5 + $0x38] ss:$12 sps:$4 sm:$0xff]   ;;  %v3185_v11 = vld [vmem:[#allocation5 + $0x30] ss:$12 sps:$4 sm:$0xff]  }
  0x3c   :  { %2778 = vmatpush3.bf16.msra.mxu1 %v3176_v3  ;;  %317 = vmatprep.subr.bf16.mxu0 %v3178_v5  ;;  %v3186_v12 = vld [vmem:[#allocation5 + $0x4c] ss:$12 sps:$4 sm:$0xff]   ;;  %v3188_v13 = vld [vmem:[#allocation5 + $0x50] ss:$12 sps:$4 sm:$0xff]   ;;  %v3189_v14 = vld [vmem:[#allocation5 + $0x48] ss:$12 sps:$4 sm:$0xff]  }
  0x3d   :  { %2779 = vmatprep.subr.bf16.mxu1 %v3180_v6  ;;  %3159 = vset.pattern.permute.xlu1 %v3588_v10  ;;  %v3190_v15 = vld [vmem:[#allocation5 + $0x64] ss:$12 sps:$4 sm:$0xff]   ;;  %v3192_v16 = vld [vmem:[#allocation5 + $0x68] ss:$12 sps:$4 sm:$0xff]   ;;  %v3193_v17 = vld [vmem:[#allocation5 + $0x60] ss:$12 sps:$4 sm:$0xff]  }
  0x3e   :  { %v3194_v18 = vld [vmem:[#allocation5 + $0x7c] ss:$12 sps:$4 sm:$0xff]   ;;  %v3196_v19 = vld [vmem:[#allocation5 + $0x80] ss:$12 sps:$4 sm:$0xff]   ;;  %v3197_v21 = vld [vmem:[#allocation5 + $0x78] ss:$12 sps:$4 sm:$0xff]  }
  0x3f   :  { %318 = vmatpush1.bf16.msra.mxu0 %v3181_v7  ;;  %v3206_v20 = vld [vmem:[#allocation2] sm:$0xff]   ;;  %v3201_v24 = vld [vmem:[#allocation5 + $0x90] ss:$12 sps:$4 sm:$0xff]   ;;  %v3202_v25 = vld [vmem:[#allocation5 + $0xac] ss:$12 sps:$4 sm:$0xff]   ;;  %v3590_v60 = vmov 0.0|0.0  }
  0x40   :  { %2780 = vmatpush3.bf16.msra.mxu1 %v3180_v6  ;;  %319 = vmatprep.subr.bf16.mxu0 %v3182_v8  ;;  %v3198_v22 = vld [vmem:[#allocation5 + $0x94] ss:$12 sps:$4 sm:$0xff]   ;;  %v3200_v23 = vld [vmem:[#allocation5 + $0x98] ss:$12 sps:$4 sm:$0xff]   ;;  %v3204_v26 = vld [vmem:[#allocation5 + $0xb0] ss:$12 sps:$4 sm:$0xff]  }
  0x41   :  { %2781 = vmatprep.subr.bf16.mxu1 %v3184_v9  ;;  %2793 = vmatprep.mubr.bf16.mxu1 %v3206_v20  ;;  %v3205_v27 = vld [vmem:[#allocation5 + $0xa8] ss:$12 sps:$4 sm:$0xff]   ;;  %v3697_v28 = vld [vmem:[#allocation7 + $0x4] ss:$12 sps:$4 sm:$0xff]   ;;  %v3702_v32 = vld [vmem:[#allocation7] ss:$12 sps:$4 sm:$0xff]  }
  0x42   :  { %v3207_v29 = vld [vmem:[#allocation2 + $0x8] sm:$0xff]   ;;  %v3215_v34 = vld [vmem:[#allocation2 + $0x10] sm:$0xff]   ;;  %v3711_v36 = vld [vmem:[#allocation7 + $0x18] ss:$12 sps:$4 sm:$0xff]   ;;  %vm3591_vm0 = vmmov 0   ;;  %v561_v62 = vand.u32 127, %v124_v61 }
  0x43   :  { %320 = vmatpush1.bf16.msra.mxu0 %v3185_v11  ;;  %v3699_v30 = vld [vmem:[#allocation7 + $0x8] ss:$12 sps:$4 sm:$0xff]   ;;  %v3708_v35 = vld [vmem:[#allocation7 + $0x20] ss:$12 sps:$4 sm:$0xff]   ;;  %v3216_v38 = vld [vmem:[#allocation2 + $0x18] sm:$0xff]   ;;  %v3592_v2 = vmov 2  }
  0x44   :  { %2782 = vmatpush3.bf16.msra.mxu1 %v3184_v9  ;;  %321 = vmatprep.subr.bf16.mxu0 %v3186_v12  ;;  %v3704_v33 = vld [vmem:[#allocation7 + $0x1c] ss:$12 sps:$4 sm:$0xff]   ;;  %v3715_v37 = vld [vmem:[#allocation7 + $0x34] ss:$12 sps:$4 sm:$0xff]   ;;  %v3722_v40 = vld [vmem:[#allocation7 + $0x4c] ss:$12 sps:$4 sm:$0xff]  }
  0x45   :  { %2783 = vmatprep.subr.bf16.mxu1 %v3188_v13  ;;  %v3718_v39 = vld [vmem:[#allocation7 + $0x30] ss:$12 sps:$4 sm:$0xff]   ;;  %v3224_v41 = vld [vmem:[#allocation2 + $0x20] sm:$0xff]   ;;  %v3730_v43 = vld [vmem:[#allocation7 + $0x48] ss:$12 sps:$4 sm:$0xff]   ;;  %v3593_v3 = vmov 3  }
  0x46   :  { %v3726_v42 = vld [vmem:[#allocation7 + $0x38] ss:$12 sps:$4 sm:$0xff]   ;;  %v3736_v45 = vld [vmem:[#allocation7 + $0x50] ss:$12 sps:$4 sm:$0xff]   ;;  %v3225_v46 = vld [vmem:[#allocation2 + $0x28] sm:$0xff]   ;;  %v3594_v4 = vmov 4  }
  0x47   :  { %322 = vmatpush1.bf16.msra.mxu0 %v3189_v14  ;;  %v3733_v44 = vld [vmem:[#allocation7 + $0x64] ss:$12 sps:$4 sm:$0xff]   ;;  %v3740_v47 = vld [vmem:[#allocation7 + $0x60] ss:$12 sps:$4 sm:$0xff]   ;;  %v3743_v49 = vld [vmem:[#allocation7 + $0x7c] ss:$12 sps:$4 sm:$0xff]  }
  0x48   :  { %2784 = vmatpush3.bf16.msra.mxu1 %v3188_v13  ;;  %323 = vmatprep.subr.bf16.mxu0 %v3190_v15  ;;  %v3233_v48 = vld [vmem:[#allocation2 + $0x30] sm:$0xff]   ;;  %v3751_v51 = vld [vmem:[#allocation7 + $0x78] ss:$12 sps:$4 sm:$0xff]   ;;  %v3757_v53 = vld [vmem:[#allocation7 + $0x80] ss:$12 sps:$4 sm:$0xff]   ;;  %v3595_v5 = vmov 6  }
  0x49   :  { %2785 = vmatprep.subr.bf16.mxu1 %v3192_v16  ;;  %v3746_v50 = vld [vmem:[#allocation7 + $0x68] ss:$12 sps:$4 sm:$0xff]   ;;  %v3234_v54 = vld [vmem:[#allocation2 + $0x38] sm:$0xff]   ;;  %v3596_v6 = vmov 5   ;;  %v3597_v7 = vmov 9   ;;  %v3598_v8 = vmov 7  }
  0x4a   :  { %v3754_v52 = vld [vmem:[#allocation7 + $0x94] ss:$12 sps:$4 sm:$0xff]   ;;  %v3761_v55 = vld [vmem:[#allocation7 + $0x90] ss:$12 sps:$4 sm:$0xff]   ;;  %v3764_v56 = vld [vmem:[#allocation7 + $0xac] ss:$12 sps:$4 sm:$0xff]  }
  0x4b   :  { %324 = vmatpush1.bf16.msra.mxu0 %v3193_v17  ;;  %v3767_v57 = vld [vmem:[#allocation7 + $0x98] ss:$12 sps:$4 sm:$0xff]   ;;  %v3772_v58 = vld [vmem:[#allocation7 + $0xa8] ss:$12 sps:$4 sm:$0xff]   ;;  %v3777_v59 = vld [vmem:[#allocation7 + $0xb0] ss:$12 sps:$4 sm:$0xff]  }
  0x4c   :  { %2786 = vmatpush3.bf16.msra.mxu1 %v3192_v16  ;;  %325 = vmatprep.subr.bf16.mxu0 %v3194_v18  ;;  %v3599_v9 = vmov 12   ;;  %v3600_v10 = vmov 8   ;;  %v3601_v11 = vmov 15   ;;  %v3602_v12 = vmov 10   ;;  %s3606_s23 = smov [#allocation8]   ;;  %s3607_s2 = smov [#allocation9]  }
  0x4d   :  { %2787 = vmatprep.subr.bf16.mxu1 %v3196_v19  ;;  %v3603_v13 = vmov 11   ;;  %v3604_v14 = vmov 13   ;;  %v3605_v15 = vmov 14   ;;  %v125_v16 = vshrl.u32 %v124_v61, 7  ;;  %s2501_s24 = sshll.u32 %s3606_s23, 4  ;;  %s2514_s25 = sshll.u32 %s3607_s2, 4  ;;  %s2502_s24 = int_to_ptr.vmem [resolvable:$true] %s2501_s24  ;;  %s4721_s25 = int_to_ptr.vmem [resolvable:$true] %s2514_s25 }
  0x4e   :  { %p3533_p11 = scmp.lt.s32.totalorder %s2502_s24, %s2502_s24 }
  0x4f   :  { %326 = vmatpush1.bf16.msra.mxu0 %v3197_v21  ;;  %v126_v17 = vsub.s32 0, %v125_v16  ;;  %v130_v18 = vsub.s32 1, %v125_v16 }
  0x50   :  { %2788 = vmatpush3.bf16.msra.mxu1 %v3196_v19  ;;  %327 = vmatprep.subr.bf16.mxu0 %v3198_v22  ;;  %v134_v19 = vsub.s32 2, %v125_v16 }
  0x51   :  { %2789 = vmatprep.subr.bf16.mxu1 %v3200_v23 }
  0x53   :  { %328 = vmatpush1.bf16.msra.mxu0 %v3201_v24 }
  0x54   :  { %2790 = vmatpush3.bf16.msra.mxu1 %v3200_v23  ;;  %329 = vmatprep.subr.bf16.mxu0 %v3202_v25 }
  0x55   :  { %2791 = vmatprep.subr.bf16.mxu1 %v3204_v26 }
  0x57   :  { %330 = vmatpush1.bf16.msra.mxu0 %v3205_v27 }
  0x58   :  { %2792 = vmatpush3.bf16.msra.mxu1 %v3204_v26  ;;  %2809 = vmatprep.subr.bf16.mxu0 %v4762_v31 }
  0x59   :  { %698 = vmatprep.subr.bf16.mxu1 %v3697_v28 }
  0x5a   :  { %348 = vmatmul.mubr.bf16.vlgmr.msra.gmra.mrb[0].mxu0 %v3206_v20  ;;  %v122_v20 = vld [vmem:[%s4756_s4] sm:$0x7] }
  0x5b   :  { %2794 = vmatmul.mubr.bf16.vlgmr.msra.gmra.mrb[0].mxu1 %v3207_v29  ;;  %2810 = vmatpush3.bf16.msra.mxu0 %v3699_v30  ;;  %v3828_v21 = vrot.slane %v122_v20, %v126_v17  ;;  %v3830_v22 = vrot.slane %v122_v20, %v130_v18  ;;  %v3832_v23 = vrot.slane %v122_v20, %v134_v19 }
  0x5c   :  { %699 = vmatpush1.bf16.msra.mxu1 %v3702_v32  ;;  %357 = vmatprep.mubr.bf16.mxu0 %v4760_v0 }
  0x5d   :  { %700 = vmatprep.subr.bf16.mxu1 %v3704_v33  ;;  %2797 = vmatprep.mubr.bf16.mxu1 %v3215_v34 }
  0x5e   :  { %2811 = vmatprep.subr.bf16.mxu0 %v4762_v31 }
  0x5f   :  { %2812 = vmatpush3.bf16.msra.mxu0 %v3708_v35 }
  0x60   :  { %701 = vmatpush1.bf16.msra.mxu1 %v3711_v36  ;;  %2813 = vmatprep.subr.bf16.mxu0 %v4762_v31 }
  0x61   :  { %702 = vmatprep.subr.bf16.mxu1 %v3715_v37 }
  0x62   :  { %358 = vmatmul.mubr.bf16.gmra.mrb[4].mxu0 %v3207_v29 }
  0x63   :  { %2798 = vmatmul.mubr.bf16.gmra.mrb[4].mxu1 %v3216_v38  ;;  %367 = vmatprep.mubr.bf16.mxu0 %v4760_v0 }
  0x64   :  { %703 = vmatpush1.bf16.msra.mxu1 %v3718_v39  ;;  %2801 = vmatprep.mubr.bf16.mxu1 %v3224_v41 }
  0x65   :  { %704 = vmatprep.subr.bf16.mxu1 %v3722_v40  ;;  %2814 = vmatpush3.bf16.msra.mxu0 %v3726_v42 }
  0x66   :  { %2815 = vmatprep.subr.bf16.mxu0 %v4762_v31 }
  0x68   :  { %705 = vmatpush1.bf16.msra.mxu1 %v3730_v43 }
  0x69   :  { %706 = vmatprep.subr.bf16.mxu1 %v3733_v44  ;;  %2816 = vmatpush3.bf16.msra.mxu0 %v3736_v45 }
  0x6a   :  { %368 = vmatmul.mubr.bf16.gmra.mrb[8].mxu0 %v3215_v34  ;;  %2817 = vmatprep.subr.bf16.mxu0 %v4762_v31 }
  0x6b   :  { %2802 = vmatmul.mubr.bf16.gmra.mrb[8].mxu1 %v3225_v46  ;;  %377 = vmatprep.mubr.bf16.mxu0 %v4760_v0 }
  0x6c   :  { %707 = vmatpush1.bf16.msra.mxu1 %v3740_v47  ;;  %2805 = vmatprep.mubr.bf16.mxu1 %v3233_v48 }
  0x6d   :  { %708 = vmatprep.subr.bf16.mxu1 %v3743_v49  ;;  %2818 = vmatpush3.bf16.msra.mxu0 %v3746_v50 }
  0x6e   :  { %2819 = vmatprep.subr.bf16.mxu0 %v4762_v31 }
  0x70   :  { %709 = vmatpush1.bf16.msra.mxu1 %v3751_v51 }
  0x71   :  { %710 = vmatprep.subr.bf16.mxu1 %v3754_v52  ;;  %2820 = vmatpush3.bf16.msra.mxu0 %v3757_v53 }
  0x72   :  { %378 = vmatmul.mubr.bf16.gmra.mrb[12].mxu0 %v3216_v38  ;;  %2821 = vmatprep.subr.bf16.mxu0 %v4762_v31 }
  0x73   :  { %2806 = vmatmul.mubr.bf16.gmra.mrb[12].mxu1 %v3234_v54  ;;  %387 = vmatprep.mubr.bf16.mxu0 %v4760_v0 }
  0x74   :  { %711 = vmatpush1.bf16.msra.mxu1 %v3761_v55  ;;  %730 = vmatprep.mubr.bf16.mxu1 %v4760_v0 }
  0x75   :  { %712 = vmatprep.subr.bf16.mxu1 %v3764_v56  ;;  %2822 = vmatpush3.bf16.msra.mxu0 %v3767_v57 }
  0x76   :  { %2823 = vmatprep.subr.bf16.mxu0 %v4762_v31 }
  0x78   :  { %713 = vmatpush1.bf16.msra.mxu1 %v3772_v58 }
  0x79   :  { %2824 = vmatpush3.bf16.msra.mxu0 %v3777_v59  ;;  %816 = vmatprep.subr.bf16.mxu1 %v3697_v28 }
  0x7a   :  { %388 = vmatmul.mubr.bf16.gmra.mrb[16].mxu0 %v3224_v41  ;;  %2829 = vmatprep.subr.bf16.mxu0 %v4762_v31 }
  0x7b   :  { %731 = vmatmul.mubr.bf16.vlgmr.msra.gmra.mrb[16].mxu1 %v3590_v60  ;;  %397 = vmatprep.mubr.bf16.mxu0 %v4760_v0 }
  0x7c   :  { %817 = vmatpush1.bf16.msra.mxu1 %v3702_v32  ;;  %848 = vmatprep.mubr.bf16.mxu1 %v4760_v0 }
  0x7d   :  { %818 = vmatprep.subr.bf16.mxu1 %v3704_v33 }
  0x80   :  { %819 = vmatpush1.bf16.msra.mxu1 %v3711_v36 }
  0x81   :  { %820 = vmatprep.subr.bf16.mxu1 %v3715_v37 }
  0x82   :  { %398 = vmatmul.mubr.bf16.gmra.mrb[20].mxu0 %v3225_v46 }
  0x83   :  { %407 = vmatprep.mubr.bf16.mxu0 %v4760_v0 }
  0x84   :  { %821 = vmatpush1.bf16.msra.mxu1 %v3718_v39 }
  0x85   :  { %822 = vmatprep.subr.bf16.mxu1 %v3722_v40 }
  0x88   :  { %823 = vmatpush1.bf16.msra.mxu1 %v3730_v43 }
  0x89   :  { %824 = vmatprep.subr.bf16.mxu1 %v3733_v44 }
  0x8a   :  { %408 = vmatmul.mubr.bf16.gmra.mrb[24].mxu0 %v3233_v48 }
  0x8b   :  { %417 = vmatprep.mubr.bf16.mxu0 %v4760_v0 }
  0x8c   :  { %825 = vmatpush1.bf16.msra.mxu1 %v3740_v47 }
  0x8d   :  { %826 = vmatprep.subr.bf16.mxu1 %v3743_v49 }
  0x90   :  { %827 = vmatpush1.bf16.msra.mxu1 %v3751_v51 }
  0x91   :  { %828 = vmatprep.subr.bf16.mxu1 %v3754_v52 }
  0x92   :  { %418 = vmatmul.mubr.bf16.gmra.mrb[28].mxu0 %v3234_v54 }
  0x93   :  { %2825 = vmatprep.mubr.msk.bf16.mxu0 %vm3591_vm0, %v4762_v31 }
  0x94   :  { %829 = vmatpush1.bf16.msra.mxu1 %v3761_v55 }
  0x95   :  { %830 = vmatprep.subr.bf16.mxu1 %v3764_v56 }
  0x98   :  { %831 = vmatpush1.bf16.msra.mxu1 %v3772_v58 }
  0x99   :  { %928 = vmatprep.subr.bf16.mxu1 %v3697_v28 }
  0x9a   :  { %2826 = vmatmul.mubr.bf16.vlgmr.msra.gmra.mrb[32].mxu0 %v3590_v60 }
  0x9b   :  { %2830 = vmatpush3.bf16.msra.mxu0 %v3699_v30  ;;  %2845 = vmatprep.mubr.msk.bf16.mxu0 %vm3591_vm0, %v4762_v31 }
  0x9c   :  { %2831 = vmatprep.subr.bf16.mxu0 %v4762_v31 }
  0x9f   :  { %2832 = vmatpush3.bf16.msra.mxu0 %v3708_v35 }
  0xa0   :  { %2833 = vmatprep.subr.bf16.mxu0 %v4762_v31 }
  0xa3   :  { %2834 = vmatpush3.bf16.msra.mxu0 %v3726_v42 }
  0xa4   :  { %2835 = vmatprep.subr.bf16.mxu0 %v4762_v31 }
  0xa7   :  { %2836 = vmatpush3.bf16.msra.mxu0 %v3736_v45 }
  0xa8   :  { %2837 = vmatprep.subr.bf16.mxu0 %v4762_v31 }
  0xab   :  { %2838 = vmatpush3.bf16.msra.mxu0 %v3746_v50 }
  0xac   :  { %2839 = vmatprep.subr.bf16.mxu0 %v4762_v31 }
  0xaf   :  { %2840 = vmatpush3.bf16.msra.mxu0 %v3757_v53 }
  0xb0   :  { %2841 = vmatprep.subr.bf16.mxu0 %v4762_v31 }
  0xb3   :  { %2842 = vmatpush3.bf16.msra.mxu0 %v3767_v57 }
  0xb4   :  { %2843 = vmatprep.subr.bf16.mxu0 %v4762_v31 }
  0xb7   :  { %2844 = vmatpush3.bf16.msra.mxu0 %v3777_v59 }
  0xb8   :  { %2849 = vmatprep.subr.bf16.mxu0 %v4762_v31 }
  0xb9   :  { %v566_v63 = vpop.permute.xlu0 %565 }
  0xba   :  { %vm567_vm1 = vcmp.lt.s32.totalorder %v561_v62, %v566_v63 }
  0xbb   :  { %v807_v1 = vsel %vm567_vm1, 1, %v4760_v0 }
  0xbc   :  { %809 = vperm.xlu0 %3158, %v807_v1   ;;  %920 = vperm.xlu1 %3159, %v807_v1  }
  0xc0   :  { %3160 = vset.pattern.permute.xlu1 %v3592_v2  ;;  %3161 = vset.pattern.permute.xlu0 %v3593_v3 }
  0xc1   :  { %1032 = vperm.xlu1 %3160, %v807_v1   ;;  %1144 = vperm.xlu0 %3161, %v807_v1  }
  0xc5   :  { %3162 = vset.pattern.permute.xlu1 %v3594_v4  ;;  %3164 = vset.pattern.permute.xlu0 %v3595_v5 }
  0xc6   :  { %1256 = vperm.xlu1 %3162, %v807_v1   ;;  %1480 = vperm.xlu0 %3164, %v807_v1  }
  0xca   :  { %3163 = vset.pattern.permute.xlu1 %v3596_v6  ;;  %3167 = vset.pattern.permute.xlu0 %v3597_v7 }
  0xcb   :  { %1368 = vperm.xlu1 %3163, %v807_v1   ;;  %1816 = vperm.xlu0 %3167, %v807_v1  }
  0xcf   :  { %3165 = vset.pattern.permute.xlu1 %v3598_v8  ;;  %3170 = vset.pattern.permute.xlu0 %v3599_v9 }
  0xd0   :  { %1592 = vperm.xlu1 %3165, %v807_v1   ;;  %2152 = vperm.xlu0 %3170, %v807_v1  }
  0xd4   :  { %3166 = vset.pattern.permute.xlu1 %v3600_v10  ;;  %3173 = vset.pattern.permute.xlu0 %v3601_v11 }
  0xd5   :  { %1704 = vperm.xlu1 %3166, %v807_v1   ;;  %2488 = vperm.xlu0 %3173, %v807_v1  }
  0xd9   :  { %3168 = vset.pattern.permute.xlu1 %v3602_v12 }
  0xda   :  { %1928 = vperm.xlu1 %3168, %v807_v1  }
  0xde   :  { %3169 = vset.pattern.permute.xlu1 %v3603_v13 }
  0xdf   :  { %2040 = vperm.xlu1 %3169, %v807_v1  }
  0xe3   :  { %3171 = vset.pattern.permute.xlu1 %v3604_v14 }
  0xe4   :  { %2264 = vperm.xlu1 %3171, %v807_v1  }
  0xe8   :  { %3172 = vset.pattern.permute.xlu1 %v3605_v15 }
  0xe9   :  { %2376 = vperm.xlu1 %3172, %v807_v1  }
 0x12d   :  { %v349_v24 = vpop.f32.mrb[0].mxu0 }
 0x12e   :  { %v3835_v25 = vadd.f32 %v349_v24, %v3828_v21  ;;  %v351_v26 = vpop.f32.mrb[1].mxu0  ;;  %v2795_v27 = vpop.f32.mrb[0].mxu1 }
 0x12f   :  { %v3838_v29 = vadd.f32 %v351_v26, %v3830_v22  ;;  %v353_v34 = vpop.f32.mrb[2].mxu0  ;;  %v3841_v38 = vadd.f32 %v2795_v27, %v3832_v23  ;;  %v462_v41 = vpop.f32.mrb[1].mxu1 }
 0x130   :  { %v3844_v46 = vadd.f32 %v353_v34, %v3828_v21  ;;  %v355_v48 = vpop.f32.mrb[3].mxu0  ;;  %v3847_v54 = vadd.f32 %v462_v41, %v3832_v23  ;;  %v2796_v60 = vpop.f32.mrb[2].mxu1 }
 0x131   :  { %v3850_v61 = vadd.f32 %v355_v48, %v3830_v22  ;;  %v3853_v62 = vadd.f32 %v2796_v60, %v3832_v23  ;;  %v465_v63 = vpop.f32.mrb[3].mxu1 }
 0x132   :  { %v3856_v1 = vadd.f32 %v465_v63, %v3832_v23 }
 0x135   :  { %v359_v2 = vpop.f32.mrb[4].mxu0 }
 0x136   :  { %v3859_v3 = vadd.f32 %v359_v2, %v3828_v21  ;;  %v361_v4 = vpop.f32.mrb[5].mxu0  ;;  %v2799_v5 = vpop.f32.mrb[4].mxu1 }
 0x137   :  { %v3862_v6 = vadd.f32 %v361_v4, %v3830_v22  ;;  %v363_v7 = vpop.f32.mrb[6].mxu0  ;;  %v3865_v8 = vadd.f32 %v2799_v5, %v3832_v23  ;;  %v478_v9 = vpop.f32.mrb[5].mxu1 }
 0x138   :  { %v3868_v10 = vadd.f32 %v363_v7, %v3828_v21  ;;  %v365_v11 = vpop.f32.mrb[7].mxu0  ;;  %v3871_v12 = vadd.f32 %v478_v9, %v3832_v23  ;;  %v2800_v13 = vpop.f32.mrb[6].mxu1 }
 0x139   :  { %v3874_v14 = vadd.f32 %v365_v11, %v3830_v22  ;;  %v3877_v15 = vadd.f32 %v2800_v13, %v3832_v23  ;;  %v481_v16 = vpop.f32.mrb[7].mxu1 }
 0x13a   :  { %v3880_v17 = vadd.f32 %v481_v16, %v3832_v23 }
 0x13b   :  { %4764 = vst [vmem:[#allocation15_spill] sm:$0xff] %v3877_v15 }
 0x13d   :  { %v369_v18 = vpop.f32.mrb[8].mxu0 }
 0x13e   :  { %v3883_v19 = vadd.f32 %v369_v18, %v3828_v21  ;;  %v371_v20 = vpop.f32.mrb[9].mxu0  ;;  %v2803_v24 = vpop.f32.mrb[8].mxu1 }
 0x13f   :  { %v3886_v26 = vadd.f32 %v371_v20, %v3830_v22  ;;  %v373_v27 = vpop.f32.mrb[10].mxu0  ;;  %v3889_v34 = vadd.f32 %v2803_v24, %v3832_v23  ;;  %v494_v41 = vpop.f32.mrb[9].mxu1 }
 0x140   :  { %v3892_v48 = vadd.f32 %v373_v27, %v3828_v21  ;;  %v375_v60 = vpop.f32.mrb[11].mxu0  ;;  %v3895_v63 = vadd.f32 %v494_v41, %v3832_v23  ;;  %v2804_v2 = vpop.f32.mrb[10].mxu1 }
 0x141   :  { %4765 = vst [vmem:[#allocation16_spill] sm:$0xff] %v3889_v34  ;;  %v3898_v4 = vadd.f32 %v375_v60, %v3830_v22  ;;  %v3901_v5 = vadd.f32 %v2804_v2, %v3832_v23  ;;  %v497_v7 = vpop.f32.mrb[11].mxu1 }
 0x142   :  { %4766 = vst [vmem:[#allocation17_spill] sm:$0xff] %v3895_v63  ;;  %v3904_v9 = vadd.f32 %v497_v7, %v3832_v23 }
 0x143   :  { %4767 = vst [vmem:[#allocation18_spill] sm:$0xff] %v3901_v5 }
 0x144   :  { %4768 = vst [vmem:[#allocation19_spill] sm:$0xff] %v3904_v9 }
 0x145   :  { %v379_v11 = vpop.f32.mrb[12].mxu0 }
 0x146   :  { %v3907_v13 = vadd.f32 %v379_v11, %v3828_v21  ;;  %v381_v16 = vpop.f32.mrb[13].mxu0  ;;  %v2807_v18 = vpop.f32.mrb[12].mxu1 }
 0x147   :  { %v3910_v20 = vadd.f32 %v381_v16, %v3830_v22  ;;  %v383_v24 = vpop.f32.mrb[14].mxu0  ;;  %v3913_v27 = vadd.f32 %v2807_v18, %v3832_v23  ;;  %v510_v41 = vpop.f32.mrb[13].mxu1 }
 0x148   :  { %v3916_v60 = vadd.f32 %v383_v24, %v3828_v21  ;;  %v385_v2 = vpop.f32.mrb[15].mxu0  ;;  %v3919_v7 = vadd.f32 %v510_v41, %v3832_v23  ;;  %v2808_v0 = vpop.f32.mrb[14].mxu1 }
 0x149   :  { %4769 = vst [vmem:[#allocation20_spill] sm:$0xff] %v3913_v27  ;;  %v3922_v11 = vadd.f32 %v385_v2, %v3830_v22  ;;  %v3925_v31 = vadd.f32 %v2808_v0, %v3832_v23  ;;  %v513_v16 = vpop.f32.mrb[15].mxu1 }
 0x14a   :  { %4770 = vst [vmem:[#allocation21_spill] sm:$0xff] %v3919_v7  ;;  %v3928_v5 = vadd.f32 %v513_v16, %v3832_v23 }
 0x14b   :  { %4771 = vst [vmem:[#allocation22_spill] sm:$0xff] %v3922_v11  ;;  %4772 = vst [vmem:[#allocation23_spill] sm:$0xff] %v3925_v31 }
 0x14c   :  { %4773 = vst [vmem:[#allocation24_spill] sm:$0xff] %v3928_v5 }
 0x14d   :  { %v389_v18 = vpop.f32.mrb[16].mxu0 }
 0x14e   :  { %v3931_v27 = vadd.f32 %v389_v18, %v3828_v21  ;;  %v732_v24 = vpop.f32.mrb[16].mxu1  ;;  %v391_v34 = vpop.f32.mrb[17].mxu0 }
 0x14f   :  { %v779_v41 = vadd.f32 %v732_v24, %v3835_v25  ;;  %v3935_v7 = vadd.f32 %v391_v34, %v3830_v22  ;;  %v734_v2 = vpop.f32.mrb[17].mxu1  ;;  %v393_v9 = vpop.f32.mrb[18].mxu0 }
 0x150   :  { %4774 = vst [vmem:[#allocation25_spill] sm:$0xff] %v3931_v27  ;;  %v786_v0 = vadd.f32 %v734_v2, %v3838_v29  ;;  %v3939_v31 = vadd.f32 %v393_v9, %v3828_v21  ;;  %v395_v23 = vpop.f32.mrb[19].mxu0  ;;  %v736_v16 = vpop.f32.mrb[18].mxu1 }
 0x151   :  { %4775 = vst [vmem:[#allocation26_spill] sm:$0xff] %v3935_v7  ;;  %v2584_v5 = vmul.f32 -1.442695, %v779_v41  ;;  %v3942_v18 = vadd.f32 %v395_v23, %v3830_v22  ;;  %v737_v63 = vpop.f32.mrb[19].mxu1 }
 0x152   :  { %4776 = vst [vmem:[#allocation27_spill] sm:$0xff] %v3939_v31  ;;  %v2585_v23 = vmul.f32 -1.442695, %v786_v0 }
 0x153   :  { %4777 = vst [vmem:[#allocation28_spill] sm:$0xff] %v3942_v18  ;;  %3246 = vpow2.f32 %v2584_v5 }
 0x154   :  { %3248 = vpow2.f32 %v2585_v23 }
 0x155   :  { %v399_v27 = vpop.f32.mrb[20].mxu0 }
 0x156   :  { %v3945_v25 = vadd.f32 %v399_v27, %v3828_v21  ;;  %v401_v34 = vpop.f32.mrb[21].mxu0 }
 0x157   :  { %v3948_v24 = vadd.f32 %v401_v34, %v3830_v22  ;;  %v403_v29 = vpop.f32.mrb[22].mxu0 }
 0x158   :  { %4778 = vst [vmem:[#allocation29_spill] sm:$0xff] %v3945_v25  ;;  %v3951_v9 = vadd.f32 %v403_v29, %v3828_v21  ;;  %v405_v2 = vpop.f32.mrb[23].mxu0 }
 0x159   :  { %4779 = vst [vmem:[#allocation30_spill] sm:$0xff] %v3948_v24  ;;  %v3954_v41 = vadd.f32 %v405_v2, %v3830_v22 }
 0x15a   :  { %4780 = vst [vmem:[#allocation31_spill] sm:$0xff] %v3951_v9 }
 0x15b   :  { %4781 = vst [vmem:[#allocation32_spill] sm:$0xff] %v3954_v41 }
 0x15d   :  { %v409_v16 = vpop.f32.mrb[24].mxu0  ;;  %v3247_v63 = vpop.eup %3246 }
 0x15e   :  { %v3957_v5 = vadd.f32 %v409_v16, %v3828_v21  ;;  %v411_v27 = vpop.f32.mrb[25].mxu0  ;;  %v783_v9 = vadd.f32 1.0, %v3247_v63 }
 0x15f   :  { %v3960_v25 = vadd.f32 %v411_v27, %v3830_v22  ;;  %v413_v34 = vpop.f32.mrb[26].mxu0 }
 0x160   :  { %4782 = vst [vmem:[#allocation33_spill] sm:$0xff] %v3957_v5  ;;  %v3963_v24 = vadd.f32 %v413_v34, %v3828_v21  ;;  %v415_v29 = vpop.f32.mrb[27].mxu0  ;;  %3250 = vrcp.f32 %v783_v9  ;;  %v3983_v9 = vld [vmem:[%s4757_s5] ss:$0 sm:$0xff]  ;;  %v810_v5 = vpop.permute.xlu0 %809 }
 0x161   :  { %4783 = vst [vmem:[#allocation34_spill] sm:$0xff] %v3960_v25  ;;  %v3966_v2 = vadd.f32 %v415_v29, %v3830_v22  ;;  %vm811_vm2 = vcmp.eq.s32.totalorder %v810_v5, 1 }
 0x162   :  { %4784 = vst [vmem:[#allocation35_spill] sm:$0xff] %v3963_v24  ;;  %v3249_v24 = vpop.eup %3248  ;;  %vm3456_vm3 = vmpackc.low %vm811_vm2, %vm811_vm2 }
 0x163   :  { %4785 = vst [vmem:[#allocation36_spill] sm:$0xff] %v3966_v2  ;;  %v790_v29 = vadd.f32 1.0, %v3249_v24 }
 0x165   :  { %v419_v0 = vpop.f32.mrb[28].mxu0  ;;  %3252 = vrcp.f32 %v790_v29 }
 0x166   :  { %v3969_v41 = vadd.f32 %v419_v0, %v3828_v21  ;;  %v421_v16 = vpop.f32.mrb[29].mxu0 }
 0x167   :  { %v3972_v23 = vadd.f32 %v421_v16, %v3830_v22  ;;  %v423_v27 = vpop.f32.mrb[30].mxu0 }
 0x168   :  { %4786 = vst [vmem:[#allocation37_spill] sm:$0xff] %v3969_v41  ;;  %v3975_v25 = vadd.f32 %v423_v27, %v3828_v21  ;;  %v425_v34 = vpop.f32.mrb[31].mxu0 }
 0x169   :  { %4787 = vst [vmem:[#allocation38_spill] sm:$0xff] %v3972_v23  ;;  %v3978_v63 = vadd.f32 %v425_v34, %v3830_v22 }
 0x16a   :  { %4788 = vst [vmem:[#allocation39_spill] sm:$0xff] %v3975_v25  ;;  %v3251_v23 = vpop.eup %3250 }
 0x16b   :  { %4789 = vst [vmem:[#allocation40_spill] sm:$0xff] %v3978_v63 }
 0x16d   :  { %v773_v0 = vpop.f32.mrb[32].mxu0 }
 0x16e   :  { %v799_v41 = vadd.f32 %v3983_v9, %v773_v0  ;;  %v2827_v16 = vpop.f32.mrb[33].mxu0 }
 0x16f   :  { %v776_v2 = vpop.f32.mrb[34].mxu0  ;;  %v3253_v22 = vpop.eup %3252 }
 0x170   :  { %v800_v21 = vmul.f32 %v3251_v23, %v799_v41  ;;  %v2828_v27 = vpop.f32.mrb[35].mxu0  ;;  %v803_v34 = vsub.f32 1.0, %v3253_v22  ;;  %v805_v18 = vmul.f32 0.0, %v3253_v22 }
 0x172   :  { %v801_v25 = vadd.f32 %v800_v21, %v3847_v54  ;;  %v4790_v54 = vmov 0.0  }
 0x174   :  { %3254 = vtanh.f32 %v801_v25  ;;  %v4791_v25 = vmov 0  }
 0x17e   :  { %v3255_v63 = vpop.eup %3254 }
 0x17f   :  { %v804_v31 = vmul.f32 %v3255_v63, %v803_v34 }
 0x181   :  { %v806_v7 = vadd.f32 %v805_v18, %v804_v31 }
 0x183   :  { %v3987_v24 = vsel %vm811_vm2, %v806_v7, 0.0  ;;  %v3457_v2 = vpack.c.bf16 %v806_v7, %v806_v7 }
 0x184   :  { %814 = vst [vmem:[#allocation8] sm:$0xff] %v3987_v24 }
 0x185   :  { %3458 = vmatmul.mubr.msk.bf16.vlgmr.msra.gmra.mrb[20].mxu1 %vm3456_vm3, %v3457_v2  ;;  %3461 = vmatmul.mubr.msk.bf16.vlgmr.msra.gmra.mrb[36].mxu0 %vm3456_vm3, %v3457_v2 }
 0x186   :  { %929 = vmatpush1.bf16.msra.mxu1 %v3702_v32  ;;  %2850 = vmatpush3.bf16.msra.mxu0 %v3699_v30 }
 0x187   :  { %930 = vmatprep.subr.bf16.mxu1 %v3704_v33  ;;  %2851 = vmatprep.subr.bf16.mxu0 %v4790_v54 }
 0x188   :  { %960 = vmatprep.mubr.bf16.mxu1 %v4791_v25  ;;  %2865 = vmatprep.mubr.msk.bf16.mxu0 %vm3591_vm0, %v4790_v54 }
 0x18a   :  { %931 = vmatpush1.bf16.msra.mxu1 %v3711_v36  ;;  %2852 = vmatpush3.bf16.msra.mxu0 %v3708_v35 }
 0x18b   :  { %932 = vmatprep.subr.bf16.mxu1 %v3715_v37  ;;  %2853 = vmatprep.subr.bf16.mxu0 %v4790_v54 }
 0x18e   :  { %933 = vmatpush1.bf16.msra.mxu1 %v3718_v39  ;;  %2854 = vmatpush3.bf16.msra.mxu0 %v3726_v42 }
 0x18f   :  { %934 = vmatprep.subr.bf16.mxu1 %v3722_v40  ;;  %2855 = vmatprep.subr.bf16.mxu0 %v4790_v54 }
 0x192   :  { %935 = vmatpush1.bf16.msra.mxu1 %v3730_v43  ;;  %2856 = vmatpush3.bf16.msra.mxu0 %v3736_v45 }
 0x193   :  { %936 = vmatprep.subr.bf16.mxu1 %v3733_v44  ;;  %2857 = vmatprep.subr.bf16.mxu0 %v4790_v54 }
 0x196   :  { %937 = vmatpush1.bf16.msra.mxu1 %v3740_v47  ;;  %2858 = vmatpush3.bf16.msra.mxu0 %v3746_v50 }
 0x197   :  { %938 = vmatprep.subr.bf16.mxu1 %v3743_v49  ;;  %2859 = vmatprep.subr.bf16.mxu0 %v4790_v54 }
 0x19a   :  { %939 = vmatpush1.bf16.msra.mxu1 %v3751_v51  ;;  %2860 = vmatpush3.bf16.msra.mxu0 %v3757_v53 }
 0x19b   :  { %940 = vmatprep.subr.bf16.mxu1 %v3754_v52  ;;  %2861 = vmatprep.subr.bf16.mxu0 %v4790_v54 }
 0x19e   :  { %941 = vmatpush1.bf16.msra.mxu1 %v3761_v55  ;;  %2862 = vmatpush3.bf16.msra.mxu0 %v3767_v57 }
 0x19f   :  { %942 = vmatprep.subr.bf16.mxu1 %v3764_v56  ;;  %2863 = vmatprep.subr.bf16.mxu0 %v4790_v54 }
 0x1a2   :  { %943 = vmatpush1.bf16.msra.mxu1 %v3772_v58  ;;  %2864 = vmatpush3.bf16.msra.mxu0 %v3777_v59 }
 0x1a3   :  { %1040 = vmatprep.subr.bf16.mxu1 %v3697_v28  ;;  %2869 = vmatprep.subr.bf16.mxu0 %v4790_v54 }
 0x258   :  { %v850_v31 = vpop.f32.mrb[20].mxu1  ;;  %v891_v7 = vpop.f32.mrb[36].mxu0 }
 0x259   :  { %v897_v18 = vadd.f32 %v850_v31, %v3844_v46  ;;  %v852_v41 = vpop.f32.mrb[21].mxu1  ;;  %v2847_v5 = vpop.f32.mrb[37].mxu0  ;;  %v911_v11 = vadd.f32 %v3983_v9, %v891_v7 }
 0x25a   :  { %v904_v23 = vadd.f32 %v852_v41, %v3850_v61  ;;  %v854_v63 = vpop.f32.mrb[22].mxu1  ;;  %v894_v29 = vpop.f32.mrb[38].mxu0 }
 0x25b   :  { %v2587_v0 = vmul.f32 -1.442695, %v897_v18  ;;  %v855_v16 = vpop.f32.mrb[23].mxu1  ;;  %v2848_v21 = vpop.f32.mrb[39].mxu0 }
 0x25c   :  { %v2588_v27 = vmul.f32 -1.442695, %v904_v23  ;;  %v921_v29 = vpop.permute.xlu1 %920 }
 0x25d   :  { %3256 = vpow2.f32 %v2587_v0  ;;  %vm922_vm4 = vcmp.eq.s32.totalorder %v921_v29, 1 }
 0x25e   :  { %3258 = vpow2.f32 %v2588_v27 }
 0x267   :  { %v3257_v22 = vpop.eup %3256 }
 0x268   :  { %v901_v34 = vadd.f32 1.0, %v3257_v22  ;;  %v3259_v2 = vpop.eup %3258 }
 0x269   :  { %v908_v15 = vadd.f32 1.0, %v3259_v2 }
 0x26a   :  { %3260 = vrcp.f32 %v901_v34 }
 0x26b   :  { %3262 = vrcp.f32 %v908_v15 }
 0x274   :  { %v3261_v46 = vpop.eup %3260 }
 0x275   :  { %v912_v31 = vmul.f32 %v3261_v46, %v911_v11  ;;  %v3263_v41 = vpop.eup %3262 }
 0x276   :  { %v915_v18 = vsub.f32 1.0, %v3263_v41  ;;  %v917_v63 = vmul.f32 %v3263_v41, %v3987_v24 }
 0x277   :  { %v913_v61 = vadd.f32 %v912_v31, %v3856_v1 }
 0x279   :  { %3264 = vtanh.f32 %v913_v61 }
 0x283   :  { %v3265_v5 = vpop.eup %3264 }
 0x284   :  { %v916_v23 = vmul.f32 %v3265_v5, %v915_v18 }
 0x286   :  { %v918_v0 = vadd.f32 %v917_v63, %v916_v23 }
 0x288   :  { %v4031_v16 = vsel %vm922_vm4, %v918_v0, %v3987_v24  ;;  %v924_v21 = vsel %vm922_vm4, %v918_v0, 0.0 }
 0x289   :  { %926 = vst [vmem:[#allocation8 + $0x8] sm:$0xff] %v924_v21  ;;  %v927_v15 = vpack.c.bf16 %v4031_v16, %v4031_v16 }
 0x28b   :  { %961 = vmatmul.mubr.bf16.vlgmr.msra.gmra.mrb[24].mxu1 %v927_v15  ;;  %2866 = vmatmul.mubr.bf16.vlgmr.msra.gmra.mrb[40].mxu0 %v927_v15 }
 0x28c   :  { %1041 = vmatpush1.bf16.msra.mxu1 %v3702_v32  ;;  %2870 = vmatpush3.bf16.msra.mxu0 %v3699_v30 }
 0x28d   :  { %1042 = vmatprep.subr.bf16.mxu1 %v3704_v33  ;;  %2871 = vmatprep.subr.bf16.mxu0 %v4790_v54 }
 0x28e   :  { %1072 = vmatprep.mubr.bf16.mxu1 %v4791_v25  ;;  %2885 = vmatprep.mubr.msk.bf16.mxu0 %vm3591_vm0, %v4790_v54 }
 0x290   :  { %1043 = vmatpush1.bf16.msra.mxu1 %v3711_v36  ;;  %2872 = vmatpush3.bf16.msra.mxu0 %v3708_v35 }
 0x291   :  { %1044 = vmatprep.subr.bf16.mxu1 %v3715_v37  ;;  %2873 = vmatprep.subr.bf16.mxu0 %v4790_v54 }
 0x294   :  { %1045 = vmatpush1.bf16.msra.mxu1 %v3718_v39  ;;  %2874 = vmatpush3.bf16.msra.mxu0 %v3726_v42 }
 0x295   :  { %1046 = vmatprep.subr.bf16.mxu1 %v3722_v40  ;;  %2875 = vmatprep.subr.bf16.mxu0 %v4790_v54 }
 0x298   :  { %1047 = vmatpush1.bf16.msra.mxu1 %v3730_v43  ;;  %2876 = vmatpush3.bf16.msra.mxu0 %v3736_v45 }
 0x299   :  { %1048 = vmatprep.subr.bf16.mxu1 %v3733_v44  ;;  %2877 = vmatprep.subr.bf16.mxu0 %v4790_v54 }
 0x29c   :  { %1049 = vmatpush1.bf16.msra.mxu1 %v3740_v47  ;;  %2878 = vmatpush3.bf16.msra.mxu0 %v3746_v50 }
 0x29d   :  { %1050 = vmatprep.subr.bf16.mxu1 %v3743_v49  ;;  %2879 = vmatprep.subr.bf16.mxu0 %v4790_v54 }
 0x2a0   :  { %1051 = vmatpush1.bf16.msra.mxu1 %v3751_v51  ;;  %2880 = vmatpush3.bf16.msra.mxu0 %v3757_v53 }
 0x2a1   :  { %1052 = vmatprep.subr.bf16.mxu1 %v3754_v52  ;;  %2881 = vmatprep.subr.bf16.mxu0 %v4790_v54 }
 0x2a4   :  { %1053 = vmatpush1.bf16.msra.mxu1 %v3761_v55  ;;  %2882 = vmatpush3.bf16.msra.mxu0 %v3767_v57 }
 0x2a5   :  { %1054 = vmatprep.subr.bf16.mxu1 %v3764_v56  ;;  %2883 = vmatprep.subr.bf16.mxu0 %v4790_v54 }
 0x2a8   :  { %1055 = vmatpush1.bf16.msra.mxu1 %v3772_v58  ;;  %2884 = vmatpush3.bf16.msra.mxu0 %v3777_v59 }
 0x2a9   :  { %1152 = vmatprep.subr.bf16.mxu1 %v3697_v28  ;;  %2889 = vmatprep.subr.bf16.mxu0 %v4790_v54 }
 0x35e   :  { %v962_v1 = vpop.f32.mrb[24].mxu1  ;;  %v1003_v11 = vpop.f32.mrb[40].mxu0 }
 0x35f   :  { %v1009_v24 = vadd.f32 %v962_v1, %v3859_v3  ;;  %v964_v7 = vpop.f32.mrb[25].mxu1  ;;  %v2867_v27 = vpop.f32.mrb[41].mxu0  ;;  %v1023_v23 = vadd.f32 %v3983_v9, %v1003_v11 }
 0x360   :  { %v1016_v22 = vadd.f32 %v964_v7, %v3862_v6  ;;  %v966_v34 = vpop.f32.mrb[26].mxu1  ;;  %v1006_v2 = vpop.f32.mrb[42].mxu0 }
 0x361   :  { %v2589_v46 = vmul.f32 -1.442695, %v1009_v24  ;;  %v967_v31 = vpop.f32.mrb[27].mxu1  ;;  %v2868_v61 = vpop.f32.mrb[43].mxu0 }
 0x362   :  { %v2590_v41 = vmul.f32 -1.442695, %v1016_v22  ;;  %v1033_v7 = vpop.permute.xlu1 %1032 }
 0x363   :  { %3266 = vpow2.f32 %v2589_v46  ;;  %vm1034_vm5 = vcmp.eq.s32.totalorder %v1033_v7, 1  ;;  %v4153_v7 = vld [vmem:[#allocation7 + $0x38] ss:$12 sps:$4 sm:$0xff]  }
 0x364   :  { %3268 = vpow2.f32 %v2590_v41 }
 0x36d   :  { %v3267_v18 = vpop.eup %3266 }
 0x36e   :  { %v1013_v28 = vadd.f32 1.0, %v3267_v18  ;;  %v3269_v5 = vpop.eup %3268 }
 0x36f   :  { %v1020_v63 = vadd.f32 1.0, %v3269_v5  ;;  %v1145_v5 = vpop.permute.xlu0 %1144 }
 0x370   :  { %3270 = vrcp.f32 %v1013_v28  ;;  %vm1146_vm6 = vcmp.eq.s32.totalorder %v1145_v5, 1  ;;  %v4235_v5 = vld [vmem:[#allocation7 + $0x90] ss:$12 sps:$4 sm:$0xff]  }
 0x371   :  { %3272 = vrcp.f32 %v1020_v63 }
 0x37a   :  { %v3271_v3 = vpop.eup %3270 }
 0x37b   :  { %v1024_v29 = vmul.f32 %v3271_v3, %v1023_v23  ;;  %v3273_v0 = vpop.eup %3272 }
 0x37c   :  { %v1027_v21 = vsub.f32 1.0, %v3273_v0  ;;  %v1029_v1 = vmul.f32 %v3273_v0, %v4031_v16  ;;  %v4133_v0 = vld [vmem:[#allocation7 + $0x1c] ss:$12 sps:$4 sm:$0xff]  }
 0x37d   :  { %v1025_v6 = vadd.f32 %v1024_v29, %v3841_v38 }
 0x37f   :  { %3274 = vtanh.f32 %v1025_v6  ;;  %v4130_v6 = vld [vmem:[#allocation7 + $0x8] ss:$12 sps:$4 sm:$0xff]  }
 0x389   :  { %v3275_v15 = vpop.eup %3274 }
 0x38a   :  { %v1028_v24 = vmul.f32 %v3275_v15, %v1027_v21  ;;  %v4140_v21 = vld [vmem:[#allocation7 + $0x18] ss:$12 sps:$4 sm:$0xff]   ;;  %v4143_v15 = vld [vmem:[#allocation7 + $0x20] ss:$12 sps:$4 sm:$0xff]  }
 0x38c   :  { %v1030_v27 = vadd.f32 %v1029_v1, %v1028_v24  ;;  %v4146_v1 = vld [vmem:[#allocation7 + $0x34] ss:$12 sps:$4 sm:$0xff]   ;;  %v4150_v24 = vld [vmem:[#allocation7 + $0x30] ss:$12 sps:$4 sm:$0xff]  }
 0x38e   :  { %v4076_v22 = vsel %vm1034_vm5, %v1030_v27, %v4031_v16  ;;  %v1036_v34 = vsel %vm1034_vm5, %v1030_v27, 0.0  ;;  %v4156_v27 = vld [vmem:[#allocation7 + $0x4c] ss:$12 sps:$4 sm:$0xff]  }
 0x38f   :  { %1038 = vst [vmem:[#allocation8 + $0x10] sm:$0xff] %v1036_v34  ;;  %v1039_v11 = vpack.c.bf16 %v4076_v22, %v4076_v22  ;;  %v4163_v34 = vld [vmem:[#allocation7 + $0x50] ss:$12 sps:$4 sm:$0xff]  }
 0x391   :  { %1073 = vmatmul.mubr.bf16.vlgmr.msra.gmra.mrb[28].mxu1 %v1039_v11  ;;  %2886 = vmatmul.mubr.bf16.vlgmr.msra.gmra.mrb[44].mxu0 %v1039_v11  ;;  %v4166_v11 = vld [vmem:[#allocation7 + $0x64] ss:$12 sps:$4 sm:$0xff]  }
 0x392   :  { %1153 = vmatpush1.bf16.msra.mxu1 %v3702_v32  ;;  %2890 = vmatpush3.bf16.msra.mxu0 %v3699_v30  ;;  %v4113_v30 = vld [vmem:[#allocation7 + $0x4] ss:$12 sps:$4 sm:$0xff]  }
 0x393   :  { %1154 = vmatprep.subr.bf16.mxu1 %v3704_v33  ;;  %2891 = vmatprep.subr.bf16.mxu0 %v4790_v54 }
 0x394   :  { %1184 = vmatprep.mubr.bf16.mxu1 %v4791_v25  ;;  %2905 = vmatprep.mubr.msk.bf16.mxu0 %vm3591_vm0, %v4790_v54 }
 0x396   :  { %1155 = vmatpush1.bf16.msra.mxu1 %v3711_v36  ;;  %2892 = vmatpush3.bf16.msra.mxu0 %v3708_v35 }
 0x397   :  { %1156 = vmatprep.subr.bf16.mxu1 %v3715_v37  ;;  %2893 = vmatprep.subr.bf16.mxu0 %v4790_v54 }
 0x39a   :  { %1157 = vmatpush1.bf16.msra.mxu1 %v3718_v39  ;;  %2894 = vmatpush3.bf16.msra.mxu0 %v3726_v42 }
 0x39b   :  { %1158 = vmatprep.subr.bf16.mxu1 %v3722_v40  ;;  %2895 = vmatprep.subr.bf16.mxu0 %v4790_v54 }
 0x39e   :  { %1159 = vmatpush1.bf16.msra.mxu1 %v3730_v43  ;;  %2896 = vmatpush3.bf16.msra.mxu0 %v3736_v45 }
 0x39f   :  { %1160 = vmatprep.subr.bf16.mxu1 %v3733_v44  ;;  %2897 = vmatprep.subr.bf16.mxu0 %v4790_v54 }
 0x3a2   :  { %1161 = vmatpush1.bf16.msra.mxu1 %v3740_v47  ;;  %2898 = vmatpush3.bf16.msra.mxu0 %v3746_v50 }
 0x3a3   :  { %1162 = vmatprep.subr.bf16.mxu1 %v3743_v49  ;;  %2899 = vmatprep.subr.bf16.mxu0 %v4790_v54 }
 0x3a6   :  { %1163 = vmatpush1.bf16.msra.mxu1 %v3751_v51  ;;  %2900 = vmatpush3.bf16.msra.mxu0 %v3757_v53 }
 0x3a7   :  { %1164 = vmatprep.subr.bf16.mxu1 %v3754_v52  ;;  %2901 = vmatprep.subr.bf16.mxu0 %v4790_v54 }
 0x3aa   :  { %1165 = vmatpush1.bf16.msra.mxu1 %v3761_v55  ;;  %2902 = vmatpush3.bf16.msra.mxu0 %v3767_v57 }
 0x3ab   :  { %1166 = vmatprep.subr.bf16.mxu1 %v3764_v56  ;;  %2903 = vmatprep.subr.bf16.mxu0 %v4790_v54 }
 0x3ae   :  { %1167 = vmatpush1.bf16.msra.mxu1 %v3772_v58  ;;  %2904 = vmatpush3.bf16.msra.mxu0 %v3777_v59 }
 0x3af   :  { %1264 = vmatprep.subr.bf16.mxu1 %v4113_v30  ;;  %2909 = vmatprep.subr.bf16.mxu0 %v4790_v54 }
 0x464   :  { %v1074_v32 = vpop.f32.mrb[28].mxu1  ;;  %v1115_v33 = vpop.f32.mrb[44].mxu0 }
 0x465   :  { %v1121_v35 = vadd.f32 %v1074_v32, %v3868_v10  ;;  %v1076_v36 = vpop.f32.mrb[29].mxu1  ;;  %v2887_v37 = vpop.f32.mrb[45].mxu0  ;;  %v1135_v2 = vadd.f32 %v3983_v9, %v1115_v33  ;;  %v4170_v32 = vld [vmem:[#allocation7 + $0x60] ss:$12 sps:$4 sm:$0xff]   ;;  %v4173_v33 = vld [vmem:[#allocation7 + $0x68] ss:$12 sps:$4 sm:$0xff]  }
 0x466   :  { %v1128_v39 = vadd.f32 %v1076_v36, %v3874_v14  ;;  %v1078_v40 = vpop.f32.mrb[30].mxu1  ;;  %v1118_v42 = vpop.f32.mrb[46].mxu0 }
 0x467   :  { %v2591_v43 = vmul.f32 -1.442695, %v1121_v35  ;;  %v1079_v44 = vpop.f32.mrb[31].mxu1  ;;  %v2888_v45 = vpop.f32.mrb[47].mxu0  ;;  %v4176_v35 = vld [vmem:[#allocation7 + $0x7c] ss:$12 sps:$4 sm:$0xff]  }
 0x468   :  { %v2592_v47 = vmul.f32 -1.442695, %v1128_v39 }
 0x469   :  { %3276 = vpow2.f32 %v2591_v43 }
 0x46a   :  { %3278 = vpow2.f32 %v2592_v47 }
 0x473   :  { %v3277_v49 = vpop.eup %3276 }
 0x474   :  { %v1125_v50 = vadd.f32 1.0, %v3277_v49  ;;  %v3279_v38 = vpop.eup %3278 }
 0x475   :  { %v1132_v16 = vadd.f32 1.0, %v3279_v38 }
 0x476   :  { %3280 = vrcp.f32 %v1125_v50 }
 0x477   :  { %3282 = vrcp.f32 %v1132_v16 }
 0x480   :  { %v3281_v10 = vpop.eup %3280 }
 0x481   :  { %v1136_v46 = vmul.f32 %v3281_v10, %v1135_v2  ;;  %v3283_v31 = vpop.eup %3282 }
 0x482   :  { %v1139_v61 = vsub.f32 1.0, %v3283_v31  ;;  %v1141_v18 = vmul.f32 %v3283_v31, %v4076_v22 }
 0x483   :  { %v1137_v14 = vadd.f32 %v1136_v46, %v3853_v62  ;;  %v4127_v62 = vld [vmem:[#allocation7] ss:$12 sps:$4 sm:$0xff]   ;;  %v1257_v46 = vpop.permute.xlu1 %1256 }
 0x484   :  { %vm1258_vm7 = vcmp.eq.s32.totalorder %v1257_v46, 1 }
 0x485   :  { %3284 = vtanh.f32 %v1137_v14 }
 0x48f   :  { %v3285_v41 = vpop.eup %3284 }
 0x490   :  { %v1140_v28 = vmul.f32 %v3285_v41, %v1139_v61 }
 0x492   :  { %v1142_v63 = vadd.f32 %v1141_v18, %v1140_v28  ;;  %v4228_v18 = vld [vmem:[#allocation7 + $0x80] ss:$12 sps:$4 sm:$0xff]  }
 0x493   :  { %v4231_v28 = vld [vmem:[#allocation7 + $0x94] ss:$12 sps:$4 sm:$0xff]  }
 0x494   :  { %v4123_v23 = vsel %vm1146_vm6, %v1142_v63, %v4076_v22  ;;  %v1148_v3 = vsel %vm1146_vm6, %v1142_v63, 0.0  ;;  %v4160_v22 = vld [vmem:[#allocation7 + $0x48] ss:$12 sps:$4 sm:$0xff]   ;;  %v4238_v63 = vld [vmem:[#allocation7 + $0x98] ss:$12 sps:$4 sm:$0xff]  }
 0x495   :  { %1150 = vst [vmem:[#allocation8 + $0x18] sm:$0xff] %v1148_v3  ;;  %v1151_v29 = vpack.c.bf16 %v4123_v23, %v4123_v23  ;;  %v4245_v3 = vld [vmem:[#allocation7 + $0xa8] ss:$12 sps:$4 sm:$0xff]  }
 0x497   :  { %1185 = vmatmul.mubr.bf16.vlgmr.msra.gmra.mrb[32].mxu1 %v1151_v29  ;;  %2906 = vmatmul.mubr.bf16.vlgmr.msra.gmra.mrb[48].mxu0 %v1151_v29  ;;  %v4248_v29 = vld [vmem:[#allocation7 + $0xb0] ss:$12 sps:$4 sm:$0xff]  }
 0x498   :  { %1265 = vmatpush1.bf16.msra.mxu1 %v4127_v62  ;;  %2910 = vmatpush3.bf16.msra.mxu0 %v4130_v6 }
 0x499   :  { %1266 = vmatprep.subr.bf16.mxu1 %v4133_v0  ;;  %2911 = vmatprep.subr.bf16.mxu0 %v4790_v54 }
 0x49a   :  { %1296 = vmatprep.mubr.bf16.mxu1 %v4791_v25  ;;  %2925 = vmatprep.mubr.msk.bf16.mxu0 %vm3591_vm0, %v4790_v54 }
 0x49c   :  { %1267 = vmatpush1.bf16.msra.mxu1 %v4140_v21  ;;  %2912 = vmatpush3.bf16.msra.mxu0 %v4143_v15 }
 0x49d   :  { %1268 = vmatprep.subr.bf16.mxu1 %v4146_v1  ;;  %2913 = vmatprep.subr.bf16.mxu0 %v4790_v54 }
 0x4a0   :  { %1269 = vmatpush1.bf16.msra.mxu1 %v4150_v24  ;;  %2914 = vmatpush3.bf16.msra.mxu0 %v4153_v7 }
 0x4a1   :  { %1270 = vmatprep.subr.bf16.mxu1 %v4156_v27  ;;  %2915 = vmatprep.subr.bf16.mxu0 %v4790_v54 }
 0x4a4   :  { %1271 = vmatpush1.bf16.msra.mxu1 %v4160_v22  ;;  %2916 = vmatpush3.bf16.msra.mxu0 %v4163_v34 }
 0x4a5   :  { %1272 = vmatprep.subr.bf16.mxu1 %v4166_v11  ;;  %2917 = vmatprep.subr.bf16.mxu0 %v4790_v54 }
 0x4a8   :  { %1273 = vmatpush1.bf16.msra.mxu1 %v4170_v32  ;;  %2918 = vmatpush3.bf16.msra.mxu0 %v4173_v33 }
 0x4a9   :  { %1274 = vmatprep.subr.bf16.mxu1 %v4176_v35  ;;  %2919 = vmatprep.subr.bf16.mxu0 %v4790_v54 }
 0x4ac   :  { %1275 = vmatpush1.bf16.msra.mxu1 %v3751_v51  ;;  %2920 = vmatpush3.bf16.msra.mxu0 %v3757_v53 }
 0x4ad   :  { %1276 = vmatprep.subr.bf16.mxu1 %v3754_v52  ;;  %2921 = vmatprep.subr.bf16.mxu0 %v4790_v54 }
 0x4b0   :  { %1277 = vmatpush1.bf16.msra.mxu1 %v3761_v55  ;;  %2922 = vmatpush3.bf16.msra.mxu0 %v3767_v57 }
 0x4b1   :  { %1278 = vmatprep.subr.bf16.mxu1 %v3764_v56  ;;  %2923 = vmatprep.subr.bf16.mxu0 %v4790_v54 }
 0x4b4   :  { %1279 = vmatpush1.bf16.msra.mxu1 %v3772_v58  ;;  %2924 = vmatpush3.bf16.msra.mxu0 %v3777_v59 }
 0x4b5   :  { %1376 = vmatprep.subr.bf16.mxu1 %v4113_v30  ;;  %2929 = vmatprep.subr.bf16.mxu0 %v4790_v54 }
 0x56a   :  { %v1186_v51 = vpop.f32.mrb[32].mxu1  ;;  %v1227_v52 = vpop.f32.mrb[48].mxu0 }
 0x56b   :  { %v1233_v53 = vadd.f32 %v1186_v51, %v3883_v19  ;;  %v1188_v36 = vpop.f32.mrb[33].mxu1  ;;  %v2907_v55 = vpop.f32.mrb[49].mxu0  ;;  %v1247_v47 = vadd.f32 %v3983_v9, %v1227_v52 }
 0x56c   :  { %v1240_v57 = vadd.f32 %v1188_v36, %v3886_v26  ;;  %v1190_v37 = vpop.f32.mrb[34].mxu1  ;;  %v1230_v56 = vpop.f32.mrb[50].mxu0 }
 0x56d   :  { %v2593_v39 = vmul.f32 -1.442695, %v1233_v53  ;;  %v1191_v40 = vpop.f32.mrb[35].mxu1  ;;  %v2908_v42 = vpop.f32.mrb[51].mxu0 }
 0x56e   :  { %v2594_v58 = vmul.f32 -1.442695, %v1240_v57 }
 0x56f   :  { %3286 = vpow2.f32 %v2593_v39 }
 0x570   :  { %3288 = vpow2.f32 %v2594_v58 }
 0x579   :  { %v3287_v59 = vpop.eup %3286 }
 0x57a   :  { %v1237_v43 = vadd.f32 1.0, %v3287_v59  ;;  %v3289_v44 = vpop.eup %3288 }
 0x57b   :  { %v1244_v45 = vadd.f32 1.0, %v3289_v44 }
 0x57c   :  { %3290 = vrcp.f32 %v1237_v43 }
 0x57d   :  { %3292 = vrcp.f32 %v1244_v45 }
 0x586   :  { %v3291_v19 = vpop.eup %3290 }
 0x587   :  { %v1248_v49 = vmul.f32 %v3291_v19, %v1247_v47  ;;  %v3293_v50 = vpop.eup %3292 }
 0x588   :  { %v1251_v38 = vsub.f32 1.0, %v3293_v50  ;;  %v1253_v2 = vmul.f32 %v3293_v50, %v4123_v23 }
 0x589   :  { %v1249_v26 = vadd.f32 %v1248_v49, %v3871_v12  ;;  %v4225_v12 = vld [vmem:[#allocation7 + $0x78] ss:$12 sps:$4 sm:$0xff]  }
 0x58b   :  { %3294 = vtanh.f32 %v1249_v26 }
 0x595   :  { %v3295_v16 = vpop.eup %3294 }
 0x596   :  { %v1252_v10 = vmul.f32 %v3295_v16, %v1251_v38 }
 0x598   :  { %v1254_v14 = vadd.f32 %v1253_v2, %v1252_v10  ;;  %v1369_v2 = vpop.permute.xlu1 %1368 }
 0x599   :  { %vm1370_vm8 = vcmp.eq.s32.totalorder %v1369_v2, 1 }
 0x59a   :  { %v4198_v31 = vsel %vm1258_vm7, %v1254_v14, %v4123_v23  ;;  %v1260_v61 = vsel %vm1258_vm7, %v1254_v14, 0.0  ;;  %v4241_v23 = vld [vmem:[#allocation7 + $0xac] ss:$12 sps:$4 sm:$0xff]  }
 0x59b   :  { %1262 = vst [vmem:[#allocation8 + $0x20] sm:$0xff] %v1260_v61  ;;  %v1263_v41 = vpack.c.bf16 %v4198_v31, %v4198_v31 }
 0x59d   :  { %1297 = vmatmul.mubr.bf16.vlgmr.msra.gmra.mrb[36].mxu1 %v1263_v41  ;;  %2926 = vmatmul.mubr.bf16.vlgmr.msra.gmra.mrb[52].mxu0 %v1263_v41 }
 0x59e   :  { %1377 = vmatpush1.bf16.msra.mxu1 %v4127_v62  ;;  %2930 = vmatpush3.bf16.msra.mxu0 %v4130_v6 }
 0x59f   :  { %1378 = vmatprep.subr.bf16.mxu1 %v4133_v0  ;;  %2931 = vmatprep.subr.bf16.mxu0 %v4790_v54 }
 0x5a0   :  { %1408 = vmatprep.mubr.bf16.mxu1 %v4791_v25  ;;  %2945 = vmatprep.mubr.msk.bf16.mxu0 %vm3591_vm0, %v4790_v54 }
 0x5a2   :  { %1379 = vmatpush1.bf16.msra.mxu1 %v4140_v21  ;;  %2932 = vmatpush3.bf16.msra.mxu0 %v4143_v15 }
 0x5a3   :  { %1380 = vmatprep.subr.bf16.mxu1 %v4146_v1  ;;  %2933 = vmatprep.subr.bf16.mxu0 %v4790_v54 }
 0x5a6   :  { %1381 = vmatpush1.bf16.msra.mxu1 %v4150_v24  ;;  %2934 = vmatpush3.bf16.msra.mxu0 %v4153_v7 }
 0x5a7   :  { %1382 = vmatprep.subr.bf16.mxu1 %v4156_v27  ;;  %2935 = vmatprep.subr.bf16.mxu0 %v4790_v54 }
 0x5aa   :  { %1383 = vmatpush1.bf16.msra.mxu1 %v4160_v22  ;;  %2936 = vmatpush3.bf16.msra.mxu0 %v4163_v34 }
 0x5ab   :  { %1384 = vmatprep.subr.bf16.mxu1 %v4166_v11  ;;  %2937 = vmatprep.subr.bf16.mxu0 %v4790_v54 }
 0x5ae   :  { %1385 = vmatpush1.bf16.msra.mxu1 %v4170_v32  ;;  %2938 = vmatpush3.bf16.msra.mxu0 %v4173_v33 }
 0x5af   :  { %1386 = vmatprep.subr.bf16.mxu1 %v4176_v35  ;;  %2939 = vmatprep.subr.bf16.mxu0 %v4790_v54 }
 0x5b2   :  { %1387 = vmatpush1.bf16.msra.mxu1 %v4225_v12  ;;  %2940 = vmatpush3.bf16.msra.mxu0 %v4228_v18 }
 0x5b3   :  { %1388 = vmatprep.subr.bf16.mxu1 %v4231_v28  ;;  %2941 = vmatprep.subr.bf16.mxu0 %v4790_v54 }
 0x5b6   :  { %1389 = vmatpush1.bf16.msra.mxu1 %v4235_v5  ;;  %2942 = vmatpush3.bf16.msra.mxu0 %v4238_v63 }
 0x5b7   :  { %1390 = vmatprep.subr.bf16.mxu1 %v4241_v23  ;;  %2943 = vmatprep.subr.bf16.mxu0 %v4790_v54 }
 0x5ba   :  { %1391 = vmatpush1.bf16.msra.mxu1 %v4245_v3  ;;  %2944 = vmatpush3.bf16.msra.mxu0 %v4248_v29 }
 0x5bb   :  { %1488 = vmatprep.subr.bf16.mxu1 %v4113_v30  ;;  %2949 = vmatprep.subr.bf16.mxu0 %v4790_v54 }
 0x670   :  { %v1298_v51 = vpop.f32.mrb[36].mxu1  ;;  %v1339_v52 = vpop.f32.mrb[52].mxu0 }
 0x671   :  { %v1345_v53 = vadd.f32 %v1298_v51, %v3892_v48  ;;  %v1300_v36 = vpop.f32.mrb[37].mxu1  ;;  %v2927_v55 = vpop.f32.mrb[53].mxu0  ;;  %v1359_v47 = vadd.f32 %v3983_v9, %v1339_v52 }
 0x672   :  { %v1352_v57 = vadd.f32 %v1300_v36, %v3898_v4  ;;  %v1302_v37 = vpop.f32.mrb[38].mxu1  ;;  %v1342_v56 = vpop.f32.mrb[54].mxu0 }
 0x673   :  { %v2595_v39 = vmul.f32 -1.442695, %v1345_v53  ;;  %v1303_v40 = vpop.f32.mrb[39].mxu1  ;;  %v2928_v42 = vpop.f32.mrb[55].mxu0 }
 0x674   :  { %v2596_v58 = vmul.f32 -1.442695, %v1352_v57 }
 0x675   :  { %3296 = vpow2.f32 %v2595_v39 }
 0x676   :  { %3298 = vpow2.f32 %v2596_v58 }
 0x67f   :  { %v3297_v59 = vpop.eup %3296 }
 0x680   :  { %v1349_v43 = vadd.f32 1.0, %v3297_v59  ;;  %v3299_v44 = vpop.eup %3298 }
 0x681   :  { %v1356_v45 = vadd.f32 1.0, %v3299_v44 }
 0x682   :  { %3300 = vrcp.f32 %v1349_v43 }
 0x683   :  { %3302 = vrcp.f32 %v1356_v45 }
 0x68c   :  { %v3301_v48 = vpop.eup %3300 }
 0x68d   :  { %v1360_v19 = vmul.f32 %v3301_v48, %v1359_v47  ;;  %v3303_v49 = vpop.eup %3302 }
 0x68e   :  { %v1363_v26 = vsub.f32 1.0, %v3303_v49  ;;  %v1365_v38 = vmul.f32 %v3303_v49, %v4198_v31  ;;  %v1481_v49 = vpop.permute.xlu0 %1480 }
 0x68f   :  { %v1361_v4 = vadd.f32 %v1360_v19, %v3880_v17  ;;  %vm1482_vm9 = vcmp.eq.s32.totalorder %v1481_v49, 1 }
 0x691   :  { %3304 = vtanh.f32 %v1361_v4 }
 0x69b   :  { %v3305_v50 = vpop.eup %3304 }
 0x69c   :  { %v1364_v16 = vmul.f32 %v3305_v50, %v1363_v26 }
 0x69e   :  { %v1366_v10 = vadd.f32 %v1365_v38, %v1364_v16 }
 0x6a0   :  { %v4259_v46 = vsel %vm1370_vm8, %v1366_v10, %v4198_v31  ;;  %v1372_v14 = vsel %vm1370_vm8, %v1366_v10, 0.0 }
 0x6a1   :  { %1374 = vst [vmem:[#allocation8 + $0x28] sm:$0xff] %v1372_v14  ;;  %v1375_v61 = vpack.c.bf16 %v4259_v46, %v4259_v46  ;;  %v4792_v14 = vld [vmem:[#allocation22_spill] sm:$0xff] }
 0x6a3   :  { %1409 = vmatmul.mubr.bf16.vlgmr.msra.gmra.mrb[40].mxu1 %v1375_v61  ;;  %2946 = vmatmul.mubr.bf16.vlgmr.msra.gmra.mrb[56].mxu0 %v1375_v61 }
 0x6a4   :  { %1489 = vmatpush1.bf16.msra.mxu1 %v4127_v62  ;;  %2950 = vmatpush3.bf16.msra.mxu0 %v4130_v6 }
 0x6a5   :  { %1490 = vmatprep.subr.bf16.mxu1 %v4133_v0  ;;  %2951 = vmatprep.subr.bf16.mxu0 %v4790_v54 }
 0x6a6   :  { %1520 = vmatprep.mubr.bf16.mxu1 %v4791_v25  ;;  %2965 = vmatprep.mubr.msk.bf16.mxu0 %vm3591_vm0, %v4790_v54 }
 0x6a8   :  { %1491 = vmatpush1.bf16.msra.mxu1 %v4140_v21  ;;  %2952 = vmatpush3.bf16.msra.mxu0 %v4143_v15 }
 0x6a9   :  { %1492 = vmatprep.subr.bf16.mxu1 %v4146_v1  ;;  %2953 = vmatprep.subr.bf16.mxu0 %v4790_v54 }
 0x6ac   :  { %1493 = vmatpush1.bf16.msra.mxu1 %v4150_v24  ;;  %2954 = vmatpush3.bf16.msra.mxu0 %v4153_v7 }
 0x6ad   :  { %1494 = vmatprep.subr.bf16.mxu1 %v4156_v27  ;;  %2955 = vmatprep.subr.bf16.mxu0 %v4790_v54 }
 0x6b0   :  { %1495 = vmatpush1.bf16.msra.mxu1 %v4160_v22  ;;  %2956 = vmatpush3.bf16.msra.mxu0 %v4163_v34 }
 0x6b1   :  { %1496 = vmatprep.subr.bf16.mxu1 %v4166_v11  ;;  %2957 = vmatprep.subr.bf16.mxu0 %v4790_v54 }
 0x6b4   :  { %1497 = vmatpush1.bf16.msra.mxu1 %v4170_v32  ;;  %2958 = vmatpush3.bf16.msra.mxu0 %v4173_v33 }
 0x6b5   :  { %1498 = vmatprep.subr.bf16.mxu1 %v4176_v35  ;;  %2959 = vmatprep.subr.bf16.mxu0 %v4790_v54 }
 0x6b8   :  { %1499 = vmatpush1.bf16.msra.mxu1 %v4225_v12  ;;  %2960 = vmatpush3.bf16.msra.mxu0 %v4228_v18 }
 0x6b9   :  { %1500 = vmatprep.subr.bf16.mxu1 %v4231_v28  ;;  %2961 = vmatprep.subr.bf16.mxu0 %v4790_v54 }
 0x6bc   :  { %1501 = vmatpush1.bf16.msra.mxu1 %v4235_v5  ;;  %2962 = vmatpush3.bf16.msra.mxu0 %v4238_v63 }
 0x6bd   :  { %1502 = vmatprep.subr.bf16.mxu1 %v4241_v23  ;;  %2963 = vmatprep.subr.bf16.mxu0 %v4790_v54 }
 0x6c0   :  { %1503 = vmatpush1.bf16.msra.mxu1 %v4245_v3  ;;  %2964 = vmatpush3.bf16.msra.mxu0 %v4248_v29 }
 0x6c1   :  { %1600 = vmatprep.subr.bf16.mxu1 %v4113_v30  ;;  %2969 = vmatprep.subr.bf16.mxu0 %v4790_v54 }
 0x776   :  { %v1410_v17 = vpop.f32.mrb[40].mxu1  ;;  %v1451_v31 = vpop.f32.mrb[56].mxu0 }
 0x777   :  { %v1457_v41 = vadd.f32 %v1410_v17, %v3907_v13  ;;  %v1412_v51 = vpop.f32.mrb[41].mxu1  ;;  %v2947_v52 = vpop.f32.mrb[57].mxu0  ;;  %v1471_v43 = vadd.f32 %v3983_v9, %v1451_v31 }
 0x778   :  { %v1464_v53 = vadd.f32 %v1412_v51, %v3910_v20  ;;  %v1414_v36 = vpop.f32.mrb[42].mxu1  ;;  %v1454_v55 = vpop.f32.mrb[58].mxu0 }
 0x779   :  { %v2597_v57 = vmul.f32 -1.442695, %v1457_v41  ;;  %v1415_v37 = vpop.f32.mrb[43].mxu1  ;;  %v2948_v56 = vpop.f32.mrb[59].mxu0 }
 0x77a   :  { %v2598_v39 = vmul.f32 -1.442695, %v1464_v53 }
 0x77b   :  { %3306 = vpow2.f32 %v2597_v57 }
 0x77c   :  { %3308 = vpow2.f32 %v2598_v39 }
 0x785   :  { %v3307_v40 = vpop.eup %3306 }
 0x786   :  { %v1461_v42 = vadd.f32 1.0, %v3307_v40  ;;  %v3309_v58 = vpop.eup %3308 }
 0x787   :  { %v1468_v59 = vadd.f32 1.0, %v3309_v58 }
 0x788   :  { %3310 = vrcp.f32 %v1461_v42  ;;  %v4793_v42 = vld [vmem:[#allocation15_spill] sm:$0xff] }
 0x789   :  { %3312 = vrcp.f32 %v1468_v59 }
 0x792   :  { %v3311_v13 = vpop.eup %3310 }
 0x793   :  { %v1472_v44 = vmul.f32 %v3311_v13, %v1471_v43  ;;  %v3313_v45 = vpop.eup %3312 }
 0x794   :  { %v1475_v47 = vsub.f32 1.0, %v3313_v45  ;;  %v1477_v19 = vmul.f32 %v3313_v45, %v4259_v46  ;;  %v1593_v45 = vpop.permute.xlu1 %1592 }
 0x795   :  { %v1473_v20 = vadd.f32 %v1472_v44, %v3865_v8  ;;  %vm1594_vm10 = vcmp.eq.s32.totalorder %v1593_v45, 1 }
 0x797   :  { %3314 = vtanh.f32 %v1473_v20 }
 0x7a1   :  { %v3315_v48 = vpop.eup %3314 }
 0x7a2   :  { %v1476_v4 = vmul.f32 %v3315_v48, %v1475_v47 }
 0x7a4   :  { %v1478_v26 = vadd.f32 %v1477_v19, %v1476_v4 }
 0x7a6   :  { %v4304_v50 = vsel %vm1482_vm9, %v1478_v26, %v4259_v46  ;;  %v1484_v38 = vsel %vm1482_vm9, %v1478_v26, 0.0 }
 0x7a7   :  { %1486 = vst [vmem:[#allocation8 + $0x30] sm:$0xff] %v1484_v38  ;;  %v1487_v9 = vpack.c.bf16 %v4304_v50, %v4304_v50 }
 0x7a9   :  { %1521 = vmatmul.mubr.bf16.vlgmr.msra.gmra.mrb[44].mxu1 %v1487_v9  ;;  %2966 = vmatmul.mubr.bf16.vlgmr.msra.gmra.mrb[60].mxu0 %v1487_v9 }
 0x7aa   :  { %1601 = vmatpush1.bf16.msra.mxu1 %v4127_v62  ;;  %2970 = vmatpush3.bf16.msra.mxu0 %v4130_v6 }
 0x7ab   :  { %1602 = vmatprep.subr.bf16.mxu1 %v4133_v0  ;;  %2971 = vmatprep.subr.bf16.mxu0 %v4790_v54 }
 0x7ac   :  { %1632 = vmatprep.mubr.bf16.mxu1 %v4791_v25  ;;  %2985 = vmatprep.mubr.msk.bf16.mxu0 %vm3591_vm0, %v4790_v54 }
 0x7ae   :  { %1603 = vmatpush1.bf16.msra.mxu1 %v4140_v21  ;;  %2972 = vmatpush3.bf16.msra.mxu0 %v4143_v15 }
 0x7af   :  { %1604 = vmatprep.subr.bf16.mxu1 %v4146_v1  ;;  %2973 = vmatprep.subr.bf16.mxu0 %v4790_v54 }
 0x7b2   :  { %1605 = vmatpush1.bf16.msra.mxu1 %v4150_v24  ;;  %2974 = vmatpush3.bf16.msra.mxu0 %v4153_v7 }
 0x7b3   :  { %1606 = vmatprep.subr.bf16.mxu1 %v4156_v27  ;;  %2975 = vmatprep.subr.bf16.mxu0 %v4790_v54 }
 0x7b6   :  { %1607 = vmatpush1.bf16.msra.mxu1 %v4160_v22  ;;  %2976 = vmatpush3.bf16.msra.mxu0 %v4163_v34 }
 0x7b7   :  { %1608 = vmatprep.subr.bf16.mxu1 %v4166_v11  ;;  %2977 = vmatprep.subr.bf16.mxu0 %v4790_v54 }
 0x7ba   :  { %1609 = vmatpush1.bf16.msra.mxu1 %v4170_v32  ;;  %2978 = vmatpush3.bf16.msra.mxu0 %v4173_v33 }
 0x7bb   :  { %1610 = vmatprep.subr.bf16.mxu1 %v4176_v35  ;;  %2979 = vmatprep.subr.bf16.mxu0 %v4790_v54 }
 0x7be   :  { %1611 = vmatpush1.bf16.msra.mxu1 %v4225_v12  ;;  %2980 = vmatpush3.bf16.msra.mxu0 %v4228_v18 }
 0x7bf   :  { %1612 = vmatprep.subr.bf16.mxu1 %v4231_v28  ;;  %2981 = vmatprep.subr.bf16.mxu0 %v4790_v54 }
 0x7c2   :  { %1613 = vmatpush1.bf16.msra.mxu1 %v4235_v5  ;;  %2982 = vmatpush3.bf16.msra.mxu0 %v4238_v63 }
 0x7c3   :  { %1614 = vmatprep.subr.bf16.mxu1 %v4241_v23  ;;  %2983 = vmatprep.subr.bf16.mxu0 %v4790_v54 }
 0x7c6   :  { %1615 = vmatpush1.bf16.msra.mxu1 %v4245_v3  ;;  %2984 = vmatpush3.bf16.msra.mxu0 %v4248_v29 }
 0x7c7   :  { %1712 = vmatprep.subr.bf16.mxu1 %v4113_v30  ;;  %2989 = vmatprep.subr.bf16.mxu0 %v4790_v54 }
 0x87c   :  { %v1522_v8 = vpop.f32.mrb[44].mxu1  ;;  %v1563_v16 = vpop.f32.mrb[60].mxu0 }
 0x87d   :  { %v1569_v2 = vadd.f32 %v1522_v8, %v3916_v60  ;;  %v1524_v10 = vpop.f32.mrb[45].mxu1  ;;  %v2967_v46 = vpop.f32.mrb[61].mxu0  ;;  %v4348_v60 = vld [vmem:[%s4757_s5] ss:$0 sm:$0xff] }
 0x87e   :  { %v1576_v61 = vadd.f32 %v1524_v10, %v4792_v14  ;;  %v1526_v17 = vpop.f32.mrb[46].mxu1  ;;  %v1566_v31 = vpop.f32.mrb[62].mxu0  ;;  %v1583_v56 = vadd.f32 %v4348_v60, %v1563_v16  ;;  %v4795_v16 = vld [vmem:[#allocation26_spill] sm:$0xff] }
 0x87f   :  { %v2599_v41 = vmul.f32 -1.442695, %v1569_v2  ;;  %v1527_v51 = vpop.f32.mrb[47].mxu1  ;;  %v2968_v52 = vpop.f32.mrb[63].mxu0 }
 0x880   :  { %v2600_v53 = vmul.f32 -1.442695, %v1576_v61 }
 0x881   :  { %3316 = vpow2.f32 %v2599_v41 }
 0x882   :  { %3318 = vpow2.f32 %v2600_v53 }
 0x88b   :  { %v3317_v36 = vpop.eup %3316 }
 0x88c   :  { %v1573_v55 = vadd.f32 1.0, %v3317_v36  ;;  %v3319_v57 = vpop.eup %3318 }
 0x88d   :  { %v1580_v37 = vadd.f32 1.0, %v3319_v57 }
 0x88e   :  { %3320 = vrcp.f32 %v1573_v55 }
 0x88f   :  { %3322 = vrcp.f32 %v1580_v37  ;;  %v4796_v37 = vld [vmem:[#allocation17_spill] sm:$0xff] }
 0x898   :  { %v3321_v39 = vpop.eup %3320 }
 0x899   :  { %v1584_v40 = vmul.f32 %v3321_v39, %v1583_v56  ;;  %v3323_v59 = vpop.eup %3322 }
 0x89a   :  { %v1587_v43 = vsub.f32 1.0, %v3323_v59  ;;  %v1589_v44 = vmul.f32 %v3323_v59, %v4304_v50 }
 0x89b   :  { %v1585_v58 = vadd.f32 %v1584_v40, %v4793_v42 }
 0x89d   :  { %3324 = vtanh.f32 %v1585_v58 }
 0x8a7   :  { %v3325_v13 = vpop.eup %3324 }
 0x8a8   :  { %v1588_v20 = vmul.f32 %v3325_v13, %v1587_v43  ;;  %v1705_v43 = vpop.permute.xlu1 %1704 }
 0x8a9   :  { %vm1706_vm11 = vcmp.eq.s32.totalorder %v1705_v43, 1 }
 0x8aa   :  { %v1590_v47 = vadd.f32 %v1589_v44, %v1588_v20 }
 0x8ac   :  { %v4354_v48 = vsel %vm1594_vm10, %v1590_v47, %v4304_v50  ;;  %v1596_v19 = vsel %vm1594_vm10, %v1590_v47, 0.0  ;;  %v4794_v50 = vld [vmem:[#allocation25_spill] sm:$0xff] }
 0x8ad   :  { %1598 = vst [vmem:[#allocation8 + $0x38] sm:$0xff] %v1596_v19  ;;  %v1599_v4 = vpack.c.bf16 %v4354_v48, %v4354_v48  ;;  %v4797_v19 = vld [vmem:[#allocation27_spill] sm:$0xff] }
 0x8af   :  { %1633 = vmatmul.mubr.bf16.vlgmr.msra.gmra.mrb[48].mxu1 %v1599_v4  ;;  %2986 = vmatmul.mubr.bf16.vlgmr.msra.gmra.mrb[64].mxu0 %v1599_v4 }
 0x8b0   :  { %1713 = vmatpush1.bf16.msra.mxu1 %v4127_v62  ;;  %2990 = vmatpush3.bf16.msra.mxu0 %v4130_v6 }
 0x8b1   :  { %1714 = vmatprep.subr.bf16.mxu1 %v4133_v0  ;;  %2991 = vmatprep.subr.bf16.mxu0 %v4790_v54 }
 0x8b2   :  { %1744 = vmatprep.mubr.bf16.mxu1 %v4791_v25  ;;  %3005 = vmatprep.mubr.msk.bf16.mxu0 %vm3591_vm0, %v4790_v54 }
 0x8b4   :  { %1715 = vmatpush1.bf16.msra.mxu1 %v4140_v21  ;;  %2992 = vmatpush3.bf16.msra.mxu0 %v4143_v15 }
 0x8b5   :  { %1716 = vmatprep.subr.bf16.mxu1 %v4146_v1  ;;  %2993 = vmatprep.subr.bf16.mxu0 %v4790_v54 }
 0x8b8   :  { %1717 = vmatpush1.bf16.msra.mxu1 %v4150_v24  ;;  %2994 = vmatpush3.bf16.msra.mxu0 %v4153_v7 }
 0x8b9   :  { %1718 = vmatprep.subr.bf16.mxu1 %v4156_v27  ;;  %2995 = vmatprep.subr.bf16.mxu0 %v4790_v54 }
 0x8bc   :  { %1719 = vmatpush1.bf16.msra.mxu1 %v4160_v22  ;;  %2996 = vmatpush3.bf16.msra.mxu0 %v4163_v34 }
 0x8bd   :  { %1720 = vmatprep.subr.bf16.mxu1 %v4166_v11  ;;  %2997 = vmatprep.subr.bf16.mxu0 %v4790_v54 }
 0x8c0   :  { %1721 = vmatpush1.bf16.msra.mxu1 %v4170_v32  ;;  %2998 = vmatpush3.bf16.msra.mxu0 %v4173_v33 }
 0x8c1   :  { %1722 = vmatprep.subr.bf16.mxu1 %v4176_v35  ;;  %2999 = vmatprep.subr.bf16.mxu0 %v4790_v54 }
 0x8c4   :  { %1723 = vmatpush1.bf16.msra.mxu1 %v4225_v12  ;;  %3000 = vmatpush3.bf16.msra.mxu0 %v4228_v18 }
 0x8c5   :  { %1724 = vmatprep.subr.bf16.mxu1 %v4231_v28  ;;  %3001 = vmatprep.subr.bf16.mxu0 %v4790_v54 }
 0x8c8   :  { %1725 = vmatpush1.bf16.msra.mxu1 %v4235_v5  ;;  %3002 = vmatpush3.bf16.msra.mxu0 %v4238_v63 }
 0x8c9   :  { %1726 = vmatprep.subr.bf16.mxu1 %v4241_v23  ;;  %3003 = vmatprep.subr.bf16.mxu0 %v4790_v54 }
 0x8cc   :  { %1727 = vmatpush1.bf16.msra.mxu1 %v4245_v3  ;;  %3004 = vmatpush3.bf16.msra.mxu0 %v4248_v29 }
 0x8cd   :  { %1824 = vmatprep.subr.bf16.mxu1 %v4113_v30  ;;  %3009 = vmatprep.subr.bf16.mxu0 %v4790_v54 }
 0x982   :  { %v1634_v49 = vpop.f32.mrb[48].mxu1  ;;  %v1675_v26 = vpop.f32.mrb[64].mxu0 }
 0x983   :  { %v1681_v38 = vadd.f32 %v1634_v49, %v4794_v50  ;;  %v1636_v9 = vpop.f32.mrb[49].mxu1  ;;  %v2987_v8 = vpop.f32.mrb[65].mxu0  ;;  %v1695_v36 = vadd.f32 %v4348_v60, %v1675_v26  ;;  %v4798_v50 = vld [vmem:[#allocation28_spill] sm:$0xff] }
 0x984   :  { %v1688_v2 = vadd.f32 %v1636_v9, %v4795_v16  ;;  %v1638_v10 = vpop.f32.mrb[50].mxu1  ;;  %v1678_v46 = vpop.f32.mrb[66].mxu0 }
 0x985   :  { %v2601_v14 = vmul.f32 -1.442695, %v1681_v38  ;;  %v1639_v61 = vpop.f32.mrb[51].mxu1  ;;  %v2988_v17 = vpop.f32.mrb[67].mxu0 }
 0x986   :  { %v2602_v31 = vmul.f32 -1.442695, %v1688_v2 }
 0x987   :  { %3326 = vpow2.f32 %v2601_v14 }
 0x988   :  { %3328 = vpow2.f32 %v2602_v31 }
 0x991   :  { %v3327_v41 = vpop.eup %3326 }
 0x992   :  { %v1685_v51 = vadd.f32 1.0, %v3327_v41  ;;  %v3329_v52 = vpop.eup %3328 }
 0x993   :  { %v1692_v53 = vadd.f32 1.0, %v3329_v52 }
 0x994   :  { %3330 = vrcp.f32 %v1685_v51 }
 0x995   :  { %3332 = vrcp.f32 %v1692_v53  ;;  %v4799_v53 = vld [vmem:[#allocation19_spill] sm:$0xff] }
 0x99e   :  { %v3331_v55 = vpop.eup %3330 }
 0x99f   :  { %v1696_v57 = vmul.f32 %v3331_v55, %v1695_v36  ;;  %v3333_v39 = vpop.eup %3332 }
 0x9a0   :  { %v1699_v40 = vsub.f32 1.0, %v3333_v39  ;;  %v1701_v58 = vmul.f32 %v3333_v39, %v4354_v48 }
 0x9a1   :  { %v1697_v56 = vadd.f32 %v1696_v57, %v4796_v37 }
 0x9a3   :  { %3334 = vtanh.f32 %v1697_v56 }
 0x9ad   :  { %v3335_v42 = vpop.eup %3334 }
 0x9ae   :  { %v1700_v59 = vmul.f32 %v3335_v42, %v1699_v40  ;;  %v1817_v40 = vpop.permute.xlu0 %1816 }
 0x9af   :  { %vm1818_vm12 = vcmp.eq.s32.totalorder %v1817_v40, 1 }
 0x9b0   :  { %v1702_v13 = vadd.f32 %v1701_v58, %v1700_v59 }
 0x9b2   :  { %v4399_v44 = vsel %vm1706_vm11, %v1702_v13, %v4354_v48  ;;  %v1708_v20 = vsel %vm1706_vm11, %v1702_v13, 0.0 }
 0x9b3   :  { %1710 = vst [vmem:[#allocation8 + $0x40] sm:$0xff] %v1708_v20  ;;  %v1711_v45 = vpack.c.bf16 %v4399_v44, %v4399_v44  ;;  %v4800_v20 = vld [vmem:[#allocation29_spill] sm:$0xff] }
 0x9b5   :  { %1745 = vmatmul.mubr.bf16.vlgmr.msra.gmra.mrb[52].mxu1 %v1711_v45  ;;  %3006 = vmatmul.mubr.bf16.vlgmr.msra.gmra.mrb[68].mxu0 %v1711_v45 }
 0x9b6   :  { %1825 = vmatpush1.bf16.msra.mxu1 %v4127_v62  ;;  %3010 = vmatpush3.bf16.msra.mxu0 %v4130_v6 }
 0x9b7   :  { %1826 = vmatprep.subr.bf16.mxu1 %v4133_v0  ;;  %3011 = vmatprep.subr.bf16.mxu0 %v4790_v54 }
 0x9b8   :  { %1856 = vmatprep.mubr.bf16.mxu1 %v4791_v25  ;;  %3025 = vmatprep.mubr.msk.bf16.mxu0 %vm3591_vm0, %v4790_v54 }
 0x9ba   :  { %1827 = vmatpush1.bf16.msra.mxu1 %v4140_v21  ;;  %3012 = vmatpush3.bf16.msra.mxu0 %v4143_v15 }
 0x9bb   :  { %1828 = vmatprep.subr.bf16.mxu1 %v4146_v1  ;;  %3013 = vmatprep.subr.bf16.mxu0 %v4790_v54 }
 0x9be   :  { %1829 = vmatpush1.bf16.msra.mxu1 %v4150_v24  ;;  %3014 = vmatpush3.bf16.msra.mxu0 %v4153_v7 }
 0x9bf   :  { %1830 = vmatprep.subr.bf16.mxu1 %v4156_v27  ;;  %3015 = vmatprep.subr.bf16.mxu0 %v4790_v54 }
 0x9c2   :  { %1831 = vmatpush1.bf16.msra.mxu1 %v4160_v22  ;;  %3016 = vmatpush3.bf16.msra.mxu0 %v4163_v34 }
 0x9c3   :  { %1832 = vmatprep.subr.bf16.mxu1 %v4166_v11  ;;  %3017 = vmatprep.subr.bf16.mxu0 %v4790_v54 }
 0x9c6   :  { %1833 = vmatpush1.bf16.msra.mxu1 %v4170_v32  ;;  %3018 = vmatpush3.bf16.msra.mxu0 %v4173_v33 }
 0x9c7   :  { %1834 = vmatprep.subr.bf16.mxu1 %v4176_v35  ;;  %3019 = vmatprep.subr.bf16.mxu0 %v4790_v54 }
 0x9ca   :  { %1835 = vmatpush1.bf16.msra.mxu1 %v4225_v12  ;;  %3020 = vmatpush3.bf16.msra.mxu0 %v4228_v18 }
 0x9cb   :  { %1836 = vmatprep.subr.bf16.mxu1 %v4231_v28  ;;  %3021 = vmatprep.subr.bf16.mxu0 %v4790_v54 }
 0x9ce   :  { %1837 = vmatpush1.bf16.msra.mxu1 %v4235_v5  ;;  %3022 = vmatpush3.bf16.msra.mxu0 %v4238_v63 }
 0x9cf   :  { %1838 = vmatprep.subr.bf16.mxu1 %v4241_v23  ;;  %3023 = vmatprep.subr.bf16.mxu0 %v4790_v54 }
 0x9d2   :  { %1839 = vmatpush1.bf16.msra.mxu1 %v4245_v3  ;;  %3024 = vmatpush3.bf16.msra.mxu0 %v4248_v29 }
 0x9d3   :  { %1936 = vmatprep.subr.bf16.mxu1 %v4113_v30  ;;  %3029 = vmatprep.subr.bf16.mxu0 %v4790_v54 }
 0xa88   :  { %v1746_v47 = vpop.f32.mrb[52].mxu1  ;;  %v1787_v48 = vpop.f32.mrb[68].mxu0 }
 0xa89   :  { %v1793_v4 = vadd.f32 %v1746_v47, %v4797_v19  ;;  %v1748_v49 = vpop.f32.mrb[53].mxu1  ;;  %v3007_v26 = vpop.f32.mrb[69].mxu0  ;;  %v1807_v41 = vadd.f32 %v4348_v60, %v1787_v48  ;;  %v4801_v19 = vld [vmem:[#allocation30_spill] sm:$0xff] }
 0xa8a   :  { %v1800_v38 = vadd.f32 %v1748_v49, %v4798_v50  ;;  %v1750_v9 = vpop.f32.mrb[54].mxu1  ;;  %v1790_v8 = vpop.f32.mrb[70].mxu0 }
 0xa8b   :  { %v2603_v16 = vmul.f32 -1.442695, %v1793_v4  ;;  %v1751_v2 = vpop.f32.mrb[55].mxu1  ;;  %v3008_v10 = vpop.f32.mrb[71].mxu0 }
 0xa8c   :  { %v2604_v46 = vmul.f32 -1.442695, %v1800_v38 }
 0xa8d   :  { %3336 = vpow2.f32 %v2603_v16 }
 0xa8e   :  { %3338 = vpow2.f32 %v2604_v46 }
 0xa97   :  { %v3337_v14 = vpop.eup %3336 }
 0xa98   :  { %v1797_v61 = vadd.f32 1.0, %v3337_v14  ;;  %v3339_v17 = vpop.eup %3338 }
 0xa99   :  { %v1804_v31 = vadd.f32 1.0, %v3339_v17  ;;  %v4802_v17 = vld [vmem:[#allocation16_spill] sm:$0xff] }
 0xa9a   :  { %3340 = vrcp.f32 %v1797_v61 }
 0xa9b   :  { %3342 = vrcp.f32 %v1804_v31 }
 0xaa4   :  { %v3341_v51 = vpop.eup %3340 }
 0xaa5   :  { %v1808_v52 = vmul.f32 %v3341_v51, %v1807_v41  ;;  %v3343_v55 = vpop.eup %3342 }
 0xaa6   :  { %v1811_v57 = vsub.f32 1.0, %v3343_v55  ;;  %v1813_v56 = vmul.f32 %v3343_v55, %v4399_v44  ;;  %v1929_v55 = vpop.permute.xlu1 %1928 }
 0xaa7   :  { %v1809_v36 = vadd.f32 %v1808_v52, %v4799_v53  ;;  %vm1930_vm13 = vcmp.eq.s32.totalorder %v1929_v55, 1  ;;  %v4589_v55 = vld [vmem:[#allocation7 + $0x7c] ss:$12 sps:$4 sm:$0xff]  }
 0xaa9   :  { %3344 = vtanh.f32 %v1809_v36 }
 0xab3   :  { %v3345_v37 = vpop.eup %3344 }
 0xab4   :  { %v1812_v39 = vmul.f32 %v3345_v37, %v1811_v57 }
 0xab6   :  { %v1814_v42 = vadd.f32 %v1813_v56, %v1812_v39 }
 0xab8   :  { %v4444_v58 = vsel %vm1818_vm12, %v1814_v42, %v4399_v44  ;;  %v1820_v59 = vsel %vm1818_vm12, %v1814_v42, 0.0 }
 0xab9   :  { %1822 = vst [vmem:[#allocation8 + $0x48] sm:$0xff] %v1820_v59  ;;  %v1823_v43 = vpack.c.bf16 %v4444_v58, %v4444_v58 }
 0xabb   :  { %1857 = vmatmul.mubr.bf16.vlgmr.msra.gmra.mrb[56].mxu1 %v1823_v43  ;;  %3026 = vmatmul.mubr.bf16.vlgmr.msra.gmra.mrb[72].mxu0 %v1823_v43 }
 0xabc   :  { %1937 = vmatpush1.bf16.msra.mxu1 %v4127_v62  ;;  %3030 = vmatpush3.bf16.msra.mxu0 %v4130_v6 }
 0xabd   :  { %1938 = vmatprep.subr.bf16.mxu1 %v4133_v0  ;;  %3031 = vmatprep.subr.bf16.mxu0 %v4790_v54 }
 0xabe   :  { %1968 = vmatprep.mubr.bf16.mxu1 %v4791_v25  ;;  %3045 = vmatprep.mubr.msk.bf16.mxu0 %vm3591_vm0, %v4790_v54 }
 0xac0   :  { %1939 = vmatpush1.bf16.msra.mxu1 %v4140_v21  ;;  %3032 = vmatpush3.bf16.msra.mxu0 %v4143_v15 }
 0xac1   :  { %1940 = vmatprep.subr.bf16.mxu1 %v4146_v1  ;;  %3033 = vmatprep.subr.bf16.mxu0 %v4790_v54 }
 0xac4   :  { %1941 = vmatpush1.bf16.msra.mxu1 %v4150_v24  ;;  %3034 = vmatpush3.bf16.msra.mxu0 %v4153_v7 }
 0xac5   :  { %1942 = vmatprep.subr.bf16.mxu1 %v4156_v27  ;;  %3035 = vmatprep.subr.bf16.mxu0 %v4790_v54 }
 0xac8   :  { %1943 = vmatpush1.bf16.msra.mxu1 %v4160_v22  ;;  %3036 = vmatpush3.bf16.msra.mxu0 %v4163_v34 }
 0xac9   :  { %1944 = vmatprep.subr.bf16.mxu1 %v4166_v11  ;;  %3037 = vmatprep.subr.bf16.mxu0 %v4790_v54 }
 0xacc   :  { %1945 = vmatpush1.bf16.msra.mxu1 %v4170_v32  ;;  %3038 = vmatpush3.bf16.msra.mxu0 %v4173_v33 }
 0xacd   :  { %1946 = vmatprep.subr.bf16.mxu1 %v4176_v35  ;;  %3039 = vmatprep.subr.bf16.mxu0 %v4790_v54 }
 0xad0   :  { %1947 = vmatpush1.bf16.msra.mxu1 %v4225_v12  ;;  %3040 = vmatpush3.bf16.msra.mxu0 %v4228_v18 }
 0xad1   :  { %1948 = vmatprep.subr.bf16.mxu1 %v4231_v28  ;;  %3041 = vmatprep.subr.bf16.mxu0 %v4790_v54 }
 0xad4   :  { %1949 = vmatpush1.bf16.msra.mxu1 %v4235_v5  ;;  %3042 = vmatpush3.bf16.msra.mxu0 %v4238_v63 }
 0xad5   :  { %1950 = vmatprep.subr.bf16.mxu1 %v4241_v23  ;;  %3043 = vmatprep.subr.bf16.mxu0 %v4790_v54 }
 0xad8   :  { %1951 = vmatpush1.bf16.msra.mxu1 %v4245_v3  ;;  %3044 = vmatpush3.bf16.msra.mxu0 %v4248_v29 }
 0xad9   :  { %2048 = vmatprep.subr.bf16.mxu1 %v4113_v30  ;;  %3049 = vmatprep.subr.bf16.mxu0 %v4790_v54 }
 0xb8e   :  { %v1858_v13 = vpop.f32.mrb[56].mxu1  ;;  %v1899_v44 = vpop.f32.mrb[72].mxu0 }
 0xb8f   :  { %v1905_v45 = vadd.f32 %v1858_v13, %v4800_v20  ;;  %v1860_v47 = vpop.f32.mrb[57].mxu1  ;;  %v3027_v48 = vpop.f32.mrb[73].mxu0  ;;  %v1919_v46 = vadd.f32 %v4348_v60, %v1899_v44  ;;  %v4805_v20 = vld [vmem:[#allocation18_spill] sm:$0xff] }
 0xb90   :  { %v1912_v4 = vadd.f32 %v1860_v47, %v4801_v19  ;;  %v1862_v49 = vpop.f32.mrb[58].mxu1  ;;  %v1902_v26 = vpop.f32.mrb[74].mxu0 }
 0xb91   :  { %v2605_v50 = vmul.f32 -1.442695, %v1905_v45  ;;  %v1863_v38 = vpop.f32.mrb[59].mxu1  ;;  %v3028_v9 = vpop.f32.mrb[75].mxu0 }
 0xb92   :  { %v2606_v8 = vmul.f32 -1.442695, %v1912_v4  ;;  %v2041_v26 = vpop.permute.xlu1 %2040 }
 0xb93   :  { %3346 = vpow2.f32 %v2605_v50  ;;  %vm2042_vm14 = vcmp.eq.s32.totalorder %v2041_v26, 1  ;;  %v4661_v26 = vld [vmem:[#allocation7 + $0xb0] ss:$12 sps:$4 sm:$0xff]  }
 0xb94   :  { %3348 = vpow2.f32 %v2606_v8 }
 0xb9d   :  { %v3347_v16 = vpop.eup %3346 }
 0xb9e   :  { %v1909_v30 = vadd.f32 1.0, %v3347_v16  ;;  %v3349_v2 = vpop.eup %3348  ;;  %v4540_v16 = vld [vmem:[#allocation7] ss:$12 sps:$4 sm:$0xff]  }
 0xb9f   :  { %v1916_v10 = vadd.f32 1.0, %v3349_v2  ;;  %v4546_v2 = vld [vmem:[#allocation7 + $0x1c] ss:$12 sps:$4 sm:$0xff]  }
 0xba0   :  { %3350 = vrcp.f32 %v1909_v30  ;;  %v4543_v30 = vld [vmem:[#allocation7 + $0x8] ss:$12 sps:$4 sm:$0xff]  }
 0xba1   :  { %3352 = vrcp.f32 %v1916_v10  ;;  %v4553_v10 = vld [vmem:[#allocation7 + $0x18] ss:$12 sps:$4 sm:$0xff]  }
 0xbaa   :  { %v3351_v14 = vpop.eup %3350 }
 0xbab   :  { %v1920_v61 = vmul.f32 %v3351_v14, %v1919_v46  ;;  %v3353_v41 = vpop.eup %3352  ;;  %v4556_v46 = vld [vmem:[#allocation7 + $0x20] ss:$12 sps:$4 sm:$0xff]  }
 0xbac   :  { %v1923_v51 = vsub.f32 1.0, %v3353_v41  ;;  %v1925_v53 = vmul.f32 %v3353_v41, %v4444_v58  ;;  %v4559_v14 = vld [vmem:[#allocation7 + $0x34] ss:$12 sps:$4 sm:$0xff]  }
 0xbad   :  { %v1921_v31 = vadd.f32 %v1920_v61, %v4802_v17  ;;  %v4563_v61 = vld [vmem:[#allocation7 + $0x30] ss:$12 sps:$4 sm:$0xff]   ;;  %v4566_v17 = vld [vmem:[#allocation7 + $0x38] ss:$12 sps:$4 sm:$0xff]   ;;  %v4573_v41 = vld [vmem:[#allocation7 + $0x48] ss:$12 sps:$4 sm:$0xff]  }
 0xbaf   :  { %3354 = vtanh.f32 %v1921_v31  ;;  %v4569_v31 = vld [vmem:[#allocation7 + $0x4c] ss:$12 sps:$4 sm:$0xff]  }
 0xbb9   :  { %v3355_v52 = vpop.eup %3354 }
 0xbba   :  { %v1924_v36 = vmul.f32 %v3355_v52, %v1923_v51  ;;  %v4576_v51 = vld [vmem:[#allocation7 + $0x50] ss:$12 sps:$4 sm:$0xff]  }
 0xbbb   :  { %v4579_v52 = vld [vmem:[#allocation7 + $0x64] ss:$12 sps:$4 sm:$0xff]  }
 0xbbc   :  { %v1926_v57 = vadd.f32 %v1925_v53, %v1924_v36  ;;  %v4583_v53 = vld [vmem:[#allocation7 + $0x60] ss:$12 sps:$4 sm:$0xff]   ;;  %v4586_v36 = vld [vmem:[#allocation7 + $0x68] ss:$12 sps:$4 sm:$0xff]  }
 0xbbe   :  { %v4489_v37 = vsel %vm1930_vm13, %v1926_v57, %v4444_v58  ;;  %v1932_v56 = vsel %vm1930_vm13, %v1926_v57, 0.0 }
 0xbbf   :  { %1934 = vst [vmem:[#allocation8 + $0x50] sm:$0xff] %v1932_v56  ;;  %v1935_v39 = vpack.c.bf16 %v4489_v37, %v4489_v37  ;;  %v4807_v56 = vld [vmem:[#allocation34_spill] sm:$0xff] }
 0xbc1   :  { %1969 = vmatmul.mubr.bf16.vlgmr.msra.gmra.mrb[60].mxu1 %v1935_v39  ;;  %3046 = vmatmul.mubr.bf16.vlgmr.msra.gmra.mrb[76].mxu0 %v1935_v39 }
 0xbc2   :  { %2049 = vmatpush1.bf16.msra.mxu1 %v4127_v62  ;;  %3050 = vmatpush3.bf16.msra.mxu0 %v4130_v6  ;;  %v4526_v62 = vld [vmem:[#allocation7 + $0x4] ss:$12 sps:$4 sm:$0xff]  }
 0xbc3   :  { %2050 = vmatprep.subr.bf16.mxu1 %v4133_v0  ;;  %3051 = vmatprep.subr.bf16.mxu0 %v4790_v54 }
 0xbc4   :  { %2080 = vmatprep.mubr.bf16.mxu1 %v4791_v25  ;;  %3065 = vmatprep.mubr.msk.bf16.mxu0 %vm3591_vm0, %v4790_v54 }
 0xbc6   :  { %2051 = vmatpush1.bf16.msra.mxu1 %v4140_v21  ;;  %3052 = vmatpush3.bf16.msra.mxu0 %v4143_v15  ;;  %v4803_v21 = vld [vmem:[#allocation31_spill] sm:$0xff] }
 0xbc7   :  { %2052 = vmatprep.subr.bf16.mxu1 %v4146_v1  ;;  %3053 = vmatprep.subr.bf16.mxu0 %v4790_v54 }
 0xbca   :  { %2053 = vmatpush1.bf16.msra.mxu1 %v4150_v24  ;;  %3054 = vmatpush3.bf16.msra.mxu0 %v4153_v7  ;;  %v4804_v7 = vld [vmem:[#allocation32_spill] sm:$0xff] }
 0xbcb   :  { %2054 = vmatprep.subr.bf16.mxu1 %v4156_v27  ;;  %3055 = vmatprep.subr.bf16.mxu0 %v4790_v54 }
 0xbce   :  { %2055 = vmatpush1.bf16.msra.mxu1 %v4160_v22  ;;  %3056 = vmatpush3.bf16.msra.mxu0 %v4163_v34 }
 0xbcf   :  { %2056 = vmatprep.subr.bf16.mxu1 %v4166_v11  ;;  %3057 = vmatprep.subr.bf16.mxu0 %v4790_v54 }
 0xbd2   :  { %2057 = vmatpush1.bf16.msra.mxu1 %v4170_v32  ;;  %3058 = vmatpush3.bf16.msra.mxu0 %v4173_v33 }
 0xbd3   :  { %2058 = vmatprep.subr.bf16.mxu1 %v4176_v35  ;;  %3059 = vmatprep.subr.bf16.mxu0 %v4790_v54 }
 0xbd6   :  { %2059 = vmatpush1.bf16.msra.mxu1 %v4225_v12  ;;  %3060 = vmatpush3.bf16.msra.mxu0 %v4228_v18 }
 0xbd7   :  { %2060 = vmatprep.subr.bf16.mxu1 %v4231_v28  ;;  %3061 = vmatprep.subr.bf16.mxu0 %v4790_v54 }
 0xbda   :  { %2061 = vmatpush1.bf16.msra.mxu1 %v4235_v5  ;;  %3062 = vmatpush3.bf16.msra.mxu0 %v4238_v63 }
 0xbdb   :  { %2062 = vmatprep.subr.bf16.mxu1 %v4241_v23  ;;  %3063 = vmatprep.subr.bf16.mxu0 %v4790_v54 }
 0xbde   :  { %2063 = vmatpush1.bf16.msra.mxu1 %v4245_v3  ;;  %3064 = vmatpush3.bf16.msra.mxu0 %v4248_v29 }
 0xbdf   :  { %2160 = vmatprep.subr.bf16.mxu1 %v4526_v62  ;;  %3069 = vmatprep.subr.bf16.mxu0 %v4790_v54 }
 0xc94   :  { %v1970_v6 = vpop.f32.mrb[60].mxu1  ;;  %v2011_v0 = vpop.f32.mrb[76].mxu0 }
 0xc95   :  { %v2017_v15 = vadd.f32 %v1970_v6, %v4803_v21  ;;  %v1972_v1 = vpop.f32.mrb[61].mxu1  ;;  %v3047_v24 = vpop.f32.mrb[77].mxu0  ;;  %v2031_v43 = vadd.f32 %v4348_v60, %v2011_v0 }
 0xc96   :  { %v2024_v27 = vadd.f32 %v1972_v1, %v4804_v7  ;;  %v1974_v22 = vpop.f32.mrb[62].mxu1  ;;  %v2014_v34 = vpop.f32.mrb[78].mxu0 }
 0xc97   :  { %v2607_v11 = vmul.f32 -1.442695, %v2017_v15  ;;  %v1975_v32 = vpop.f32.mrb[63].mxu1  ;;  %v3048_v33 = vpop.f32.mrb[79].mxu0  ;;  %v4808_v34 = vld [vmem:[#allocation21_spill] sm:$0xff] }
 0xc98   :  { %v2608_v35 = vmul.f32 -1.442695, %v2024_v27 }
 0xc99   :  { %3356 = vpow2.f32 %v2607_v11 }
 0xc9a   :  { %3358 = vpow2.f32 %v2608_v35 }
 0xca3   :  { %v3357_v40 = vpop.eup %3356 }
 0xca4   :  { %v2021_v42 = vadd.f32 1.0, %v3357_v40  ;;  %v3359_v58 = vpop.eup %3358 }
 0xca5   :  { %v2028_v59 = vadd.f32 1.0, %v3359_v58  ;;  %v2153_v58 = vpop.permute.xlu0 %2152 }
 0xca6   :  { %3360 = vrcp.f32 %v2021_v42  ;;  %vm2154_vm15 = vcmp.eq.s32.totalorder %v2153_v58, 1 }
 0xca7   :  { %3362 = vrcp.f32 %v2028_v59 }
 0xcb0   :  { %v3361_v13 = vpop.eup %3360 }
 0xcb1   :  { %v2032_v44 = vmul.f32 %v3361_v13, %v2031_v43  ;;  %v3363_v47 = vpop.eup %3362 }
 0xcb2   :  { %v2035_v48 = vsub.f32 1.0, %v3363_v47  ;;  %v2037_v4 = vmul.f32 %v3363_v47, %v4489_v37  ;;  %v4644_v47 = vld [vmem:[#allocation7 + $0x94] ss:$12 sps:$4 sm:$0xff]  }
 0xcb3   :  { %v2033_v45 = vadd.f32 %v2032_v44, %v4805_v20  ;;  %v4638_v20 = vld [vmem:[#allocation7 + $0x78] ss:$12 sps:$4 sm:$0xff]  }
 0xcb5   :  { %3364 = vtanh.f32 %v2033_v45  ;;  %v4641_v45 = vld [vmem:[#allocation7 + $0x80] ss:$12 sps:$4 sm:$0xff]  }
 0xcbf   :  { %v3365_v19 = vpop.eup %3364 }
 0xcc0   :  { %v2036_v49 = vmul.f32 %v3365_v19, %v2035_v48  ;;  %v4648_v48 = vld [vmem:[#allocation7 + $0x90] ss:$12 sps:$4 sm:$0xff]   ;;  %v4651_v19 = vld [vmem:[#allocation7 + $0x98] ss:$12 sps:$4 sm:$0xff]  }
 0xcc2   :  { %v2038_v50 = vadd.f32 %v2037_v4, %v2036_v49  ;;  %v4654_v4 = vld [vmem:[#allocation7 + $0xac] ss:$12 sps:$4 sm:$0xff]   ;;  %v4658_v49 = vld [vmem:[#allocation7 + $0xa8] ss:$12 sps:$4 sm:$0xff]  }
 0xcc4   :  { %v4536_v38 = vsel %vm2042_vm14, %v2038_v50, %v4489_v37  ;;  %v2044_v9 = vsel %vm2042_vm14, %v2038_v50, 0.0 }
 0xcc5   :  { %2046 = vst [vmem:[#allocation8 + $0x58] sm:$0xff] %v2044_v9  ;;  %v2047_v8 = vpack.c.bf16 %v4536_v38, %v4536_v38  ;;  %v4809_v9 = vld [vmem:[#allocation35_spill] sm:$0xff] }
 0xcc7   :  { %2081 = vmatmul.mubr.bf16.vlgmr.msra.gmra.mrb[64].mxu1 %v2047_v8  ;;  %3066 = vmatmul.mubr.bf16.vlgmr.msra.gmra.mrb[80].mxu0 %v2047_v8 }
 0xcc8   :  { %2161 = vmatpush1.bf16.msra.mxu1 %v4540_v16  ;;  %3070 = vmatpush3.bf16.msra.mxu0 %v4543_v30 }
 0xcc9   :  { %2162 = vmatprep.subr.bf16.mxu1 %v4546_v2  ;;  %3071 = vmatprep.subr.bf16.mxu0 %v4790_v54 }
 0xcca   :  { %2192 = vmatprep.mubr.bf16.mxu1 %v4791_v25  ;;  %3085 = vmatprep.mubr.msk.bf16.mxu0 %vm3591_vm0, %v4790_v54 }
 0xccc   :  { %2163 = vmatpush1.bf16.msra.mxu1 %v4553_v10  ;;  %3072 = vmatpush3.bf16.msra.mxu0 %v4556_v46 }
 0xccd   :  { %2164 = vmatprep.subr.bf16.mxu1 %v4559_v14  ;;  %3073 = vmatprep.subr.bf16.mxu0 %v4790_v54 }
 0xcd0   :  { %2165 = vmatpush1.bf16.msra.mxu1 %v4563_v61  ;;  %3074 = vmatpush3.bf16.msra.mxu0 %v4566_v17 }
 0xcd1   :  { %2166 = vmatprep.subr.bf16.mxu1 %v4569_v31  ;;  %3075 = vmatprep.subr.bf16.mxu0 %v4790_v54 }
 0xcd4   :  { %2167 = vmatpush1.bf16.msra.mxu1 %v4573_v41  ;;  %3076 = vmatpush3.bf16.msra.mxu0 %v4576_v51 }
 0xcd5   :  { %2168 = vmatprep.subr.bf16.mxu1 %v4579_v52  ;;  %3077 = vmatprep.subr.bf16.mxu0 %v4790_v54 }
 0xcd8   :  { %2169 = vmatpush1.bf16.msra.mxu1 %v4583_v53  ;;  %3078 = vmatpush3.bf16.msra.mxu0 %v4586_v36 }
 0xcd9   :  { %2170 = vmatprep.subr.bf16.mxu1 %v4589_v55  ;;  %3079 = vmatprep.subr.bf16.mxu0 %v4790_v54 }
 0xcdc   :  { %2171 = vmatpush1.bf16.msra.mxu1 %v4225_v12  ;;  %3080 = vmatpush3.bf16.msra.mxu0 %v4228_v18 }
 0xcdd   :  { %2172 = vmatprep.subr.bf16.mxu1 %v4231_v28  ;;  %3081 = vmatprep.subr.bf16.mxu0 %v4790_v54  ;;  %v4806_v28 = vld [vmem:[#allocation33_spill] sm:$0xff] }
 0xce0   :  { %2173 = vmatpush1.bf16.msra.mxu1 %v4235_v5  ;;  %3082 = vmatpush3.bf16.msra.mxu0 %v4238_v63 }
 0xce1   :  { %2174 = vmatprep.subr.bf16.mxu1 %v4241_v23  ;;  %3083 = vmatprep.subr.bf16.mxu0 %v4790_v54 }
 0xce4   :  { %2175 = vmatpush1.bf16.msra.mxu1 %v4245_v3  ;;  %3084 = vmatpush3.bf16.msra.mxu0 %v4248_v29 }
 0xce5   :  { %2272 = vmatprep.subr.bf16.mxu1 %v4526_v62  ;;  %3089 = vmatprep.subr.bf16.mxu0 %v4790_v54 }
 0xd9a   :  { %v2082_v12 = vpop.f32.mrb[64].mxu1  ;;  %v2123_v18 = vpop.f32.mrb[80].mxu0 }
 0xd9b   :  { %v2129_v57 = vadd.f32 %v2082_v12, %v4806_v28  ;;  %v2084_v37 = vpop.f32.mrb[65].mxu1  ;;  %v3067_v5 = vpop.f32.mrb[81].mxu0  ;;  %v2143_v7 = vadd.f32 %v4348_v60, %v2123_v18  ;;  %v4810_v28 = vld [vmem:[#allocation36_spill] sm:$0xff] }
 0xd9c   :  { %v2136_v63 = vadd.f32 %v2084_v37, %v4807_v56  ;;  %v2086_v39 = vpop.f32.mrb[66].mxu1  ;;  %v2126_v23 = vpop.f32.mrb[82].mxu0 }
 0xd9d   :  { %v2609_v6 = vmul.f32 -1.442695, %v2129_v57  ;;  %v2087_v0 = vpop.f32.mrb[67].mxu1  ;;  %v3068_v21 = vpop.f32.mrb[83].mxu0 }
 0xd9e   :  { %v2610_v3 = vmul.f32 -1.442695, %v2136_v63 }
 0xd9f   :  { %3366 = vpow2.f32 %v2609_v6 }
 0xda0   :  { %3368 = vpow2.f32 %v2610_v3 }
 0xda9   :  { %v3367_v29 = vpop.eup %3366 }
 0xdaa   :  { %v2133_v15 = vadd.f32 1.0, %v3367_v29  ;;  %v3369_v1 = vpop.eup %3368 }
 0xdab   :  { %v2140_v24 = vadd.f32 1.0, %v3369_v1  ;;  %v4811_v1 = vld [vmem:[#allocation24_spill] sm:$0xff] }
 0xdac   :  { %3370 = vrcp.f32 %v2133_v15 }
 0xdad   :  { %3372 = vrcp.f32 %v2140_v24 }
 0xdb6   :  { %v3371_v27 = vpop.eup %3370 }
 0xdb7   :  { %v2144_v22 = vmul.f32 %v3371_v27, %v2143_v7  ;;  %v3373_v32 = vpop.eup %3372 }
 0xdb8   :  { %v2147_v33 = vsub.f32 1.0, %v3373_v32  ;;  %v2149_v40 = vmul.f32 %v3373_v32, %v4536_v38  ;;  %v2265_v32 = vpop.permute.xlu1 %2264 }
 0xdb9   :  { %v2145_v11 = vadd.f32 %v2144_v22, %v4808_v34  ;;  %vm2266_vm1 = vcmp.eq.s32.totalorder %v2265_v32, 1 }
 0xdbb   :  { %3374 = vtanh.f32 %v2145_v11 }
 0xdc5   :  { %v3375_v35 = vpop.eup %3374 }
 0xdc6   :  { %v2148_v42 = vmul.f32 %v3375_v35, %v2147_v33 }
 0xdc8   :  { %v2150_v59 = vadd.f32 %v2149_v40, %v2148_v42 }
 0xdca   :  { %v4611_v43 = vsel %vm2154_vm15, %v2150_v59, %v4536_v38  ;;  %v2156_v13 = vsel %vm2154_vm15, %v2150_v59, 0.0 }
 0xdcb   :  { %2158 = vst [vmem:[#allocation8 + $0x60] sm:$0xff] %v2156_v13  ;;  %v2159_v44 = vpack.c.bf16 %v4611_v43, %v4611_v43 }
 0xdcd   :  { %2193 = vmatmul.mubr.bf16.vlgmr.msra.gmra.mrb[68].mxu1 %v2159_v44  ;;  %3086 = vmatmul.mubr.bf16.vlgmr.msra.gmra.mrb[84].mxu0 %v2159_v44  ;;  %v4814_v44 = vld [vmem:[#allocation20_spill] sm:$0xff] }
 0xdce   :  { %2273 = vmatpush1.bf16.msra.mxu1 %v4540_v16  ;;  %3090 = vmatpush3.bf16.msra.mxu0 %v4543_v30 }
 0xdcf   :  { %2274 = vmatprep.subr.bf16.mxu1 %v4546_v2  ;;  %3091 = vmatprep.subr.bf16.mxu0 %v4790_v54 }
 0xdd0   :  { %2304 = vmatprep.mubr.bf16.mxu1 %v4791_v25  ;;  %3105 = vmatprep.mubr.msk.bf16.mxu0 %vm3591_vm0, %v4790_v54 }
 0xdd2   :  { %2275 = vmatpush1.bf16.msra.mxu1 %v4553_v10  ;;  %3092 = vmatpush3.bf16.msra.mxu0 %v4556_v46 }
 0xdd3   :  { %2276 = vmatprep.subr.bf16.mxu1 %v4559_v14  ;;  %3093 = vmatprep.subr.bf16.mxu0 %v4790_v54 }
 0xdd6   :  { %2277 = vmatpush1.bf16.msra.mxu1 %v4563_v61  ;;  %3094 = vmatpush3.bf16.msra.mxu0 %v4566_v17 }
 0xdd7   :  { %2278 = vmatprep.subr.bf16.mxu1 %v4569_v31  ;;  %3095 = vmatprep.subr.bf16.mxu0 %v4790_v54 }
 0xdda   :  { %2279 = vmatpush1.bf16.msra.mxu1 %v4573_v41  ;;  %3096 = vmatpush3.bf16.msra.mxu0 %v4576_v51 }
 0xddb   :  { %2280 = vmatprep.subr.bf16.mxu1 %v4579_v52  ;;  %3097 = vmatprep.subr.bf16.mxu0 %v4790_v54 }
 0xdde   :  { %2281 = vmatpush1.bf16.msra.mxu1 %v4583_v53  ;;  %3098 = vmatpush3.bf16.msra.mxu0 %v4586_v36 }
 0xddf   :  { %2282 = vmatprep.subr.bf16.mxu1 %v4589_v55  ;;  %3099 = vmatprep.subr.bf16.mxu0 %v4790_v54 }
 0xde2   :  { %2283 = vmatpush1.bf16.msra.mxu1 %v4638_v20  ;;  %3100 = vmatpush3.bf16.msra.mxu0 %v4641_v45 }
 0xde3   :  { %2284 = vmatprep.subr.bf16.mxu1 %v4644_v47  ;;  %3101 = vmatprep.subr.bf16.mxu0 %v4790_v54 }
 0xde6   :  { %2285 = vmatpush1.bf16.msra.mxu1 %v4648_v48  ;;  %3102 = vmatpush3.bf16.msra.mxu0 %v4651_v19 }
 0xde7   :  { %2286 = vmatprep.subr.bf16.mxu1 %v4654_v4  ;;  %3103 = vmatprep.subr.bf16.mxu0 %v4790_v54 }
 0xdea   :  { %2287 = vmatpush1.bf16.msra.mxu1 %v4658_v49  ;;  %3104 = vmatpush3.bf16.msra.mxu0 %v4661_v26 }
 0xdeb   :  { %2384 = vmatprep.subr.bf16.mxu1 %v4526_v62  ;;  %3109 = vmatprep.subr.bf16.mxu0 %v4790_v54 }
 0xea0   :  { %v2194_v50 = vpop.f32.mrb[68].mxu1  ;;  %v2235_v38 = vpop.f32.mrb[84].mxu0 }
 0xea1   :  { %v2241_v8 = vadd.f32 %v2194_v50, %v4809_v9  ;;  %v2196_v12 = vpop.f32.mrb[69].mxu1  ;;  %v3087_v18 = vpop.f32.mrb[85].mxu0  ;;  %v2255_v3 = vadd.f32 %v4348_v60, %v2235_v38 }
 0xea2   :  { %v2248_v57 = vadd.f32 %v2196_v12, %v4810_v28  ;;  %v2198_v37 = vpop.f32.mrb[70].mxu1  ;;  %v2238_v5 = vpop.f32.mrb[86].mxu0  ;;  %v4815_v12 = vld [vmem:[#allocation39_spill] sm:$0xff] }
 0xea3   :  { %v2611_v56 = vmul.f32 -1.442695, %v2241_v8  ;;  %v2199_v63 = vpop.f32.mrb[71].mxu1  ;;  %v3088_v39 = vpop.f32.mrb[87].mxu0  ;;  %v4816_v37 = vld [vmem:[#allocation40_spill] sm:$0xff] }
 0xea4   :  { %v2612_v23 = vmul.f32 -1.442695, %v2248_v57 }
 0xea5   :  { %3376 = vpow2.f32 %v2611_v56 }
 0xea6   :  { %3378 = vpow2.f32 %v2612_v23 }
 0xeaf   :  { %v3377_v6 = vpop.eup %3376 }
 0xeb0   :  { %v2245_v62 = vadd.f32 1.0, %v3377_v6  ;;  %v3379_v0 = vpop.eup %3378 }
 0xeb1   :  { %v2252_v21 = vadd.f32 1.0, %v3379_v0 }
 0xeb2   :  { %3380 = vrcp.f32 %v2245_v62 }
 0xeb3   :  { %3382 = vrcp.f32 %v2252_v21 }
 0xebc   :  { %v3381_v29 = vpop.eup %3380 }
 0xebd   :  { %v2256_v15 = vmul.f32 %v3381_v29, %v2255_v3  ;;  %v3383_v7 = vpop.eup %3382 }
 0xebe   :  { %v2259_v27 = vsub.f32 1.0, %v3383_v7  ;;  %v2261_v34 = vmul.f32 %v3383_v7, %v4611_v43 }
 0xebf   :  { %v2257_v24 = vadd.f32 %v2256_v15, %v4811_v1  ;;  %v3455_v15 = vld [vmem:[%s4757_s5] ss:$0 sm:$0xff]  ;;  %s3528_s5 = scalar_lea.vmem %s2502_s24, 2048 }
 0xec0   :  { %p3529_p10 = scmp.ne.s32.totalorder %s2502_s24, %s3528_s5  ;;  %p3534_p12 = scmp.lt.s32.totalorder %s3528_s5, %s3528_s5 }
 0xec1   :  { %3384 = vtanh.f32 %v2257_v24 }
 0xec2   :  { %p3535_p13 = por %p3534_p12, %p3533_p11 }
 0xec4   :  { %p3536_p0 = pnand %p3535_p13, %p3529_p10 }
 0xecb   :  { %v3385_v22 = vpop.eup %3384 }
 0xecc   :  { %v2260_v11 = vmul.f32 %v3385_v22, %v2259_v27  ;;  %v4817_v27 = vld [vmem:[#allocation23_spill] sm:$0xff] }
 0xece   :  { %v2262_v33 = vadd.f32 %v2261_v34, %v2260_v11 }
 0xed0   :  { %v4672_v35 = vsel %vm2266_vm1, %v2262_v33, %v4611_v43  ;;  %v2268_v40 = vsel %vm2266_vm1, %v2262_v33, 0.0  ;;  %v2489_v33 = vpop.permute.xlu0 %2488 }
 0xed1   :  { %2270 = vst [vmem:[#allocation8 + $0x68] sm:$0xff] %v2268_v40  ;;  %v2271_v42 = vpack.c.bf16 %v4672_v35, %v4672_v35  ;;  %vm2490_vm2 = vcmp.eq.s32.totalorder %v2489_v33, 1 }
 0xed3   :  { %2305 = vmatmul.mubr.bf16.vlgmr.msra.gmra.mrb[72].mxu1 %v2271_v42  ;;  %3106 = vmatmul.mubr.bf16.vlgmr.msra.gmra.mrb[88].mxu0 %v2271_v42 }
 0xed4   :  { %2385 = vmatpush1.bf16.msra.mxu1 %v4540_v16  ;;  %3110 = vmatpush3.bf16.msra.mxu0 %v4543_v30  ;;  %v4812_v30 = vld [vmem:[#allocation37_spill] sm:$0xff] }
 0xed5   :  { %2386 = vmatprep.subr.bf16.mxu1 %v4546_v2  ;;  %3111 = vmatprep.subr.bf16.mxu0 %v4790_v54 }
 0xed6   :  { %2416 = vmatprep.mubr.bf16.mxu1 %v4791_v25  ;;  %3125 = vmatprep.mubr.msk.bf16.mxu0 %vm3591_vm0, %v4790_v54 }
 0xed8   :  { %2387 = vmatpush1.bf16.msra.mxu1 %v4553_v10  ;;  %3112 = vmatpush3.bf16.msra.mxu0 %v4556_v46 }
 0xed9   :  { %2388 = vmatprep.subr.bf16.mxu1 %v4559_v14  ;;  %3113 = vmatprep.subr.bf16.mxu0 %v4790_v54  ;;  %v4813_v14 = vld [vmem:[#allocation38_spill] sm:$0xff] }
 0xedc   :  { %2389 = vmatpush1.bf16.msra.mxu1 %v4563_v61  ;;  %3114 = vmatpush3.bf16.msra.mxu0 %v4566_v17 }
 0xedd   :  { %2390 = vmatprep.subr.bf16.mxu1 %v4569_v31  ;;  %3115 = vmatprep.subr.bf16.mxu0 %v4790_v54 }
 0xee0   :  { %2391 = vmatpush1.bf16.msra.mxu1 %v4573_v41  ;;  %3116 = vmatpush3.bf16.msra.mxu0 %v4576_v51 }
 0xee1   :  { %2392 = vmatprep.subr.bf16.mxu1 %v4579_v52  ;;  %3117 = vmatprep.subr.bf16.mxu0 %v4790_v54 }
 0xee4   :  { %2393 = vmatpush1.bf16.msra.mxu1 %v4583_v53  ;;  %3118 = vmatpush3.bf16.msra.mxu0 %v4586_v36 }
 0xee5   :  { %2394 = vmatprep.subr.bf16.mxu1 %v4589_v55  ;;  %3119 = vmatprep.subr.bf16.mxu0 %v4790_v54 }
 0xee8   :  { %2395 = vmatpush1.bf16.msra.mxu1 %v4638_v20  ;;  %3120 = vmatpush3.bf16.msra.mxu0 %v4641_v45 }
 0xee9   :  { %2396 = vmatprep.subr.bf16.mxu1 %v4644_v47  ;;  %3121 = vmatprep.subr.bf16.mxu0 %v4790_v54 }
 0xeec   :  { %2397 = vmatpush1.bf16.msra.mxu1 %v4648_v48  ;;  %3122 = vmatpush3.bf16.msra.mxu0 %v4651_v19  ;;  %v2377_v19 = vpop.permute.xlu1 %2376 }
 0xeed   :  { %2398 = vmatprep.subr.bf16.mxu1 %v4654_v4  ;;  %3123 = vmatprep.subr.bf16.mxu0 %v4790_v54  ;;  %vm2378_vm0 = vcmp.eq.s32.totalorder %v2377_v19, 1 }
 0xef0   :  { %2399 = vmatpush1.bf16.msra.mxu1 %v4658_v49  ;;  %3124 = vmatpush3.bf16.msra.mxu0 %v4661_v26 }
 0xfa6   :  { %v2306_v25 = vpop.f32.mrb[72].mxu1  ;;  %v2347_v16 = vpop.f32.mrb[88].mxu0 }
 0xfa7   :  { %v2353_v2 = vadd.f32 %v2306_v25, %v4812_v30  ;;  %v2308_v10 = vpop.f32.mrb[73].mxu1  ;;  %v3107_v46 = vpop.f32.mrb[89].mxu0  ;;  %v2367_v59 = vadd.f32 %v4348_v60, %v2347_v16 }
 0xfa8   :  { %v2360_v61 = vadd.f32 %v2308_v10, %v4813_v14  ;;  %v2310_v17 = vpop.f32.mrb[74].mxu1  ;;  %v2350_v31 = vpop.f32.mrb[90].mxu0 }
 0xfa9   :  { %v2613_v41 = vmul.f32 -1.442695, %v2353_v2  ;;  %v2311_v51 = vpop.f32.mrb[75].mxu1  ;;  %v3108_v52 = vpop.f32.mrb[91].mxu0 }
 0xfaa   :  { %v2614_v53 = vmul.f32 -1.442695, %v2360_v61 }
 0xfab   :  { %3386 = vpow2.f32 %v2613_v41 }
 0xfac   :  { %3388 = vpow2.f32 %v2614_v53 }
 0xfb5   :  { %v3387_v54 = vpop.eup %3386 }
 0xfb6   :  { %v2357_v36 = vadd.f32 1.0, %v3387_v54  ;;  %v3389_v55 = vpop.eup %3388 }
 0xfb7   :  { %v2364_v58 = vadd.f32 1.0, %v3389_v55 }
 0xfb8   :  { %3390 = vrcp.f32 %v2357_v36 }
 0xfb9   :  { %3392 = vrcp.f32 %v2364_v58 }
 0xfc2   :  { %v3391_v43 = vpop.eup %3390 }
 0xfc3   :  { %v2368_v13 = vmul.f32 %v3391_v43, %v2367_v59  ;;  %v3393_v45 = vpop.eup %3392 }
 0xfc4   :  { %v2371_v47 = vsub.f32 1.0, %v3393_v45  ;;  %v2373_v4 = vmul.f32 %v3393_v45, %v4672_v35 }
 0xfc5   :  { %v2369_v20 = vadd.f32 %v2368_v13, %v4814_v44 }
 0xfc7   :  { %3394 = vtanh.f32 %v2369_v20 }
 0xfd1   :  { %v3395_v48 = vpop.eup %3394 }
 0xfd2   :  { %v2372_v49 = vmul.f32 %v3395_v48, %v2371_v47 }
 0xfd4   :  { %v2374_v26 = vadd.f32 %v2373_v4, %v2372_v49 }
 0xfd6   :  { %v2379_v50 = vsel %vm2378_vm0, %v2374_v26, %v4672_v35  ;;  %v2380_v38 = vsel %vm2378_vm0, %v2374_v26, 0.0 }
 0xfd7   :  { %2382 = vst [vmem:[#allocation8 + $0x70] sm:$0xff] %v2380_v38  ;;  %v2383_v60 = vpack.c.bf16 %v2379_v50, %v2379_v50 }
 0xfd9   :  { %2417 = vmatmul.mubr.bf16.vlgmr.msra.gmra.mrb[76].mxu1 %v2383_v60  ;;  %3126 = vmatmul.mubr.bf16.vlgmr.msra.gmra.mrb[92].mxu0 %v2383_v60 }
0x10ac   :  { %v2418_v9 = vpop.f32.mrb[76].mxu1  ;;  %v2459_v8 = vpop.f32.mrb[92].mxu0 }
0x10ad   :  { %v2465_v18 = vadd.f32 %v2418_v9, %v4815_v12  ;;  %v2420_v28 = vpop.f32.mrb[77].mxu1  ;;  %v3127_v57 = vpop.f32.mrb[93].mxu0  ;;  %v2479_v1 = vadd.f32 %v3455_v15, %v2459_v8 }
0x10ae   :  { %v2472_v5 = vadd.f32 %v2420_v28, %v4816_v37  ;;  %v2422_v56 = vpop.f32.mrb[78].mxu1  ;;  %v2462_v63 = vpop.f32.mrb[94].mxu0 }
0x10af   :  { %v2615_v39 = vmul.f32 -1.442695, %v2465_v18  ;;  %v2423_v23 = vpop.f32.mrb[79].mxu1  ;;  %v3128_v6 = vpop.f32.mrb[95].mxu0 }
0x10b0   :  { %v2616_v62 = vmul.f32 -1.442695, %v2472_v5 }
0x10b1   :  { %3396 = vpow2.f32 %v2615_v39 }
0x10b2   :  { %3398 = vpow2.f32 %v2616_v62 }
0x10bb   :  { %v3397_v0 = vpop.eup %3396 }
0x10bc   :  { %v2469_v21 = vadd.f32 1.0, %v3397_v0  ;;  %v3399_v3 = vpop.eup %3398 }
0x10bd   :  { %v2476_v29 = vadd.f32 1.0, %v3399_v3 }
0x10be   :  { %3400 = vrcp.f32 %v2469_v21 }
0x10bf   :  { %3402 = vrcp.f32 %v2476_v29 }
0x10c8   :  { %v3401_v24 = vpop.eup %3400 }
0x10c9   :  { %v2480_v7 = vmul.f32 %v3401_v24, %v2479_v1  ;;  %v3403_v34 = vpop.eup %3402 }
0x10ca   :  { %v2483_v11 = vsub.f32 1.0, %v3403_v34  ;;  %v2485_v40 = vmul.f32 %v3403_v34, %v2379_v50 }
0x10cb   :  { %v2481_v22 = vadd.f32 %v2480_v7, %v4817_v27 }
0x10cd   :  { %3404 = vtanh.f32 %v2481_v22 }
0x10d7   :  { %v3405_v32 = vpop.eup %3404 }
0x10d8   :  { %v2484_v35 = vmul.f32 %v3405_v32, %v2483_v11 }
0x10da   :  { %v2486_v42 = vadd.f32 %v2485_v40, %v2484_v35 }
0x10dc   :  { %v2492_v25 = vsel %vm2490_vm2, %v2486_v42, 0.0  ;;  %v2491_v16 = vsel %vm2490_vm2, %v2486_v42, %v2379_v50 }
0x10dd   :  { %2494 = vst [vmem:[#allocation8 + $0x78] sm:$0xff] %v2492_v25  ;;  %2495 = vst [vmem:[#allocation9] sm:$0xff] %v2491_v16 }
0x10de   :  { %3539 = shalt.err (!%p3536_p0)
}
0x10df   :  { %s3540_s28 = scalar_lea.hbm %s4758_s6, 2048 }
0x10e0   :  { %p3541_p1 = scmp.ne.s32.totalorder %s4758_s6, %s3540_s28  ;;  %p3544_p2 = scmp.lt.u32.totalorder %s3540_s28, %s4758_s6 }
0x10e2   :  { %p3546_p3 = pnand %p3544_p2, %p3541_p1 }
0x10e4   :  { %3549 = shalt.err (!%p3546_p3)
}
0x10e5   :  { %s3608_s10 = smov 128   ;;  %s3609_s13 = smov 8  }
0x10e6   :  { %2507 = dma.vmem_to_hbm [thread:$0]  %s2502_s24, 2048, %s4758_s6, [#allocation4], %s3608_s10, %s3608_s10, %s3609_s13  }
0x10e7   :  { %s3550_s17 = scalar_lea.vmem %s4721_s25, 128  ;;  %p3555_p5 = scmp.lt.s32.totalorder %s4721_s25, %s4721_s25 }
0x10e8   :  { %p3551_p4 = scmp.ne.s32.totalorder %s4721_s25, %s3550_s17  ;;  %p3556_p6 = scmp.lt.s32.totalorder %s3550_s17, %s3550_s17 }
0x10ea   :  { %p3557_p7 = por %p3556_p6, %p3555_p5 }
0x10ec   :  { %p3558_p8 = pnand %p3557_p7, %p3551_p4 }
0x10ee   :  { %3561 = shalt.err (!%p3558_p8)
}
0x10ef   :  { %s3562_s18 = scalar_lea.hbm %s4759_s7, 128 }
0x10f0   :  { %p3563_p9 = scmp.ne.s32.totalorder %s4759_s7, %s3562_s18  ;;  %p3566_p10 = scmp.lt.u32.totalorder %s3562_s18, %s4759_s7 }
0x10f2   :  { %p3568_p11 = pnand %p3566_p10, %p3563_p9 }
0x10f4   :  { %3571 = shalt.err (!%p3568_p11)
}
0x10f5   :  { %2517 = dma.vmem_to_hbm [thread:$0]  %s4721_s25, 128, %s4759_s7, [#allocation10]  }
0x10f6   :  { %3576 = dma.done.wait [#allocation4], 2048  }
0x10f7   :  { %3577 = vsyncadd [#allocation4], 4294965248 }
0x10f8   :  { %3578 = dma.done.wait [#allocation10], 128  }
0x10f9   :  { %3579 = vsyncadd [#allocation10], 4294967168 }
0x10fa   :  { %2524 = vsyncpa [#allocation3], 1 }
0x10fb   :  { %2525 = vsyncpa [#allocation6], 1 }
0x10fc   :  { %2526 = vsyncpa [#allocation4], 1 }
0x10fd   :  { %2527 = vsyncpa [#allocation10], 1 }

// kernel: tpu_custom_call.1
= control target key start
LH: loop header
LB: loop body
LE: loop exit
PB: predicated region body
PF: predicated region fallthrough
CT: control target
= control target key end

     0   :  { %13 = vsyncpa [#allocation3], 0  ;;  %s4752_s0 = inlined_call_operand.hbm [shape: bf16[16,8,128], index: 0, kind: input, shape index: {}]   ;;  %s4753_s1 = inlined_call_operand.vmem [shape: s32[8,1], index: 1, kind: input, shape index: {}]   ;;  %s4754_s2 = inlined_call_operand.hbm [shape: bf16[128,384], index: 2, kind: input, shape index: {}]   ;;  %s4755_s3 = inlined_call_operand.hbm [shape: bf16[128,384], index: 3, kind: input, shape index: {}]   ;;  %s4756_s4 = inlined_call_operand.vmem [shape: f32[1,384], index: 4, kind: input, shape index: {}]   ;;  %s4757_s5 = inlined_call_operand.vmem [shape: f32[1,128], index: 5, kind: input, shape index: {}]   ;;  %s4758_s6 = inlined_call_operand.hbm [shape: f32[16,8,128], index: 6, kind: output, shape index: {0}]   ;;  %s4759_s7 = inlined_call_operand.hbm [shape: f32[8,128], index: 7, kind: output, shape index: {1}]  }
   0x1   :  { %14 = vsyncpa [#allocation6], 0 }
   0x2   :  { %15 = vsyncpa [#allocation4], 0 }
   0x3   :  { %16 = vsyncpa [#allocation10], 0  ;;  %s3580_s24 = smov [#allocation5]   ;;  %s3462_s28 = scalar_lea.hbm %s4754_s2, 3072 }
   0x4   :  { %s36_s25 = sshll.u32 %s3580_s24, 4  ;;  %p3463_p0 = scmp.ne.s32.totalorder %s4754_s2, %s3462_s28  ;;  %s37_s25 = int_to_ptr.vmem [resolvable:$true] %s36_s25 }
   0x5   :  { %p3466_p1 = scmp.lt.u32.totalorder %s3462_s28, %s4754_s2 }
   0x7   :  { %p3468_p2 = pnand %p3466_p1, %p3463_p0 }
   0x9   :  { %3471 = shalt.err (!%p3468_p2)
}
   0xa   :  { %s3472_s10 = scalar_lea.vmem %s37_s25, 3072  ;;  %p3477_p4 = scmp.lt.s32.totalorder %s37_s25, %s37_s25 }
   0xb   :  { %p3473_p3 = scmp.ne.s32.totalorder %s37_s25, %s3472_s10  ;;  %p3478_p5 = scmp.lt.s32.totalorder %s3472_s10, %s3472_s10 }
   0xd   :  { %p3479_p6 = por %p3478_p5, %p3477_p4 }
   0xf   :  { %p3480_p7 = pnand %p3479_p6, %p3473_p3 }
  0x11   :  { %3483 = shalt.err (!%p3480_p7)
}
  0x12   :  { %s3581_s11 = smov 192   ;;  %s3582_s12 = smov 12  }
  0x13   :  { %42 = dma.hbm_to_vmem [thread:$0]  %s4754_s2, 3072, %s37_s25, [#allocation6], %s3581_s11, %s3581_s11, %s3582_s12  }
  0x14   :  { %s3583_s15 = smov [#allocation2]   ;;  %s3484_s19 = scalar_lea.hbm %s4752_s0, 1024 }
  0x15   :  { %s22_s16 = sshll.u32 %s3583_s15, 4  ;;  %p3485_p8 = scmp.ne.s32.totalorder %s4752_s0, %s3484_s19  ;;  %s23_s16 = int_to_ptr.vmem [resolvable:$true] %s22_s16 }
  0x16   :  { %p3488_p9 = scmp.lt.u32.totalorder %s3484_s19, %s4752_s0 }
  0x18   :  { %p3490_p10 = pnand %p3488_p9, %p3485_p8 }
  0x1a   :  { %3493 = shalt.err (!%p3490_p10)
}
  0x1b   :  { %s3494_s24 = scalar_lea.vmem %s23_s16, 1024  ;;  %p3499_p12 = scmp.lt.s32.totalorder %s23_s16, %s23_s16 }
  0x1c   :  { %p3495_p11 = scmp.ne.s32.totalorder %s23_s16, %s3494_s24  ;;  %p3500_p13 = scmp.lt.s32.totalorder %s3494_s24, %s3494_s24 }
  0x1e   :  { %p3501_p0 = por %p3500_p13, %p3499_p12 }
  0x20   :  { %p3502_p1 = pnand %p3501_p0, %p3495_p11 }
  0x22   :  { %3505 = shalt.err (!%p3502_p1)
}
  0x23   :  { %s3584_s2 = smov 64   ;;  %s3585_s25 = smov 4  }
  0x24   :  { %28 = dma.hbm_to_vmem [thread:$0]  %s4752_s0, 1024, %s23_s16, [#allocation3], %s3584_s2, %s3584_s2, %s3585_s25  }
  0x25   :  { %s3586_s28 = smov [#allocation7]   ;;  %s3506_s9 = scalar_lea.hbm %s4755_s3, 3072 }
  0x26   :  { %s48_s29 = sshll.u32 %s3586_s28, 4  ;;  %p3507_p2 = scmp.ne.s32.totalorder %s4755_s3, %s3506_s9  ;;  %s49_s29 = int_to_ptr.vmem [resolvable:$true] %s48_s29 }
  0x27   :  { %p3510_p3 = scmp.lt.u32.totalorder %s3506_s9, %s4755_s3 }
  0x29   :  { %p3512_p4 = pnand %p3510_p3, %p3507_p2 }
  0x2b   :  { %3515 = shalt.err (!%p3512_p4)
}
  0x2c   :  { %s3516_s17 = scalar_lea.vmem %s49_s29, 3072  ;;  %p3521_p6 = scmp.lt.s32.totalorder %s49_s29, %s49_s29 }
  0x2d   :  { %p3517_p5 = scmp.ne.s32.totalorder %s49_s29, %s3516_s17  ;;  %p3522_p7 = scmp.lt.s32.totalorder %s3516_s17, %s3516_s17 }
  0x2f   :  { %p3523_p8 = por %p3522_p7, %p3521_p6 }
  0x31   :  { %p3524_p9 = pnand %p3523_p8, %p3517_p5 }
  0x33   :  { %3527 = shalt.err (!%p3524_p9)
}
  0x34   :  { %54 = dma.hbm_to_vmem [thread:$0]  %s4755_s3, 3072, %s49_s29, [#allocation6], %s3581_s11, %s3581_s11, %s3582_s12  }
  0x35   :  { %3572 = dma.done.wait [#allocation3], 1024  }
  0x36   :  { %3573 = vsyncadd [#allocation3], 4294966272 }
  0x37   :  { %3574 = dma.done.wait [#allocation6], 6144  }
  0x38   :  { %3575 = vsyncadd [#allocation6], 4294961152  ;;  %v4760_v0 = vmov 0   ;;  %v558_v1 = vld [vmem:[%s4753_s1] sm:$0xff]  ;;  %v3176_v3 = vld [vmem:[#allocation5 + $0x8] ss:$12 sps:$4 sm:$0xff]   ;;  %v124_v61 = vlaneseq }
  0x39   :  { %3158 = vset.pattern.permute.xlu0 %v4760_v0  ;;  %347 = vmatprep.mubr.bf16.mxu0 %v4760_v0  ;;  %v3174_v2 = vld [vmem:[#allocation5 + $0x4] ss:$12 sps:$4 sm:$0xff]   ;;  %v3177_v4 = vld [vmem:[#allocation5] ss:$12 sps:$4 sm:$0xff]   ;;  %v3178_v5 = vld [vmem:[#allocation5 + $0x1c] ss:$12 sps:$4 sm:$0xff]  }
  0x3a   :  { %565 = vperm.xlu0 %3158, %v558_v1   ;;  %315 = vmatprep.subr.bf16.mxu0 %v3174_v2  ;;  %v3180_v6 = vld [vmem:[#allocation5 + $0x20] ss:$12 sps:$4 sm:$0xff]   ;;  %v3181_v7 = vld [vmem:[#allocation5 + $0x18] ss:$12 sps:$4 sm:$0xff]   ;;  %v3588_v10 = vmov 1   ;;  %v4762_v31 = vmov 0.0  }
  0x3b   :  { %2777 = vmatprep.subr.bf16.mxu1 %v3176_v3  ;;  %316 = vmatpush1.bf16.msra.mxu0 %v3177_v4  ;;  %v3182_v8 = vld [vmem:[#allocation5 + $0x34] ss:$12 sps:$4 sm:$0xff]   ;;  %v3184_v9 = vld [vmem:[#allocation5 + $0x38] ss:$12 sps:$4 sm:$0xff]   ;;  %v3185_v11 = vld [vmem:[#allocation5 + $0x30] ss:$12 sps:$4 sm:$0xff]  }
  0x3c   :  { %2778 = vmatpush3.bf16.msra.mxu1 %v3176_v3  ;;  %317 = vmatprep.subr.bf16.mxu0 %v3178_v5  ;;  %v3186_v12 = vld [vmem:[#allocation5 + $0x4c] ss:$12 sps:$4 sm:$0xff]   ;;  %v3188_v13 = vld [vmem:[#allocation5 + $0x50] ss:$12 sps:$4 sm:$0xff]   ;;  %v3189_v14 = vld [vmem:[#allocation5 + $0x48] ss:$12 sps:$4 sm:$0xff]  }
  0x3d   :  { %2779 = vmatprep.subr.bf16.mxu1 %v3180_v6  ;;  %3159 = vset.pattern.permute.xlu1 %v3588_v10  ;;  %v3190_v15 = vld [vmem:[#allocation5 + $0x64] ss:$12 sps:$4 sm:$0xff]   ;;  %v3192_v16 = vld [vmem:[#allocation5 + $0x68] ss:$12 sps:$4 sm:$0xff]   ;;  %v3193_v17 = vld [vmem:[#allocation5 + $0x60] ss:$12 sps:$4 sm:$0xff]  }
  0x3e   :  { %v3194_v18 = vld [vmem:[#allocation5 + $0x7c] ss:$12 sps:$4 sm:$0xff]   ;;  %v3196_v19 = vld [vmem:[#allocation5 + $0x80] ss:$12 sps:$4 sm:$0xff]   ;;  %v3197_v21 = vld [vmem:[#allocation5 + $0x78] ss:$12 sps:$4 sm:$0xff]  }
  0x3f   :  { %318 = vmatpush1.bf16.msra.mxu0 %v3181_v7  ;;  %v3206_v20 = vld [vmem:[#allocation2] sm:$0xff]   ;;  %v3201_v24 = vld [vmem:[#allocation5 + $0x90] ss:$12 sps:$4 sm:$0xff]   ;;  %v3202_v25 = vld [vmem:[#allocation5 + $0xac] ss:$12 sps:$4 sm:$0xff]   ;;  %v3590_v60 = vmov 0.0|0.0  }
  0x40   :  { %2780 = vmatpush3.bf16.msra.mxu1 %v3180_v6  ;;  %319 = vmatprep.subr.bf16.mxu0 %v3182_v8  ;;  %v3198_v22 = vld [vmem:[#allocation5 + $0x94] ss:$12 sps:$4 sm:$0xff]   ;;  %v3200_v23 = vld [vmem:[#allocation5 + $0x98] ss:$12 sps:$4 sm:$0xff]   ;;  %v3204_v26 = vld [vmem:[#allocation5 + $0xb0] ss:$12 sps:$4 sm:$0xff]  }
  0x41   :  { %2781 = vmatprep.subr.bf16.mxu1 %v3184_v9  ;;  %2793 = vmatprep.mubr.bf16.mxu1 %v3206_v20  ;;  %v3205_v27 = vld [vmem:[#allocation5 + $0xa8] ss:$12 sps:$4 sm:$0xff]   ;;  %v3697_v28 = vld [vmem:[#allocation7 + $0x4] ss:$12 sps:$4 sm:$0xff]   ;;  %v3702_v32 = vld [vmem:[#allocation7] ss:$12 sps:$4 sm:$0xff]  }
  0x42   :  { %v3207_v29 = vld [vmem:[#allocation2 + $0x8] sm:$0xff]   ;;  %v3215_v34 = vld [vmem:[#allocation2 + $0x10] sm:$0xff]   ;;  %v3711_v36 = vld [vmem:[#allocation7 + $0x18] ss:$12 sps:$4 sm:$0xff]   ;;  %vm3591_vm0 = vmmov 0   ;;  %v561_v62 = vand.u32 127, %v124_v61 }
  0x43   :  { %320 = vmatpush1.bf16.msra.mxu0 %v3185_v11  ;;  %v3699_v30 = vld [vmem:[#allocation7 + $0x8] ss:$12 sps:$4 sm:$0xff]   ;;  %v3708_v35 = vld [vmem:[#allocation7 + $0x20] ss:$12 sps:$4 sm:$0xff]   ;;  %v3216_v38 = vld [vmem:[#allocation2 + $0x18] sm:$0xff]   ;;  %v3592_v2 = vmov 2  }
  0x44   :  { %2782 = vmatpush3.bf16.msra.mxu1 %v3184_v9  ;;  %321 = vmatprep.subr.bf16.mxu0 %v3186_v12  ;;  %v3704_v33 = vld [vmem:[#allocation7 + $0x1c] ss:$12 sps:$4 sm:$0xff]   ;;  %v3715_v37 = vld [vmem:[#allocation7 + $0x34] ss:$12 sps:$4 sm:$0xff]   ;;  %v3722_v40 = vld [vmem:[#allocation7 + $0x4c] ss:$12 sps:$4 sm:$0xff]  }
  0x45   :  { %2783 = vmatprep.subr.bf16.mxu1 %v3188_v13  ;;  %v3718_v39 = vld [vmem:[#allocation7 + $0x30] ss:$12 sps:$4 sm:$0xff]   ;;  %v3224_v41 = vld [vmem:[#allocation2 + $0x20] sm:$0xff]   ;;  %v3730_v43 = vld [vmem:[#allocation7 + $0x48] ss:$12 sps:$4 sm:$0xff]   ;;  %v3593_v3 = vmov 3  }
  0x46   :  { %v3726_v42 = vld [vmem:[#allocation7 + $0x38] ss:$12 sps:$4 sm:$0xff]   ;;  %v3736_v45 = vld [vmem:[#allocation7 + $0x50] ss:$12 sps:$4 sm:$0xff]   ;;  %v3225_v46 = vld [vmem:[#allocation2 + $0x28] sm:$0xff]   ;;  %v3594_v4 = vmov 4  }
  0x47   :  { %322 = vmatpush1.bf16.msra.mxu0 %v3189_v14  ;;  %v3733_v44 = vld [vmem:[#allocation7 + $0x64] ss:$12 sps:$4 sm:$0xff]   ;;  %v3740_v47 = vld [vmem:[#allocation7 + $0x60] ss:$12 sps:$4 sm:$0xff]   ;;  %v3743_v49 = vld [vmem:[#allocation7 + $0x7c] ss:$12 sps:$4 sm:$0xff]  }
  0x48   :  { %2784 = vmatpush3.bf16.msra.mxu1 %v3188_v13  ;;  %323 = vmatprep.subr.bf16.mxu0 %v3190_v15  ;;  %v3233_v48 = vld [vmem:[#allocation2 + $0x30] sm:$0xff]   ;;  %v3751_v51 = vld [vmem:[#allocation7 + $0x78] ss:$12 sps:$4 sm:$0xff]   ;;  %v3757_v53 = vld [vmem:[#allocation7 + $0x80] ss:$12 sps:$4 sm:$0xff]   ;;  %v3595_v5 = vmov 6  }
  0x49   :  { %2785 = vmatprep.subr.bf16.mxu1 %v3192_v16  ;;  %v3746_v50 = vld [vmem:[#allocation7 + $0x68] ss:$12 sps:$4 sm:$0xff]   ;;  %v3234_v54 = vld [vmem:[#allocation2 + $0x38] sm:$0xff]   ;;  %v3596_v6 = vmov 5   ;;  %v3597_v7 = vmov 9   ;;  %v3598_v8 = vmov 7  }
  0x4a   :  { %v3754_v52 = vld [vmem:[#allocation7 + $0x94] ss:$12 sps:$4 sm:$0xff]   ;;  %v3761_v55 = vld [vmem:[#allocation7 + $0x90] ss:$12 sps:$4 sm:$0xff]   ;;  %v3764_v56 = vld [vmem:[#allocation7 + $0xac] ss:$12 sps:$4 sm:$0xff]  }
  0x4b   :  { %324 = vmatpush1.bf16.msra.mxu0 %v3193_v17  ;;  %v3767_v57 = vld [vmem:[#allocation7 + $0x98] ss:$12 sps:$4 sm:$0xff]   ;;  %v3772_v58 = vld [vmem:[#allocation7 + $0xa8] ss:$12 sps:$4 sm:$0xff]   ;;  %v3777_v59 = vld [vmem:[#allocation7 + $0xb0] ss:$12 sps:$4 sm:$0xff]  }
  0x4c   :  { %2786 = vmatpush3.bf16.msra.mxu1 %v3192_v16  ;;  %325 = vmatprep.subr.bf16.mxu0 %v3194_v18  ;;  %v3599_v9 = vmov 12   ;;  %v3600_v10 = vmov 8   ;;  %v3601_v11 = vmov 15   ;;  %v3602_v12 = vmov 10   ;;  %s3606_s23 = smov [#allocation8]   ;;  %s3607_s2 = smov [#allocation9]  }
  0x4d   :  { %2787 = vmatprep.subr.bf16.mxu1 %v3196_v19  ;;  %v3603_v13 = vmov 11   ;;  %v3604_v14 = vmov 13   ;;  %v3605_v15 = vmov 14   ;;  %v125_v16 = vshrl.u32 %v124_v61, 7  ;;  %s2501_s24 = sshll.u32 %s3606_s23, 4  ;;  %s2514_s25 = sshll.u32 %s3607_s2, 4  ;;  %s2502_s24 = int_to_ptr.vmem [resolvable:$true] %s2501_s24  ;;  %s4721_s25 = int_to_ptr.vmem [resolvable:$true] %s2514_s25 }
  0x4e   :  { %p3533_p11 = scmp.lt.s32.totalorder %s2502_s24, %s2502_s24 }
  0x4f   :  { %326 = vmatpush1.bf16.msra.mxu0 %v3197_v21  ;;  %v126_v17 = vsub.s32 0, %v125_v16  ;;  %v130_v18 = vsub.s32 1, %v125_v16 }
  0x50   :  { %2788 = vmatpush3.bf16.msra.mxu1 %v3196_v19  ;;  %327 = vmatprep.subr.bf16.mxu0 %v3198_v22  ;;  %v134_v19 = vsub.s32 2, %v125_v16 }
  0x51   :  { %2789 = vmatprep.subr.bf16.mxu1 %v3200_v23 }
  0x53   :  { %328 = vmatpush1.bf16.msra.mxu0 %v3201_v24 }
  0x54   :  { %2790 = vmatpush3.bf16.msra.mxu1 %v3200_v23  ;;  %329 = vmatprep.subr.bf16.mxu0 %v3202_v25 }
  0x55   :  { %2791 = vmatprep.subr.bf16.mxu1 %v3204_v26 }
  0x57   :  { %330 = vmatpush1.bf16.msra.mxu0 %v3205_v27 }
  0x58   :  { %2792 = vmatpush3.bf16.msra.mxu1 %v3204_v26  ;;  %2809 = vmatprep.subr.bf16.mxu0 %v4762_v31 }
  0x59   :  { %698 = vmatprep.subr.bf16.mxu1 %v3697_v28 }
  0x5a   :  { %348 = vmatmul.mubr.bf16.vlgmr.msra.gmra.mrb[0].mxu0 %v3206_v20  ;;  %v122_v20 = vld [vmem:[%s4756_s4] sm:$0x7] }
  0x5b   :  { %2794 = vmatmul.mubr.bf16.vlgmr.msra.gmra.mrb[0].mxu1 %v3207_v29  ;;  %2810 = vmatpush3.bf16.msra.mxu0 %v3699_v30  ;;  %v3828_v21 = vrot.slane %v122_v20, %v126_v17  ;;  %v3830_v22 = vrot.slane %v122_v20, %v130_v18  ;;  %v3832_v23 = vrot.slane %v122_v20, %v134_v19 }
  0x5c   :  { %699 = vmatpush1.bf16.msra.mxu1 %v3702_v32  ;;  %357 = vmatprep.mubr.bf16.mxu0 %v4760_v0 }
  0x5d   :  { %700 = vmatprep.subr.bf16.mxu1 %v3704_v33  ;;  %2797 = vmatprep.mubr.bf16.mxu1 %v3215_v34 }
  0x5e   :  { %2811 = vmatprep.subr.bf16.mxu0 %v4762_v31 }
  0x5f   :  { %2812 = vmatpush3.bf16.msra.mxu0 %v3708_v35 }
  0x60   :  { %701 = vmatpush1.bf16.msra.mxu1 %v3711_v36  ;;  %2813 = vmatprep.subr.bf16.mxu0 %v4762_v31 }
  0x61   :  { %702 = vmatprep.subr.bf16.mxu1 %v3715_v37 }
  0x62   :  { %358 = vmatmul.mubr.bf16.gmra.mrb[4].mxu0 %v3207_v29 }
  0x63   :  { %2798 = vmatmul.mubr.bf16.gmra.mrb[4].mxu1 %v3216_v38  ;;  %367 = vmatprep.mubr.bf16.mxu0 %v4760_v0 }
  0x64   :  { %703 = vmatpush1.bf16.msra.mxu1 %v3718_v39  ;;  %2801 = vmatprep.mubr.bf16.mxu1 %v3224_v41 }
  0x65   :  { %704 = vmatprep.subr.bf16.mxu1 %v3722_v40  ;;  %2814 = vmatpush3.bf16.msra.mxu0 %v3726_v42 }
  0x66   :  { %2815 = vmatprep.subr.bf16.mxu0 %v4762_v31 }
  0x68   :  { %705 = vmatpush1.bf16.msra.mxu1 %v3730_v43 }
  0x69   :  { %706 = vmatprep.subr.bf16.mxu1 %v3733_v44  ;;  %2816 = vmatpush3.bf16.msra.mxu0 %v3736_v45 }
  0x6a   :  { %368 = vmatmul.mubr.bf16.gmra.mrb[8].mxu0 %v3215_v34  ;;  %2817 = vmatprep.subr.bf16.mxu0 %v4762_v31 }
  0x6b   :  { %2802 = vmatmul.mubr.bf16.gmra.mrb[8].mxu1 %v3225_v46  ;;  %377 = vmatprep.mubr.bf16.mxu0 %v4760_v0 }
  0x6c   :  { %707 = vmatpush1.bf16.msra.mxu1 %v3740_v47  ;;  %2805 = vmatprep.mubr.bf16.mxu1 %v3233_v48 }
  0x6d   :  { %708 = vmatprep.subr.bf16.mxu1 %v3743_v49  ;;  %2818 = vmatpush3.bf16.msra.mxu0 %v3746_v50 }
  0x6e   :  { %2819 = vmatprep.subr.bf16.mxu0 %v4762_v31 }
  0x70   :  { %709 = vmatpush1.bf16.msra.mxu1 %v3751_v51 }
  0x71   :  { %710 = vmatprep.subr.bf16.mxu1 %v3754_v52  ;;  %2820 = vmatpush3.bf16.msra.mxu0 %v3757_v53 }
  0x72   :  { %378 = vmatmul.mubr.bf16.gmra.mrb[12].mxu0 %v3216_v38  ;;  %2821 = vmatprep.subr.bf16.mxu0 %v4762_v31 }
  0x73   :  { %2806 = vmatmul.mubr.bf16.gmra.mrb[12].mxu1 %v3234_v54  ;;  %387 = vmatprep.mubr.bf16.mxu0 %v4760_v0 }
  0x74   :  { %711 = vmatpush1.bf16.msra.mxu1 %v3761_v55  ;;  %730 = vmatprep.mubr.bf16.mxu1 %v4760_v0 }
  0x75   :  { %712 = vmatprep.subr.bf16.mxu1 %v3764_v56  ;;  %2822 = vmatpush3.bf16.msra.mxu0 %v3767_v57 }
  0x76   :  { %2823 = vmatprep.subr.bf16.mxu0 %v4762_v31 }
  0x78   :  { %713 = vmatpush1.bf16.msra.mxu1 %v3772_v58 }
  0x79   :  { %2824 = vmatpush3.bf16.msra.mxu0 %v3777_v59  ;;  %816 = vmatprep.subr.bf16.mxu1 %v3697_v28 }
  0x7a   :  { %388 = vmatmul.mubr.bf16.gmra.mrb[16].mxu0 %v3224_v41  ;;  %2829 = vmatprep.subr.bf16.mxu0 %v4762_v31 }
  0x7b   :  { %731 = vmatmul.mubr.bf16.vlgmr.msra.gmra.mrb[16].mxu1 %v3590_v60  ;;  %397 = vmatprep.mubr.bf16.mxu0 %v4760_v0 }
  0x7c   :  { %817 = vmatpush1.bf16.msra.mxu1 %v3702_v32  ;;  %848 = vmatprep.mubr.bf16.mxu1 %v4760_v0 }
  0x7d   :  { %818 = vmatprep.subr.bf16.mxu1 %v3704_v33 }
  0x80   :  { %819 = vmatpush1.bf16.msra.mxu1 %v3711_v36 }
  0x81   :  { %820 = vmatprep.subr.bf16.mxu1 %v3715_v37 }
  0x82   :  { %398 = vmatmul.mubr.bf16.gmra.mrb[20].mxu0 %v3225_v46 }
  0x83   :  { %407 = vmatprep.mubr.bf16.mxu0 %v4760_v0 }
  0x84   :  { %821 = vmatpush1.bf16.msra.mxu1 %v3718_v39 }
  0x85   :  { %822 = vmatprep.subr.bf16.mxu1 %v3722_v40 }
  0x88   :  { %823 = vmatpush1.bf16.msra.mxu1 %v3730_v43 }
  0x89   :  { %824 = vmatprep.subr.bf16.mxu1 %v3733_v44 }
  0x8a   :  { %408 = vmatmul.mubr.bf16.gmra.mrb[24].mxu0 %v3233_v48 }
  0x8b   :  { %417 = vmatprep.mubr.bf16.mxu0 %v4760_v0 }
  0x8c   :  { %825 = vmatpush1.bf16.msra.mxu1 %v3740_v47 }
  0x8d   :  { %826 = vmatprep.subr.bf16.mxu1 %v3743_v49 }
  0x90   :  { %827 = vmatpush1.bf16.msra.mxu1 %v3751_v51 }
  0x91   :  { %828 = vmatprep.subr.bf16.mxu1 %v3754_v52 }
  0x92   :  { %418 = vmatmul.mubr.bf16.gmra.mrb[28].mxu0 %v3234_v54 }
  0x93   :  { %2825 = vmatprep.mubr.msk.bf16.mxu0 %vm3591_vm0, %v4762_v31 }
  0x94   :  { %829 = vmatpush1.bf16.msra.mxu1 %v3761_v55 }
  0x95   :  { %830 = vmatprep.subr.bf16.mxu1 %v3764_v56 }
  0x98   :  { %831 = vmatpush1.bf16.msra.mxu1 %v3772_v58 }
  0x99   :  { %928 = vmatprep.subr.bf16.mxu1 %v3697_v28 }
  0x9a   :  { %2826 = vmatmul.mubr.bf16.vlgmr.msra.gmra.mrb[32].mxu0 %v3590_v60 }
  0x9b   :  { %2830 = vmatpush3.bf16.msra.mxu0 %v3699_v30  ;;  %2845 = vmatprep.mubr.msk.bf16.mxu0 %vm3591_vm0, %v4762_v31 }
  0x9c   :  { %2831 = vmatprep.subr.bf16.mxu0 %v4762_v31 }
  0x9f   :  { %2832 = vmatpush3.bf16.msra.mxu0 %v3708_v35 }
  0xa0   :  { %2833 = vmatprep.subr.bf16.mxu0 %v4762_v31 }
  0xa3   :  { %2834 = vmatpush3.bf16.msra.mxu0 %v3726_v42 }
  0xa4   :  { %2835 = vmatprep.subr.bf16.mxu0 %v4762_v31 }
  0xa7   :  { %2836 = vmatpush3.bf16.msra.mxu0 %v3736_v45 }
  0xa8   :  { %2837 = vmatprep.subr.bf16.mxu0 %v4762_v31 }
  0xab   :  { %2838 = vmatpush3.bf16.msra.mxu0 %v3746_v50 }
  0xac   :  { %2839 = vmatprep.subr.bf16.mxu0 %v4762_v31 }
  0xaf   :  { %2840 = vmatpush3.bf16.msra.mxu0 %v3757_v53 }
  0xb0   :  { %2841 = vmatprep.subr.bf16.mxu0 %v4762_v31 }
  0xb3   :  { %2842 = vmatpush3.bf16.msra.mxu0 %v3767_v57 }
  0xb4   :  { %2843 = vmatprep.subr.bf16.mxu0 %v4762_v31 }
  0xb7   :  { %2844 = vmatpush3.bf16.msra.mxu0 %v3777_v59 }
  0xb8   :  { %2849 = vmatprep.subr.bf16.mxu0 %v4762_v31 }
  0xb9   :  { %v566_v63 = vpop.permute.xlu0 %565 }
  0xba   :  { %vm567_vm1 = vcmp.lt.s32.totalorder %v561_v62, %v566_v63 }
  0xbb   :  { %v807_v1 = vsel %vm567_vm1, 1, %v4760_v0 }
  0xbc   :  { %809 = vperm.xlu0 %3158, %v807_v1   ;;  %920 = vperm.xlu1 %3159, %v807_v1  }
  0xc0   :  { %3160 = vset.pattern.permute.xlu1 %v3592_v2  ;;  %3161 = vset.pattern.permute.xlu0 %v3593_v3 }
  0xc1   :  { %1032 = vperm.xlu1 %3160, %v807_v1   ;;  %1144 = vperm.xlu0 %3161, %v807_v1  }
  0xc5   :  { %3162 = vset.pattern.permute.xlu1 %v3594_v4  ;;  %3164 = vset.pattern.permute.xlu0 %v3595_v5 }
  0xc6   :  { %1256 = vperm.xlu1 %3162, %v807_v1   ;;  %1480 = vperm.xlu0 %3164, %v807_v1  }
  0xca   :  { %3163 = vset.pattern.permute.xlu1 %v3596_v6  ;;  %3167 = vset.pattern.permute.xlu0 %v3597_v7 }
  0xcb   :  { %1368 = vperm.xlu1 %3163, %v807_v1   ;;  %1816 = vperm.xlu0 %3167, %v807_v1  }
  0xcf   :  { %3165 = vset.pattern.permute.xlu1 %v3598_v8  ;;  %3170 = vset.pattern.permute.xlu0 %v3599_v9 }
  0xd0   :  { %1592 = vperm.xlu1 %3165, %v807_v1   ;;  %2152 = vperm.xlu0 %3170, %v807_v1  }
  0xd4   :  { %3166 = vset.pattern.permute.xlu1 %v3600_v10  ;;  %3173 = vset.pattern.permute.xlu0 %v3601_v11 }
  0xd5   :  { %1704 = vperm.xlu1 %3166, %v807_v1   ;;  %2488 = vperm.xlu0 %3173, %v807_v1  }
  0xd9   :  { %3168 = vset.pattern.permute.xlu1 %v3602_v12 }
  0xda   :  { %1928 = vperm.xlu1 %3168, %v807_v1  }
  0xde   :  { %3169 = vset.pattern.permute.xlu1 %v3603_v13 }
  0xdf   :  { %2040 = vperm.xlu1 %3169, %v807_v1  }
  0xe3   :  { %3171 = vset.pattern.permute.xlu1 %v3604_v14 }
  0xe4   :  { %2264 = vperm.xlu1 %3171, %v807_v1  }
  0xe8   :  { %3172 = vset.pattern.permute.xlu1 %v3605_v15 }
  0xe9   :  { %2376 = vperm.xlu1 %3172, %v807_v1  }
 0x12d   :  { %v349_v24 = vpop.f32.mrb[0].mxu0 }
 0x12e   :  { %v3835_v25 = vadd.f32 %v349_v24, %v3828_v21  ;;  %v351_v26 = vpop.f32.mrb[1].mxu0  ;;  %v2795_v27 = vpop.f32.mrb[0].mxu1 }
 0x12f   :  { %v3838_v29 = vadd.f32 %v351_v26, %v3830_v22  ;;  %v353_v34 = vpop.f32.mrb[2].mxu0  ;;  %v3841_v38 = vadd.f32 %v2795_v27, %v3832_v23  ;;  %v462_v41 = vpop.f32.mrb[1].mxu1 }
 0x130   :  { %v3844_v46 = vadd.f32 %v353_v34, %v3828_v21  ;;  %v355_v48 = vpop.f32.mrb[3].mxu0  ;;  %v3847_v54 = vadd.f32 %v462_v41, %v3832_v23  ;;  %v2796_v60 = vpop.f32.mrb[2].mxu1 }
 0x131   :  { %v3850_v61 = vadd.f32 %v355_v48, %v3830_v22  ;;  %v3853_v62 = vadd.f32 %v2796_v60, %v3832_v23  ;;  %v465_v63 = vpop.f32.mrb[3].mxu1 }
 0x132   :  { %v3856_v1 = vadd.f32 %v465_v63, %v3832_v23 }
 0x135   :  { %v359_v2 = vpop.f32.mrb[4].mxu0 }
 0x136   :  { %v3859_v3 = vadd.f32 %v359_v2, %v3828_v21  ;;  %v361_v4 = vpop.f32.mrb[5].mxu0  ;;  %v2799_v5 = vpop.f32.mrb[4].mxu1 }
 0x137   :  { %v3862_v6 = vadd.f32 %v361_v4, %v3830_v22  ;;  %v363_v7 = vpop.f32.mrb[6].mxu0  ;;  %v3865_v8 = vadd.f32 %v2799_v5, %v3832_v23  ;;  %v478_v9 = vpop.f32.mrb[5].mxu1 }
 0x138   :  { %v3868_v10 = vadd.f32 %v363_v7, %v3828_v21  ;;  %v365_v11 = vpop.f32.mrb[7].mxu0  ;;  %v3871_v12 = vadd.f32 %v478_v9, %v3832_v23  ;;  %v2800_v13 = vpop.f32.mrb[6].mxu1 }
 0x139   :  { %v3874_v14 = vadd.f32 %v365_v11, %v3830_v22  ;;  %v3877_v15 = vadd.f32 %v2800_v13, %v3832_v23  ;;  %v481_v16 = vpop.f32.mrb[7].mxu1 }
 0x13a   :  { %v3880_v17 = vadd.f32 %v481_v16, %v3832_v23 }
 0x13b   :  { %4764 = vst [vmem:[#allocation15_spill] sm:$0xff] %v3877_v15 }
 0x13d   :  { %v369_v18 = vpop.f32.mrb[8].mxu0 }
 0x13e   :  { %v3883_v19 = vadd.f32 %v369_v18, %v3828_v21  ;;  %v371_v20 = vpop.f32.mrb[9].mxu0  ;;  %v2803_v24 = vpop.f32.mrb[8].mxu1 }
 0x13f   :  { %v3886_v26 = vadd.f32 %v371_v20, %v3830_v22  ;;  %v373_v27 = vpop.f32.mrb[10].mxu0  ;;  %v3889_v34 = vadd.f32 %v2803_v24, %v3832_v23  ;;  %v494_v41 = vpop.f32.mrb[9].mxu1 }
 0x140   :  { %v3892_v48 = vadd.f32 %v373_v27, %v3828_v21  ;;  %v375_v60 = vpop.f32.mrb[11].mxu0  ;;  %v3895_v63 = vadd.f32 %v494_v41, %v3832_v23  ;;  %v2804_v2 = vpop.f32.mrb[10].mxu1 }
 0x141   :  { %4765 = vst [vmem:[#allocation16_spill] sm:$0xff] %v3889_v34  ;;  %v3898_v4 = vadd.f32 %v375_v60, %v3830_v22  ;;  %v3901_v5 = vadd.f32 %v2804_v2, %v3832_v23  ;;  %v497_v7 = vpop.f32.mrb[11].mxu1 }
 0x142   :  { %4766 = vst [vmem:[#allocation17_spill] sm:$0xff] %v3895_v63  ;;  %v3904_v9 = vadd.f32 %v497_v7, %v3832_v23 }
 0x143   :  { %4767 = vst [vmem:[#allocation18_spill] sm:$0xff] %v3901_v5 }
 0x144   :  { %4768 = vst [vmem:[#allocation19_spill] sm:$0xff] %v3904_v9 }
 0x145   :  { %v379_v11 = vpop.f32.mrb[12].mxu0 }
 0x146   :  { %v3907_v13 = vadd.f32 %v379_v11, %v3828_v21  ;;  %v381_v16 = vpop.f32.mrb[13].mxu0  ;;  %v2807_v18 = vpop.f32.mrb[12].mxu1 }
 0x147   :  { %v3910_v20 = vadd.f32 %v381_v16, %v3830_v22  ;;  %v383_v24 = vpop.f32.mrb[14].mxu0  ;;  %v3913_v27 = vadd.f32 %v2807_v18, %v3832_v23  ;;  %v510_v41 = vpop.f32.mrb[13].mxu1 }
 0x148   :  { %v3916_v60 = vadd.f32 %v383_v24, %v3828_v21  ;;  %v385_v2 = vpop.f32.mrb[15].mxu0  ;;  %v3919_v7 = vadd.f32 %v510_v41, %v3832_v23  ;;  %v2808_v0 = vpop.f32.mrb[14].mxu1 }
 0x149   :  { %4769 = vst [vmem:[#allocation20_spill] sm:$0xff] %v3913_v27  ;;  %v3922_v11 = vadd.f32 %v385_v2, %v3830_v22  ;;  %v3925_v31 = vadd.f32 %v2808_v0, %v3832_v23  ;;  %v513_v16 = vpop.f32.mrb[15].mxu1 }
 0x14a   :  { %4770 = vst [vmem:[#allocation21_spill] sm:$0xff] %v3919_v7  ;;  %v3928_v5 = vadd.f32 %v513_v16, %v3832_v23 }
 0x14b   :  { %4771 = vst [vmem:[#allocation22_spill] sm:$0xff] %v3922_v11  ;;  %4772 = vst [vmem:[#allocation23_spill] sm:$0xff] %v3925_v31 }
 0x14c   :  { %4773 = vst [vmem:[#allocation24_spill] sm:$0xff] %v3928_v5 }
 0x14d   :  { %v389_v18 = vpop.f32.mrb[16].mxu0 }
 0x14e   :  { %v3931_v27 = vadd.f32 %v389_v18, %v3828_v21  ;;  %v732_v24 = vpop.f32.mrb[16].mxu1  ;;  %v391_v34 = vpop.f32.mrb[17].mxu0 }
 0x14f   :  { %v779_v41 = vadd.f32 %v732_v24, %v3835_v25  ;;  %v3935_v7 = vadd.f32 %v391_v34, %v3830_v22  ;;  %v734_v2 = vpop.f32.mrb[17].mxu1  ;;  %v393_v9 = vpop.f32.mrb[18].mxu0 }
 0x150   :  { %4774 = vst [vmem:[#allocation25_spill] sm:$0xff] %v3931_v27  ;;  %v786_v0 = vadd.f32 %v734_v2, %v3838_v29  ;;  %v3939_v31 = vadd.f32 %v393_v9, %v3828_v21  ;;  %v395_v23 = vpop.f32.mrb[19].mxu0  ;;  %v736_v16 = vpop.f32.mrb[18].mxu1 }
 0x151   :  { %4775 = vst [vmem:[#allocation26_spill] sm:$0xff] %v3935_v7  ;;  %v2584_v5 = vmul.f32 -1.442695, %v779_v41  ;;  %v3942_v18 = vadd.f32 %v395_v23, %v3830_v22  ;;  %v737_v63 = vpop.f32.mrb[19].mxu1 }
 0x152   :  { %4776 = vst [vmem:[#allocation27_spill] sm:$0xff] %v3939_v31  ;;  %v2585_v23 = vmul.f32 -1.442695, %v786_v0 }
 0x153   :  { %4777 = vst [vmem:[#allocation28_spill] sm:$0xff] %v3942_v18  ;;  %3246 = vpow2.f32 %v2584_v5 }
 0x154   :  { %3248 = vpow2.f32 %v2585_v23 }
 0x155   :  { %v399_v27 = vpop.f32.mrb[20].mxu0 }
 0x156   :  { %v3945_v25 = vadd.f32 %v399_v27, %v3828_v21  ;;  %v401_v34 = vpop.f32.mrb[21].mxu0 }
 0x157   :  { %v3948_v24 = vadd.f32 %v401_v34, %v3830_v22  ;;  %v403_v29 = vpop.f32.mrb[22].mxu0 }
 0x158   :  { %4778 = vst [vmem:[#allocation29_spill] sm:$0xff] %v3945_v25  ;;  %v3951_v9 = vadd.f32 %v403_v29, %v3828_v21  ;;  %v405_v2 = vpop.f32.mrb[23].mxu0 }
 0x159   :  { %4779 = vst [vmem:[#allocation30_spill] sm:$0xff] %v3948_v24  ;;  %v3954_v41 = vadd.f32 %v405_v2, %v3830_v22 }
 0x15a   :  { %4780 = vst [vmem:[#allocation31_spill] sm:$0xff] %v3951_v9 }
 0x15b   :  { %4781 = vst [vmem:[#allocation32_spill] sm:$0xff] %v3954_v41 }
 0x15d   :  { %v409_v16 = vpop.f32.mrb[24].mxu0  ;;  %v3247_v63 = vpop.eup %3246 }
 0x15e   :  { %v3957_v5 = vadd.f32 %v409_v16, %v3828_v21  ;;  %v411_v27 = vpop.f32.mrb[25].mxu0  ;;  %v783_v9 = vadd.f32 1.0, %v3247_v63 }
 0x15f   :  { %v3960_v25 = vadd.f32 %v411_v27, %v3830_v22  ;;  %v413_v34 = vpop.f32.mrb[26].mxu0 }
 0x160   :  { %4782 = vst [vmem:[#allocation33_spill] sm:$0xff] %v3957_v5  ;;  %v3963_v24 = vadd.f32 %v413_v34, %v3828_v21  ;;  %v415_v29 = vpop.f32.mrb[27].mxu0  ;;  %3250 = vrcp.f32 %v783_v9  ;;  %v3983_v9 = vld [vmem:[%s4757_s5] ss:$0 sm:$0xff]  ;;  %v810_v5 = vpop.permute.xlu0 %809 }
 0x161   :  { %4783 = vst [vmem:[#allocation34_spill] sm:$0xff] %v3960_v25  ;;  %v3966_v2 = vadd.f32 %v415_v29, %v3830_v22  ;;  %vm811_vm2 = vcmp.eq.s32.totalorder %v810_v5, 1 }
 0x162   :  { %4784 = vst [vmem:[#allocation35_spill] sm:$0xff] %v3963_v24  ;;  %v3249_v24 = vpop.eup %3248  ;;  %vm3456_vm3 = vmpackc.low %vm811_vm2, %vm811_vm2 }
 0x163   :  { %4785 = vst [vmem:[#allocation36_spill] sm:$0xff] %v3966_v2  ;;  %v790_v29 = vadd.f32 1.0, %v3249_v24 }
 0x165   :  { %v419_v0 = vpop.f32.mrb[28].mxu0  ;;  %3252 = vrcp.f32 %v790_v29 }
 0x166   :  { %v3969_v41 = vadd.f32 %v419_v0, %v3828_v21  ;;  %v421_v16 = vpop.f32.mrb[29].mxu0 }
 0x167   :  { %v3972_v23 = vadd.f32 %v421_v16, %v3830_v22  ;;  %v423_v27 = vpop.f32.mrb[30].mxu0 }
 0x168   :  { %4786 = vst [vmem:[#allocation37_spill] sm:$0xff] %v3969_v41  ;;  %v3975_v25 = vadd.f32 %v423_v27, %v3828_v21  ;;  %v425_v34 = vpop.f32.mrb[31].mxu0 }
 0x169   :  { %4787 = vst [vmem:[#allocation38_spill] sm:$0xff] %v3972_v23  ;;  %v3978_v63 = vadd.f32 %v425_v34, %v3830_v22 }
 0x16a   :  { %4788 = vst [vmem:[#allocation39_spill] sm:$0xff] %v3975_v25  ;;  %v3251_v23 = vpop.eup %3250 }
 0x16b   :  { %4789 = vst [vmem:[#allocation40_spill] sm:$0xff] %v3978_v63 }
 0x16d   :  { %v773_v0 = vpop.f32.mrb[32].mxu0 }
 0x16e   :  { %v799_v41 = vadd.f32 %v3983_v9, %v773_v0  ;;  %v2827_v16 = vpop.f32.mrb[33].mxu0 }
 0x16f   :  { %v776_v2 = vpop.f32.mrb[34].mxu0  ;;  %v3253_v22 = vpop.eup %3252 }
 0x170   :  { %v800_v21 = vmul.f32 %v3251_v23, %v799_v41  ;;  %v2828_v27 = vpop.f32.mrb[35].mxu0  ;;  %v803_v34 = vsub.f32 1.0, %v3253_v22  ;;  %v805_v18 = vmul.f32 0.0, %v3253_v22 }
 0x172   :  { %v801_v25 = vadd.f32 %v800_v21, %v3847_v54  ;;  %v4790_v54 = vmov 0.0  }
 0x174   :  { %3254 = vtanh.f32 %v801_v25  ;;  %v4791_v25 = vmov 0  }
 0x17e   :  { %v3255_v63 = vpop.eup %3254 }
 0x17f   :  { %v804_v31 = vmul.f32 %v3255_v63, %v803_v34 }
 0x181   :  { %v806_v7 = vadd.f32 %v805_v18, %v804_v31 }
 0x183   :  { %v3987_v24 = vsel %vm811_vm2, %v806_v7, 0.0  ;;  %v3457_v2 = vpack.c.bf16 %v806_v7, %v806_v7 }
 0x184   :  { %814 = vst [vmem:[#allocation8] sm:$0xff] %v3987_v24 }
 0x185   :  { %3458 = vmatmul.mubr.msk.bf16.vlgmr.msra.gmra.mrb[20].mxu1 %vm3456_vm3, %v3457_v2  ;;  %3461 = vmatmul.mubr.msk.bf16.vlgmr.msra.gmra.mrb[36].mxu0 %vm3456_vm3, %v3457_v2 }
 0x186   :  { %929 = vmatpush1.bf16.msra.mxu1 %v3702_v32  ;;  %2850 = vmatpush3.bf16.msra.mxu0 %v3699_v30 }
 0x187   :  { %930 = vmatprep.subr.bf16.mxu1 %v3704_v33  ;;  %2851 = vmatprep.subr.bf16.mxu0 %v4790_v54 }
 0x188   :  { %960 = vmatprep.mubr.bf16.mxu1 %v4791_v25  ;;  %2865 = vmatprep.mubr.msk.bf16.mxu0 %vm3591_vm0, %v4790_v54 }
 0x18a   :  { %931 = vmatpush1.bf16.msra.mxu1 %v3711_v36  ;;  %2852 = vmatpush3.bf16.msra.mxu0 %v3708_v35 }
 0x18b   :  { %932 = vmatprep.subr.bf16.mxu1 %v3715_v37  ;;  %2853 = vmatprep.subr.bf16.mxu0 %v4790_v54 }
 0x18e   :  { %933 = vmatpush1.bf16.msra.mxu1 %v3718_v39  ;;  %2854 = vmatpush3.bf16.msra.mxu0 %v3726_v42 }
 0x18f   :  { %934 = vmatprep.subr.bf16.mxu1 %v3722_v40  ;;  %2855 = vmatprep.subr.bf16.mxu0 %v4790_v54 }
 0x192   :  { %935 = vmatpush1.bf16.msra.mxu1 %v3730_v43  ;;  %2856 = vmatpush3.bf16.msra.mxu0 %v3736_v45 }
 0x193   :  { %936 = vmatprep.subr.bf16.mxu1 %v3733_v44  ;;  %2857 = vmatprep.subr.bf16.mxu0 %v4790_v54 }
 0x196   :  { %937 = vmatpush1.bf16.msra.mxu1 %v3740_v47  ;;  %2858 = vmatpush3.bf16.msra.mxu0 %v3746_v50 }
 0x197   :  { %938 = vmatprep.subr.bf16.mxu1 %v3743_v49  ;;  %2859 = vmatprep.subr.bf16.mxu0 %v4790_v54 }
 0x19a   :  { %939 = vmatpush1.bf16.msra.mxu1 %v3751_v51  ;;  %2860 = vmatpush3.bf16.msra.mxu0 %v3757_v53 }
 0x19b   :  { %940 = vmatprep.subr.bf16.mxu1 %v3754_v52  ;;  %2861 = vmatprep.subr.bf16.mxu0 %v4790_v54 }
 0x19e   :  { %941 = vmatpush1.bf16.msra.mxu1 %v3761_v55  ;;  %2862 = vmatpush3.bf16.msra.mxu0 %v3767_v57 }
 0x19f   :  { %942 = vmatprep.subr.bf16.mxu1 %v3764_v56  ;;  %2863 = vmatprep.subr.bf16.mxu0 %v4790_v54 }
 0x1a2   :  { %943 = vmatpush1.bf16.msra.mxu1 %v3772_v58  ;;  %2864 = vmatpush3.bf16.msra.mxu0 %v3777_v59 }
 0x1a3   :  { %1040 = vmatprep.subr.bf16.mxu1 %v3697_v28  ;;  %2869 = vmatprep.subr.bf16.mxu0 %v4790_v54 }
 0x258   :  { %v850_v31 = vpop.f32.mrb[20].mxu1  ;;  %v891_v7 = vpop.f32.mrb[36].mxu0 }
 0x259   :  { %v897_v18 = vadd.f32 %v850_v31, %v3844_v46  ;;  %v852_v41 = vpop.f32.mrb[21].mxu1  ;;  %v2847_v5 = vpop.f32.mrb[37].mxu0  ;;  %v911_v11 = vadd.f32 %v3983_v9, %v891_v7 }
 0x25a   :  { %v904_v23 = vadd.f32 %v852_v41, %v3850_v61  ;;  %v854_v63 = vpop.f32.mrb[22].mxu1  ;;  %v894_v29 = vpop.f32.mrb[38].mxu0 }
 0x25b   :  { %v2587_v0 = vmul.f32 -1.442695, %v897_v18  ;;  %v855_v16 = vpop.f32.mrb[23].mxu1  ;;  %v2848_v21 = vpop.f32.mrb[39].mxu0 }
 0x25c   :  { %v2588_v27 = vmul.f32 -1.442695, %v904_v23  ;;  %v921_v29 = vpop.permute.xlu1 %920 }
 0x25d   :  { %3256 = vpow2.f32 %v2587_v0  ;;  %vm922_vm4 = vcmp.eq.s32.totalorder %v921_v29, 1 }
 0x25e   :  { %3258 = vpow2.f32 %v2588_v27 }
 0x267   :  { %v3257_v22 = vpop.eup %3256 }
 0x268   :  { %v901_v34 = vadd.f32 1.0, %v3257_v22  ;;  %v3259_v2 = vpop.eup %3258 }
 0x269   :  { %v908_v15 = vadd.f32 1.0, %v3259_v2 }
 0x26a   :  { %3260 = vrcp.f32 %v901_v34 }
 0x26b   :  { %3262 = vrcp.f32 %v908_v15 }
 0x274   :  { %v3261_v46 = vpop.eup %3260 }
 0x275   :  { %v912_v31 = vmul.f32 %v3261_v46, %v911_v11  ;;  %v3263_v41 = vpop.eup %3262 }
 0x276   :  { %v915_v18 = vsub.f32 1.0, %v3263_v41  ;;  %v917_v63 = vmul.f32 %v3263_v41, %v3987_v24 }
 0x277   :  { %v913_v61 = vadd.f32 %v912_v31, %v3856_v1 }
 0x279   :  { %3264 = vtanh.f32 %v913_v61 }
 0x283   :  { %v3265_v5 = vpop.eup %3264 }
 0x284   :  { %v916_v23 = vmul.f32 %v3265_v5, %v915_v18 }
 0x286   :  { %v918_v0 = vadd.f32 %v917_v63, %v916_v23 }
 0x288   :  { %v4031_v16 = vsel %vm922_vm4, %v918_v0, %v3987_v24  ;;  %v924_v21 = vsel %vm922_vm4, %v918_v0, 0.0 }
 0x289   :  { %926 = vst [vmem:[#allocation8 + $0x8] sm:$0xff] %v924_v21  ;;  %v927_v15 = vpack.c.bf16 %v4031_v16, %v4031_v16 }
 0x28b   :  { %961 = vmatmul.mubr.bf16.vlgmr.msra.gmra.mrb[24].mxu1 %v927_v15  ;;  %2866 = vmatmul.mubr.bf16.vlgmr.msra.gmra.mrb[40].mxu0 %v927_v15 }
 0x28c   :  { %1041 = vmatpush1.bf16.msra.mxu1 %v3702_v32  ;;  %2870 = vmatpush3.bf16.msra.mxu0 %v3699_v30 }
 0x28d   :  { %1042 = vmatprep.subr.bf16.mxu1 %v3704_v33  ;;  %2871 = vmatprep.subr.bf16.mxu0 %v4790_v54 }
 0x28e   :  { %1072 = vmatprep.mubr.bf16.mxu1 %v4791_v25  ;;  %2885 = vmatprep.mubr.msk.bf16.mxu0 %vm3591_vm0, %v4790_v54 }
 0x290   :  { %1043 = vmatpush1.bf16.msra.mxu1 %v3711_v36  ;;  %2872 = vmatpush3.bf16.msra.mxu0 %v3708_v35 }
 0x291   :  { %1044 = vmatprep.subr.bf16.mxu1 %v3715_v37  ;;  %2873 = vmatprep.subr.bf16.mxu0 %v4790_v54 }
 0x294   :  { %1045 = vmatpush1.bf16.msra.mxu1 %v3718_v39  ;;  %2874 = vmatpush3.bf16.msra.mxu0 %v3726_v42 }
 0x295   :  { %1046 = vmatprep.subr.bf16.mxu1 %v3722_v40  ;;  %2875 = vmatprep.subr.bf16.mxu0 %v4790_v54 }
 0x298   :  { %1047 = vmatpush1.bf16.msra.mxu1 %v3730_v43  ;;  %2876 = vmatpush3.bf16.msra.mxu0 %v3736_v45 }
 0x299   :  { %1048 = vmatprep.subr.bf16.mxu1 %v3733_v44  ;;  %2877 = vmatprep.subr.bf16.mxu0 %v4790_v54 }
 0x29c   :  { %1049 = vmatpush1.bf16.msra.mxu1 %v3740_v47  ;;  %2878 = vmatpush3.bf16.msra.mxu0 %v3746_v50 }
 0x29d   :  { %1050 = vmatprep.subr.bf16.mxu1 %v3743_v49  ;;  %2879 = vmatprep.subr.bf16.mxu0 %v4790_v54 }
 0x2a0   :  { %1051 = vmatpush1.bf16.msra.mxu1 %v3751_v51  ;;  %2880 = vmatpush3.bf16.msra.mxu0 %v3757_v53 }
 0x2a1   :  { %1052 = vmatprep.subr.bf16.mxu1 %v3754_v52  ;;  %2881 = vmatprep.subr.bf16.mxu0 %v4790_v54 }
 0x2a4   :  { %1053 = vmatpush1.bf16.msra.mxu1 %v3761_v55  ;;  %2882 = vmatpush3.bf16.msra.mxu0 %v3767_v57 }
 0x2a5   :  { %1054 = vmatprep.subr.bf16.mxu1 %v3764_v56  ;;  %2883 = vmatprep.subr.bf16.mxu0 %v4790_v54 }
 0x2a8   :  { %1055 = vmatpush1.bf16.msra.mxu1 %v3772_v58  ;;  %2884 = vmatpush3.bf16.msra.mxu0 %v3777_v59 }
 0x2a9   :  { %1152 = vmatprep.subr.bf16.mxu1 %v3697_v28  ;;  %2889 = vmatprep.subr.bf16.mxu0 %v4790_v54 }
 0x35e   :  { %v962_v1 = vpop.f32.mrb[24].mxu1  ;;  %v1003_v11 = vpop.f32.mrb[40].mxu0 }
 0x35f   :  { %v1009_v24 = vadd.f32 %v962_v1, %v3859_v3  ;;  %v964_v7 = vpop.f32.mrb[25].mxu1  ;;  %v2867_v27 = vpop.f32.mrb[41].mxu0  ;;  %v1023_v23 = vadd.f32 %v3983_v9, %v1003_v11 }
 0x360   :  { %v1016_v22 = vadd.f32 %v964_v7, %v3862_v6  ;;  %v966_v34 = vpop.f32.mrb[26].mxu1  ;;  %v1006_v2 = vpop.f32.mrb[42].mxu0 }
 0x361   :  { %v2589_v46 = vmul.f32 -1.442695, %v1009_v24  ;;  %v967_v31 = vpop.f32.mrb[27].mxu1  ;;  %v2868_v61 = vpop.f32.mrb[43].mxu0 }
 0x362   :  { %v2590_v41 = vmul.f32 -1.442695, %v1016_v22  ;;  %v1033_v7 = vpop.permute.xlu1 %1032 }
 0x363   :  { %3266 = vpow2.f32 %v2589_v46  ;;  %vm1034_vm5 = vcmp.eq.s32.totalorder %v1033_v7, 1  ;;  %v4153_v7 = vld [vmem:[#allocation7 + $0x38] ss:$12 sps:$4 sm:$0xff]  }
 0x364   :  { %3268 = vpow2.f32 %v2590_v41 }
 0x36d   :  { %v3267_v18 = vpop.eup %3266 }
 0x36e   :  { %v1013_v28 = vadd.f32 1.0, %v3267_v18  ;;  %v3269_v5 = vpop.eup %3268 }
 0x36f   :  { %v1020_v63 = vadd.f32 1.0, %v3269_v5  ;;  %v1145_v5 = vpop.permute.xlu0 %1144 }
 0x370   :  { %3270 = vrcp.f32 %v1013_v28  ;;  %vm1146_vm6 = vcmp.eq.s32.totalorder %v1145_v5, 1  ;;  %v4235_v5 = vld [vmem:[#allocation7 + $0x90] ss:$12 sps:$4 sm:$0xff]  }
 0x371   :  { %3272 = vrcp.f32 %v1020_v63 }
 0x37a   :  { %v3271_v3 = vpop.eup %3270 }
 0x37b   :  { %v1024_v29 = vmul.f32 %v3271_v3, %v1023_v23  ;;  %v3273_v0 = vpop.eup %3272 }
 0x37c   :  { %v1027_v21 = vsub.f32 1.0, %v3273_v0  ;;  %v1029_v1 = vmul.f32 %v3273_v0, %v4031_v16  ;;  %v4133_v0 = vld [vmem:[#allocation7 + $0x1c] ss:$12 sps:$4 sm:$0xff]  }
 0x37d   :  { %v1025_v6 = vadd.f32 %v1024_v29, %v3841_v38 }
 0x37f   :  { %3274 = vtanh.f32 %v1025_v6  ;;  %v4130_v6 = vld [vmem:[#allocation7 + $0x8] ss:$12 sps:$4 sm:$0xff]  }
 0x389   :  { %v3275_v15 = vpop.eup %3274 }
 0x38a   :  { %v1028_v24 = vmul.f32 %v3275_v15, %v1027_v21  ;;  %v4140_v21 = vld [vmem:[#allocation7 + $0x18] ss:$12 sps:$4 sm:$0xff]   ;;  %v4143_v15 = vld [vmem:[#allocation7 + $0x20] ss:$12 sps:$4 sm:$0xff]  }
 0x38c   :  { %v1030_v27 = vadd.f32 %v1029_v1, %v1028_v24  ;;  %v4146_v1 = vld [vmem:[#allocation7 + $0x34] ss:$12 sps:$4 sm:$0xff]   ;;  %v4150_v24 = vld [vmem:[#allocation7 + $0x30] ss:$12 sps:$4 sm:$0xff]  }
 0x38e   :  { %v4076_v22 = vsel %vm1034_vm5, %v1030_v27, %v4031_v16  ;;  %v1036_v34 = vsel %vm1034_vm5, %v1030_v27, 0.0  ;;  %v4156_v27 = vld [vmem:[#allocation7 + $0x4c] ss:$12 sps:$4 sm:$0xff]  }
 0x38f   :  { %1038 = vst [vmem:[#allocation8 + $0x10] sm:$0xff] %v1036_v34  ;;  %v1039_v11 = vpack.c.bf16 %v4076_v22, %v4076_v22  ;;  %v4163_v34 = vld [vmem:[#allocation7 + $0x50] ss:$12 sps:$4 sm:$0xff]  }
 0x391   :  { %1073 = vmatmul.mubr.bf16.vlgmr.msra.gmra.mrb[28].mxu1 %v1039_v11  ;;  %2886 = vmatmul.mubr.bf16.vlgmr.msra.gmra.mrb[44].mxu0 %v1039_v11  ;;  %v4166_v11 = vld [vmem:[#allocation7 + $0x64] ss:$12 sps:$4 sm:$0xff]  }
 0x392   :  { %1153 = vmatpush1.bf16.msra.mxu1 %v3702_v32  ;;  %2890 = vmatpush3.bf16.msra.mxu0 %v3699_v30  ;;  %v4113_v30 = vld [vmem:[#allocation7 + $0x4] ss:$12 sps:$4 sm:$0xff]  }
 0x393   :  { %1154 = vmatprep.subr.bf16.mxu1 %v3704_v33  ;;  %2891 = vmatprep.subr.bf16.mxu0 %v4790_v54 }
 0x394   :  { %1184 = vmatprep.mubr.bf16.mxu1 %v4791_v25  ;;  %2905 = vmatprep.mubr.msk.bf16.mxu0 %vm3591_vm0, %v4790_v54 }
 0x396   :  { %1155 = vmatpush1.bf16.msra.mxu1 %v3711_v36  ;;  %2892 = vmatpush3.bf16.msra.mxu0 %v3708_v35 }
 0x397   :  { %1156 = vmatprep.subr.bf16.mxu1 %v3715_v37  ;;  %2893 = vmatprep.subr.bf16.mxu0 %v4790_v54 }
 0x39a   :  { %1157 = vmatpush1.bf16.msra.mxu1 %v3718_v39  ;;  %2894 = vmatpush3.bf16.msra.mxu0 %v3726_v42 }
 0x39b   :  { %1158 = vmatprep.subr.bf16.mxu1 %v3722_v40  ;;  %2895 = vmatprep.subr.bf16.mxu0 %v4790_v54 }
 0x39e   :  { %1159 = vmatpush1.bf16.msra.mxu1 %v3730_v43  ;;  %2896 = vmatpush3.bf16.msra.mxu0 %v3736_v45 }
 0x39f   :  { %1160 = vmatprep.subr.bf16.mxu1 %v3733_v44  ;;  %2897 = vmatprep.subr.bf16.mxu0 %v4790_v54 }
 0x3a2   :  { %1161 = vmatpush1.bf16.msra.mxu1 %v3740_v47  ;;  %2898 = vmatpush3.bf16.msra.mxu0 %v3746_v50 }
 0x3a3   :  { %1162 = vmatprep.subr.bf16.mxu1 %v3743_v49  ;;  %2899 = vmatprep.subr.bf16.mxu0 %v4790_v54 }
 0x3a6   :  { %1163 = vmatpush1.bf16.msra.mxu1 %v3751_v51  ;;  %2900 = vmatpush3.bf16.msra.mxu0 %v3757_v53 }
 0x3a7   :  { %1164 = vmatprep.subr.bf16.mxu1 %v3754_v52  ;;  %2901 = vmatprep.subr.bf16.mxu0 %v4790_v54 }
 0x3aa   :  { %1165 = vmatpush1.bf16.msra.mxu1 %v3761_v55  ;;  %2902 = vmatpush3.bf16.msra.mxu0 %v3767_v57 }
 0x3ab   :  { %1166 = vmatprep.subr.bf16.mxu1 %v3764_v56  ;;  %2903 = vmatprep.subr.bf16.mxu0 %v4790_v54 }
 0x3ae   :  { %1167 = vmatpush1.bf16.msra.mxu1 %v3772_v58  ;;  %2904 = vmatpush3.bf16.msra.mxu0 %v3777_v59 }
 0x3af   :  { %1264 = vmatprep.subr.bf16.mxu1 %v4113_v30  ;;  %2909 = vmatprep.subr.bf16.mxu0 %v4790_v54 }
 0x464   :  { %v1074_v32 = vpop.f32.mrb[28].mxu1  ;;  %v1115_v33 = vpop.f32.mrb[44].mxu0 }
 0x465   :  { %v1121_v35 = vadd.f32 %v1074_v32, %v3868_v10  ;;  %v1076_v36 = vpop.f32.mrb[29].mxu1  ;;  %v2887_v37 = vpop.f32.mrb[45].mxu0  ;;  %v1135_v2 = vadd.f32 %v3983_v9, %v1115_v33  ;;  %v4170_v32 = vld [vmem:[#allocation7 + $0x60] ss:$12 sps:$4 sm:$0xff]   ;;  %v4173_v33 = vld [vmem:[#allocation7 + $0x68] ss:$12 sps:$4 sm:$0xff]  }
 0x466   :  { %v1128_v39 = vadd.f32 %v1076_v36, %v3874_v14  ;;  %v1078_v40 = vpop.f32.mrb[30].mxu1  ;;  %v1118_v42 = vpop.f32.mrb[46].mxu0 }
 0x467   :  { %v2591_v43 = vmul.f32 -1.442695, %v1121_v35  ;;  %v1079_v44 = vpop.f32.mrb[31].mxu1  ;;  %v2888_v45 = vpop.f32.mrb[47].mxu0  ;;  %v4176_v35 = vld [vmem:[#allocation7 + $0x7c] ss:$12 sps:$4 sm:$0xff]  }
 0x468   :  { %v2592_v47 = vmul.f32 -1.442695, %v1128_v39 }
 0x469   :  { %3276 = vpow2.f32 %v2591_v43 }
 0x46a   :  { %3278 = vpow2.f32 %v2592_v47 }
 0x473   :  { %v3277_v49 = vpop.eup %3276 }
 0x474   :  { %v1125_v50 = vadd.f32 1.0, %v3277_v49  ;;  %v3279_v38 = vpop.eup %3278 }
 0x475   :  { %v1132_v16 = vadd.f32 1.0, %v3279_v38 }
 0x476   :  { %3280 = vrcp.f32 %v1125_v50 }
 0x477   :  { %3282 = vrcp.f32 %v1132_v16 }
 0x480   :  { %v3281_v10 = vpop.eup %3280 }
 0x481   :  { %v1136_v46 = vmul.f32 %v3281_v10, %v1135_v2  ;;  %v3283_v31 = vpop.eup %3282 }
 0x482   :  { %v1139_v61 = vsub.f32 1.0, %v3283_v31  ;;  %v1141_v18 = vmul.f32 %v3283_v31, %v4076_v22 }
 0x483   :  { %v1137_v14 = vadd.f32 %v1136_v46, %v3853_v62  ;;  %v4127_v62 = vld [vmem:[#allocation7] ss:$12 sps:$4 sm:$0xff]   ;;  %v1257_v46 = vpop.permute.xlu1 %1256 }
 0x484   :  { %vm1258_vm7 = vcmp.eq.s32.totalorder %v1257_v46, 1 }
 0x485   :  { %3284 = vtanh.f32 %v1137_v14 }
 0x48f   :  { %v3285_v41 = vpop.eup %3284 }
 0x490   :  { %v1140_v28 = vmul.f32 %v3285_v41, %v1139_v61 }
 0x492   :  { %v1142_v63 = vadd.f32 %v1141_v18, %v1140_v28  ;;  %v4228_v18 = vld [vmem:[#allocation7 + $0x80] ss:$12 sps:$4 sm:$0xff]  }
 0x493   :  { %v4231_v28 = vld [vmem:[#allocation7 + $0x94] ss:$12 sps:$4 sm:$0xff]  }
 0x494   :  { %v4123_v23 = vsel %vm1146_vm6, %v1142_v63, %v4076_v22  ;;  %v1148_v3 = vsel %vm1146_vm6, %v1142_v63, 0.0  ;;  %v4160_v22 = vld [vmem:[#allocation7 + $0x48] ss:$12 sps:$4 sm:$0xff]   ;;  %v4238_v63 = vld [vmem:[#allocation7 + $0x98] ss:$12 sps:$4 sm:$0xff]  }
 0x495   :  { %1150 = vst [vmem:[#allocation8 + $0x18] sm:$0xff] %v1148_v3  ;;  %v1151_v29 = vpack.c.bf16 %v4123_v23, %v4123_v23  ;;  %v4245_v3 = vld [vmem:[#allocation7 + $0xa8] ss:$12 sps:$4 sm:$0xff]  }
 0x497   :  { %1185 = vmatmul.mubr.bf16.vlgmr.msra.gmra.mrb[32].mxu1 %v1151_v29  ;;  %2906 = vmatmul.mubr.bf16.vlgmr.msra.gmra.mrb[48].mxu0 %v1151_v29  ;;  %v4248_v29 = vld [vmem:[#allocation7 + $0xb0] ss:$12 sps:$4 sm:$0xff]  }
 0x498   :  { %1265 = vmatpush1.bf16.msra.mxu1 %v4127_v62  ;;  %2910 = vmatpush3.bf16.msra.mxu0 %v4130_v6 }
 0x499   :  { %1266 = vmatprep.subr.bf16.mxu1 %v4133_v0  ;;  %2911 = vmatprep.subr.bf16.mxu0 %v4790_v54 }
 0x49a   :  { %1296 = vmatprep.mubr.bf16.mxu1 %v4791_v25  ;;  %2925 = vmatprep.mubr.msk.bf16.mxu0 %vm3591_vm0, %v4790_v54 }
 0x49c   :  { %1267 = vmatpush1.bf16.msra.mxu1 %v4140_v21  ;;  %2912 = vmatpush3.bf16.msra.mxu0 %v4143_v15 }
 0x49d   :  { %1268 = vmatprep.subr.bf16.mxu1 %v4146_v1  ;;  %2913 = vmatprep.subr.bf16.mxu0 %v4790_v54 }
 0x4a0   :  { %1269 = vmatpush1.bf16.msra.mxu1 %v4150_v24  ;;  %2914 = vmatpush3.bf16.msra.mxu0 %v4153_v7 }
 0x4a1   :  { %1270 = vmatprep.subr.bf16.mxu1 %v4156_v27  ;;  %2915 = vmatprep.subr.bf16.mxu0 %v4790_v54 }
 0x4a4   :  { %1271 = vmatpush1.bf16.msra.mxu1 %v4160_v22  ;;  %2916 = vmatpush3.bf16.msra.mxu0 %v4163_v34 }
 0x4a5   :  { %1272 = vmatprep.subr.bf16.mxu1 %v4166_v11  ;;  %2917 = vmatprep.subr.bf16.mxu0 %v4790_v54 }
 0x4a8   :  { %1273 = vmatpush1.bf16.msra.mxu1 %v4170_v32  ;;  %2918 = vmatpush3.bf16.msra.mxu0 %v4173_v33 }
 0x4a9   :  { %1274 = vmatprep.subr.bf16.mxu1 %v4176_v35  ;;  %2919 = vmatprep.subr.bf16.mxu0 %v4790_v54 }
 0x4ac   :  { %1275 = vmatpush1.bf16.msra.mxu1 %v3751_v51  ;;  %2920 = vmatpush3.bf16.msra.mxu0 %v3757_v53 }
 0x4ad   :  { %1276 = vmatprep.subr.bf16.mxu1 %v3754_v52  ;;  %2921 = vmatprep.subr.bf16.mxu0 %v4790_v54 }
 0x4b0   :  { %1277 = vmatpush1.bf16.msra.mxu1 %v3761_v55  ;;  %2922 = vmatpush3.bf16.msra.mxu0 %v3767_v57 }
 0x4b1   :  { %1278 = vmatprep.subr.bf16.mxu1 %v3764_v56  ;;  %2923 = vmatprep.subr.bf16.mxu0 %v4790_v54 }
 0x4b4   :  { %1279 = vmatpush1.bf16.msra.mxu1 %v3772_v58  ;;  %2924 = vmatpush3.bf16.msra.mxu0 %v3777_v59 }
 0x4b5   :  { %1376 = vmatprep.subr.bf16.mxu1 %v4113_v30  ;;  %2929 = vmatprep.subr.bf16.mxu0 %v4790_v54 }
 0x56a   :  { %v1186_v51 = vpop.f32.mrb[32].mxu1  ;;  %v1227_v52 = vpop.f32.mrb[48].mxu0 }
 0x56b   :  { %v1233_v53 = vadd.f32 %v1186_v51, %v3883_v19  ;;  %v1188_v36 = vpop.f32.mrb[33].mxu1  ;;  %v2907_v55 = vpop.f32.mrb[49].mxu0  ;;  %v1247_v47 = vadd.f32 %v3983_v9, %v1227_v52 }
 0x56c   :  { %v1240_v57 = vadd.f32 %v1188_v36, %v3886_v26  ;;  %v1190_v37 = vpop.f32.mrb[34].mxu1  ;;  %v1230_v56 = vpop.f32.mrb[50].mxu0 }
 0x56d   :  { %v2593_v39 = vmul.f32 -1.442695, %v1233_v53  ;;  %v1191_v40 = vpop.f32.mrb[35].mxu1  ;;  %v2908_v42 = vpop.f32.mrb[51].mxu0 }
 0x56e   :  { %v2594_v58 = vmul.f32 -1.442695, %v1240_v57 }
 0x56f   :  { %3286 = vpow2.f32 %v2593_v39 }
 0x570   :  { %3288 = vpow2.f32 %v2594_v58 }
 0x579   :  { %v3287_v59 = vpop.eup %3286 }
 0x57a   :  { %v1237_v43 = vadd.f32 1.0, %v3287_v59  ;;  %v3289_v44 = vpop.eup %3288 }
 0x57b   :  { %v1244_v45 = vadd.f32 1.0, %v3289_v44 }
 0x57c   :  { %3290 = vrcp.f32 %v1237_v43 }
 0x57d   :  { %3292 = vrcp.f32 %v1244_v45 }
 0x586   :  { %v3291_v19 = vpop.eup %3290 }
 0x587   :  { %v1248_v49 = vmul.f32 %v3291_v19, %v1247_v47  ;;  %v3293_v50 = vpop.eup %3292 }
 0x588   :  { %v1251_v38 = vsub.f32 1.0, %v3293_v50  ;;  %v1253_v2 = vmul.f32 %v3293_v50, %v4123_v23 }
 0x589   :  { %v1249_v26 = vadd.f32 %v1248_v49, %v3871_v12  ;;  %v4225_v12 = vld [vmem:[#allocation7 + $0x78] ss:$12 sps:$4 sm:$0xff]  }
 0x58b   :  { %3294 = vtanh.f32 %v1249_v26 }
 0x595   :  { %v3295_v16 = vpop.eup %3294 }
 0x596   :  { %v1252_v10 = vmul.f32 %v3295_v16, %v1251_v38 }
 0x598   :  { %v1254_v14 = vadd.f32 %v1253_v2, %v1252_v10  ;;  %v1369_v2 = vpop.permute.xlu1 %1368 }
 0x599   :  { %vm1370_vm8 = vcmp.eq.s32.totalorder %v1369_v2, 1 }
 0x59a   :  { %v4198_v31 = vsel %vm1258_vm7, %v1254_v14, %v4123_v23  ;;  %v1260_v61 = vsel %vm1258_vm7, %v1254_v14, 0.0  ;;  %v4241_v23 = vld [vmem:[#allocation7 + $0xac] ss:$12 sps:$4 sm:$0xff]  }
 0x59b   :  { %1262 = vst [vmem:[#allocation8 + $0x20] sm:$0xff] %v1260_v61  ;;  %v1263_v41 = vpack.c.bf16 %v4198_v31, %v4198_v31 }
 0x59d   :  { %1297 = vmatmul.mubr.bf16.vlgmr.msra.gmra.mrb[36].mxu1 %v1263_v41  ;;  %2926 = vmatmul.mubr.bf16.vlgmr.msra.gmra.mrb[52].mxu0 %v1263_v41 }
 0x59e   :  { %1377 = vmatpush1.bf16.msra.mxu1 %v4127_v62  ;;  %2930 = vmatpush3.bf16.msra.mxu0 %v4130_v6 }
 0x59f   :  { %1378 = vmatprep.subr.bf16.mxu1 %v4133_v0  ;;  %2931 = vmatprep.subr.bf16.mxu0 %v4790_v54 }
 0x5a0   :  { %1408 = vmatprep.mubr.bf16.mxu1 %v4791_v25  ;;  %2945 = vmatprep.mubr.msk.bf16.mxu0 %vm3591_vm0, %v4790_v54 }
 0x5a2   :  { %1379 = vmatpush1.bf16.msra.mxu1 %v4140_v21  ;;  %2932 = vmatpush3.bf16.msra.mxu0 %v4143_v15 }
 0x5a3   :  { %1380 = vmatprep.subr.bf16.mxu1 %v4146_v1  ;;  %2933 = vmatprep.subr.bf16.mxu0 %v4790_v54 }
 0x5a6   :  { %1381 = vmatpush1.bf16.msra.mxu1 %v4150_v24  ;;  %2934 = vmatpush3.bf16.msra.mxu0 %v4153_v7 }
 0x5a7   :  { %1382 = vmatprep.subr.bf16.mxu1 %v4156_v27  ;;  %2935 = vmatprep.subr.bf16.mxu0 %v4790_v54 }
 0x5aa   :  { %1383 = vmatpush1.bf16.msra.mxu1 %v4160_v22  ;;  %2936 = vmatpush3.bf16.msra.mxu0 %v4163_v34 }
 0x5ab   :  { %1384 = vmatprep.subr.bf16.mxu1 %v4166_v11  ;;  %2937 = vmatprep.subr.bf16.mxu0 %v4790_v54 }
 0x5ae   :  { %1385 = vmatpush1.bf16.msra.mxu1 %v4170_v32  ;;  %2938 = vmatpush3.bf16.msra.mxu0 %v4173_v33 }
 0x5af   :  { %1386 = vmatprep.subr.bf16.mxu1 %v4176_v35  ;;  %2939 = vmatprep.subr.bf16.mxu0 %v4790_v54 }
 0x5b2   :  { %1387 = vmatpush1.bf16.msra.mxu1 %v4225_v12  ;;  %2940 = vmatpush3.bf16.msra.mxu0 %v4228_v18 }
 0x5b3   :  { %1388 = vmatprep.subr.bf16.mxu1 %v4231_v28  ;;  %2941 = vmatprep.subr.bf16.mxu0 %v4790_v54 }
 0x5b6   :  { %1389 = vmatpush1.bf16.msra.mxu1 %v4235_v5  ;;  %2942 = vmatpush3.bf16.msra.mxu0 %v4238_v63 }
 0x5b7   :  { %1390 = vmatprep.subr.bf16.mxu1 %v4241_v23  ;;  %2943 = vmatprep.subr.bf16.mxu0 %v4790_v54 }
 0x5ba   :  { %1391 = vmatpush1.bf16.msra.mxu1 %v4245_v3  ;;  %2944 = vmatpush3.bf16.msra.mxu0 %v4248_v29 }
 0x5bb   :  { %1488 = vmatprep.subr.bf16.mxu1 %v4113_v30  ;;  %2949 = vmatprep.subr.bf16.mxu0 %v4790_v54 }
 0x670   :  { %v1298_v51 = vpop.f32.mrb[36].mxu1  ;;  %v1339_v52 = vpop.f32.mrb[52].mxu0 }
 0x671   :  { %v1345_v53 = vadd.f32 %v1298_v51, %v3892_v48  ;;  %v1300_v36 = vpop.f32.mrb[37].mxu1  ;;  %v2927_v55 = vpop.f32.mrb[53].mxu0  ;;  %v1359_v47 = vadd.f32 %v3983_v9, %v1339_v52 }
 0x672   :  { %v1352_v57 = vadd.f32 %v1300_v36, %v3898_v4  ;;  %v1302_v37 = vpop.f32.mrb[38].mxu1  ;;  %v1342_v56 = vpop.f32.mrb[54].mxu0 }
 0x673   :  { %v2595_v39 = vmul.f32 -1.442695, %v1345_v53  ;;  %v1303_v40 = vpop.f32.mrb[39].mxu1  ;;  %v2928_v42 = vpop.f32.mrb[55].mxu0 }
 0x674   :  { %v2596_v58 = vmul.f32 -1.442695, %v1352_v57 }
 0x675   :  { %3296 = vpow2.f32 %v2595_v39 }
 0x676   :  { %3298 = vpow2.f32 %v2596_v58 }
 0x67f   :  { %v3297_v59 = vpop.eup %3296 }
 0x680   :  { %v1349_v43 = vadd.f32 1.0, %v3297_v59  ;;  %v3299_v44 = vpop.eup %3298 }
 0x681   :  { %v1356_v45 = vadd.f32 1.0, %v3299_v44 }
 0x682   :  { %3300 = vrcp.f32 %v1349_v43 }
 0x683   :  { %3302 = vrcp.f32 %v1356_v45 }
 0x68c   :  { %v3301_v48 = vpop.eup %3300 }
 0x68d   :  { %v1360_v19 = vmul.f32 %v3301_v48, %v1359_v47  ;;  %v3303_v49 = vpop.eup %3302 }
 0x68e   :  { %v1363_v26 = vsub.f32 1.0, %v3303_v49  ;;  %v1365_v38 = vmul.f32 %v3303_v49, %v4198_v31  ;;  %v1481_v49 = vpop.permute.xlu0 %1480 }
 0x68f   :  { %v1361_v4 = vadd.f32 %v1360_v19, %v3880_v17  ;;  %vm1482_vm9 = vcmp.eq.s32.totalorder %v1481_v49, 1 }
 0x691   :  { %3304 = vtanh.f32 %v1361_v4 }
 0x69b   :  { %v3305_v50 = vpop.eup %3304 }
 0x69c   :  { %v1364_v16 = vmul.f32 %v3305_v50, %v1363_v26 }
 0x69e   :  { %v1366_v10 = vadd.f32 %v1365_v38, %v1364_v16 }
 0x6a0   :  { %v4259_v46 = vsel %vm1370_vm8, %v1366_v10, %v4198_v31  ;;  %v1372_v14 = vsel %vm1370_vm8, %v1366_v10, 0.0 }
 0x6a1   :  { %1374 = vst [vmem:[#allocation8 + $0x28] sm:$0xff] %v1372_v14  ;;  %v1375_v61 = vpack.c.bf16 %v4259_v46, %v4259_v46  ;;  %v4792_v14 = vld [vmem:[#allocation22_spill] sm:$0xff] }
 0x6a3   :  { %1409 = vmatmul.mubr.bf16.vlgmr.msra.gmra.mrb[40].mxu1 %v1375_v61  ;;  %2946 = vmatmul.mubr.bf16.vlgmr.msra.gmra.mrb[56].mxu0 %v1375_v61 }
 0x6a4   :  { %1489 = vmatpush1.bf16.msra.mxu1 %v4127_v62  ;;  %2950 = vmatpush3.bf16.msra.mxu0 %v4130_v6 }
 0x6a5   :  { %1490 = vmatprep.subr.bf16.mxu1 %v4133_v0  ;;  %2951 = vmatprep.subr.bf16.mxu0 %v4790_v54 }
 0x6a6   :  { %1520 = vmatprep.mubr.bf16.mxu1 %v4791_v25  ;;  %2965 = vmatprep.mubr.msk.bf16.mxu0 %vm3591_vm0, %v4790_v54 }
 0x6a8   :  { %1491 = vmatpush1.bf16.msra.mxu1 %v4140_v21  ;;  %2952 = vmatpush3.bf16.msra.mxu0 %v4143_v15 }
 0x6a9   :  { %1492 = vmatprep.subr.bf16.mxu1 %v4146_v1  ;;  %2953 = vmatprep.subr.bf16.mxu0 %v4790_v54 }
 0x6ac   :  { %1493 = vmatpush1.bf16.msra.mxu1 %v4150_v24  ;;  %2954 = vmatpush3.bf16.msra.mxu0 %v4153_v7 }
 0x6ad   :  { %1494 = vmatprep.subr.bf16.mxu1 %v4156_v27  ;;  %2955 = vmatprep.subr.bf16.mxu0 %v4790_v54 }
 0x6b0   :  { %1495 = vmatpush1.bf16.msra.mxu1 %v4160_v22  ;;  %2956 = vmatpush3.bf16.msra.mxu0 %v4163_v34 }
 0x6b1   :  { %1496 = vmatprep.subr.bf16.mxu1 %v4166_v11  ;;  %2957 = vmatprep.subr.bf16.mxu0 %v4790_v54 }
 0x6b4   :  { %1497 = vmatpush1.bf16.msra.mxu1 %v4170_v32  ;;  %2958 = vmatpush3.bf16.msra.mxu0 %v4173_v33 }
 0x6b5   :  { %1498 = vmatprep.subr.bf16.mxu1 %v4176_v35  ;;  %2959 = vmatprep.subr.bf16.mxu0 %v4790_v54 }
 0x6b8   :  { %1499 = vmatpush1.bf16.msra.mxu1 %v4225_v12  ;;  %2960 = vmatpush3.bf16.msra.mxu0 %v4228_v18 }
 0x6b9   :  { %1500 = vmatprep.subr.bf16.mxu1 %v4231_v28  ;;  %2961 = vmatprep.subr.bf16.mxu0 %v4790_v54 }
 0x6bc   :  { %1501 = vmatpush1.bf16.msra.mxu1 %v4235_v5  ;;  %2962 = vmatpush3.bf16.msra.mxu0 %v4238_v63 }
 0x6bd   :  { %1502 = vmatprep.subr.bf16.mxu1 %v4241_v23  ;;  %2963 = vmatprep.subr.bf16.mxu0 %v4790_v54 }
 0x6c0   :  { %1503 = vmatpush1.bf16.msra.mxu1 %v4245_v3  ;;  %2964 = vmatpush3.bf16.msra.mxu0 %v4248_v29 }
 0x6c1   :  { %1600 = vmatprep.subr.bf16.mxu1 %v4113_v30  ;;  %2969 = vmatprep.subr.bf16.mxu0 %v4790_v54 }
 0x776   :  { %v1410_v17 = vpop.f32.mrb[40].mxu1  ;;  %v1451_v31 = vpop.f32.mrb[56].mxu0 }
 0x777   :  { %v1457_v41 = vadd.f32 %v1410_v17, %v3907_v13  ;;  %v1412_v51 = vpop.f32.mrb[41].mxu1  ;;  %v2947_v52 = vpop.f32.mrb[57].mxu0  ;;  %v1471_v43 = vadd.f32 %v3983_v9, %v1451_v31 }
 0x778   :  { %v1464_v53 = vadd.f32 %v1412_v51, %v3910_v20  ;;  %v1414_v36 = vpop.f32.mrb[42].mxu1  ;;  %v1454_v55 = vpop.f32.mrb[58].mxu0 }
 0x779   :  { %v2597_v57 = vmul.f32 -1.442695, %v1457_v41  ;;  %v1415_v37 = vpop.f32.mrb[43].mxu1  ;;  %v2948_v56 = vpop.f32.mrb[59].mxu0 }
 0x77a   :  { %v2598_v39 = vmul.f32 -1.442695, %v1464_v53 }
 0x77b   :  { %3306 = vpow2.f32 %v2597_v57 }
 0x77c   :  { %3308 = vpow2.f32 %v2598_v39 }
 0x785   :  { %v3307_v40 = vpop.eup %3306 }
 0x786   :  { %v1461_v42 = vadd.f32 1.0, %v3307_v40  ;;  %v3309_v58 = vpop.eup %3308 }
 0x787   :  { %v1468_v59 = vadd.f32 1.0, %v3309_v58 }
 0x788   :  { %3310 = vrcp.f32 %v1461_v42  ;;  %v4793_v42 = vld [vmem:[#allocation15_spill] sm:$0xff] }
 0x789   :  { %3312 = vrcp.f32 %v1468_v59 }
 0x792   :  { %v3311_v13 = vpop.eup %3310 }
 0x793   :  { %v1472_v44 = vmul.f32 %v3311_v13, %v1471_v43  ;;  %v3313_v45 = vpop.eup %3312 }
 0x794   :  { %v1475_v47 = vsub.f32 1.0, %v3313_v45  ;;  %v1477_v19 = vmul.f32 %v3313_v45, %v4259_v46  ;;  %v1593_v45 = vpop.permute.xlu1 %1592 }
 0x795   :  { %v1473_v20 = vadd.f32 %v1472_v44, %v3865_v8  ;;  %vm1594_vm10 = vcmp.eq.s32.totalorder %v1593_v45, 1 }
 0x797   :  { %3314 = vtanh.f32 %v1473_v20 }
 0x7a1   :  { %v3315_v48 = vpop.eup %3314 }
 0x7a2   :  { %v1476_v4 = vmul.f32 %v3315_v48, %v1475_v47 }
 0x7a4   :  { %v1478_v26 = vadd.f32 %v1477_v19, %v1476_v4 }
 0x7a6   :  { %v4304_v50 = vsel %vm1482_vm9, %v1478_v26, %v4259_v46  ;;  %v1484_v38 = vsel %vm1482_vm9, %v1478_v26, 0.0 }
 0x7a7   :  { %1486 = vst [vmem:[#allocation8 + $0x30] sm:$0xff] %v1484_v38  ;;  %v1487_v9 = vpack.c.bf16 %v4304_v50, %v4304_v50 }
 0x7a9   :  { %1521 = vmatmul.mubr.bf16.vlgmr.msra.gmra.mrb[44].mxu1 %v1487_v9  ;;  %2966 = vmatmul.mubr.bf16.vlgmr.msra.gmra.mrb[60].mxu0 %v1487_v9 }
 0x7aa   :  { %1601 = vmatpush1.bf16.msra.mxu1 %v4127_v62  ;;  %2970 = vmatpush3.bf16.msra.mxu0 %v4130_v6 }
 0x7ab   :  { %1602 = vmatprep.subr.bf16.mxu1 %v4133_v0  ;;  %2971 = vmatprep.subr.bf16.mxu0 %v4790_v54 }
 0x7ac   :  { %1632 = vmatprep.mubr.bf16.mxu1 %v4791_v25  ;;  %2985 = vmatprep.mubr.msk.bf16.mxu0 %vm3591_vm0, %v4790_v54 }
 0x7ae   :  { %1603 = vmatpush1.bf16.msra.mxu1 %v4140_v21  ;;  %2972 = vmatpush3.bf16.msra.mxu0 %v4143_v15 }
 0x7af   :  { %1604 = vmatprep.subr.bf16.mxu1 %v4146_v1  ;;  %2973 = vmatprep.subr.bf16.mxu0 %v4790_v54 }
 0x7b2   :  { %1605 = vmatpush1.bf16.msra.mxu1 %v4150_v24  ;;  %2974 = vmatpush3.bf16.msra.mxu0 %v4153_v7 }
 0x7b3   :  { %1606 = vmatprep.subr.bf16.mxu1 %v4156_v27  ;;  %2975 = vmatprep.subr.bf16.mxu0 %v4790_v54 }
 0x7b6   :  { %1607 = vmatpush1.bf16.msra.mxu1 %v4160_v22  ;;  %2976 = vmatpush3.bf16.msra.mxu0 %v4163_v34 }
 0x7b7   :  { %1608 = vmatprep.subr.bf16.mxu1 %v4166_v11  ;;  %2977 = vmatprep.subr.bf16.mxu0 %v4790_v54 }
 0x7ba   :  { %1609 = vmatpush1.bf16.msra.mxu1 %v4170_v32  ;;  %2978 = vmatpush3.bf16.msra.mxu0 %v4173_v33 }
 0x7bb   :  { %1610 = vmatprep.subr.bf16.mxu1 %v4176_v35  ;;  %2979 = vmatprep.subr.bf16.mxu0 %v4790_v54 }
 0x7be   :  { %1611 = vmatpush1.bf16.msra.mxu1 %v4225_v12  ;;  %2980 = vmatpush3.bf16.msra.mxu0 %v4228_v18 }
 0x7bf   :  { %1612 = vmatprep.subr.bf16.mxu1 %v4231_v28  ;;  %2981 = vmatprep.subr.bf16.mxu0 %v4790_v54 }
 0x7c2   :  { %1613 = vmatpush1.bf16.msra.mxu1 %v4235_v5  ;;  %2982 = vmatpush3.bf16.msra.mxu0 %v4238_v63 }
 0x7c3   :  { %1614 = vmatprep.subr.bf16.mxu1 %v4241_v23  ;;  %2983 = vmatprep.subr.bf16.mxu0 %v4790_v54 }
 0x7c6   :  { %1615 = vmatpush1.bf16.msra.mxu1 %v4245_v3  ;;  %2984 = vmatpush3.bf16.msra.mxu0 %v4248_v29 }
 0x7c7   :  { %1712 = vmatprep.subr.bf16.mxu1 %v4113_v30  ;;  %2989 = vmatprep.subr.bf16.mxu0 %v4790_v54 }
 0x87c   :  { %v1522_v8 = vpop.f32.mrb[44].mxu1  ;;  %v1563_v16 = vpop.f32.mrb[60].mxu0 }
 0x87d   :  { %v1569_v2 = vadd.f32 %v1522_v8, %v3916_v60  ;;  %v1524_v10 = vpop.f32.mrb[45].mxu1  ;;  %v2967_v46 = vpop.f32.mrb[61].mxu0  ;;  %v4348_v60 = vld [vmem:[%s4757_s5] ss:$0 sm:$0xff] }
 0x87e   :  { %v1576_v61 = vadd.f32 %v1524_v10, %v4792_v14  ;;  %v1526_v17 = vpop.f32.mrb[46].mxu1  ;;  %v1566_v31 = vpop.f32.mrb[62].mxu0  ;;  %v1583_v56 = vadd.f32 %v4348_v60, %v1563_v16  ;;  %v4795_v16 = vld [vmem:[#allocation26_spill] sm:$0xff] }
 0x87f   :  { %v2599_v41 = vmul.f32 -1.442695, %v1569_v2  ;;  %v1527_v51 = vpop.f32.mrb[47].mxu1  ;;  %v2968_v52 = vpop.f32.mrb[63].mxu0 }
 0x880   :  { %v2600_v53 = vmul.f32 -1.442695, %v1576_v61 }
 0x881   :  { %3316 = vpow2.f32 %v2599_v41 }
 0x882   :  { %3318 = vpow2.f32 %v2600_v53 }
 0x88b   :  { %v3317_v36 = vpop.eup %3316 }
 0x88c   :  { %v1573_v55 = vadd.f32 1.0, %v3317_v36  ;;  %v3319_v57 = vpop.eup %3318 }
 0x88d   :  { %v1580_v37 = vadd.f32 1.0, %v3319_v57 }
 0x88e   :  { %3320 = vrcp.f32 %v1573_v55 }
 0x88f   :  { %3322 = vrcp.f32 %v1580_v37  ;;  %v4796_v37 = vld [vmem:[#allocation17_spill] sm:$0xff] }
 0x898   :  { %v3321_v39 = vpop.eup %3320 }
 0x899   :  { %v1584_v40 = vmul.f32 %v3321_v39, %v1583_v56  ;;  %v3323_v59 = vpop.eup %3322 }
 0x89a   :  { %v1587_v43 = vsub.f32 1.0, %v3323_v59  ;;  %v1589_v44 = vmul.f32 %v3323_v59, %v4304_v50 }
 0x89b   :  { %v1585_v58 = vadd.f32 %v1584_v40, %v4793_v42 }
 0x89d   :  { %3324 = vtanh.f32 %v1585_v58 }
 0x8a7   :  { %v3325_v13 = vpop.eup %3324 }
 0x8a8   :  { %v1588_v20 = vmul.f32 %v3325_v13, %v1587_v43  ;;  %v1705_v43 = vpop.permute.xlu1 %1704 }
 0x8a9   :  { %vm1706_vm11 = vcmp.eq.s32.totalorder %v1705_v43, 1 }
 0x8aa   :  { %v1590_v47 = vadd.f32 %v1589_v44, %v1588_v20 }
 0x8ac   :  { %v4354_v48 = vsel %vm1594_vm10, %v1590_v47, %v4304_v50  ;;  %v1596_v19 = vsel %vm1594_vm10, %v1590_v47, 0.0  ;;  %v4794_v50 = vld [vmem:[#allocation25_spill] sm:$0xff] }
 0x8ad   :  { %1598 = vst [vmem:[#allocation8 + $0x38] sm:$0xff] %v1596_v19  ;;  %v1599_v4 = vpack.c.bf16 %v4354_v48, %v4354_v48  ;;  %v4797_v19 = vld [vmem:[#allocation27_spill] sm:$0xff] }
 0x8af   :  { %1633 = vmatmul.mubr.bf16.vlgmr.msra.gmra.mrb[48].mxu1 %v1599_v4  ;;  %2986 = vmatmul.mubr.bf16.vlgmr.msra.gmra.mrb[64].mxu0 %v1599_v4 }
 0x8b0   :  { %1713 = vmatpush1.bf16.msra.mxu1 %v4127_v62  ;;  %2990 = vmatpush3.bf16.msra.mxu0 %v4130_v6 }
 0x8b1   :  { %1714 = vmatprep.subr.bf16.mxu1 %v4133_v0  ;;  %2991 = vmatprep.subr.bf16.mxu0 %v4790_v54 }
 0x8b2   :  { %1744 = vmatprep.mubr.bf16.mxu1 %v4791_v25  ;;  %3005 = vmatprep.mubr.msk.bf16.mxu0 %vm3591_vm0, %v4790_v54 }
 0x8b4   :  { %1715 = vmatpush1.bf16.msra.mxu1 %v4140_v21  ;;  %2992 = vmatpush3.bf16.msra.mxu0 %v4143_v15 }
 0x8b5   :  { %1716 = vmatprep.subr.bf16.mxu1 %v4146_v1  ;;  %2993 = vmatprep.subr.bf16.mxu0 %v4790_v54 }
 0x8b8   :  { %1717 = vmatpush1.bf16.msra.mxu1 %v4150_v24  ;;  %2994 = vmatpush3.bf16.msra.mxu0 %v4153_v7 }
 0x8b9   :  { %1718 = vmatprep.subr.bf16.mxu1 %v4156_v27  ;;  %2995 = vmatprep.subr.bf16.mxu0 %v4790_v54 }
 0x8bc   :  { %1719 = vmatpush1.bf16.msra.mxu1 %v4160_v22  ;;  %2996 = vmatpush3.bf16.msra.mxu0 %v4163_v34 }
 0x8bd   :  { %1720 = vmatprep.subr.bf16.mxu1 %v4166_v11  ;;  %2997 = vmatprep.subr.bf16.mxu0 %v4790_v54 }
 0x8c0   :  { %1721 = vmatpush1.bf16.msra.mxu1 %v4170_v32  ;;  %2998 = vmatpush3.bf16.msra.mxu0 %v4173_v33 }
 0x8c1   :  { %1722 = vmatprep.subr.bf16.mxu1 %v4176_v35  ;;  %2999 = vmatprep.subr.bf16.mxu0 %v4790_v54 }
 0x8c4   :  { %1723 = vmatpush1.bf16.msra.mxu1 %v4225_v12  ;;  %3000 = vmatpush3.bf16.msra.mxu0 %v4228_v18 }
 0x8c5   :  { %1724 = vmatprep.subr.bf16.mxu1 %v4231_v28  ;;  %3001 = vmatprep.subr.bf16.mxu0 %v4790_v54 }
 0x8c8   :  { %1725 = vmatpush1.bf16.msra.mxu1 %v4235_v5  ;;  %3002 = vmatpush3.bf16.msra.mxu0 %v4238_v63 }
 0x8c9   :  { %1726 = vmatprep.subr.bf16.mxu1 %v4241_v23  ;;  %3003 = vmatprep.subr.bf16.mxu0 %v4790_v54 }
 0x8cc   :  { %1727 = vmatpush1.bf16.msra.mxu1 %v4245_v3  ;;  %3004 = vmatpush3.bf16.msra.mxu0 %v4248_v29 }
 0x8cd   :  { %1824 = vmatprep.subr.bf16.mxu1 %v4113_v30  ;;  %3009 = vmatprep.subr.bf16.mxu0 %v4790_v54 }
 0x982   :  { %v1634_v49 = vpop.f32.mrb[48].mxu1  ;;  %v1675_v26 = vpop.f32.mrb[64].mxu0 }
 0x983   :  { %v1681_v38 = vadd.f32 %v1634_v49, %v4794_v50  ;;  %v1636_v9 = vpop.f32.mrb[49].mxu1  ;;  %v2987_v8 = vpop.f32.mrb[65].mxu0  ;;  %v1695_v36 = vadd.f32 %v4348_v60, %v1675_v26  ;;  %v4798_v50 = vld [vmem:[#allocation28_spill] sm:$0xff] }
 0x984   :  { %v1688_v2 = vadd.f32 %v1636_v9, %v4795_v16  ;;  %v1638_v10 = vpop.f32.mrb[50].mxu1  ;;  %v1678_v46 = vpop.f32.mrb[66].mxu0 }
 0x985   :  { %v2601_v14 = vmul.f32 -1.442695, %v1681_v38  ;;  %v1639_v61 = vpop.f32.mrb[51].mxu1  ;;  %v2988_v17 = vpop.f32.mrb[67].mxu0 }
 0x986   :  { %v2602_v31 = vmul.f32 -1.442695, %v1688_v2 }
 0x987   :  { %3326 = vpow2.f32 %v2601_v14 }
 0x988   :  { %3328 = vpow2.f32 %v2602_v31 }
 0x991   :  { %v3327_v41 = vpop.eup %3326 }
 0x992   :  { %v1685_v51 = vadd.f32 1.0, %v3327_v41  ;;  %v3329_v52 = vpop.eup %3328 }
 0x993   :  { %v1692_v53 = vadd.f32 1.0, %v3329_v52 }
 0x994   :  { %3330 = vrcp.f32 %v1685_v51 }
 0x995   :  { %3332 = vrcp.f32 %v1692_v53  ;;  %v4799_v53 = vld [vmem:[#allocation19_spill] sm:$0xff] }
 0x99e   :  { %v3331_v55 = vpop.eup %3330 }
 0x99f   :  { %v1696_v57 = vmul.f32 %v3331_v55, %v1695_v36  ;;  %v3333_v39 = vpop.eup %3332 }
 0x9a0   :  { %v1699_v40 = vsub.f32 1.0, %v3333_v39  ;;  %v1701_v58 = vmul.f32 %v3333_v39, %v4354_v48 }
 0x9a1   :  { %v1697_v56 = vadd.f32 %v1696_v57, %v4796_v37 }
 0x9a3   :  { %3334 = vtanh.f32 %v1697_v56 }
 0x9ad   :  { %v3335_v42 = vpop.eup %3334 }
 0x9ae   :  { %v1700_v59 = vmul.f32 %v3335_v42, %v1699_v40  ;;  %v1817_v40 = vpop.permute.xlu0 %1816 }
 0x9af   :  { %vm1818_vm12 = vcmp.eq.s32.totalorder %v1817_v40, 1 }
 0x9b0   :  { %v1702_v13 = vadd.f32 %v1701_v58, %v1700_v59 }
 0x9b2   :  { %v4399_v44 = vsel %vm1706_vm11, %v1702_v13, %v4354_v48  ;;  %v1708_v20 = vsel %vm1706_vm11, %v1702_v13, 0.0 }
 0x9b3   :  { %1710 = vst [vmem:[#allocation8 + $0x40] sm:$0xff] %v1708_v20  ;;  %v1711_v45 = vpack.c.bf16 %v4399_v44, %v4399_v44  ;;  %v4800_v20 = vld [vmem:[#allocation29_spill] sm:$0xff] }
 0x9b5   :  { %1745 = vmatmul.mubr.bf16.vlgmr.msra.gmra.mrb[52].mxu1 %v1711_v45  ;;  %3006 = vmatmul.mubr.bf16.vlgmr.msra.gmra.mrb[68].mxu0 %v1711_v45 }
 0x9b6   :  { %1825 = vmatpush1.bf16.msra.mxu1 %v4127_v62  ;;  %3010 = vmatpush3.bf16.msra.mxu0 %v4130_v6 }
 0x9b7   :  { %1826 = vmatprep.subr.bf16.mxu1 %v4133_v0  ;;  %3011 = vmatprep.subr.bf16.mxu0 %v4790_v54 }
 0x9b8   :  { %1856 = vmatprep.mubr.bf16.mxu1 %v4791_v25  ;;  %3025 = vmatprep.mubr.msk.bf16.mxu0 %vm3591_vm0, %v4790_v54 }
 0x9ba   :  { %1827 = vmatpush1.bf16.msra.mxu1 %v4140_v21  ;;  %3012 = vmatpush3.bf16.msra.mxu0 %v4143_v15 }
 0x9bb   :  { %1828 = vmatprep.subr.bf16.mxu1 %v4146_v1  ;;  %3013 = vmatprep.subr.bf16.mxu0 %v4790_v54 }
 0x9be   :  { %1829 = vmatpush1.bf16.msra.mxu1 %v4150_v24  ;;  %3014 = vmatpush3.bf16.msra.mxu0 %v4153_v7 }
 0x9bf   :  { %1830 = vmatprep.subr.bf16.mxu1 %v4156_v27  ;;  %3015 = vmatprep.subr.bf16.mxu0 %v4790_v54 }
 0x9c2   :  { %1831 = vmatpush1.bf16.msra.mxu1 %v4160_v22  ;;  %3016 = vmatpush3.bf16.msra.mxu0 %v4163_v34 }
 0x9c3   :  { %1832 = vmatprep.subr.bf16.mxu1 %v4166_v11  ;;  %3017 = vmatprep.subr.bf16.mxu0 %v4790_v54 }
 0x9c6   :  { %1833 = vmatpush1.bf16.msra.mxu1 %v4170_v32  ;;  %3018 = vmatpush3.bf16.msra.mxu0 %v4173_v33 }
 0x9c7   :  { %1834 = vmatprep.subr.bf16.mxu1 %v4176_v35  ;;  %3019 = vmatprep.subr.bf16.mxu0 %v4790_v54 }
 0x9ca   :  { %1835 = vmatpush1.bf16.msra.mxu1 %v4225_v12  ;;  %3020 = vmatpush3.bf16.msra.mxu0 %v4228_v18 }
 0x9cb   :  { %1836 = vmatprep.subr.bf16.mxu1 %v4231_v28  ;;  %3021 = vmatprep.subr.bf16.mxu0 %v4790_v54 }
 0x9ce   :  { %1837 = vmatpush1.bf16.msra.mxu1 %v4235_v5  ;;  %3022 = vmatpush3.bf16.msra.mxu0 %v4238_v63 }
 0x9cf   :  { %1838 = vmatprep.subr.bf16.mxu1 %v4241_v23  ;;  %3023 = vmatprep.subr.bf16.mxu0 %v4790_v54 }
 0x9d2   :  { %1839 = vmatpush1.bf16.msra.mxu1 %v4245_v3  ;;  %3024 = vmatpush3.bf16.msra.mxu0 %v4248_v29 }
 0x9d3   :  { %1936 = vmatprep.subr.bf16.mxu1 %v4113_v30  ;;  %3029 = vmatprep.subr.bf16.mxu0 %v4790_v54 }
 0xa88   :  { %v1746_v47 = vpop.f32.mrb[52].mxu1  ;;  %v1787_v48 = vpop.f32.mrb[68].mxu0 }
 0xa89   :  { %v1793_v4 = vadd.f32 %v1746_v47, %v4797_v19  ;;  %v1748_v49 = vpop.f32.mrb[53].mxu1  ;;  %v3007_v26 = vpop.f32.mrb[69].mxu0  ;;  %v1807_v41 = vadd.f32 %v4348_v60, %v1787_v48  ;;  %v4801_v19 = vld [vmem:[#allocation30_spill] sm:$0xff] }
 0xa8a   :  { %v1800_v38 = vadd.f32 %v1748_v49, %v4798_v50  ;;  %v1750_v9 = vpop.f32.mrb[54].mxu1  ;;  %v1790_v8 = vpop.f32.mrb[70].mxu0 }
 0xa8b   :  { %v2603_v16 = vmul.f32 -1.442695, %v1793_v4  ;;  %v1751_v2 = vpop.f32.mrb[55].mxu1  ;;  %v3008_v10 = vpop.f32.mrb[71].mxu0 }
 0xa8c   :  { %v2604_v46 = vmul.f32 -1.442695, %v1800_v38 }
 0xa8d   :  { %3336 = vpow2.f32 %v2603_v16 }
 0xa8e   :  { %3338 = vpow2.f32 %v2604_v46 }
 0xa97   :  { %v3337_v14 = vpop.eup %3336 }
 0xa98   :  { %v1797_v61 = vadd.f32 1.0, %v3337_v14  ;;  %v3339_v17 = vpop.eup %3338 }
 0xa99   :  { %v1804_v31 = vadd.f32 1.0, %v3339_v17  ;;  %v4802_v17 = vld [vmem:[#allocation16_spill] sm:$0xff] }
 0xa9a   :  { %3340 = vrcp.f32 %v1797_v61 }
 0xa9b   :  { %3342 = vrcp.f32 %v1804_v31 }
 0xaa4   :  { %v3341_v51 = vpop.eup %3340 }
 0xaa5   :  { %v1808_v52 = vmul.f32 %v3341_v51, %v1807_v41  ;;  %v3343_v55 = vpop.eup %3342 }
 0xaa6   :  { %v1811_v57 = vsub.f32 1.0, %v3343_v55  ;;  %v1813_v56 = vmul.f32 %v3343_v55, %v4399_v44  ;;  %v1929_v55 = vpop.permute.xlu1 %1928 }
 0xaa7   :  { %v1809_v36 = vadd.f32 %v1808_v52, %v4799_v53  ;;  %vm1930_vm13 = vcmp.eq.s32.totalorder %v1929_v55, 1  ;;  %v4589_v55 = vld [vmem:[#allocation7 + $0x7c] ss:$12 sps:$4 sm:$0xff]  }
 0xaa9   :  { %3344 = vtanh.f32 %v1809_v36 }
 0xab3   :  { %v3345_v37 = vpop.eup %3344 }
 0xab4   :  { %v1812_v39 = vmul.f32 %v3345_v37, %v1811_v57 }
 0xab6   :  { %v1814_v42 = vadd.f32 %v1813_v56, %v1812_v39 }
 0xab8   :  { %v4444_v58 = vsel %vm1818_vm12, %v1814_v42, %v4399_v44  ;;  %v1820_v59 = vsel %vm1818_vm12, %v1814_v42, 0.0 }
 0xab9   :  { %1822 = vst [vmem:[#allocation8 + $0x48] sm:$0xff] %v1820_v59  ;;  %v1823_v43 = vpack.c.bf16 %v4444_v58, %v4444_v58 }
 0xabb   :  { %1857 = vmatmul.mubr.bf16.vlgmr.msra.gmra.mrb[56].mxu1 %v1823_v43  ;;  %3026 = vmatmul.mubr.bf16.vlgmr.msra.gmra.mrb[72].mxu0 %v1823_v43 }
 0xabc   :  { %1937 = vmatpush1.bf16.msra.mxu1 %v4127_v62  ;;  %3030 = vmatpush3.bf16.msra.mxu0 %v4130_v6 }
 0xabd   :  { %1938 = vmatprep.subr.bf16.mxu1 %v4133_v0  ;;  %3031 = vmatprep.subr.bf16.mxu0 %v4790_v54 }
 0xabe   :  { %1968 = vmatprep.mubr.bf16.mxu1 %v4791_v25  ;;  %3045 = vmatprep.mubr.msk.bf16.mxu0 %vm3591_vm0, %v4790_v54 }
 0xac0   :  { %1939 = vmatpush1.bf16.msra.mxu1 %v4140_v21  ;;  %3032 = vmatpush3.bf16.msra.mxu0 %v4143_v15 }
 0xac1   :  { %1940 = vmatprep.subr.bf16.mxu1 %v4146_v1  ;;  %3033 = vmatprep.subr.bf16.mxu0 %v4790_v54 }
 0xac4   :  { %1941 = vmatpush1.bf16.msra.mxu1 %v4150_v24  ;;  %3034 = vmatpush3.bf16.msra.mxu0 %v4153_v7 }
 0xac5   :  { %1942 = vmatprep.subr.bf16.mxu1 %v4156_v27  ;;  %3035 = vmatprep.subr.bf16.mxu0 %v4790_v54 }
 0xac8   :  { %1943 = vmatpush1.bf16.msra.mxu1 %v4160_v22  ;;  %3036 = vmatpush3.bf16.msra.mxu0 %v4163_v34 }
 0xac9   :  { %1944 = vmatprep.subr.bf16.mxu1 %v4166_v11  ;;  %3037 = vmatprep.subr.bf16.mxu0 %v4790_v54 }
 0xacc   :  { %1945 = vmatpush1.bf16.msra.mxu1 %v4170_v32  ;;  %3038 = vmatpush3.bf16.msra.mxu0 %v4173_v33 }
 0xacd   :  { %1946 = vmatprep.subr.bf16.mxu1 %v4176_v35  ;;  %3039 = vmatprep.subr.bf16.mxu0 %v4790_v54 }
 0xad0   :  { %1947 = vmatpush1.bf16.msra.mxu1 %v4225_v12  ;;  %3040 = vmatpush3.bf16.msra.mxu0 %v4228_v18 }
 0xad1   :  { %1948 = vmatprep.subr.bf16.mxu1 %v4231_v28  ;;  %3041 = vmatprep.subr.bf16.mxu0 %v4790_v54 }
 0xad4   :  { %1949 = vmatpush1.bf16.msra.mxu1 %v4235_v5  ;;  %3042 = vmatpush3.bf16.msra.mxu0 %v4238_v63 }
 0xad5   :  { %1950 = vmatprep.subr.bf16.mxu1 %v4241_v23  ;;  %3043 = vmatprep.subr.bf16.mxu0 %v4790_v54 }
 0xad8   :  { %1951 = vmatpush1.bf16.msra.mxu1 %v4245_v3  ;;  %3044 = vmatpush3.bf16.msra.mxu0 %v4248_v29 }
 0xad9   :  { %2048 = vmatprep.subr.bf16.mxu1 %v4113_v30  ;;  %3049 = vmatprep.subr.bf16.mxu0 %v4790_v54 }
 0xb8e   :  { %v1858_v13 = vpop.f32.mrb[56].mxu1  ;;  %v1899_v44 = vpop.f32.mrb[72].mxu0 }
 0xb8f   :  { %v1905_v45 = vadd.f32 %v1858_v13, %v4800_v20  ;;  %v1860_v47 = vpop.f32.mrb[57].mxu1  ;;  %v3027_v48 = vpop.f32.mrb[73].mxu0  ;;  %v1919_v46 = vadd.f32 %v4348_v60, %v1899_v44  ;;  %v4805_v20 = vld [vmem:[#allocation18_spill] sm:$0xff] }
 0xb90   :  { %v1912_v4 = vadd.f32 %v1860_v47, %v4801_v19  ;;  %v1862_v49 = vpop.f32.mrb[58].mxu1  ;;  %v1902_v26 = vpop.f32.mrb[74].mxu0 }
 0xb91   :  { %v2605_v50 = vmul.f32 -1.442695, %v1905_v45  ;;  %v1863_v38 = vpop.f32.mrb[59].mxu1  ;;  %v3028_v9 = vpop.f32.mrb[75].mxu0 }
 0xb92   :  { %v2606_v8 = vmul.f32 -1.442695, %v1912_v4  ;;  %v2041_v26 = vpop.permute.xlu1 %2040 }
 0xb93   :  { %3346 = vpow2.f32 %v2605_v50  ;;  %vm2042_vm14 = vcmp.eq.s32.totalorder %v2041_v26, 1  ;;  %v4661_v26 = vld [vmem:[#allocation7 + $0xb0] ss:$12 sps:$4 sm:$0xff]  }
 0xb94   :  { %3348 = vpow2.f32 %v2606_v8 }
 0xb9d   :  { %v3347_v16 = vpop.eup %3346 }
 0xb9e   :  { %v1909_v30 = vadd.f32 1.0, %v3347_v16  ;;  %v3349_v2 = vpop.eup %3348  ;;  %v4540_v16 = vld [vmem:[#allocation7] ss:$12 sps:$4 sm:$0xff]  }
 0xb9f   :  { %v1916_v10 = vadd.f32 1.0, %v3349_v2  ;;  %v4546_v2 = vld [vmem:[#allocation7 + $0x1c] ss:$12 sps:$4 sm:$0xff]  }
 0xba0   :  { %3350 = vrcp.f32 %v1909_v30  ;;  %v4543_v30 = vld [vmem:[#allocation7 + $0x8] ss:$12 sps:$4 sm:$0xff]  }
 0xba1   :  { %3352 = vrcp.f32 %v1916_v10  ;;  %v4553_v10 = vld [vmem:[#allocation7 + $0x18] ss:$12 sps:$4 sm:$0xff]  }
 0xbaa   :  { %v3351_v14 = vpop.eup %3350 }
 0xbab   :  { %v1920_v61 = vmul.f32 %v3351_v14, %v1919_v46  ;;  %v3353_v41 = vpop.eup %3352  ;;  %v4556_v46 = vld [vmem:[#allocation7 + $0x20] ss:$12 sps:$4 sm:$0xff]  }
 0xbac   :  { %v1923_v51 = vsub.f32 1.0, %v3353_v41  ;;  %v1925_v53 = vmul.f32 %v3353_v41, %v4444_v58  ;;  %v4559_v14 = vld [vmem:[#allocation7 + $0x34] ss:$12 sps:$4 sm:$0xff]  }
 0xbad   :  { %v1921_v31 = vadd.f32 %v1920_v61, %v4802_v17  ;;  %v4563_v61 = vld [vmem:[#allocation7 + $0x30] ss:$12 sps:$4 sm:$0xff]   ;;  %v4566_v17 = vld [vmem:[#allocation7 + $0x38] ss:$12 sps:$4 sm:$0xff]   ;;  %v4573_v41 = vld [vmem:[#allocation7 + $0x48] ss:$12 sps:$4 sm:$0xff]  }
 0xbaf   :  { %3354 = vtanh.f32 %v1921_v31  ;;  %v4569_v31 = vld [vmem:[#allocation7 + $0x4c] ss:$12 sps:$4 sm:$0xff]  }
 0xbb9   :  { %v3355_v52 = vpop.eup %3354 }
 0xbba   :  { %v1924_v36 = vmul.f32 %v3355_v52, %v1923_v51  ;;  %v4576_v51 = vld [vmem:[#allocation7 + $0x50] ss:$12 sps:$4 sm:$0xff]  }
 0xbbb   :  { %v4579_v52 = vld [vmem:[#allocation7 + $0x64] ss:$12 sps:$4 sm:$0xff]  }
 0xbbc   :  { %v1926_v57 = vadd.f32 %v1925_v53, %v1924_v36  ;;  %v4583_v53 = vld [vmem:[#allocation7 + $0x60] ss:$12 sps:$4 sm:$0xff]   ;;  %v4586_v36 = vld [vmem:[#allocation7 + $0x68] ss:$12 sps:$4 sm:$0xff]  }
 0xbbe   :  { %v4489_v37 = vsel %vm1930_vm13, %v1926_v57, %v4444_v58  ;;  %v1932_v56 = vsel %vm1930_vm13, %v1926_v57, 0.0 }
 0xbbf   :  { %1934 = vst [vmem:[#allocation8 + $0x50] sm:$0xff] %v1932_v56  ;;  %v1935_v39 = vpack.c.bf16 %v4489_v37, %v4489_v37  ;;  %v4807_v56 = vld [vmem:[#allocation34_spill] sm:$0xff] }
 0xbc1   :  { %1969 = vmatmul.mubr.bf16.vlgmr.msra.gmra.mrb[60].mxu1 %v1935_v39  ;;  %3046 = vmatmul.mubr.bf16.vlgmr.msra.gmra.mrb[76].mxu0 %v1935_v39 }
 0xbc2   :  { %2049 = vmatpush1.bf16.msra.mxu1 %v4127_v62  ;;  %3050 = vmatpush3.bf16.msra.mxu0 %v4130_v6  ;;  %v4526_v62 = vld [vmem:[#allocation7 + $0x4] ss:$12 sps:$4 sm:$0xff]  }
 0xbc3   :  { %2050 = vmatprep.subr.bf16.mxu1 %v4133_v0  ;;  %3051 = vmatprep.subr.bf16.mxu0 %v4790_v54 }
 0xbc4   :  { %2080 = vmatprep.mubr.bf16.mxu1 %v4791_v25  ;;  %3065 = vmatprep.mubr.msk.bf16.mxu0 %vm3591_vm0, %v4790_v54 }
 0xbc6   :  { %2051 = vmatpush1.bf16.msra.mxu1 %v4140_v21  ;;  %3052 = vmatpush3.bf16.msra.mxu0 %v4143_v15  ;;  %v4803_v21 = vld [vmem:[#allocation31_spill] sm:$0xff] }
 0xbc7   :  { %2052 = vmatprep.subr.bf16.mxu1 %v4146_v1  ;;  %3053 = vmatprep.subr.bf16.mxu0 %v4790_v54 }
 0xbca   :  { %2053 = vmatpush1.bf16.msra.mxu1 %v4150_v24  ;;  %3054 = vmatpush3.bf16.msra.mxu0 %v4153_v7  ;;  %v4804_v7 = vld [vmem:[#allocation32_spill] sm:$0xff] }
 0xbcb   :  { %2054 = vmatprep.subr.bf16.mxu1 %v4156_v27  ;;  %3055 = vmatprep.subr.bf16.mxu0 %v4790_v54 }
 0xbce   :  { %2055 = vmatpush1.bf16.msra.mxu1 %v4160_v22  ;;  %3056 = vmatpush3.bf16.msra.mxu0 %v4163_v34 }
 0xbcf   :  { %2056 = vmatprep.subr.bf16.mxu1 %v4166_v11  ;;  %3057 = vmatprep.subr.bf16.mxu0 %v4790_v54 }
 0xbd2   :  { %2057 = vmatpush1.bf16.msra.mxu1 %v4170_v32  ;;  %3058 = vmatpush3.bf16.msra.mxu0 %v4173_v33 }
 0xbd3   :  { %2058 = vmatprep.subr.bf16.mxu1 %v4176_v35  ;;  %3059 = vmatprep.subr.bf16.mxu0 %v4790_v54 }
 0xbd6   :  { %2059 = vmatpush1.bf16.msra.mxu1 %v4225_v12  ;;  %3060 = vmatpush3.bf16.msra.mxu0 %v4228_v18 }
 0xbd7   :  { %2060 = vmatprep.subr.bf16.mxu1 %v4231_v28  ;;  %3061 = vmatprep.subr.bf16.mxu0 %v4790_v54 }
 0xbda   :  { %2061 = vmatpush1.bf16.msra.mxu1 %v4235_v5  ;;  %3062 = vmatpush3.bf16.msra.mxu0 %v4238_v63 }
 0xbdb   :  { %2062 = vmatprep.subr.bf16.mxu1 %v4241_v23  ;;  %3063 = vmatprep.subr.bf16.mxu0 %v4790_v54 }
 0xbde   :  { %2063 = vmatpush1.bf16.msra.mxu1 %v4245_v3  ;;  %3064 = vmatpush3.bf16.msra.mxu0 %v4248_v29 }
 0xbdf   :  { %2160 = vmatprep.subr.bf16.mxu1 %v4526_v62  ;;  %3069 = vmatprep.subr.bf16.mxu0 %v4790_v54 }
 0xc94   :  { %v1970_v6 = vpop.f32.mrb[60].mxu1  ;;  %v2011_v0 = vpop.f32.mrb[76].mxu0 }
 0xc95   :  { %v2017_v15 = vadd.f32 %v1970_v6, %v4803_v21  ;;  %v1972_v1 = vpop.f32.mrb[61].mxu1  ;;  %v3047_v24 = vpop.f32.mrb[77].mxu0  ;;  %v2031_v43 = vadd.f32 %v4348_v60, %v2011_v0 }
 0xc96   :  { %v2024_v27 = vadd.f32 %v1972_v1, %v4804_v7  ;;  %v1974_v22 = vpop.f32.mrb[62].mxu1  ;;  %v2014_v34 = vpop.f32.mrb[78].mxu0 }
 0xc97   :  { %v2607_v11 = vmul.f32 -1.442695, %v2017_v15  ;;  %v1975_v32 = vpop.f32.mrb[63].mxu1  ;;  %v3048_v33 = vpop.f32.mrb[79].mxu0  ;;  %v4808_v34 = vld [vmem:[#allocation21_spill] sm:$0xff] }
 0xc98   :  { %v2608_v35 = vmul.f32 -1.442695, %v2024_v27 }
 0xc99   :  { %3356 = vpow2.f32 %v2607_v11 }
 0xc9a   :  { %3358 = vpow2.f32 %v2608_v35 }
 0xca3   :  { %v3357_v40 = vpop.eup %3356 }
 0xca4   :  { %v2021_v42 = vadd.f32 1.0, %v3357_v40  ;;  %v3359_v58 = vpop.eup %3358 }
 0xca5   :  { %v2028_v59 = vadd.f32 1.0, %v3359_v58  ;;  %v2153_v58 = vpop.permute.xlu0 %2152 }
 0xca6   :  { %3360 = vrcp.f32 %v2021_v42  ;;  %vm2154_vm15 = vcmp.eq.s32.totalorder %v2153_v58, 1 }
 0xca7   :  { %3362 = vrcp.f32 %v2028_v59 }
 0xcb0   :  { %v3361_v13 = vpop.eup %3360 }
 0xcb1   :  { %v2032_v44 = vmul.f32 %v3361_v13, %v2031_v43  ;;  %v3363_v47 = vpop.eup %3362 }
 0xcb2   :  { %v2035_v48 = vsub.f32 1.0, %v3363_v47  ;;  %v2037_v4 = vmul.f32 %v3363_v47, %v4489_v37  ;;  %v4644_v47 = vld [vmem:[#allocation7 + $0x94] ss:$12 sps:$4 sm:$0xff]  }
 0xcb3   :  { %v2033_v45 = vadd.f32 %v2032_v44, %v4805_v20  ;;  %v4638_v20 = vld [vmem:[#allocation7 + $0x78] ss:$12 sps:$4 sm:$0xff]  }
 0xcb5   :  { %3364 = vtanh.f32 %v2033_v45  ;;  %v4641_v45 = vld [vmem:[#allocation7 + $0x80] ss:$12 sps:$4 sm:$0xff]  }
 0xcbf   :  { %v3365_v19 = vpop.eup %3364 }
 0xcc0   :  { %v2036_v49 = vmul.f32 %v3365_v19, %v2035_v48  ;;  %v4648_v48 = vld [vmem:[#allocation7 + $0x90] ss:$12 sps:$4 sm:$0xff]   ;;  %v4651_v19 = vld [vmem:[#allocation7 + $0x98] ss:$12 sps:$4 sm:$0xff]  }
 0xcc2   :  { %v2038_v50 = vadd.f32 %v2037_v4, %v2036_v49  ;;  %v4654_v4 = vld [vmem:[#allocation7 + $0xac] ss:$12 sps:$4 sm:$0xff]   ;;  %v4658_v49 = vld [vmem:[#allocation7 + $0xa8] ss:$12 sps:$4 sm:$0xff]  }
 0xcc4   :  { %v4536_v38 = vsel %vm2042_vm14, %v2038_v50, %v4489_v37  ;;  %v2044_v9 = vsel %vm2042_vm14, %v2038_v50, 0.0 }
 0xcc5   :  { %2046 = vst [vmem:[#allocation8 + $0x58] sm:$0xff] %v2044_v9  ;;  %v2047_v8 = vpack.c.bf16 %v4536_v38, %v4536_v38  ;;  %v4809_v9 = vld [vmem:[#allocation35_spill] sm:$0xff] }
 0xcc7   :  { %2081 = vmatmul.mubr.bf16.vlgmr.msra.gmra.mrb[64].mxu1 %v2047_v8  ;;  %3066 = vmatmul.mubr.bf16.vlgmr.msra.gmra.mrb[80].mxu0 %v2047_v8 }
 0xcc8   :  { %2161 = vmatpush1.bf16.msra.mxu1 %v4540_v16  ;;  %3070 = vmatpush3.bf16.msra.mxu0 %v4543_v30 }
 0xcc9   :  { %2162 = vmatprep.subr.bf16.mxu1 %v4546_v2  ;;  %3071 = vmatprep.subr.bf16.mxu0 %v4790_v54 }
 0xcca   :  { %2192 = vmatprep.mubr.bf16.mxu1 %v4791_v25  ;;  %3085 = vmatprep.mubr.msk.bf16.mxu0 %vm3591_vm0, %v4790_v54 }
 0xccc   :  { %2163 = vmatpush1.bf16.msra.mxu1 %v4553_v10  ;;  %3072 = vmatpush3.bf16.msra.mxu0 %v4556_v46 }
 0xccd   :  { %2164 = vmatprep.subr.bf16.mxu1 %v4559_v14  ;;  %3073 = vmatprep.subr.bf16.mxu0 %v4790_v54 }
 0xcd0   :  { %2165 = vmatpush1.bf16.msra.mxu1 %v4563_v61  ;;  %3074 = vmatpush3.bf16.msra.mxu0 %v4566_v17 }
 0xcd1   :  { %2166 = vmatprep.subr.bf16.mxu1 %v4569_v31  ;;  %3075 = vmatprep.subr.bf16.mxu0 %v4790_v54 }
 0xcd4   :  { %2167 = vmatpush1.bf16.msra.mxu1 %v4573_v41  ;;  %3076 = vmatpush3.bf16.msra.mxu0 %v4576_v51 }
 0xcd5   :  { %2168 = vmatprep.subr.bf16.mxu1 %v4579_v52  ;;  %3077 = vmatprep.subr.bf16.mxu0 %v4790_v54 }
 0xcd8   :  { %2169 = vmatpush1.bf16.msra.mxu1 %v4583_v53  ;;  %3078 = vmatpush3.bf16.msra.mxu0 %v4586_v36 }
 0xcd9   :  { %2170 = vmatprep.subr.bf16.mxu1 %v4589_v55  ;;  %3079 = vmatprep.subr.bf16.mxu0 %v4790_v54 }
 0xcdc   :  { %2171 = vmatpush1.bf16.msra.mxu1 %v4225_v12  ;;  %3080 = vmatpush3.bf16.msra.mxu0 %v4228_v18 }
 0xcdd   :  { %2172 = vmatprep.subr.bf16.mxu1 %v4231_v28  ;;  %3081 = vmatprep.subr.bf16.mxu0 %v4790_v54  ;;  %v4806_v28 = vld [vmem:[#allocation33_spill] sm:$0xff] }
 0xce0   :  { %2173 = vmatpush1.bf16.msra.mxu1 %v4235_v5  ;;  %3082 = vmatpush3.bf16.msra.mxu0 %v4238_v63 }
 0xce1   :  { %2174 = vmatprep.subr.bf16.mxu1 %v4241_v23  ;;  %3083 = vmatprep.subr.bf16.mxu0 %v4790_v54 }
 0xce4   :  { %2175 = vmatpush1.bf16.msra.mxu1 %v4245_v3  ;;  %3084 = vmatpush3.bf16.msra.mxu0 %v4248_v29 }
 0xce5   :  { %2272 = vmatprep.subr.bf16.mxu1 %v4526_v62  ;;  %3089 = vmatprep.subr.bf16.mxu0 %v4790_v54 }
 0xd9a   :  { %v2082_v12 = vpop.f32.mrb[64].mxu1  ;;  %v2123_v18 = vpop.f32.mrb[80].mxu0 }
 0xd9b   :  { %v2129_v57 = vadd.f32 %v2082_v12, %v4806_v28  ;;  %v2084_v37 = vpop.f32.mrb[65].mxu1  ;;  %v3067_v5 = vpop.f32.mrb[81].mxu0  ;;  %v2143_v7 = vadd.f32 %v4348_v60, %v2123_v18  ;;  %v4810_v28 = vld [vmem:[#allocation36_spill] sm:$0xff] }
 0xd9c   :  { %v2136_v63 = vadd.f32 %v2084_v37, %v4807_v56  ;;  %v2086_v39 = vpop.f32.mrb[66].mxu1  ;;  %v2126_v23 = vpop.f32.mrb[82].mxu0 }
 0xd9d   :  { %v2609_v6 = vmul.f32 -1.442695, %v2129_v57  ;;  %v2087_v0 = vpop.f32.mrb[67].mxu1  ;;  %v3068_v21 = vpop.f32.mrb[83].mxu0 }
 0xd9e   :  { %v2610_v3 = vmul.f32 -1.442695, %v2136_v63 }
 0xd9f   :  { %3366 = vpow2.f32 %v2609_v6 }
 0xda0   :  { %3368 = vpow2.f32 %v2610_v3 }
 0xda9   :  { %v3367_v29 = vpop.eup %3366 }
 0xdaa   :  { %v2133_v15 = vadd.f32 1.0, %v3367_v29  ;;  %v3369_v1 = vpop.eup %3368 }
 0xdab   :  { %v2140_v24 = vadd.f32 1.0, %v3369_v1  ;;  %v4811_v1 = vld [vmem:[#allocation24_spill] sm:$0xff] }
 0xdac   :  { %3370 = vrcp.f32 %v2133_v15 }
 0xdad   :  { %3372 = vrcp.f32 %v2140_v24 }
 0xdb6   :  { %v3371_v27 = vpop.eup %3370 }
 0xdb7   :  { %v2144_v22 = vmul.f32 %v3371_v27, %v2143_v7  ;;  %v3373_v32 = vpop.eup %3372 }
 0xdb8   :  { %v2147_v33 = vsub.f32 1.0, %v3373_v32  ;;  %v2149_v40 = vmul.f32 %v3373_v32, %v4536_v38  ;;  %v2265_v32 = vpop.permute.xlu1 %2264 }
 0xdb9   :  { %v2145_v11 = vadd.f32 %v2144_v22, %v4808_v34  ;;  %vm2266_vm1 = vcmp.eq.s32.totalorder %v2265_v32, 1 }
 0xdbb   :  { %3374 = vtanh.f32 %v2145_v11 }
 0xdc5   :  { %v3375_v35 = vpop.eup %3374 }
 0xdc6   :  { %v2148_v42 = vmul.f32 %v3375_v35, %v2147_v33 }
 0xdc8   :  { %v2150_v59 = vadd.f32 %v2149_v40, %v2148_v42 }
 0xdca   :  { %v4611_v43 = vsel %vm2154_vm15, %v2150_v59, %v4536_v38  ;;  %v2156_v13 = vsel %vm2154_vm15, %v2150_v59, 0.0 }
 0xdcb   :  { %2158 = vst [vmem:[#allocation8 + $0x60] sm:$0xff] %v2156_v13  ;;  %v2159_v44 = vpack.c.bf16 %v4611_v43, %v4611_v43 }
 0xdcd   :  { %2193 = vmatmul.mubr.bf16.vlgmr.msra.gmra.mrb[68].mxu1 %v2159_v44  ;;  %3086 = vmatmul.mubr.bf16.vlgmr.msra.gmra.mrb[84].mxu0 %v2159_v44  ;;  %v4814_v44 = vld [vmem:[#allocation20_spill] sm:$0xff] }
 0xdce   :  { %2273 = vmatpush1.bf16.msra.mxu1 %v4540_v16  ;;  %3090 = vmatpush3.bf16.msra.mxu0 %v4543_v30 }
 0xdcf   :  { %2274 = vmatprep.subr.bf16.mxu1 %v4546_v2  ;;  %3091 = vmatprep.subr.bf16.mxu0 %v4790_v54 }
 0xdd0   :  { %2304 = vmatprep.mubr.bf16.mxu1 %v4791_v25  ;;  %3105 = vmatprep.mubr.msk.bf16.mxu0 %vm3591_vm0, %v4790_v54 }
 0xdd2   :  { %2275 = vmatpush1.bf16.msra.mxu1 %v4553_v10  ;;  %3092 = vmatpush3.bf16.msra.mxu0 %v4556_v46 }
 0xdd3   :  { %2276 = vmatprep.subr.bf16.mxu1 %v4559_v14  ;;  %3093 = vmatprep.subr.bf16.mxu0 %v4790_v54 }
 0xdd6   :  { %2277 = vmatpush1.bf16.msra.mxu1 %v4563_v61  ;;  %3094 = vmatpush3.bf16.msra.mxu0 %v4566_v17 }
 0xdd7   :  { %2278 = vmatprep.subr.bf16.mxu1 %v4569_v31  ;;  %3095 = vmatprep.subr.bf16.mxu0 %v4790_v54 }
 0xdda   :  { %2279 = vmatpush1.bf16.msra.mxu1 %v4573_v41  ;;  %3096 = vmatpush3.bf16.msra.mxu0 %v4576_v51 }
 0xddb   :  { %2280 = vmatprep.subr.bf16.mxu1 %v4579_v52  ;;  %3097 = vmatprep.subr.bf16.mxu0 %v4790_v54 }
 0xdde   :  { %2281 = vmatpush1.bf16.msra.mxu1 %v4583_v53  ;;  %3098 = vmatpush3.bf16.msra.mxu0 %v4586_v36 }
 0xddf   :  { %2282 = vmatprep.subr.bf16.mxu1 %v4589_v55  ;;  %3099 = vmatprep.subr.bf16.mxu0 %v4790_v54 }
 0xde2   :  { %2283 = vmatpush1.bf16.msra.mxu1 %v4638_v20  ;;  %3100 = vmatpush3.bf16.msra.mxu0 %v4641_v45 }
 0xde3   :  { %2284 = vmatprep.subr.bf16.mxu1 %v4644_v47  ;;  %3101 = vmatprep.subr.bf16.mxu0 %v4790_v54 }
 0xde6   :  { %2285 = vmatpush1.bf16.msra.mxu1 %v4648_v48  ;;  %3102 = vmatpush3.bf16.msra.mxu0 %v4651_v19 }
 0xde7   :  { %2286 = vmatprep.subr.bf16.mxu1 %v4654_v4  ;;  %3103 = vmatprep.subr.bf16.mxu0 %v4790_v54 }
 0xdea   :  { %2287 = vmatpush1.bf16.msra.mxu1 %v4658_v49  ;;  %3104 = vmatpush3.bf16.msra.mxu0 %v4661_v26 }
 0xdeb   :  { %2384 = vmatprep.subr.bf16.mxu1 %v4526_v62  ;;  %3109 = vmatprep.subr.bf16.mxu0 %v4790_v54 }
 0xea0   :  { %v2194_v50 = vpop.f32.mrb[68].mxu1  ;;  %v2235_v38 = vpop.f32.mrb[84].mxu0 }
 0xea1   :  { %v2241_v8 = vadd.f32 %v2194_v50, %v4809_v9  ;;  %v2196_v12 = vpop.f32.mrb[69].mxu1  ;;  %v3087_v18 = vpop.f32.mrb[85].mxu0  ;;  %v2255_v3 = vadd.f32 %v4348_v60, %v2235_v38 }
 0xea2   :  { %v2248_v57 = vadd.f32 %v2196_v12, %v4810_v28  ;;  %v2198_v37 = vpop.f32.mrb[70].mxu1  ;;  %v2238_v5 = vpop.f32.mrb[86].mxu0  ;;  %v4815_v12 = vld [vmem:[#allocation39_spill] sm:$0xff] }
 0xea3   :  { %v2611_v56 = vmul.f32 -1.442695, %v2241_v8  ;;  %v2199_v63 = vpop.f32.mrb[71].mxu1  ;;  %v3088_v39 = vpop.f32.mrb[87].mxu0  ;;  %v4816_v37 = vld [vmem:[#allocation40_spill] sm:$0xff] }
 0xea4   :  { %v2612_v23 = vmul.f32 -1.442695, %v2248_v57 }
 0xea5   :  { %3376 = vpow2.f32 %v2611_v56 }
 0xea6   :  { %3378 = vpow2.f32 %v2612_v23 }
 0xeaf   :  { %v3377_v6 = vpop.eup %3376 }
 0xeb0   :  { %v2245_v62 = vadd.f32 1.0, %v3377_v6  ;;  %v3379_v0 = vpop.eup %3378 }
 0xeb1   :  { %v2252_v21 = vadd.f32 1.0, %v3379_v0 }
 0xeb2   :  { %3380 = vrcp.f32 %v2245_v62 }
 0xeb3   :  { %3382 = vrcp.f32 %v2252_v21 }
 0xebc   :  { %v3381_v29 = vpop.eup %3380 }
 0xebd   :  { %v2256_v15 = vmul.f32 %v3381_v29, %v2255_v3  ;;  %v3383_v7 = vpop.eup %3382 }
 0xebe   :  { %v2259_v27 = vsub.f32 1.0, %v3383_v7  ;;  %v2261_v34 = vmul.f32 %v3383_v7, %v4611_v43 }
 0xebf   :  { %v2257_v24 = vadd.f32 %v2256_v15, %v4811_v1  ;;  %v3455_v15 = vld [vmem:[%s4757_s5] ss:$0 sm:$0xff]  ;;  %s3528_s5 = scalar_lea.vmem %s2502_s24, 2048 }
 0xec0   :  { %p3529_p10 = scmp.ne.s32.totalorder %s2502_s24, %s3528_s5  ;;  %p3534_p12 = scmp.lt.s32.totalorder %s3528_s5, %s3528_s5 }
 0xec1   :  { %3384 = vtanh.f32 %v2257_v24 }
 0xec2   :  { %p3535_p13 = por %p3534_p12, %p3533_p11 }
 0xec4   :  { %p3536_p0 = pnand %p3535_p13, %p3529_p10 }
 0xecb   :  { %v3385_v22 = vpop.eup %3384 }
 0xecc   :  { %v2260_v11 = vmul.f32 %v3385_v22, %v2259_v27  ;;  %v4817_v27 = vld [vmem:[#allocation23_spill] sm:$0xff] }
 0xece   :  { %v2262_v33 = vadd.f32 %v2261_v34, %v2260_v11 }
 0xed0   :  { %v4672_v35 = vsel %vm2266_vm1, %v2262_v33, %v4611_v43  ;;  %v2268_v40 = vsel %vm2266_vm1, %v2262_v33, 0.0  ;;  %v2489_v33 = vpop.permute.xlu0 %2488 }
 0xed1   :  { %2270 = vst [vmem:[#allocation8 + $0x68] sm:$0xff] %v2268_v40  ;;  %v2271_v42 = vpack.c.bf16 %v4672_v35, %v4672_v35  ;;  %vm2490_vm2 = vcmp.eq.s32.totalorder %v2489_v33, 1 }
 0xed3   :  { %2305 = vmatmul.mubr.bf16.vlgmr.msra.gmra.mrb[72].mxu1 %v2271_v42  ;;  %3106 = vmatmul.mubr.bf16.vlgmr.msra.gmra.mrb[88].mxu0 %v2271_v42 }
 0xed4   :  { %2385 = vmatpush1.bf16.msra.mxu1 %v4540_v16  ;;  %3110 = vmatpush3.bf16.msra.mxu0 %v4543_v30  ;;  %v4812_v30 = vld [vmem:[#allocation37_spill] sm:$0xff] }
 0xed5   :  { %2386 = vmatprep.subr.bf16.mxu1 %v4546_v2  ;;  %3111 = vmatprep.subr.bf16.mxu0 %v4790_v54 }
 0xed6   :  { %2416 = vmatprep.mubr.bf16.mxu1 %v4791_v25  ;;  %3125 = vmatprep.mubr.msk.bf16.mxu0 %vm3591_vm0, %v4790_v54 }
 0xed8   :  { %2387 = vmatpush1.bf16.msra.mxu1 %v4553_v10  ;;  %3112 = vmatpush3.bf16.msra.mxu0 %v4556_v46 }
 0xed9   :  { %2388 = vmatprep.subr.bf16.mxu1 %v4559_v14  ;;  %3113 = vmatprep.subr.bf16.mxu0 %v4790_v54  ;;  %v4813_v14 = vld [vmem:[#allocation38_spill] sm:$0xff] }
 0xedc   :  { %2389 = vmatpush1.bf16.msra.mxu1 %v4563_v61  ;;  %3114 = vmatpush3.bf16.msra.mxu0 %v4566_v17 }
 0xedd   :  { %2390 = vmatprep.subr.bf16.mxu1 %v4569_v31  ;;  %3115 = vmatprep.subr.bf16.mxu0 %v4790_v54 }
 0xee0   :  { %2391 = vmatpush1.bf16.msra.mxu1 %v4573_v41  ;;  %3116 = vmatpush3.bf16.msra.mxu0 %v4576_v51 }
 0xee1   :  { %2392 = vmatprep.subr.bf16.mxu1 %v4579_v52  ;;  %3117 = vmatprep.subr.bf16.mxu0 %v4790_v54 }
 0xee4   :  { %2393 = vmatpush1.bf16.msra.mxu1 %v4583_v53  ;;  %3118 = vmatpush3.bf16.msra.mxu0 %v4586_v36 }
 0xee5   :  { %2394 = vmatprep.subr.bf16.mxu1 %v4589_v55  ;;  %3119 = vmatprep.subr.bf16.mxu0 %v4790_v54 }
 0xee8   :  { %2395 = vmatpush1.bf16.msra.mxu1 %v4638_v20  ;;  %3120 = vmatpush3.bf16.msra.mxu0 %v4641_v45 }
 0xee9   :  { %2396 = vmatprep.subr.bf16.mxu1 %v4644_v47  ;;  %3121 = vmatprep.subr.bf16.mxu0 %v4790_v54 }
 0xeec   :  { %2397 = vmatpush1.bf16.msra.mxu1 %v4648_v48  ;;  %3122 = vmatpush3.bf16.msra.mxu0 %v4651_v19  ;;  %v2377_v19 = vpop.permute.xlu1 %2376 }
 0xeed   :  { %2398 = vmatprep.subr.bf16.mxu1 %v4654_v4  ;;  %3123 = vmatprep.subr.bf16.mxu0 %v4790_v54  ;;  %vm2378_vm0 = vcmp.eq.s32.totalorder %v2377_v19, 1 }
 0xef0   :  { %2399 = vmatpush1.bf16.msra.mxu1 %v4658_v49  ;;  %3124 = vmatpush3.bf16.msra.mxu0 %v4661_v26 }
 0xfa6   :  { %v2306_v25 = vpop.f32.mrb[72].mxu1  ;;  %v2347_v16 = vpop.f32.mrb[88].mxu0 }
 0xfa7   :  { %v2353_v2 = vadd.f32 %v2306_v25, %v4812_v30  ;;  %v2308_v10 = vpop.f32.mrb[73].mxu1  ;;  %v3107_v46 = vpop.f32.mrb[89].mxu0  ;;  %v2367_v59 = vadd.f32 %v4348_v60, %v2347_v16 }
 0xfa8   :  { %v2360_v61 = vadd.f32 %v2308_v10, %v4813_v14  ;;  %v2310_v17 = vpop.f32.mrb[74].mxu1  ;;  %v2350_v31 = vpop.f32.mrb[90].mxu0 }
 0xfa9   :  { %v2613_v41 = vmul.f32 -1.442695, %v2353_v2  ;;  %v2311_v51 = vpop.f32.mrb[75].mxu1  ;;  %v3108_v52 = vpop.f32.mrb[91].mxu0 }
 0xfaa   :  { %v2614_v53 = vmul.f32 -1.442695, %v2360_v61 }
 0xfab   :  { %3386 = vpow2.f32 %v2613_v41 }
 0xfac   :  { %3388 = vpow2.f32 %v2614_v53 }
 0xfb5   :  { %v3387_v54 = vpop.eup %3386 }
 0xfb6   :  { %v2357_v36 = vadd.f32 1.0, %v3387_v54  ;;  %v3389_v55 = vpop.eup %3388 }
 0xfb7   :  { %v2364_v58 = vadd.f32 1.0, %v3389_v55 }
 0xfb8   :  { %3390 = vrcp.f32 %v2357_v36 }
 0xfb9   :  { %3392 = vrcp.f32 %v2364_v58 }
 0xfc2   :  { %v3391_v43 = vpop.eup %3390 }
 0xfc3   :  { %v2368_v13 = vmul.f32 %v3391_v43, %v2367_v59  ;;  %v3393_v45 = vpop.eup %3392 }
 0xfc4   :  { %v2371_v47 = vsub.f32 1.0, %v3393_v45  ;;  %v2373_v4 = vmul.f32 %v3393_v45, %v4672_v35 }
 0xfc5   :  { %v2369_v20 = vadd.f32 %v2368_v13, %v4814_v44 }
 0xfc7   :  { %3394 = vtanh.f32 %v2369_v20 }
 0xfd1   :  { %v3395_v48 = vpop.eup %3394 }
 0xfd2   :  { %v2372_v49 = vmul.f32 %v3395_v48, %v2371_v47 }
 0xfd4   :  { %v2374_v26 = vadd.f32 %v2373_v4, %v2372_v49 }
 0xfd6   :  { %v2379_v50 = vsel %vm2378_vm0, %v2374_v26, %v4672_v35  ;;  %v2380_v38 = vsel %vm2378_vm0, %v2374_v26, 0.0 }
 0xfd7   :  { %2382 = vst [vmem:[#allocation8 + $0x70] sm:$0xff] %v2380_v38  ;;  %v2383_v60 = vpack.c.bf16 %v2379_v50, %v2379_v50 }
 0xfd9   :  { %2417 = vmatmul.mubr.bf16.vlgmr.msra.gmra.mrb[76].mxu1 %v2383_v60  ;;  %3126 = vmatmul.mubr.bf16.vlgmr.msra.gmra.mrb[92].mxu0 %v2383_v60 }
0x10ac   :  { %v2418_v9 = vpop.f32.mrb[76].mxu1  ;;  %v2459_v8 = vpop.f32.mrb[92].mxu0 }
0x10ad   :  { %v2465_v18 = vadd.f32 %v2418_v9, %v4815_v12  ;;  %v2420_v28 = vpop.f32.mrb[77].mxu1  ;;  %v3127_v57 = vpop.f32.mrb[93].mxu0  ;;  %v2479_v1 = vadd.f32 %v3455_v15, %v2459_v8 }
0x10ae   :  { %v2472_v5 = vadd.f32 %v2420_v28, %v4816_v37  ;;  %v2422_v56 = vpop.f32.mrb[78].mxu1  ;;  %v2462_v63 = vpop.f32.mrb[94].mxu0 }
0x10af   :  { %v2615_v39 = vmul.f32 -1.442695, %v2465_v18  ;;  %v2423_v23 = vpop.f32.mrb[79].mxu1  ;;  %v3128_v6 = vpop.f32.mrb[95].mxu0 }
0x10b0   :  { %v2616_v62 = vmul.f32 -1.442695, %v2472_v5 }
0x10b1   :  { %3396 = vpow2.f32 %v2615_v39 }
0x10b2   :  { %3398 = vpow2.f32 %v2616_v62 }
0x10bb   :  { %v3397_v0 = vpop.eup %3396 }
0x10bc   :  { %v2469_v21 = vadd.f32 1.0, %v3397_v0  ;;  %v3399_v3 = vpop.eup %3398 }
0x10bd   :  { %v2476_v29 = vadd.f32 1.0, %v3399_v3 }
0x10be   :  { %3400 = vrcp.f32 %v2469_v21 }
0x10bf   :  { %3402 = vrcp.f32 %v2476_v29 }
0x10c8   :  { %v3401_v24 = vpop.eup %3400 }
0x10c9   :  { %v2480_v7 = vmul.f32 %v3401_v24, %v2479_v1  ;;  %v3403_v34 = vpop.eup %3402 }
0x10ca   :  { %v2483_v11 = vsub.f32 1.0, %v3403_v34  ;;  %v2485_v40 = vmul.f32 %v3403_v34, %v2379_v50 }
0x10cb   :  { %v2481_v22 = vadd.f32 %v2480_v7, %v4817_v27 }
0x10cd   :  { %3404 = vtanh.f32 %v2481_v22 }
0x10d7   :  { %v3405_v32 = vpop.eup %3404 }
0x10d8   :  { %v2484_v35 = vmul.f32 %v3405_v32, %v2483_v11 }
0x10da   :  { %v2486_v42 = vadd.f32 %v2485_v40, %v2484_v35 }
0x10dc   :  { %v2492_v25 = vsel %vm2490_vm2, %v2486_v42, 0.0  ;;  %v2491_v16 = vsel %vm2490_vm2, %v2486_v42, %v2379_v50 }
0x10dd   :  { %2494 = vst [vmem:[#allocation8 + $0x78] sm:$0xff] %v2492_v25  ;;  %2495 = vst [vmem:[#allocation9] sm:$0xff] %v2491_v16 }
0x10de   :  { %3539 = shalt.err (!%p3536_p0)
}
0x10df   :  { %s3540_s28 = scalar_lea.hbm %s4758_s6, 2048 }
0x10e0   :  { %p3541_p1 = scmp.ne.s32.totalorder %s4758_s6, %s3540_s28  ;;  %p3544_p2 = scmp.lt.u32.totalorder %s3540_s28, %s4758_s6 }
0x10e2   :  { %p3546_p3 = pnand %p3544_p2, %p3541_p1 }
0x10e4   :  { %3549 = shalt.err (!%p3546_p3)
}
0x10e5   :  { %s3608_s10 = smov 128   ;;  %s3609_s13 = smov 8  }
0x10e6   :  { %2507 = dma.vmem_to_hbm [thread:$0]  %s2502_s24, 2048, %s4758_s6, [#allocation4], %s3608_s10, %s3608_s10, %s3609_s13  }
0x10e7   :  { %s3550_s17 = scalar_lea.vmem %s4721_s25, 128  ;;  %p3555_p5 = scmp.lt.s32.totalorder %s4721_s25, %s4721_s25 }
0x10e8   :  { %p3551_p4 = scmp.ne.s32.totalorder %s4721_s25, %s3550_s17  ;;  %p3556_p6 = scmp.lt.s32.totalorder %s3550_s17, %s3550_s17 }
0x10ea   :  { %p3557_p7 = por %p3556_p6, %p3555_p5 }
0x10ec   :  { %p3558_p8 = pnand %p3557_p7, %p3551_p4 }
0x10ee   :  { %3561 = shalt.err (!%p3558_p8)
}
0x10ef   :  { %s3562_s18 = scalar_lea.hbm %s4759_s7, 128 }
0x10f0   :  { %p3563_p9 = scmp.ne.s32.totalorder %s4759_s7, %s3562_s18  ;;  %p3566_p10 = scmp.lt.u32.totalorder %s3562_s18, %s4759_s7 }
0x10f2   :  { %p3568_p11 = pnand %p3566_p10, %p3563_p9 }
0x10f4   :  { %3571 = shalt.err (!%p3568_p11)
}
0x10f5   :  { %2517 = dma.vmem_to_hbm [thread:$0]  %s4721_s25, 128, %s4759_s7, [#allocation10]  }
0x10f6   :  { %3576 = dma.done.wait [#allocation4], 2048  }
0x10f7   :  { %3577 = vsyncadd [#allocation4], 4294965248 }
0x10f8   :  { %3578 = dma.done.wait [#allocation10], 128  }
0x10f9   :  { %3579 = vsyncadd [#allocation10], 4294967168 }
0x10fa   :  { %2524 = vsyncpa [#allocation3], 1 }
0x10fb   :  { %2525 = vsyncpa [#allocation6], 1 }
0x10fc   :  { %2526 = vsyncpa [#allocation4], 1 }
0x10fd   :  { %2527 = vsyncpa [#allocation10], 1 }

</bundles_post_ra>
